<compile_context>
chip_gen: v7x
topology: tpu7x:2x2x1
jax: 0.10.0
libtpu: 0.0.40
codegen_flags: <defaults>
</compile_context>

<pallas_src>
import functools
import math

import jax
import jax.numpy as jnp
from jax.experimental import pallas as pl
from jax.experimental.pallas import tpu as pltpu

G_MIN = 0.99
G_MAX = 1.0

# Below this many elements a single fused XLA elementwise pass beats any
# pallas_call (launch + ~0.35us/grid-step overhead + wrapper reshapes dominate).
_SMALL_SIZE = 1 << 16


def _compute_f32(y32, inv_d, is_compressed):
    """Shared math: f32 in / f32 out. inv_d is None or broadcastable to y32."""
    p = jnp.exp(jnp.log(y32) * inv_d) if inv_d is not None else y32
    if is_compressed:
        # logit((p - g_min)/(g_max - g_min)) == log(p - g_min) - log(g_max - p);
        # the 1/(g_max - g_min) scale cancels -> no divides on the hot path.
        return jnp.log(p - G_MIN) - jnp.log(G_MAX - p)
    return p


def _kernel_delays(y_ref, inv_d_ref, o_ref, *, is_compressed):
    y32 = y_ref[...].astype(jnp.float32)                     # cast on load
    out = _compute_f32(y32, inv_d_ref[...], is_compressed)   # inv_d broadcasts over rows
    o_ref[...] = out.astype(o_ref.dtype)                     # cast on store


def _kernel_nodelays(y_ref, o_ref, *, is_compressed):
    y32 = y_ref[...].astype(jnp.float32)
    o_ref[...] = _compute_f32(y32, None, is_compressed).astype(o_ref.dtype)


def _row_dim_semantics():
    # Plain "parallel" does not change codegen; CORE_PARALLEL is what actually
    # shards the row grid axis across the 2 TensorCores of a v7x chip.
    try:
        kind = jax.devices()[0].device_kind.lower()
    except Exception:
        kind = ""
    return pltpu.CORE_PARALLEL if "v7" in kind else pltpu.PARALLEL


def _pallas_packed(y2, inv_d_packed, is_compressed, target_block_bytes):
    """y2: (R, L) lane-packed view; inv_d_packed: (1, L) f32 or None."""
    R, L = y2.shape
    itemsize = jnp.dtype(y2.dtype).itemsize
    # ~target_block_bytes blocks; rows a multiple of 32 so any dtype's sublane
    # tile (8 for f32, 16 for bf16) divides the block.
    rows_target = max(32, (target_block_bytes // (itemsize * L) // 32) * 32)
    tile_rows = R if R <= rows_target else rows_target       # full extent is always legal
    grid_rows = pl.cdiv(R, tile_rows)                        # ragged last block masked by Pallas

    if inv_d_packed is not None:
        kernel = functools.partial(_kernel_delays, is_compressed=is_compressed)
        in_specs = [
            pl.BlockSpec((tile_rows, L), lambda i: (i, 0)),
            pl.BlockSpec((1, L), lambda i: (0, 0)),           # stays VMEM-resident
        ]
        args = (y2, inv_d_packed)
    else:
        kernel = functools.partial(_kernel_nodelays, is_compressed=is_compressed)
        in_specs = [pl.BlockSpec((tile_rows, L), lambda i: (i, 0))]
        args = (y2,)

    return pl.pallas_call(
        kernel,
        out_shape=jax.ShapeDtypeStruct((R, L), y2.dtype),
        grid_spec=pltpu.PrefetchScalarGridSpec(
            num_scalar_prefetch=0,
            grid=(grid_rows,),
            in_specs=in_specs,
            out_specs=pl.BlockSpec((tile_rows, L), lambda i: (i, 0)),
        ),
        compiler_params=pltpu.CompilerParams(
            dimension_semantics=(_row_dim_semantics(),),
        ),
    )(*args)


def inverse_map_gamma(y, delays=None, is_compressed=True, *, target_block_bytes=2 << 20):
    """Pallas implementation of flamo's inverse_map_gamma.forward.

    y:      float array, last axis = channel/delay-line axis (size D).
    delays: optional float array of shape (D,), broadcast like PyTorch would.
    """
    if not is_compressed and delays is None:
        return y                                              # identity branch

    y = jnp.asarray(y)
    orig_shape = y.shape
    orig_dtype = y.dtype
    has_delays = delays is not None
    D = orig_shape[-1] if y.ndim > 0 else 1

    inv_d = None
    if has_delays:
        inv_d = (1.0 / jnp.asarray(delays, dtype=jnp.float32)).reshape(-1)

    # Small inputs (typical flamo gain tensors): one fused XLA pass wins.
    if y.size < _SMALL_SIZE:
        return _compute_f32(y.astype(jnp.float32), inv_d, is_compressed).astype(orig_dtype)

    # Unsupported / exotic dtypes go through the fused jnp path as well.
    if orig_dtype not in (jnp.float32, jnp.bfloat16):
        return _compute_f32(y.astype(jnp.float32), inv_d, is_compressed).astype(orig_dtype)

    # Lane packing: make the last dim L a multiple of 128 by folding `reps`
    # rows together (lane-dense loads/stores, full vreg/EUP utilization).
    if D >= 128:
        L, reps = D, 1                                        # already lane-dense enough
    else:
        L = (D * 128) // math.gcd(D, 128)
        reps = L // D

    itemsize = jnp.dtype(orig_dtype).itemsize
    if L * 32 * itemsize > target_block_bytes:
        # Channel axis too wide to tile sensibly; fused XLA pass is fine here.
        return _compute_f32(y.astype(jnp.float32), inv_d, is_compressed).astype(orig_dtype)

    rows = y.size // D
    rows_main = (rows // reps) * reps
    tail_rows = rows - rows_main
    y2d = y.reshape(rows, D)

    inv_d_packed = None
    if has_delays:
        inv_d_packed = jnp.tile(inv_d, reps).reshape(1, L)    # column j -> channel j % D

    if tail_rows == 0:
        packed = y2d.reshape(rows // reps, L)                 # free view, no copy
        out = _pallas_packed(packed, inv_d_packed, is_compressed, target_block_bytes)
        return out.reshape(orig_shape)

    # Ragged row count: Pallas over the L-aligned prefix, tiny (< reps rows)
    # tail in plain jnp.  No whole-array pad / post-slice passes.
    packed = y2d[:rows_main].reshape(rows_main // reps, L)
    out_main = _pallas_packed(packed, inv_d_packed, is_compressed, target_block_bytes)
    tail = _compute_f32(y2d[rows_main:].astype(jnp.float32), inv_d, is_compressed)
    out = jnp.concatenate([out_main.reshape(rows_main, D), tail.astype(orig_dtype)], axis=0)
    return out.reshape(orig_shape)


if __name__ == "__main__":
    key = jax.random.PRNGKey(0)
    k1, k2, k3, k4 = jax.random.split(key, 4)

    D = 16
    delays = jax.random.randint(k1, (D,), 100, 2000).astype(jnp.float32)

    def torch_ref(yv, dl=None, compressed=True):
        yv = yv.astype(jnp.float32)
        if compressed:
            p = yv ** (1.0 / dl) if dl is not None else yv
            sig = (p - G_MIN) / (G_MAX - G_MIN)
            return jnp.log(sig / (1.0 - sig))
        if dl is None:
            return yv
        return yv ** (1.0 / dl)

    def make_gamma(k, shape):
        u = jax.random.uniform(k, shape, dtype=jnp.float32)
        return G_MIN + (G_MAX - G_MIN) * (0.1 + 0.8 * u)      # strictly inside logit domain

    # ---- small, module-typical shapes (8 gains x 16 delay lines) -> fused jnp fast path ----
    gamma_s = make_gamma(k2, (8, D))
    y_s = gamma_s ** delays[None, :]
    out = jax.block_until_ready(inverse_map_gamma(y_s, delays=delays, is_compressed=True))
    assert jnp.allclose(out, torch_ref(y_s, delays, True), rtol=2e-3, atol=2e-3)
    out = inverse_map_gamma(y_s, delays=delays, is_compressed=False)
    assert jnp.allclose(out, torch_ref(y_s, delays, False), rtol=1e-4, atol=1e-4)
    out = inverse_map_gamma(gamma_s, delays=None, is_compressed=True)
    assert jnp.allclose(out, torch_ref(gamma_s, None, True), rtol=2e-3, atol=2e-3)
    assert jnp.allclose(inverse_map_gamma(y_s, None, False), y_s)     # identity branch

    # ---- larger input -> Pallas kernel path (multi-block grid, ragged last block) ----
    gamma_b = make_gamma(k3, (70000, D))
    y_b = gamma_b ** delays[None, :]
    out_b = jax.block_until_ready(inverse_map_gamma(y_b, delays=delays, is_compressed=True))
    assert out_b.shape == y_b.shape
    assert jnp.allclose(out_b, torch_ref(y_b, delays, True), rtol=2e-3, atol=2e-3)

    # ragged row count (8190 % 8 != 0): aligned prefix via Pallas, tiny tail via jnp
    gamma_r = make_gamma(k4, (8190, D))
    out_r = jax.block_until_ready(inverse_map_gamma(gamma_r, delays=None, is_compressed=True))
    assert out_r.shape == gamma_r.shape
    assert jnp.allclose(out_r, torch_ref(gamma_r, None, True), rtol=2e-3, atol=2e-3)

    # bf16 in / bf16 out (dtype preserved end-to-end, f32 math inside the kernel)
    y_bf = y_b.astype(jnp.bfloat16)
    out_bf = jax.block_until_ready(inverse_map_gamma(y_bf, delays=delays, is_compressed=False))
    assert out_bf.dtype == jnp.bfloat16
    assert jnp.allclose(out_bf.astype(jnp.float32),
                        torch_ref(y_bf.astype(jnp.float32), delays, False),
                        rtol=2e-2, atol=2e-2)

    print("KERNEL_OK")
</pallas_src>

<mosaic_0001>
module attributes {stable_mosaic.version = 11 : i64} {
  func.func @_kernel_delays(%arg0: i32, %arg1: memref<4096x128xf32, #tpu.memory_space<vmem>>, %arg2: memref<1x128xf32, #tpu.memory_space<vmem>>, %arg3: memref<4096x128xf32, #tpu.memory_space<vmem>>) attributes {dimension_semantics = [#tpu.dimension_semantics<parallel>], iteration_bounds = array<i64: 3>, scalar_prefetch = 0 : i64, scratch_operands = 0 : i64, tpu.core_type = #tpu.core_type<tc>, window_params = [{transform_indices = @transform_0, window_bounds = array<i64: 4096, 128>}, {pipeline_mode = #tpu.pipeline_mode<synchronous>, transform_indices = @transform_1, window_bounds = array<i64: 1, 128>}, {transform_indices = @transform_2, window_bounds = array<i64: 4096, 128>}]} {
    %c0 = arith.constant 0 : index
    %c0_0 = arith.constant 0 : index
    %0 = vector.load %arg1[%c0, %c0_0] : memref<4096x128xf32, #tpu.memory_space<vmem>>, vector<4096x128xf32>
    %c0_1 = arith.constant 0 : index
    %c0_2 = arith.constant 0 : index
    %1 = vector.load %arg2[%c0_1, %c0_2] : memref<1x128xf32, #tpu.memory_space<vmem>>, vector<1x128xf32>
    %2 = math.log %0 : vector<4096x128xf32>
    %3 = vector.broadcast %1 : vector<1x128xf32> to vector<4096x128xf32>
    %4 = arith.mulf %2, %3 : vector<4096x128xf32>
    %5 = math.exp %4 : vector<4096x128xf32>
    %cst = arith.constant 9.900000e-01 : f32
    %6 = vector.broadcast %cst : f32 to vector<4096x128xf32>
    %7 = arith.subf %5, %6 : vector<4096x128xf32>
    %8 = math.log %7 : vector<4096x128xf32>
    %cst_3 = arith.constant 1.000000e+00 : f32
    %9 = vector.broadcast %cst_3 : f32 to vector<4096x128xf32>
    %10 = arith.subf %9, %5 : vector<4096x128xf32>
    %11 = math.log %10 : vector<4096x128xf32>
    %12 = arith.subf %8, %11 : vector<4096x128xf32>
    %c0_4 = arith.constant 0 : index
    %c0_5 = arith.constant 0 : index
    %13 = vector.load %arg3[%c0_4, %c0_5] : memref<4096x128xf32, #tpu.memory_space<vmem>>, vector<4096x128xf32>
    tpu.vector_store %arg3[%c0_4, %c0_5], %12 {strides = array<i32>} : memref<4096x128xf32, #tpu.memory_space<vmem>>, vector<4096x128xf32>,
    return
  }
  func.func @transform_0(%arg0: i32) -> (i32, i32) {
    %c0_i32 = arith.constant 0 : i32
    %c0_i32_0 = arith.constant 0 : i32
    return %arg0, %c0_i32 : i32, i32
  }
  func.func @transform_1(%arg0: i32) -> (i32, i32) {
    %c0_i32 = arith.constant 0 : i32
    %c0_i32_0 = arith.constant 0 : i32
    %c0_i32_1 = arith.constant 0 : i32
    return %c0_i32, %c0_i32_0 : i32, i32
  }
  func.func @transform_2(%arg0: i32) -> (i32, i32) {
    %c0_i32 = arith.constant 0 : i32
    %c0_i32_0 = arith.constant 0 : i32
    return %arg0, %c0_i32 : i32, i32
  }
}

</mosaic_0001>

<bundles_post_ra>
// kernel: tpu_custom_call.1
= control target key start
LH: loop header
LB: loop body
LE: loop exit
PB: predicated region body
PF: predicated region fallthrough
CT: control target
= control target key end

     0   :  { %7 = vsyncpa [#allocation3], 0  ;;  %s14127_s0 = inlined_call_operand.hbm [shape: f32[8750,128], index: 0, kind: input, shape index: {}]   ;;  %s14128_s1 = inlined_call_operand.hbm [shape: f32[1,128], index: 1, kind: input, shape index: {}]   ;;  %s14129_s2 = inlined_call_operand.hbm [shape: f32[8750,128], index: 2, kind: output, shape index: {}]  }
   0x1   :  { %9 = vsyncpa [#allocation3 + $0x1], 0 }
   0x2   :  { %10 = vsyncpa [#allocation6], 0 }
   0x3   :  { %11 = vsyncpa [#allocation4], 0 }
   0x4   :  { %13 = vsyncpa [#allocation4 + $0x1], 0  ;;  %s12323_s9 = smov 0   ;;  %s12325_s10 = smov 0  }
   0x5   :  { %s12327_s11 = smov 0   ;;  %s12329_s12 = smov 0  }
   0x6 LB: > { %s12344_s13 = sadd.s32 4294967295, %s12299_s12   ;;  %s7469_s14 = sadd.s32 4294967294, %s12299_s12   ;;  %s12299_s12 = sphi %s12329_s12, %s14149_s12   ;;  %s12295_s11 = sphi %s12327_s11, %s14148_s11   ;;  %s12291_s10 = sphi %s12325_s10, %s14147_s10   ;;  %s12287_s9 = sphi %s12323_s9, %s14146_s9  }
   0x7   : > { %s12348_s15 = sadd.s32 1, %s12299_s12   ;;  %s26_s16 = sadd.s32 1, %s12295_s11 }
   0x8   : > { %s23_s17 = ssub.s32 %s12299_s12, %s12348_s15  ;;  %p33_p0 = scmp.ne.s32.totalorder %s12295_s11, %s12291_s10 }
   0x9   : > { %p24_p1 = scmp.eq.s32.totalorder %s23_s17, 0  ;;  %p34_p2 = scmp.eq.s32.totalorder %s12299_s12, 0 }
   0xa   : > { %p39_p3 = scmp.ne.s32.totalorder %s12291_s10, %s12287_s9  ;;  %p14130_p4 = scmp.eq.s32.totalorder %s12344_s13, 0 }
   0xb   : > { %s12360_s18 = scalar_select %p24_p1, %s12295_s11, %s26_s16  }
   0xc   : > { %p12362_p5 = por %p34_p2, %p33_p0  ;;  %p12368_p6 = por %p14130_p4, %p39_p3 }
   0xd   : > { %p84_p7 = scmp.eq.s32.totalorder %s12344_s13, 2  ;;  %p90_p8 = scmp.eq.s32.totalorder %s7469_s14, 2 }
   0xe   : > { %s14133_s19 = scalar_select %p12362_p5, 1, 0 }
   0xf   : > { %s14134_s20 = scalar_select %p12368_p6, 1, 0 }
  0x10   : > { %p7470_p9 = scmp.ge.s32.totalorder %s12299_s12, 1  ;;  %p97_p10 = scmp.lt.s32.totalorder %s12299_s12, 4 }
  0x11   : > { %p12375_p11 = por %p84_p7, %p33_p0  ;;  %p12379_p12 = por %p90_p8, %p39_p3 }
  0x12   : > { %p12383_p13 = pnand %p7470_p9, %p97_p10  ;;  %s12301_s24 = smov [#allocation5]  }
  0x13   : > { %s14135_s21 = scalar_select %p12375_p11, 1, 0 }
  0x14   : > { %s14136_s22 = scalar_select %p12379_p12, 1, 0 }
  0x15   : > { %s14137_s23 = scalar_select %p12383_p13, 1, 0 }
  0x16   : > { %p8014_p1 = pneg %p12383_p13  ;;  %s110_s25 = sshll.u32 %s12301_s24, 4  ;;  %s111_s25 = int_to_ptr.vmem [resolvable:$true] %s110_s25 }
  0x17   : > { %s12173_s29 = scalar_lea.hbm %s14128_s1, 16 }
  0x18   : > { %p12391_p2 = pnand %p8014_p1, %p14130_p4  ;;  %p12174_p0 = scmp.ne.s32.totalorder %s14128_s1, %s12173_s29 }
  0x19   : > { %p12180_p9 = scmp.lt.u32.totalorder %s12173_s29, %s14128_s1 }
  0x1a   : > { %p12175_p3 = pneg %p12391_p2 }
  0x1c   : > { %p12176_p7 = pnand %p12175_p3, %p12174_p0 }
  0x1e   : > { %p12177_p8 = pneg %p12176_p7 }
  0x20   : > { %p12182_p10 = pnand %p12180_p9, %p12177_p8 }
  0x22   : > { %12185 = shalt.err (!%p12182_p10)
}
  0x23   : > { %s12186_s6 = scalar_lea.vmem %s111_s25, 16  ;;  %s12193_s7 = scalar_lea.vmem %s111_s25, 32 }
  0x24   : > { %p12187_p1 = scmp.ne.s32.totalorder %s111_s25, %s12186_s6  ;;  %p12194_p11 = scmp.lt.s32.totalorder %s111_s25, %s111_s25 }
  0x25   : > { %p12195_p6 = scmp.lt.s32.totalorder %s12193_s7, %s12186_s6 }
  0x26   : > { %p12189_p4 = pnand %p12187_p1, %p12175_p3 }
  0x27   : > { %p12196_p13 = por %p12195_p6, %p12194_p11 }
  0x28   : > { %p12190_p12 = pneg %p12189_p4 }
  0x2a   : > { %p12197_p5 = pnand %p12196_p13, %p12190_p12 }
  0x2c   : > { %12200 = shalt.err (!%p12197_p5)
}
  0x2d   : > { %8017 = dma.hbm_to_vmem [thread:$0]  (!%p12391_p2), %s14128_s1, 16, %s111_s25, [#allocation6]  }
  0x2e   : > { %p7472_p0 = scmp.ge.s32.totalorder %s12299_s12, 3 }
  0x2f   : > { %p14139_p7 = scmp.ne.s32.totalorder (!%p7472_p0), %s14133_s19, 0 }
  0x30   : > { %117 = sbr.rel (%p7472_p0) target bundleno = 90 (0x5a), region = 20 }
  0x37   : > { %120 = sbr.rel (!%p14139_p7) target bundleno = 90 (0x5a), region = 24  ;;  %s121_s16 = sand.u32 (%p14139_p7), 1, %s12295_s11  }
  0x38   : > { %s7474_s17 = sshll.u32 (%p14139_p7), %s12299_s12, 9  ;;  %s7473_s24 = sshll.u32 (%p14139_p7), %s121_s16, 12 }
  0x39   : > { %s127_s27 = ssub.s32 (%p14139_p7), 1094, %s7474_s17  ;;  %s12419_s29 = scalar_lea.sflag (%p14139_p7), [#allocation3], %s121_s16 }
  0x3a   : > { %p128_p4 = scmp.lt.s32.totalorder (%p14139_p7), %s127_s27, 512  ;;  %s125_s25 = scalar_lea.vmem (%p14139_p7), [#allocation2], %s7473_s24 }
  0x3e   : > { %s14151_s27 = smov (!%p128_p4, %s127_s27), 512 }
  0x3f   : > { %s12416_s28 = sshll.u32 %s14151_s27, 7 }
  0x40   : > { %s132_s26 = ssub.s32 65536, %s12416_s28 }
  0x41   : > { %133 = vsyncadd %s12419_s29, %s132_s26  ;;  %p7476_p5 = scmp.ne.s32.totalorder %s12416_s28, 0  ;;  %s8006_s19 = sshll.u32 %s12299_s12, 16 }
  0x42   : > { %s12427_s4 = scalar_lea.hbm %s14127_s0, %s8006_s19  ;;  %s138_s5 = sshll.u32 %s125_s25, 4  ;;  %s12429_s5 = int_to_ptr.vmem [resolvable:$true] %s138_s5 }
  0x43   : > { %s12201_s6 = scalar_lea.hbm %s12427_s4, %s12416_s28  ;;  %s12205_s14 = scalar_lea.hbm %s14127_s0, 140032 }
  0x44   : > { %p12202_p6 = scmp.ne.s32.totalorder %s12427_s4, %s12201_s6  ;;  %p12206_p13 = scmp.lt.u32.totalorder %s12427_s4, %s14127_s0 }
  0x45   : > { %p12207_p2 = scmp.lt.u32.totalorder %s12205_s14, %s12201_s6  ;;  %p12209_p8 = scmp.lt.u32.totalorder %s12201_s6, %s12427_s4 }
  0x46   : > { %p12203_p11 = pnand %p12202_p6, %p7476_p5 }
  0x47   : > { %p12208_p3 = por %p12207_p2, %p12206_p13 }
  0x48   : > { %p12204_p12 = pneg %p12203_p11 }
  0x49   : > { %p12210_p9 = por %p12209_p8, %p12208_p3 }
  0x4b   : > { %p12211_p10 = pnand %p12210_p9, %p12204_p12 }
  0x4d   : > { %12214 = shalt.err (!%p12211_p10)
}
  0x4e   : > { %s12215_s24 = scalar_lea.vmem %s12429_s5, %s12416_s28  ;;  %s12302_s27 = smov [#allocation2]  }
  0x4f   : > { %p12216_p1 = scmp.ne.s32.totalorder %s12429_s5, %s12215_s24  ;;  %s12219_s26 = sshll.u32 %s12302_s27, 4  ;;  %s12220_s26 = int_to_ptr.vmem [resolvable:$false] %s12219_s26 }
  0x50   : > { %s12221_s25 = scalar_lea.vmem %s12220_s26, 131072  ;;  %p12222_p4 = scmp.lt.s32.totalorder %s12429_s5, %s12220_s26 }
  0x51   : > { %p12217_p0 = pnand %p12216_p1, %p7476_p5  ;;  %p12223_p6 = scmp.lt.s32.totalorder %s12221_s25, %s12215_s24 }
  0x53   : > { %p12218_p7 = pneg %p12217_p0  ;;  %p12224_p11 = por %p12223_p6, %p12222_p4 }
  0x55   : > { %p12225_p13 = pnand %p12224_p11, %p12218_p7 }
  0x57   : > { %12228 = shalt.err (!%p12225_p13)
}
  0x58   : > { %s12303_s19 = smov 128   ;;  %s12304_s30 = smov 8  }
  0x59   : > { %144 = dma.hbm_to_vmem [thread:$0]  (%p7476_p5), %s12427_s4, %s12416_s28, %s12429_s5, %s12419_s29, %s12303_s19, %s12303_s19, %s12304_s30  }
  0x5a PF: > { %p14140_p12 = scmp.ne.s32.totalorder %s14137_s23, 0 }
  0x5b   : > { %s12459_s3 = sand.u32 (!%p14140_p12), 1, %s12291_s10   ;;  %p14141_p2 = scmp.ne.s32.totalorder (!%p14140_p12), %s14134_s20, 0 }
  0x5c   : > { %150 = sbr.rel (%p14140_p12) target bundleno = 2215 (0x8a7), region = 28  ;;  %s7481_s6 = sshll.u32 (!%p14140_p12), %s12459_s3, 12 }
  0x5d   : > { %s153_s7 = scalar_lea.sflag (!%p14140_p12), [#allocation3], %s12459_s3  ;;  %s12465_s8 = scalar_lea.vmem (!%p14140_p12), [#allocation2], %s7481_s6 }
  0x63   : > { %12274 = dma.done.wait (%p14141_p2), %s153_s7, 65536  }
  0x64   : > { %12276 = vsyncadd (%p14141_p2), %s153_s7, 4294901760  ;;  %p14142_p5 = scmp.eq.s32.totalorder %s12344_s13, 0 }
  0x66   : > { %12278 = dma.done.wait (%p14142_p5), [#allocation6], 16   ;;  %p14143_p3 = pmov %p14142_p5 }
  0x67   : > { %v191_v0 = vld [vmem:[%s12465_s8] sm:$0xff]  ;;  %v192_v1 = vld [vmem:[%s12465_s8 + $0x8] sm:$0xff]  ;;  %v193_v2 = vld [vmem:[%s12465_s8 + $0x10] sm:$0xff]  ;;  %s12522_s20 = scalar_lea.vmem [#allocation7], %s7481_s6  ;;  %s7367_s23 = scalar_lea.sflag [#allocation4], %s12459_s3 }
  0x68   : > { %12280 = vsyncadd (%p14143_p3), [#allocation6], 4294967280  ;;  %8062 = vlog2.f32 %v191_v0  ;;  %v194_v3 = vld [vmem:[%s12465_s8 + $0x18] sm:$0xff]  ;;  %v195_v4 = vld [vmem:[%s12465_s8 + $0x20] sm:$0xff]  ;;  %p14144_p8 = scmp.ne.s32.totalorder %s14135_s21, 0 }
  0x69   : > { %8064 = vlog2.f32 %v192_v1  ;;  %v196_v5 = vld [vmem:[%s12465_s8 + $0x28] sm:$0xff]  ;;  %v197_v6 = vld [vmem:[%s12465_s8 + $0x30] sm:$0xff]  ;;  %v198_v7 = vld [vmem:[%s12465_s8 + $0x38] sm:$0xff]  ;;  %s7998_s28 = sshll.u32 (%p14144_p8), %s12344_s13, 9 }
  0x6a   : > { %8066 = vlog2.f32 %v193_v2  ;;  %v199_v8 = vld [vmem:[%s12465_s8 + $0x40] sm:$0xff]  ;;  %v200_v9 = vld [vmem:[%s12465_s8 + $0x48] sm:$0xff]  ;;  %v201_v10 = vld [vmem:[%s12465_s8 + $0x50] sm:$0xff]  ;;  %s7375_s29 = ssub.s32 (%p14144_p8), 1094, %s7998_s28 }
  0x6b   : > { %8068 = vlog2.f32 %v194_v3  ;;  %v202_v11 = vld [vmem:[%s12465_s8 + $0x58] sm:$0xff]  ;;  %v203_v12 = vld [vmem:[%s12465_s8 + $0x60] sm:$0xff]  ;;  %v204_v15 = vld [vmem:[%s12465_s8 + $0x68] sm:$0xff]  ;;  %p7376_p9 = scmp.lt.s32.totalorder (%p14144_p8), %s7375_s29, 512 }
  0x6c   : > { %8070 = vlog2.f32 %v195_v4  ;;  %v12488_v14 = vld [vmem:[#allocation5] ss:$0 sm:$0xff]  ;;  %v205_v18 = vld [vmem:[%s12465_s8 + $0x70] sm:$0xff]  ;;  %v206_v21 = vld [vmem:[%s12465_s8 + $0x78] sm:$0xff] }
  0x6d   : > { %8072 = vlog2.f32 %v196_v5  ;;  %v207_v25 = vld [vmem:[%s12465_s8 + $0x80] sm:$0xff] }
  0x6e   : > { %8074 = vlog2.f32 %v197_v6 }
  0x6f   : > { %8076 = vlog2.f32 %v198_v7 }
  0x70   : > { %8078 = vlog2.f32 %v199_v8 }
  0x71   : > { %8080 = vlog2.f32 %v200_v9 }
  0x72   : > { %v8063_v13 = vpop.eup %8062  ;;  %8082 = vlog2.f32 %v201_v10 }
  0x73   : > { %v8065_v16 = vpop.eup %8064  ;;  %v705_v17 = vmul.f32 0.6931472, %v8063_v13  ;;  %8084 = vlog2.f32 %v202_v11 }
  0x74   : > { %v8067_v19 = vpop.eup %8066  ;;  %v707_v20 = vmul.f32 0.6931472, %v8065_v16  ;;  %8086 = vlog2.f32 %v203_v12 }
  0x75   : > { %v8069_v22 = vpop.eup %8068  ;;  %v1734_v23 = vmul.f32 %v12488_v14, %v705_v17  ;;  %v709_v24 = vmul.f32 0.6931472, %v8067_v19  ;;  %8088 = vlog2.f32 %v204_v15 }
  0x76   : > { %v8071_v26 = vpop.eup %8070  ;;  %v1735_v27 = vmul.f32 %v12488_v14, %v707_v20  ;;  %v711_v28 = vmul.f32 0.6931472, %v8069_v22  ;;  %8090 = vlog2.f32 %v205_v18 }
  0x77   : > { %v8073_v29 = vpop.eup %8072  ;;  %v2246_v30 = vmul.f32 1.442695, %v1734_v23  ;;  %v1736_v31 = vmul.f32 %v12488_v14, %v709_v24  ;;  %v713_v32 = vmul.f32 0.6931472, %v8071_v26  ;;  %8092 = vlog2.f32 %v206_v21 }
  0x78   : > { %v8075_v33 = vpop.eup %8074  ;;  %v2248_v34 = vmul.f32 1.442695, %v1735_v27  ;;  %v1737_v35 = vmul.f32 %v12488_v14, %v711_v28  ;;  %v715_v36 = vmul.f32 0.6931472, %v8073_v29  ;;  %8094 = vlog2.f32 %v207_v25 }
  0x79   : > { %v8077_v37 = vpop.eup %8076  ;;  %8096 = vpow2.f32 %v2246_v30  ;;  %v2250_v38 = vmul.f32 1.442695, %v1736_v31  ;;  %v1738_v39 = vmul.f32 %v12488_v14, %v713_v32  ;;  %v717_v40 = vmul.f32 0.6931472, %v8075_v33 }
  0x7a   : > { %v8079_v41 = vpop.eup %8078  ;;  %8098 = vpow2.f32 %v2248_v34  ;;  %v2252_v42 = vmul.f32 1.442695, %v1737_v35  ;;  %v1739_v43 = vmul.f32 %v12488_v14, %v715_v36  ;;  %v719_v44 = vmul.f32 0.6931472, %v8077_v37 }
  0x7b   : > { %v8081_v45 = vpop.eup %8080  ;;  %8100 = vpow2.f32 %v2250_v38  ;;  %v2254_v46 = vmul.f32 1.442695, %v1738_v39  ;;  %v1740_v47 = vmul.f32 %v12488_v14, %v717_v40  ;;  %v721_v48 = vmul.f32 0.6931472, %v8079_v41 }
  0x7c   : > { %v8083_v49 = vpop.eup %8082  ;;  %8102 = vpow2.f32 %v2252_v42  ;;  %v2256_v50 = vmul.f32 1.442695, %v1739_v43  ;;  %v1741_v51 = vmul.f32 %v12488_v14, %v719_v44  ;;  %v723_v52 = vmul.f32 0.6931472, %v8081_v45 }
  0x7d   : > { %v8085_v53 = vpop.eup %8084  ;;  %8104 = vpow2.f32 %v2254_v46  ;;  %v2258_v54 = vmul.f32 1.442695, %v1740_v47  ;;  %v1742_v55 = vmul.f32 %v12488_v14, %v721_v48  ;;  %v725_v56 = vmul.f32 0.6931472, %v8083_v49 }
  0x7e   : > { %v8087_v57 = vpop.eup %8086  ;;  %8106 = vpow2.f32 %v2256_v50  ;;  %v2260_v58 = vmul.f32 1.442695, %v1741_v51  ;;  %v1743_v59 = vmul.f32 %v12488_v14, %v723_v52  ;;  %v727_v60 = vmul.f32 0.6931472, %v8085_v53 }
  0x7f   : > { %v8089_v61 = vpop.eup %8088  ;;  %8108 = vpow2.f32 %v2258_v54  ;;  %v2262_v62 = vmul.f32 1.442695, %v1742_v55  ;;  %v1744_v63 = vmul.f32 %v12488_v14, %v725_v56  ;;  %v729_v0 = vmul.f32 0.6931472, %v8087_v57 }
  0x80   : > { %v8091_v1 = vpop.eup %8090  ;;  %8110 = vpow2.f32 %v2260_v58  ;;  %v2264_v2 = vmul.f32 1.442695, %v1743_v59  ;;  %v1745_v3 = vmul.f32 %v12488_v14, %v727_v60  ;;  %v731_v36 = vmul.f32 0.6931472, %v8089_v61 }
  0x81   : > { %v12506_v4 = vpop.eup %8092  ;;  %8112 = vpow2.f32 %v2262_v62  ;;  %v2266_v5 = vmul.f32 1.442695, %v1744_v63  ;;  %v1746_v6 = vmul.f32 %v12488_v14, %v729_v0  ;;  %v733_v44 = vmul.f32 0.6931472, %v8091_v1 }
  0x82   : > { %v12509_v7 = vpop.eup %8094  ;;  %8114 = vpow2.f32 %v2264_v2  ;;  %v2268_v8 = vmul.f32 1.442695, %v1745_v3  ;;  %v1747_v48 = vmul.f32 %v12488_v14, %v731_v36  ;;  %v735_v52 = vmul.f32 0.6931472, %v12506_v4 }
  0x83   : > { %v8097_v9 = vpop.eup %8096  ;;  %8116 = vpow2.f32 %v2266_v5  ;;  %v2270_v10 = vmul.f32 1.442695, %v1746_v6  ;;  %v1748_v60 = vmul.f32 %v12488_v14, %v733_v44  ;;  %v737_v4 = vmul.f32 0.6931472, %v12509_v7 }
  0x84   : > { %v8099_v11 = vpop.eup %8098  ;;  %v7485_v12 = vadd.f32 -0.99, %v8097_v9  ;;  %v4806_v13 = vsub.f32 1.0, %v8097_v9  ;;  %8118 = vpow2.f32 %v2268_v8 }
  0x85   : > { %v8101_v15 = vpop.eup %8100  ;;  %v7486_v16 = vadd.f32 -0.99, %v8099_v11  ;;  %v4807_v17 = vsub.f32 1.0, %v8099_v11  ;;  %8120 = vpow2.f32 %v2270_v10 }
  0x86   : > { %v8103_v18 = vpop.eup %8102  ;;  %8122 = vlog2.f32 %v7485_v12  ;;  %v7487_v19 = vadd.f32 -0.99, %v8101_v15  ;;  %v4808_v21 = vsub.f32 1.0, %v8101_v15 }
  0x87   : > { %v8105_v20 = vpop.eup %8104  ;;  %8124 = vlog2.f32 %v4806_v13  ;;  %v7488_v23 = vadd.f32 -0.99, %v8103_v18  ;;  %v4809_v25 = vsub.f32 1.0, %v8103_v18  ;;  %v1749_v13 = vmul.f32 %v12488_v14, %v735_v52  ;;  %v211_v52 = vld [vmem:[%s12465_s8 + $0xa0] sm:$0xff] }
  0x88   : > { %v8107_v22 = vpop.eup %8106  ;;  %8126 = vlog2.f32 %v7486_v16  ;;  %v7489_v27 = vadd.f32 -0.99, %v8105_v20  ;;  %v4810_v29 = vsub.f32 1.0, %v8105_v20 }
  0x89   : > { %v8109_v24 = vpop.eup %8108  ;;  %8128 = vlog2.f32 %v4807_v17  ;;  %v7490_v31 = vadd.f32 -0.99, %v8107_v22  ;;  %v4811_v33 = vsub.f32 1.0, %v8107_v22 }
  0x8a   : > { %v8111_v26 = vpop.eup %8110  ;;  %8130 = vlog2.f32 %v7487_v19  ;;  %v7491_v35 = vadd.f32 -0.99, %v8109_v24  ;;  %v4812_v38 = vsub.f32 1.0, %v8109_v24 }
  0x8b   : > { %v8113_v28 = vpop.eup %8112  ;;  %8132 = vlog2.f32 %v4808_v21  ;;  %v7492_v40 = vadd.f32 -0.99, %v8111_v26  ;;  %v4813_v43 = vsub.f32 1.0, %v8111_v26  ;;  %v1750_v21 = vmul.f32 %v12488_v14, %v737_v4 }
  0x8c   : > { %v8115_v30 = vpop.eup %8114  ;;  %8134 = vlog2.f32 %v7488_v23  ;;  %v7493_v47 = vadd.f32 -0.99, %v8113_v28  ;;  %v4814_v51 = vsub.f32 1.0, %v8113_v28  ;;  %v2274_v28 = vmul.f32 1.442695, %v1748_v60 }
  0x8d   : > { %v12511_v32 = vpop.eup %8116  ;;  %8136 = vlog2.f32 %v4809_v25  ;;  %v7494_v56 = vadd.f32 -0.99, %v8115_v30  ;;  %v4815_v59 = vsub.f32 1.0, %v8115_v30  ;;  %v2272_v25 = vmul.f32 1.442695, %v1747_v48  ;;  %v210_v48 = vld [vmem:[%s12465_s8 + $0x98] sm:$0xff] }
  0x8e   : > { %v12513_v34 = vpop.eup %8118  ;;  %8138 = vlog2.f32 %v7489_v27  ;;  %v7495_v0 = vadd.f32 -0.99, %v12511_v32  ;;  %v4816_v3 = vsub.f32 1.0, %v12511_v32  ;;  %v2276_v32 = vmul.f32 1.442695, %v1749_v13 }
  0x8f   : > { %v12515_v37 = vpop.eup %8120  ;;  %8140 = vlog2.f32 %v4810_v29  ;;  %v7496_v9 = vadd.f32 -0.99, %v12513_v34  ;;  %v4817_v12 = vsub.f32 1.0, %v12513_v34 }
  0x90   : > { %v8123_v39 = vpop.eup %8122  ;;  %8142 = vlog2.f32 %v7490_v31  ;;  %v7497_v7 = vadd.f32 -0.99, %v12515_v37  ;;  %v4818_v20 = vsub.f32 1.0, %v12515_v37 }
  0x91   : > { %v8125_v41 = vpop.eup %8124  ;;  %v3783_v42 = vmul.f32 0.6931472, %v8123_v39  ;;  %8144 = vlog2.f32 %v4811_v33 }
  0x92   : > { %v8127_v45 = vpop.eup %8126  ;;  %v5319_v46 = vmul.f32 0.6931472, %v8125_v41  ;;  %8146 = vlog2.f32 %v7491_v35  ;;  %v2278_v35 = vmul.f32 1.442695, %v1750_v21  ;;  %v208_v41 = vld [vmem:[%s12465_s8 + $0x88] sm:$0xff] }
  0x93   : > { %v8129_v49 = vpop.eup %8128  ;;  %v3785_v50 = vmul.f32 0.6931472, %v8127_v45  ;;  %8148 = vlog2.f32 %v4812_v38  ;;  %v209_v45 = vld [vmem:[%s12465_s8 + $0x90] sm:$0xff] }
  0x94   : > { %v8131_v53 = vpop.eup %8130  ;;  %v6342_v54 = vsub.f32 %v3783_v42, %v5319_v46  ;;  %v5321_v55 = vmul.f32 0.6931472, %v8129_v49  ;;  %8150 = vlog2.f32 %v7492_v40 }
  0x95   : > { %v8133_v57 = vpop.eup %8132  ;;  %v3787_v58 = vmul.f32 0.6931472, %v8131_v53  ;;  %8152 = vlog2.f32 %v4813_v43 }
  0x96   : > { %v8135_v61 = vpop.eup %8134  ;;  %6854 = vst [vmem:[%s12522_s20] sm:$0xff] %v6342_v54  ;;  %v6343_v62 = vsub.f32 %v3785_v50, %v5321_v55  ;;  %v5323_v63 = vmul.f32 0.6931472, %v8133_v57  ;;  %8154 = vlog2.f32 %v7493_v47  ;;  %v212_v55 = vld [vmem:[%s12465_s8 + $0xa8] sm:$0xff] }
  0x97   : > { %v8137_v1 = vpop.eup %8136  ;;  %v3789_v2 = vmul.f32 0.6931472, %v8135_v61  ;;  %8156 = vlog2.f32 %v4814_v51 }
  0x98   : > { %v8139_v5 = vpop.eup %8138  ;;  %6855 = vst [vmem:[%s12522_s20 + $0x8] sm:$0xff] %v6343_v62  ;;  %v6344_v6 = vsub.f32 %v3787_v58, %v5323_v63  ;;  %v5325_v8 = vmul.f32 0.6931472, %v8137_v1  ;;  %8158 = vlog2.f32 %v7494_v56  ;;  %v214_v62 = vld [vmem:[%s12465_s8 + $0xb8] sm:$0xff] }
  0x99   : > { %v8141_v10 = vpop.eup %8140  ;;  %v3791_v11 = vmul.f32 0.6931472, %v8139_v5  ;;  %8160 = vlog2.f32 %v4815_v59  ;;  %v213_v59 = vld [vmem:[%s12465_s8 + $0xb0] sm:$0xff]  ;;  %v216_v5 = vld [vmem:[%s12465_s8 + $0xc8] sm:$0xff] }
  0x9a   : > { %v8143_v15 = vpop.eup %8142  ;;  %6856 = vst [vmem:[%s12522_s20 + $0x10] sm:$0xff] %v6344_v6  ;;  %v6345_v16 = vsub.f32 %v3789_v2, %v5325_v8  ;;  %v5327_v17 = vmul.f32 0.6931472, %v8141_v10  ;;  %8162 = vlog2.f32 %v7495_v0  ;;  %v215_v2 = vld [vmem:[%s12465_s8 + $0xc0] sm:$0xff] }
  0x9b   : > { %v8145_v18 = vpop.eup %8144  ;;  %v3793_v19 = vmul.f32 0.6931472, %v8143_v15  ;;  %8164 = vlog2.f32 %v4816_v3 }
  0x9c   : > { %v8147_v22 = vpop.eup %8146  ;;  %6857 = vst [vmem:[%s12522_s20 + $0x18] sm:$0xff] %v6345_v16  ;;  %v6346_v23 = vsub.f32 %v3791_v11, %v5327_v17  ;;  %v5329_v24 = vmul.f32 0.6931472, %v8145_v18  ;;  %8166 = vlog2.f32 %v7496_v9 }
  0x9d   : > { %v8149_v26 = vpop.eup %8148  ;;  %v3795_v27 = vmul.f32 0.6931472, %v8147_v22  ;;  %8168 = vlog2.f32 %v4817_v12 }
  0x9e   : > { %v8151_v29 = vpop.eup %8150  ;;  %6858 = vst [vmem:[%s12522_s20 + $0x20] sm:$0xff] %v6346_v23  ;;  %v6347_v30 = vsub.f32 %v3793_v19, %v5329_v24  ;;  %v5331_v31 = vmul.f32 0.6931472, %v8149_v26  ;;  %8170 = vlog2.f32 %v7497_v7 }
  0x9f   : > { %v8153_v33 = vpop.eup %8152  ;;  %v3797_v34 = vmul.f32 0.6931472, %v8151_v29  ;;  %8172 = vlog2.f32 %v4818_v20 }
  0xa0   : > { %v8155_v36 = vpop.eup %8154  ;;  %6859 = vst [vmem:[%s12522_s20 + $0x28] sm:$0xff] %v6347_v30  ;;  %v6348_v37 = vsub.f32 %v3795_v27, %v5331_v31  ;;  %v5333_v38 = vmul.f32 0.6931472, %v8153_v33  ;;  %8174 = vpow2.f32 %v2272_v25 }
  0xa1   : > { %v8157_v39 = vpop.eup %8156  ;;  %v3799_v40 = vmul.f32 0.6931472, %v8155_v36  ;;  %8176 = vpow2.f32 %v2274_v28 }
  0xa2   : > { %v8159_v42 = vpop.eup %8158  ;;  %6860 = vst [vmem:[%s12522_s20 + $0x30] sm:$0xff] %v6348_v37  ;;  %v6349_v43 = vsub.f32 %v3797_v34, %v5333_v38  ;;  %v5335_v44 = vmul.f32 0.6931472, %v8157_v39  ;;  %8178 = vpow2.f32 %v2276_v32 }
  0xa3   : > { %v8161_v46 = vpop.eup %8160  ;;  %v3801_v47 = vmul.f32 0.6931472, %v8159_v42  ;;  %8180 = vpow2.f32 %v2278_v35 }
  0xa4   : > { %v8163_v49 = vpop.eup %8162  ;;  %6861 = vst [vmem:[%s12522_s20 + $0x38] sm:$0xff] %v6349_v43  ;;  %v6350_v50 = vsub.f32 %v3799_v40, %v5335_v44  ;;  %v5337_v51 = vmul.f32 0.6931472, %v8161_v46  ;;  %8182 = vlog2.f32 %v208_v41 }
  0xa5   : > { %v8165_v53 = vpop.eup %8164  ;;  %v3803_v54 = vmul.f32 0.6931472, %v8163_v49  ;;  %8184 = vlog2.f32 %v209_v45 }
  0xa6   : > { %v8167_v56 = vpop.eup %8166  ;;  %6862 = vst [vmem:[%s12522_s20 + $0x40] sm:$0xff] %v6350_v50  ;;  %v6351_v57 = vsub.f32 %v3801_v47, %v5337_v51  ;;  %v5339_v58 = vmul.f32 0.6931472, %v8165_v53  ;;  %8186 = vlog2.f32 %v210_v48 }
  0xa7   : > { %v8169_v60 = vpop.eup %8168  ;;  %v3805_v61 = vmul.f32 0.6931472, %v8167_v56  ;;  %8188 = vlog2.f32 %v211_v52 }
  0xa8   : > { %v8171_v63 = vpop.eup %8170  ;;  %6863 = vst [vmem:[%s12522_s20 + $0x48] sm:$0xff] %v6351_v57  ;;  %v6352_v0 = vsub.f32 %v3803_v54, %v5339_v58  ;;  %v5341_v1 = vmul.f32 0.6931472, %v8169_v60  ;;  %8190 = vlog2.f32 %v212_v55 }
  0xa9   : > { %v8173_v3 = vpop.eup %8172  ;;  %v3807_v4 = vmul.f32 0.6931472, %v8171_v63  ;;  %8192 = vlog2.f32 %v213_v59 }
  0xaa   : > { %v8175_v6 = vpop.eup %8174  ;;  %6864 = vst [vmem:[%s12522_s20 + $0x50] sm:$0xff] %v6352_v0  ;;  %v6353_v8 = vsub.f32 %v3805_v61, %v5341_v1  ;;  %v5343_v9 = vmul.f32 0.6931472, %v8173_v3  ;;  %8194 = vlog2.f32 %v214_v62 }
  0xab   : > { %v8177_v10 = vpop.eup %8176  ;;  %v7498_v11 = vadd.f32 -0.99, %v8175_v6  ;;  %v4819_v12 = vsub.f32 1.0, %v8175_v6  ;;  %8196 = vlog2.f32 %v215_v2 }
  0xac   : > { %v8179_v13 = vpop.eup %8178  ;;  %6865 = vst [vmem:[%s12522_s20 + $0x58] sm:$0xff] %v6353_v8  ;;  %v6354_v15 = vsub.f32 %v3807_v4, %v5343_v9  ;;  %v7499_v16 = vadd.f32 -0.99, %v8177_v10  ;;  %v4820_v17 = vsub.f32 1.0, %v8177_v10  ;;  %8198 = vlog2.f32 %v216_v5  ;;  %v217_v4 = vld [vmem:[%s12465_s8 + $0xd0] sm:$0xff]  ;;  %v218_v8 = vld [vmem:[%s12465_s8 + $0xd8] sm:$0xff] }
  0xad   : > { %v8181_v7 = vpop.eup %8180  ;;  %8200 = vlog2.f32 %v7498_v11  ;;  %v7500_v18 = vadd.f32 -0.99, %v8179_v13  ;;  %v4821_v20 = vsub.f32 1.0, %v8179_v13 }
  0xae   : > { %v8183_v19 = vpop.eup %8182  ;;  %6866 = vst [vmem:[%s12522_s20 + $0x60] sm:$0xff] %v6354_v15  ;;  %8202 = vlog2.f32 %v4819_v12  ;;  %v7501_v22 = vadd.f32 -0.99, %v8181_v7  ;;  %v4822_v25 = vsub.f32 1.0, %v8181_v7  ;;  %v219_v12 = vld [vmem:[%s12465_s8 + $0xe0] sm:$0xff] }
  0xaf   : > { %v8185_v21 = vpop.eup %8184  ;;  %8204 = vlog2.f32 %v7499_v16  ;;  %v739_v23 = vmul.f32 0.6931472, %v8183_v19  ;;  %v220_v16 = vld [vmem:[%s12465_s8 + $0xe8] sm:$0xff] }
  0xb0   : > { %v8187_v24 = vpop.eup %8186  ;;  %8206 = vlog2.f32 %v4820_v17  ;;  %v741_v26 = vmul.f32 0.6931472, %v8185_v21 }
  0xb1   : > { %v8189_v27 = vpop.eup %8188  ;;  %8208 = vlog2.f32 %v7500_v18  ;;  %v1751_v28 = vmul.f32 %v12488_v14, %v739_v23  ;;  %v743_v29 = vmul.f32 0.6931472, %v8187_v24 }
  0xb2   : > { %v8191_v30 = vpop.eup %8190  ;;  %8210 = vlog2.f32 %v4821_v20  ;;  %v1752_v31 = vmul.f32 %v12488_v14, %v741_v26  ;;  %v745_v32 = vmul.f32 0.6931472, %v8189_v27 }
  0xb3   : > { %v8193_v33 = vpop.eup %8192  ;;  %8212 = vlog2.f32 %v7501_v22  ;;  %v2280_v34 = vmul.f32 1.442695, %v1751_v28  ;;  %v1753_v35 = vmul.f32 %v12488_v14, %v743_v29  ;;  %v747_v36 = vmul.f32 0.6931472, %v8191_v30 }
  0xb4   : > { %v8195_v37 = vpop.eup %8194  ;;  %8214 = vlog2.f32 %v4822_v25  ;;  %v2282_v38 = vmul.f32 1.442695, %v1752_v31  ;;  %v1754_v39 = vmul.f32 %v12488_v14, %v745_v32  ;;  %v749_v40 = vmul.f32 0.6931472, %v8193_v33 }
  0xb5   : > { %v8197_v41 = vpop.eup %8196  ;;  %8216 = vpow2.f32 %v2280_v34  ;;  %v2284_v42 = vmul.f32 1.442695, %v1753_v35  ;;  %v1755_v43 = vmul.f32 %v12488_v14, %v747_v36  ;;  %v751_v44 = vmul.f32 0.6931472, %v8195_v37 }
  0xb6   : > { %v8199_v45 = vpop.eup %8198  ;;  %8218 = vpow2.f32 %v2282_v38  ;;  %v2286_v46 = vmul.f32 1.442695, %v1754_v39  ;;  %v1756_v47 = vmul.f32 %v12488_v14, %v749_v40  ;;  %v753_v48 = vmul.f32 0.6931472, %v8197_v41 }
  0xb7   : > { %v8201_v49 = vpop.eup %8200  ;;  %8220 = vpow2.f32 %v2284_v42  ;;  %v2288_v50 = vmul.f32 1.442695, %v1755_v43  ;;  %v1757_v51 = vmul.f32 %v12488_v14, %v751_v44  ;;  %v755_v52 = vmul.f32 0.6931472, %v8199_v45 }
  0xb8   : > { %v8203_v53 = vpop.eup %8202  ;;  %v3809_v54 = vmul.f32 0.6931472, %v8201_v49  ;;  %8222 = vpow2.f32 %v2286_v46  ;;  %v2290_v55 = vmul.f32 1.442695, %v1756_v47  ;;  %v1758_v56 = vmul.f32 %v12488_v14, %v753_v48 }
  0xb9   : > { %v8205_v57 = vpop.eup %8204  ;;  %v5345_v58 = vmul.f32 0.6931472, %v8203_v53  ;;  %8224 = vpow2.f32 %v2288_v50  ;;  %v2292_v59 = vmul.f32 1.442695, %v1757_v51  ;;  %v1759_v60 = vmul.f32 %v12488_v14, %v755_v52 }
  0xba   : > { %v8207_v61 = vpop.eup %8206  ;;  %v3811_v62 = vmul.f32 0.6931472, %v8205_v57  ;;  %8226 = vpow2.f32 %v2290_v55  ;;  %v2294_v63 = vmul.f32 1.442695, %v1758_v56 }
  0xbb   : > { %v8209_v0 = vpop.eup %8208  ;;  %v6355_v1 = vsub.f32 %v3809_v54, %v5345_v58  ;;  %v5347_v2 = vmul.f32 0.6931472, %v8207_v61  ;;  %8228 = vpow2.f32 %v2292_v59  ;;  %v2296_v3 = vmul.f32 1.442695, %v1759_v60 }
  0xbc   : > { %v8211_v5 = vpop.eup %8210  ;;  %v3813_v6 = vmul.f32 0.6931472, %v8209_v0  ;;  %8230 = vpow2.f32 %v2294_v63 }
  0xbd   : > { %v8213_v9 = vpop.eup %8212  ;;  %6867 = vst [vmem:[%s12522_s20 + $0x68] sm:$0xff] %v6355_v1  ;;  %v6356_v10 = vsub.f32 %v3811_v62, %v5347_v2  ;;  %v5349_v11 = vmul.f32 0.6931472, %v8211_v5  ;;  %8232 = vpow2.f32 %v2296_v3 }
  0xbe   : > { %v8215_v13 = vpop.eup %8214  ;;  %v3815_v15 = vmul.f32 0.6931472, %v8213_v9  ;;  %8234 = vlog2.f32 %v217_v4 }
  0xbf   : > { %v8217_v17 = vpop.eup %8216  ;;  %6868 = vst [vmem:[%s12522_s20 + $0x70] sm:$0xff] %v6356_v10  ;;  %v6357_v7 = vsub.f32 %v3813_v6, %v5349_v11  ;;  %v5351_v18 = vmul.f32 0.6931472, %v8215_v13  ;;  %8236 = vlog2.f32 %v218_v8 }
  0xc0   : > { %v8219_v19 = vpop.eup %8218  ;;  %v7502_v20 = vadd.f32 -0.99, %v8217_v17  ;;  %v4823_v21 = vsub.f32 1.0, %v8217_v17  ;;  %8238 = vlog2.f32 %v219_v12 }
  0xc1   : > { %v8221_v22 = vpop.eup %8220  ;;  %6869 = vst [vmem:[%s12522_s20 + $0x78] sm:$0xff] %v6357_v7  ;;  %v6358_v23 = vsub.f32 %v3815_v15, %v5351_v18  ;;  %v7503_v24 = vadd.f32 -0.99, %v8219_v19  ;;  %v4824_v25 = vsub.f32 1.0, %v8219_v19  ;;  %8240 = vlog2.f32 %v220_v16 }
  0xc2   : > { %v8223_v26 = vpop.eup %8222  ;;  %8242 = vlog2.f32 %v7502_v20  ;;  %v7504_v27 = vadd.f32 -0.99, %v8221_v22  ;;  %v4825_v29 = vsub.f32 1.0, %v8221_v22  ;;  %v221_v20 = vld [vmem:[%s12465_s8 + $0xf0] sm:$0xff] }
  0xc3   : > { %v8225_v28 = vpop.eup %8224  ;;  %6870 = vst [vmem:[%s12522_s20 + $0x80] sm:$0xff] %v6358_v23  ;;  %8244 = vlog2.f32 %v4823_v21  ;;  %v7505_v31 = vadd.f32 -0.99, %v8223_v26  ;;  %v4826_v33 = vsub.f32 1.0, %v8223_v26 }
  0xc4   : > { %v8227_v30 = vpop.eup %8226  ;;  %8246 = vlog2.f32 %v7503_v24  ;;  %v7506_v35 = vadd.f32 -0.99, %v8225_v28  ;;  %v4827_v37 = vsub.f32 1.0, %v8225_v28  ;;  %v222_v24 = vld [vmem:[%s12465_s8 + $0xf8] sm:$0xff] }
  0xc5   : > { %v8229_v32 = vpop.eup %8228  ;;  %8248 = vlog2.f32 %v4824_v25  ;;  %v7507_v39 = vadd.f32 -0.99, %v8227_v30  ;;  %v4828_v41 = vsub.f32 1.0, %v8227_v30 }
  0xc6   : > { %v8231_v34 = vpop.eup %8230  ;;  %8250 = vlog2.f32 %v7504_v27  ;;  %v7508_v44 = vadd.f32 -0.99, %v8229_v32  ;;  %v4829_v47 = vsub.f32 1.0, %v8229_v32  ;;  %v223_v27 = vld [vmem:[%s12465_s8 + $0x100] sm:$0xff] }
  0xc7   : > { %v8233_v36 = vpop.eup %8232  ;;  %8252 = vlog2.f32 %v4825_v29  ;;  %v7509_v50 = vadd.f32 -0.99, %v8231_v34  ;;  %v4830_v55 = vsub.f32 1.0, %v8231_v34  ;;  %v225_v34 = vld [vmem:[%s12465_s8 + $0x110] sm:$0xff] }
  0xc8   : > { %v8235_v38 = vpop.eup %8234  ;;  %8254 = vlog2.f32 %v7505_v31  ;;  %v7510_v59 = vadd.f32 -0.99, %v8233_v36  ;;  %v4831_v63 = vsub.f32 1.0, %v8233_v36  ;;  %v224_v31 = vld [vmem:[%s12465_s8 + $0x108] sm:$0xff] }
  0xc9   : > { %v8237_v40 = vpop.eup %8236  ;;  %8256 = vlog2.f32 %v4826_v33  ;;  %v757_v42 = vmul.f32 0.6931472, %v8235_v38  ;;  %v226_v38 = vld [vmem:[%s12465_s8 + $0x118] sm:$0xff] }
  0xca   : > { %v8239_v43 = vpop.eup %8238  ;;  %8258 = vlog2.f32 %v7506_v35  ;;  %v759_v45 = vmul.f32 0.6931472, %v8237_v40 }
  0xcb   : > { %v8241_v46 = vpop.eup %8240  ;;  %8260 = vlog2.f32 %v4827_v37  ;;  %v761_v48 = vmul.f32 0.6931472, %v8239_v43  ;;  %v1760_v51 = vmul.f32 %v12488_v14, %v757_v42 }
  0xcc   : > { %v8243_v49 = vpop.eup %8242  ;;  %8262 = vlog2.f32 %v7507_v39  ;;  %v763_v52 = vmul.f32 0.6931472, %v8241_v46  ;;  %v1761_v56 = vmul.f32 %v12488_v14, %v759_v45  ;;  %v228_v45 = vld [vmem:[%s12465_s8 + $0x128] sm:$0xff] }
  0xcd   : > { %v8245_v53 = vpop.eup %8244  ;;  %v3817_v54 = vmul.f32 0.6931472, %v8243_v49  ;;  %8264 = vlog2.f32 %v4828_v41  ;;  %v1762_v60 = vmul.f32 %v12488_v14, %v761_v48  ;;  %v2298_v4 = vmul.f32 1.442695, %v1760_v51  ;;  %v227_v41 = vld [vmem:[%s12465_s8 + $0x120] sm:$0xff]  ;;  %v229_v48 = vld [vmem:[%s12465_s8 + $0x130] sm:$0xff] }
  0xce   : > { %v8247_v57 = vpop.eup %8246  ;;  %v5353_v58 = vmul.f32 0.6931472, %v8245_v53  ;;  %8266 = vlog2.f32 %v7508_v44  ;;  %v1763_v0 = vmul.f32 %v12488_v14, %v763_v52  ;;  %v2300_v8 = vmul.f32 1.442695, %v1761_v56 }
  0xcf   : > { %v8249_v61 = vpop.eup %8248  ;;  %v3819_v62 = vmul.f32 0.6931472, %v8247_v57  ;;  %8268 = vlog2.f32 %v4829_v47  ;;  %v2302_v12 = vmul.f32 1.442695, %v1762_v60 }
  0xd0   : > { %v8251_v1 = vpop.eup %8250  ;;  %v6359_v2 = vsub.f32 %v3817_v54, %v5353_v58  ;;  %v5355_v3 = vmul.f32 0.6931472, %v8249_v61  ;;  %8270 = vlog2.f32 %v7509_v50  ;;  %v2304_v15 = vmul.f32 1.442695, %v1763_v0 }
  0xd1   : > { %v8253_v5 = vpop.eup %8252  ;;  %v3821_v6 = vmul.f32 0.6931472, %v8251_v1  ;;  %8272 = vlog2.f32 %v4830_v55 }
  0xd2   : > { %v8255_v9 = vpop.eup %8254  ;;  %6871 = vst [vmem:[%s12522_s20 + $0x88] sm:$0xff] %v6359_v2  ;;  %v6360_v10 = vsub.f32 %v3819_v62, %v5355_v3  ;;  %v5357_v11 = vmul.f32 0.6931472, %v8253_v5  ;;  %8274 = vlog2.f32 %v7510_v59 }
  0xd3   : > { %v8257_v13 = vpop.eup %8256  ;;  %v3823_v14 = vmul.f32 0.6931472, %v8255_v9  ;;  %8276 = vlog2.f32 %v4831_v63 }
  0xd4   : > { %v8259_v16 = vpop.eup %8258  ;;  %6872 = vst [vmem:[%s12522_s20 + $0x90] sm:$0xff] %v6360_v10  ;;  %v6361_v17 = vsub.f32 %v3821_v6, %v5357_v11  ;;  %v5359_v7 = vmul.f32 0.6931472, %v8257_v13  ;;  %8278 = vpow2.f32 %v2298_v4  ;;  %v12594_v6 = vld [vmem:[#allocation5] ss:$0 sm:$0xff] }
  0xd5   : > { %v8261_v18 = vpop.eup %8260  ;;  %v3825_v19 = vmul.f32 0.6931472, %v8259_v16  ;;  %8280 = vpow2.f32 %v2300_v8 }
  0xd6   : > { %v8263_v21 = vpop.eup %8262  ;;  %6873 = vst [vmem:[%s12522_s20 + $0x98] sm:$0xff] %v6361_v17  ;;  %v6362_v22 = vsub.f32 %v3823_v14, %v5359_v7  ;;  %v5361_v23 = vmul.f32 0.6931472, %v8261_v18  ;;  %8282 = vpow2.f32 %v2302_v12 }
  0xd7   : > { %v8265_v25 = vpop.eup %8264  ;;  %v3827_v26 = vmul.f32 0.6931472, %v8263_v21  ;;  %8284 = vpow2.f32 %v2304_v15 }
  0xd8   : > { %v8267_v28 = vpop.eup %8266  ;;  %6874 = vst [vmem:[%s12522_s20 + $0xa0] sm:$0xff] %v6362_v22  ;;  %v6363_v29 = vsub.f32 %v3825_v19, %v5361_v23  ;;  %v5363_v30 = vmul.f32 0.6931472, %v8265_v25  ;;  %8286 = vlog2.f32 %v221_v20 }
  0xd9   : > { %v8269_v32 = vpop.eup %8268  ;;  %v3829_v33 = vmul.f32 0.6931472, %v8267_v28  ;;  %8288 = vlog2.f32 %v222_v24 }
  0xda   : > { %v8271_v35 = vpop.eup %8270  ;;  %6875 = vst [vmem:[%s12522_s20 + $0xa8] sm:$0xff] %v6363_v29  ;;  %v6364_v36 = vsub.f32 %v3827_v26, %v5363_v30  ;;  %v5365_v37 = vmul.f32 0.6931472, %v8269_v32  ;;  %8290 = vlog2.f32 %v223_v27 }
  0xdb   : > { %v8273_v39 = vpop.eup %8272  ;;  %v3831_v40 = vmul.f32 0.6931472, %v8271_v35  ;;  %8292 = vlog2.f32 %v224_v31 }
  0xdc   : > { %v8275_v42 = vpop.eup %8274  ;;  %6876 = vst [vmem:[%s12522_s20 + $0xb0] sm:$0xff] %v6364_v36  ;;  %v6365_v43 = vsub.f32 %v3829_v33, %v5365_v37  ;;  %v5367_v44 = vmul.f32 0.6931472, %v8273_v39  ;;  %8294 = vlog2.f32 %v225_v34 }
  0xdd   : > { %v8277_v46 = vpop.eup %8276  ;;  %v3833_v47 = vmul.f32 0.6931472, %v8275_v42  ;;  %8296 = vlog2.f32 %v226_v38 }
  0xde   : > { %v8279_v49 = vpop.eup %8278  ;;  %6877 = vst [vmem:[%s12522_s20 + $0xb8] sm:$0xff] %v6365_v43  ;;  %v6366_v50 = vsub.f32 %v3831_v40, %v5367_v44  ;;  %v5369_v51 = vmul.f32 0.6931472, %v8277_v46  ;;  %8298 = vlog2.f32 %v227_v41 }
  0xdf   : > { %v8281_v52 = vpop.eup %8280  ;;  %v7511_v53 = vadd.f32 -0.99, %v8279_v49  ;;  %v4832_v54 = vsub.f32 1.0, %v8279_v49  ;;  %8300 = vlog2.f32 %v228_v45 }
  0xe0   : > { %v8283_v55 = vpop.eup %8282  ;;  %6878 = vst [vmem:[%s12522_s20 + $0xc0] sm:$0xff] %v6366_v50  ;;  %v6367_v56 = vsub.f32 %v3833_v47, %v5369_v51  ;;  %v7512_v57 = vadd.f32 -0.99, %v8281_v52  ;;  %v4833_v58 = vsub.f32 1.0, %v8281_v52  ;;  %8302 = vlog2.f32 %v229_v48  ;;  %v230_v47 = vld [vmem:[%s12465_s8 + $0x138] sm:$0xff]  ;;  %v231_v50 = vld [vmem:[%s12465_s8 + $0x140] sm:$0xff] }
  0xe1   : > { %v8285_v59 = vpop.eup %8284  ;;  %8304 = vlog2.f32 %v7511_v53  ;;  %v7513_v60 = vadd.f32 -0.99, %v8283_v55  ;;  %v4834_v62 = vsub.f32 1.0, %v8283_v55 }
  0xe2   : > { %v8287_v61 = vpop.eup %8286  ;;  %6879 = vst [vmem:[%s12522_s20 + $0xc8] sm:$0xff] %v6367_v56  ;;  %8306 = vlog2.f32 %v4832_v54  ;;  %v7514_v0 = vadd.f32 -0.99, %v8285_v59  ;;  %v4835_v3 = vsub.f32 1.0, %v8285_v59  ;;  %v232_v54 = vld [vmem:[%s12465_s8 + $0x148] sm:$0xff] }
  0xe3   : > { %v8289_v63 = vpop.eup %8288  ;;  %8308 = vlog2.f32 %v7512_v57  ;;  %v765_v1 = vmul.f32 0.6931472, %v8287_v61  ;;  %v233_v57 = vld [vmem:[%s12465_s8 + $0x150] sm:$0xff] }
  0xe4   : > { %v8291_v2 = vpop.eup %8290  ;;  %8310 = vlog2.f32 %v4833_v58  ;;  %v767_v4 = vmul.f32 0.6931472, %v8289_v63 }
  0xe5   : > { %v8293_v5 = vpop.eup %8292  ;;  %8312 = vlog2.f32 %v7513_v60  ;;  %v1764_v8 = vmul.f32 %v12594_v6, %v765_v1  ;;  %v769_v9 = vmul.f32 0.6931472, %v8291_v2 }
  0xe6   : > { %v8295_v10 = vpop.eup %8294  ;;  %8314 = vlog2.f32 %v4834_v62  ;;  %v1765_v11 = vmul.f32 %v12594_v6, %v767_v4  ;;  %v771_v12 = vmul.f32 0.6931472, %v8293_v5 }
  0xe7   : > { %v8297_v13 = vpop.eup %8296  ;;  %8316 = vlog2.f32 %v7514_v0  ;;  %v2306_v14 = vmul.f32 1.442695, %v1764_v8  ;;  %v1766_v15 = vmul.f32 %v12594_v6, %v769_v9  ;;  %v773_v16 = vmul.f32 0.6931472, %v8295_v10 }
  0xe8   : > { %v8299_v17 = vpop.eup %8298  ;;  %8318 = vlog2.f32 %v4835_v3  ;;  %v2308_v7 = vmul.f32 1.442695, %v1765_v11  ;;  %v1767_v18 = vmul.f32 %v12594_v6, %v771_v12  ;;  %v775_v19 = vmul.f32 0.6931472, %v8297_v13 }
  0xe9   : > { %v8301_v20 = vpop.eup %8300  ;;  %8320 = vpow2.f32 %v2306_v14  ;;  %v2310_v21 = vmul.f32 1.442695, %v1766_v15  ;;  %v1768_v22 = vmul.f32 %v12594_v6, %v773_v16  ;;  %v777_v23 = vmul.f32 0.6931472, %v8299_v17 }
  0xea   : > { %v8303_v24 = vpop.eup %8302  ;;  %8322 = vpow2.f32 %v2308_v7  ;;  %v2312_v25 = vmul.f32 1.442695, %v1767_v18  ;;  %v1769_v26 = vmul.f32 %v12594_v6, %v775_v19  ;;  %v779_v27 = vmul.f32 0.6931472, %v8301_v20 }
  0xeb   : > { %v8305_v28 = vpop.eup %8304  ;;  %8324 = vpow2.f32 %v2310_v21  ;;  %v2314_v29 = vmul.f32 1.442695, %v1768_v22  ;;  %v1770_v30 = vmul.f32 %v12594_v6, %v777_v23  ;;  %v781_v31 = vmul.f32 0.6931472, %v8303_v24 }
  0xec   : > { %v8307_v32 = vpop.eup %8306  ;;  %v3835_v33 = vmul.f32 0.6931472, %v8305_v28  ;;  %8326 = vpow2.f32 %v2312_v25  ;;  %v2316_v34 = vmul.f32 1.442695, %v1769_v26  ;;  %v1771_v35 = vmul.f32 %v12594_v6, %v779_v27 }
  0xed   : > { %v8309_v36 = vpop.eup %8308  ;;  %v5371_v37 = vmul.f32 0.6931472, %v8307_v32  ;;  %8328 = vpow2.f32 %v2314_v29  ;;  %v2318_v38 = vmul.f32 1.442695, %v1770_v30  ;;  %v1772_v39 = vmul.f32 %v12594_v6, %v781_v31 }
  0xee   : > { %v8311_v40 = vpop.eup %8310  ;;  %v3837_v41 = vmul.f32 0.6931472, %v8309_v36  ;;  %8330 = vpow2.f32 %v2316_v34  ;;  %v2320_v42 = vmul.f32 1.442695, %v1771_v35 }
  0xef   : > { %v8313_v43 = vpop.eup %8312  ;;  %v6368_v44 = vsub.f32 %v3835_v33, %v5371_v37  ;;  %v5373_v45 = vmul.f32 0.6931472, %v8311_v40  ;;  %8332 = vpow2.f32 %v2318_v38  ;;  %v2322_v46 = vmul.f32 1.442695, %v1772_v39 }
  0xf0   : > { %v8315_v48 = vpop.eup %8314  ;;  %v3839_v49 = vmul.f32 0.6931472, %v8313_v43  ;;  %8334 = vpow2.f32 %v2320_v42 }
  0xf1   : > { %v8317_v51 = vpop.eup %8316  ;;  %6880 = vst [vmem:[%s12522_s20 + $0xd0] sm:$0xff] %v6368_v44  ;;  %v6369_v52 = vsub.f32 %v3837_v41, %v5373_v45  ;;  %v5375_v53 = vmul.f32 0.6931472, %v8315_v48  ;;  %8336 = vpow2.f32 %v2322_v46 }
  0xf2   : > { %v8319_v55 = vpop.eup %8318  ;;  %v3841_v56 = vmul.f32 0.6931472, %v8317_v51  ;;  %8338 = vlog2.f32 %v230_v47 }
  0xf3   : > { %v8321_v58 = vpop.eup %8320  ;;  %6881 = vst [vmem:[%s12522_s20 + $0xd8] sm:$0xff] %v6369_v52  ;;  %v6370_v59 = vsub.f32 %v3839_v49, %v5375_v53  ;;  %v5377_v60 = vmul.f32 0.6931472, %v8319_v55  ;;  %8340 = vlog2.f32 %v231_v50 }
  0xf4   : > { %v8323_v61 = vpop.eup %8322  ;;  %v7515_v62 = vadd.f32 -0.99, %v8321_v58  ;;  %v4836_v63 = vsub.f32 1.0, %v8321_v58  ;;  %8342 = vlog2.f32 %v232_v54 }
  0xf5   : > { %v8325_v0 = vpop.eup %8324  ;;  %6882 = vst [vmem:[%s12522_s20 + $0xe0] sm:$0xff] %v6370_v59  ;;  %v6371_v1 = vsub.f32 %v3841_v56, %v5377_v60  ;;  %v7516_v2 = vadd.f32 -0.99, %v8323_v61  ;;  %v4837_v3 = vsub.f32 1.0, %v8323_v61  ;;  %8344 = vlog2.f32 %v233_v57 }
  0xf6   : > { %v8327_v4 = vpop.eup %8326  ;;  %8346 = vlog2.f32 %v7515_v62  ;;  %v7517_v5 = vadd.f32 -0.99, %v8325_v0  ;;  %v4838_v9 = vsub.f32 1.0, %v8325_v0 }
  0xf7   : > { %v8329_v8 = vpop.eup %8328  ;;  %6883 = vst [vmem:[%s12522_s20 + $0xe8] sm:$0xff] %v6371_v1  ;;  %8348 = vlog2.f32 %v4836_v63  ;;  %v7518_v11 = vadd.f32 -0.99, %v8327_v4  ;;  %v4839_v13 = vsub.f32 1.0, %v8327_v4  ;;  %v234_v63 = vld [vmem:[%s12465_s8 + $0x158] sm:$0xff] }
  0xf8   : > { %v8331_v10 = vpop.eup %8330  ;;  %8350 = vlog2.f32 %v7516_v2  ;;  %v7519_v15 = vadd.f32 -0.99, %v8329_v8  ;;  %v4840_v17 = vsub.f32 1.0, %v8329_v8  ;;  %v236_v8 = vld [vmem:[%s12465_s8 + $0x168] sm:$0xff] }
  0xf9   : > { %v8333_v12 = vpop.eup %8332  ;;  %8352 = vlog2.f32 %v4837_v3  ;;  %v7520_v18 = vadd.f32 -0.99, %v8331_v10  ;;  %v4841_v20 = vsub.f32 1.0, %v8331_v10  ;;  %v235_v3 = vld [vmem:[%s12465_s8 + $0x160] sm:$0xff] }
  0xfa   : > { %v8335_v14 = vpop.eup %8334  ;;  %8354 = vlog2.f32 %v7517_v5  ;;  %v7521_v23 = vadd.f32 -0.99, %v8333_v12  ;;  %v4842_v26 = vsub.f32 1.0, %v8333_v12  ;;  %v237_v12 = vld [vmem:[%s12465_s8 + $0x170] sm:$0xff] }
  0xfb   : > { %v8337_v16 = vpop.eup %8336  ;;  %8356 = vlog2.f32 %v4838_v9  ;;  %v7522_v29 = vadd.f32 -0.99, %v8335_v14  ;;  %v4843_v34 = vsub.f32 1.0, %v8335_v14 }
  0xfc   : > { %v8339_v7 = vpop.eup %8338  ;;  %8358 = vlog2.f32 %v7518_v11  ;;  %v7523_v38 = vadd.f32 -0.99, %v8337_v16  ;;  %v4844_v42 = vsub.f32 1.0, %v8337_v16 }
  0xfd   : > { %v8341_v19 = vpop.eup %8340  ;;  %8360 = vlog2.f32 %v4839_v13  ;;  %v783_v21 = vmul.f32 0.6931472, %v8339_v7 }
  0xfe   : > { %v8343_v22 = vpop.eup %8342  ;;  %8362 = vlog2.f32 %v7519_v15  ;;  %v785_v24 = vmul.f32 0.6931472, %v8341_v19  ;;  %v238_v15 = vld [vmem:[%s12465_s8 + $0x178] sm:$0xff] }
  0xff   : > { %v8345_v25 = vpop.eup %8344  ;;  %8364 = vlog2.f32 %v4840_v17  ;;  %v787_v27 = vmul.f32 0.6931472, %v8343_v22  ;;  %v1773_v30 = vmul.f32 %v12594_v6, %v783_v21  ;;  %v240_v21 = vld [vmem:[%s12465_s8 + $0x188] sm:$0xff] }
 0x100   : > { %v8347_v28 = vpop.eup %8346  ;;  %8366 = vlog2.f32 %v7520_v18  ;;  %v789_v31 = vmul.f32 0.6931472, %v8345_v25  ;;  %v1774_v35 = vmul.f32 %v12594_v6, %v785_v24  ;;  %v239_v18 = vld [vmem:[%s12465_s8 + $0x180] sm:$0xff]  ;;  %v241_v25 = vld [vmem:[%s12465_s8 + $0x190] sm:$0xff] }
 0x101   : > { %v8349_v32 = vpop.eup %8348  ;;  %v3843_v33 = vmul.f32 0.6931472, %v8347_v28  ;;  %8368 = vlog2.f32 %v4841_v20  ;;  %v1775_v39 = vmul.f32 %v12594_v6, %v787_v27  ;;  %v2324_v47 = vmul.f32 1.442695, %v1773_v30  ;;  %v242_v28 = vld [vmem:[%s12465_s8 + $0x198] sm:$0xff] }
 0x102   : > { %v8351_v36 = vpop.eup %8350  ;;  %v5379_v37 = vmul.f32 0.6931472, %v8349_v32  ;;  %8370 = vlog2.f32 %v7521_v23  ;;  %v1776_v43 = vmul.f32 %v12594_v6, %v789_v31  ;;  %v2326_v50 = vmul.f32 1.442695, %v1774_v35 }
 0x103   : > { %v8353_v40 = vpop.eup %8352  ;;  %v3845_v41 = vmul.f32 0.6931472, %v8351_v36  ;;  %8372 = vlog2.f32 %v4842_v26  ;;  %v2328_v54 = vmul.f32 1.442695, %v1775_v39 }
 0x104   : > { %v8355_v44 = vpop.eup %8354  ;;  %v6372_v45 = vsub.f32 %v3843_v33, %v5379_v37  ;;  %v5381_v46 = vmul.f32 0.6931472, %v8353_v40  ;;  %8374 = vlog2.f32 %v7522_v29  ;;  %v2330_v57 = vmul.f32 1.442695, %v1776_v43 }
 0x105   : > { %v8357_v48 = vpop.eup %8356  ;;  %v3847_v49 = vmul.f32 0.6931472, %v8355_v44  ;;  %8376 = vlog2.f32 %v4843_v34 }
 0x106   : > { %v8359_v51 = vpop.eup %8358  ;;  %6884 = vst [vmem:[%s12522_s20 + $0xf0] sm:$0xff] %v6372_v45  ;;  %v6373_v52 = vsub.f32 %v3845_v41, %v5381_v46  ;;  %v5383_v53 = vmul.f32 0.6931472, %v8357_v48  ;;  %8378 = vlog2.f32 %v7523_v38 }
 0x107   : > { %v8361_v55 = vpop.eup %8360  ;;  %v3849_v56 = vmul.f32 0.6931472, %v8359_v51  ;;  %8380 = vlog2.f32 %v4844_v42 }
 0x108   : > { %v8363_v58 = vpop.eup %8362  ;;  %6885 = vst [vmem:[%s12522_s20 + $0xf8] sm:$0xff] %v6373_v52  ;;  %v6374_v59 = vsub.f32 %v3847_v49, %v5383_v53  ;;  %v5385_v60 = vmul.f32 0.6931472, %v8361_v55  ;;  %8382 = vpow2.f32 %v2324_v47 }
 0x109   : > { %v8365_v61 = vpop.eup %8364  ;;  %v3851_v62 = vmul.f32 0.6931472, %v8363_v58  ;;  %8384 = vpow2.f32 %v2326_v50 }
 0x10a   : > { %v8367_v0 = vpop.eup %8366  ;;  %6886 = vst [vmem:[%s12522_s20 + $0x100] sm:$0xff] %v6374_v59  ;;  %v6375_v1 = vsub.f32 %v3849_v56, %v5385_v60  ;;  %v5387_v2 = vmul.f32 0.6931472, %v8365_v61  ;;  %8386 = vpow2.f32 %v2328_v54 }
 0x10b   : > { %v8369_v4 = vpop.eup %8368  ;;  %v3853_v5 = vmul.f32 0.6931472, %v8367_v0  ;;  %8388 = vpow2.f32 %v2330_v57 }
 0x10c   : > { %v8371_v9 = vpop.eup %8370  ;;  %6887 = vst [vmem:[%s12522_s20 + $0x108] sm:$0xff] %v6375_v1  ;;  %v6376_v10 = vsub.f32 %v3851_v62, %v5387_v2  ;;  %v5389_v11 = vmul.f32 0.6931472, %v8369_v4  ;;  %8390 = vlog2.f32 %v234_v63 }
 0x10d   : > { %v8373_v13 = vpop.eup %8372  ;;  %v3855_v14 = vmul.f32 0.6931472, %v8371_v9  ;;  %8392 = vlog2.f32 %v235_v3 }
 0x10e   : > { %v8375_v16 = vpop.eup %8374  ;;  %6888 = vst [vmem:[%s12522_s20 + $0x110] sm:$0xff] %v6376_v10  ;;  %v6377_v17 = vsub.f32 %v3853_v5, %v5389_v11  ;;  %v5391_v7 = vmul.f32 0.6931472, %v8373_v13  ;;  %8394 = vlog2.f32 %v236_v8 }
 0x10f   : > { %v8377_v19 = vpop.eup %8376  ;;  %v3857_v20 = vmul.f32 0.6931472, %v8375_v16  ;;  %8396 = vlog2.f32 %v237_v12 }
 0x110   : > { %v8379_v22 = vpop.eup %8378  ;;  %6889 = vst [vmem:[%s12522_s20 + $0x118] sm:$0xff] %v6377_v17  ;;  %v6378_v23 = vsub.f32 %v3855_v14, %v5391_v7  ;;  %v5393_v24 = vmul.f32 0.6931472, %v8377_v19  ;;  %8398 = vlog2.f32 %v238_v15 }
 0x111   : > { %v8381_v26 = vpop.eup %8380  ;;  %v3859_v27 = vmul.f32 0.6931472, %v8379_v22  ;;  %8400 = vlog2.f32 %v239_v18 }
 0x112   : > { %v8383_v29 = vpop.eup %8382  ;;  %6890 = vst [vmem:[%s12522_s20 + $0x120] sm:$0xff] %v6378_v23  ;;  %v6379_v30 = vsub.f32 %v3857_v20, %v5393_v24  ;;  %v5395_v31 = vmul.f32 0.6931472, %v8381_v26  ;;  %8402 = vlog2.f32 %v240_v21 }
 0x113   : > { %v8385_v32 = vpop.eup %8384  ;;  %v7524_v33 = vadd.f32 -0.99, %v8383_v29  ;;  %v4845_v34 = vsub.f32 1.0, %v8383_v29  ;;  %8404 = vlog2.f32 %v241_v25 }
 0x114   : > { %v8387_v35 = vpop.eup %8386  ;;  %6891 = vst [vmem:[%s12522_s20 + $0x128] sm:$0xff] %v6379_v30  ;;  %v6380_v36 = vsub.f32 %v3859_v27, %v5395_v31  ;;  %v7525_v37 = vadd.f32 -0.99, %v8385_v32  ;;  %v4846_v38 = vsub.f32 1.0, %v8385_v32  ;;  %8406 = vlog2.f32 %v242_v28  ;;  %v243_v27 = vld [vmem:[%s12465_s8 + $0x1a0] sm:$0xff]  ;;  %v244_v30 = vld [vmem:[%s12465_s8 + $0x1a8] sm:$0xff] }
 0x115   : > { %v8389_v39 = vpop.eup %8388  ;;  %8408 = vlog2.f32 %v7524_v33  ;;  %v7526_v40 = vadd.f32 -0.99, %v8387_v35  ;;  %v4847_v42 = vsub.f32 1.0, %v8387_v35 }
 0x116   : > { %v8391_v41 = vpop.eup %8390  ;;  %6892 = vst [vmem:[%s12522_s20 + $0x130] sm:$0xff] %v6380_v36  ;;  %8410 = vlog2.f32 %v4845_v34  ;;  %v7527_v44 = vadd.f32 -0.99, %v8389_v39  ;;  %v4848_v47 = vsub.f32 1.0, %v8389_v39  ;;  %v245_v34 = vld [vmem:[%s12465_s8 + $0x1b0] sm:$0xff] }
 0x117   : > { %v8393_v43 = vpop.eup %8392  ;;  %8412 = vlog2.f32 %v7525_v37  ;;  %v791_v45 = vmul.f32 0.6931472, %v8391_v41  ;;  %v246_v37 = vld [vmem:[%s12465_s8 + $0x1b8] sm:$0xff] }
 0x118   : > { %v8395_v46 = vpop.eup %8394  ;;  %8414 = vlog2.f32 %v4846_v38  ;;  %v793_v48 = vmul.f32 0.6931472, %v8393_v43 }
 0x119   : > { %v8397_v49 = vpop.eup %8396  ;;  %8416 = vlog2.f32 %v7526_v40  ;;  %v1777_v50 = vmul.f32 %v12594_v6, %v791_v45  ;;  %v795_v51 = vmul.f32 0.6931472, %v8395_v46 }
 0x11a   : > { %v8399_v52 = vpop.eup %8398  ;;  %8418 = vlog2.f32 %v4847_v42  ;;  %v1778_v53 = vmul.f32 %v12594_v6, %v793_v48  ;;  %v797_v54 = vmul.f32 0.6931472, %v8397_v49 }
 0x11b   : > { %v8401_v55 = vpop.eup %8400  ;;  %8420 = vlog2.f32 %v7527_v44  ;;  %v2332_v56 = vmul.f32 1.442695, %v1777_v50  ;;  %v1779_v57 = vmul.f32 %v12594_v6, %v795_v51  ;;  %v799_v58 = vmul.f32 0.6931472, %v8399_v52 }
 0x11c   : > { %v8403_v59 = vpop.eup %8402  ;;  %8422 = vlog2.f32 %v4848_v47  ;;  %v2334_v60 = vmul.f32 1.442695, %v1778_v53  ;;  %v1780_v61 = vmul.f32 %v12594_v6, %v797_v54  ;;  %v801_v62 = vmul.f32 0.6931472, %v8401_v55 }
 0x11d   : > { %v8405_v63 = vpop.eup %8404  ;;  %8424 = vpow2.f32 %v2332_v56  ;;  %v2336_v0 = vmul.f32 1.442695, %v1779_v57  ;;  %v1781_v1 = vmul.f32 %v12594_v6, %v799_v58  ;;  %v803_v2 = vmul.f32 0.6931472, %v8403_v59 }
 0x11e   : > { %v8407_v3 = vpop.eup %8406  ;;  %8426 = vpow2.f32 %v2334_v60  ;;  %v2338_v4 = vmul.f32 1.442695, %v1780_v61  ;;  %v1782_v5 = vmul.f32 %v12594_v6, %v801_v62  ;;  %v805_v8 = vmul.f32 0.6931472, %v8405_v63 }
 0x11f   : > { %v8409_v9 = vpop.eup %8408  ;;  %8428 = vpow2.f32 %v2336_v0  ;;  %v2340_v10 = vmul.f32 1.442695, %v1781_v1  ;;  %v1783_v11 = vmul.f32 %v12594_v6, %v803_v2  ;;  %v807_v12 = vmul.f32 0.6931472, %v8407_v3 }
 0x120   : > { %v8411_v13 = vpop.eup %8410  ;;  %v3861_v14 = vmul.f32 0.6931472, %v8409_v9  ;;  %8430 = vpow2.f32 %v2338_v4  ;;  %v2342_v15 = vmul.f32 1.442695, %v1782_v5  ;;  %v1784_v16 = vmul.f32 %v12594_v6, %v805_v8 }
 0x121   : > { %v8413_v17 = vpop.eup %8412  ;;  %v5397_v7 = vmul.f32 0.6931472, %v8411_v13  ;;  %8432 = vpow2.f32 %v2340_v10  ;;  %v2344_v18 = vmul.f32 1.442695, %v1783_v11  ;;  %v1785_v19 = vmul.f32 %v12594_v6, %v807_v12 }
 0x122   : > { %v8415_v20 = vpop.eup %8414  ;;  %v3863_v21 = vmul.f32 0.6931472, %v8413_v17  ;;  %8434 = vpow2.f32 %v2342_v15  ;;  %v2346_v22 = vmul.f32 1.442695, %v1784_v16 }
 0x123   : > { %v8417_v23 = vpop.eup %8416  ;;  %v6381_v24 = vsub.f32 %v3861_v14, %v5397_v7  ;;  %v5399_v25 = vmul.f32 0.6931472, %v8415_v20  ;;  %8436 = vpow2.f32 %v2344_v18  ;;  %v2348_v26 = vmul.f32 1.442695, %v1785_v19 }
 0x124   : > { %v8419_v28 = vpop.eup %8418  ;;  %v3865_v29 = vmul.f32 0.6931472, %v8417_v23  ;;  %8438 = vpow2.f32 %v2346_v22 }
 0x125   : > { %v8421_v31 = vpop.eup %8420  ;;  %6893 = vst [vmem:[%s12522_s20 + $0x138] sm:$0xff] %v6381_v24  ;;  %v6382_v32 = vsub.f32 %v3863_v21, %v5399_v25  ;;  %v5401_v33 = vmul.f32 0.6931472, %v8419_v28  ;;  %8440 = vpow2.f32 %v2348_v26 }
 0x126   : > { %v8423_v35 = vpop.eup %8422  ;;  %v3867_v36 = vmul.f32 0.6931472, %v8421_v31  ;;  %8442 = vlog2.f32 %v243_v27 }
 0x127   : > { %v8425_v38 = vpop.eup %8424  ;;  %6894 = vst [vmem:[%s12522_s20 + $0x140] sm:$0xff] %v6382_v32  ;;  %v6383_v39 = vsub.f32 %v3865_v29, %v5401_v33  ;;  %v5403_v40 = vmul.f32 0.6931472, %v8423_v35  ;;  %8444 = vlog2.f32 %v244_v30 }
 0x128   : > { %v8427_v41 = vpop.eup %8426  ;;  %v7528_v42 = vadd.f32 -0.99, %v8425_v38  ;;  %v4849_v43 = vsub.f32 1.0, %v8425_v38  ;;  %8446 = vlog2.f32 %v245_v34 }
 0x129   : > { %v8429_v44 = vpop.eup %8428  ;;  %6895 = vst [vmem:[%s12522_s20 + $0x148] sm:$0xff] %v6383_v39  ;;  %v6384_v45 = vsub.f32 %v3867_v36, %v5403_v40  ;;  %v7529_v46 = vadd.f32 -0.99, %v8427_v41  ;;  %v4850_v47 = vsub.f32 1.0, %v8427_v41  ;;  %8448 = vlog2.f32 %v246_v37 }
 0x12a   : > { %v8431_v48 = vpop.eup %8430  ;;  %8450 = vlog2.f32 %v7528_v42  ;;  %v7530_v49 = vadd.f32 -0.99, %v8429_v44  ;;  %v4851_v51 = vsub.f32 1.0, %v8429_v44 }
 0x12b   : > { %v8433_v50 = vpop.eup %8432  ;;  %6896 = vst [vmem:[%s12522_s20 + $0x150] sm:$0xff] %v6384_v45  ;;  %8452 = vlog2.f32 %v4849_v43  ;;  %v7531_v53 = vadd.f32 -0.99, %v8431_v48  ;;  %v4852_v55 = vsub.f32 1.0, %v8431_v48  ;;  %v247_v43 = vld [vmem:[%s12465_s8 + $0x1c0] sm:$0xff] }
 0x12c   : > { %v8435_v52 = vpop.eup %8434  ;;  %8454 = vlog2.f32 %v7529_v46  ;;  %v7532_v57 = vadd.f32 -0.99, %v8433_v50  ;;  %v4853_v59 = vsub.f32 1.0, %v8433_v50  ;;  %v249_v50 = vld [vmem:[%s12465_s8 + $0x1d0] sm:$0xff] }
 0x12d   : > { %v8437_v54 = vpop.eup %8436  ;;  %8456 = vlog2.f32 %v4850_v47  ;;  %v7533_v61 = vadd.f32 -0.99, %v8435_v52  ;;  %v4854_v63 = vsub.f32 1.0, %v8435_v52  ;;  %v248_v47 = vld [vmem:[%s12465_s8 + $0x1c8] sm:$0xff] }
 0x12e   : > { %v8439_v56 = vpop.eup %8438  ;;  %8458 = vlog2.f32 %v7530_v49  ;;  %v7534_v2 = vadd.f32 -0.99, %v8437_v54  ;;  %v4855_v5 = vsub.f32 1.0, %v8437_v54  ;;  %v250_v54 = vld [vmem:[%s12465_s8 + $0x1d8] sm:$0xff] }
 0x12f   : > { %v8441_v58 = vpop.eup %8440  ;;  %8460 = vlog2.f32 %v4851_v51  ;;  %v7535_v10 = vadd.f32 -0.99, %v8439_v56  ;;  %v4856_v15 = vsub.f32 1.0, %v8439_v56 }
 0x130   : > { %v8443_v60 = vpop.eup %8442  ;;  %8462 = vlog2.f32 %v7531_v53  ;;  %v7536_v18 = vadd.f32 -0.99, %v8441_v58  ;;  %v4857_v22 = vsub.f32 1.0, %v8441_v58 }
 0x131   : > { %v8445_v62 = vpop.eup %8444  ;;  %8464 = vlog2.f32 %v4852_v55  ;;  %v809_v0 = vmul.f32 0.6931472, %v8443_v60 }
 0x132   : > { %v8447_v1 = vpop.eup %8446  ;;  %8466 = vlog2.f32 %v7532_v57  ;;  %v811_v3 = vmul.f32 0.6931472, %v8445_v62  ;;  %v251_v57 = vld [vmem:[%s12465_s8 + $0x1e0] sm:$0xff] }
 0x133   : > { %v8449_v4 = vpop.eup %8448  ;;  %8468 = vlog2.f32 %v4853_v59  ;;  %v813_v8 = vmul.f32 0.6931472, %v8447_v1  ;;  %v1786_v11 = vmul.f32 %v12594_v6, %v809_v0  ;;  %v253_v0 = vld [vmem:[%s12465_s8 + $0x1f0] sm:$0xff] }
 0x134   : > { %v8451_v9 = vpop.eup %8450  ;;  %8470 = vlog2.f32 %v7533_v61  ;;  %v815_v12 = vmul.f32 0.6931472, %v8449_v4  ;;  %v1787_v16 = vmul.f32 %v12594_v6, %v811_v3  ;;  %v252_v61 = vld [vmem:[%s12465_s8 + $0x1e8] sm:$0xff]  ;;  %v254_v4 = vld [vmem:[%s12465_s8 + $0x1f8] sm:$0xff] }
 0x135   : > { %v8453_v13 = vpop.eup %8452  ;;  %v3869_v14 = vmul.f32 0.6931472, %v8451_v9  ;;  %8472 = vlog2.f32 %v4854_v63  ;;  %v1788_v19 = vmul.f32 %v12594_v6, %v813_v8  ;;  %v2350_v27 = vmul.f32 1.442695, %v1786_v11  ;;  %v255_v9 = vld [vmem:[%s12465_s8 + $0x200] sm:$0xff] }
 0x136   : > { %v8455_v17 = vpop.eup %8454  ;;  %v5405_v7 = vmul.f32 0.6931472, %v8453_v13  ;;  %8474 = vlog2.f32 %v7534_v2  ;;  %v1789_v23 = vmul.f32 %v12594_v6, %v815_v12  ;;  %v2352_v30 = vmul.f32 1.442695, %v1787_v16 }
 0x137   : > { %v8457_v20 = vpop.eup %8456  ;;  %v3871_v21 = vmul.f32 0.6931472, %v8455_v17  ;;  %8476 = vlog2.f32 %v4855_v5  ;;  %v2354_v34 = vmul.f32 1.442695, %v1788_v19 }
 0x138   : > { %v8459_v24 = vpop.eup %8458  ;;  %v6385_v25 = vsub.f32 %v3869_v14, %v5405_v7  ;;  %v5407_v26 = vmul.f32 0.6931472, %v8457_v20  ;;  %8478 = vlog2.f32 %v7535_v10  ;;  %v2356_v37 = vmul.f32 1.442695, %v1789_v23 }
 0x139   : > { %v8461_v28 = vpop.eup %8460  ;;  %v3873_v29 = vmul.f32 0.6931472, %v8459_v24  ;;  %8480 = vlog2.f32 %v4856_v15 }
 0x13a   : > { %v8463_v31 = vpop.eup %8462  ;;  %6897 = vst [vmem:[%s12522_s20 + $0x158] sm:$0xff] %v6385_v25  ;;  %v6386_v32 = vsub.f32 %v3871_v21, %v5407_v26  ;;  %v5409_v33 = vmul.f32 0.6931472, %v8461_v28  ;;  %8482 = vlog2.f32 %v7536_v18 }
 0x13b   : > { %v8465_v35 = vpop.eup %8464  ;;  %v3875_v36 = vmul.f32 0.6931472, %v8463_v31  ;;  %8484 = vlog2.f32 %v4857_v22 }
 0x13c   : > { %v8467_v38 = vpop.eup %8466  ;;  %6898 = vst [vmem:[%s12522_s20 + $0x160] sm:$0xff] %v6386_v32  ;;  %v6387_v39 = vsub.f32 %v3873_v29, %v5409_v33  ;;  %v5411_v40 = vmul.f32 0.6931472, %v8465_v35  ;;  %8486 = vpow2.f32 %v2350_v27 }
 0x13d   : > { %v8469_v41 = vpop.eup %8468  ;;  %v3877_v42 = vmul.f32 0.6931472, %v8467_v38  ;;  %8488 = vpow2.f32 %v2352_v30 }
 0x13e   : > { %v8471_v44 = vpop.eup %8470  ;;  %6899 = vst [vmem:[%s12522_s20 + $0x168] sm:$0xff] %v6387_v39  ;;  %v6388_v45 = vsub.f32 %v3875_v36, %v5411_v40  ;;  %v5413_v46 = vmul.f32 0.6931472, %v8469_v41  ;;  %8490 = vpow2.f32 %v2354_v34 }
 0x13f   : > { %v8473_v48 = vpop.eup %8472  ;;  %v3879_v49 = vmul.f32 0.6931472, %v8471_v44  ;;  %8492 = vpow2.f32 %v2356_v37 }
 0x140   : > { %v8475_v51 = vpop.eup %8474  ;;  %6900 = vst [vmem:[%s12522_s20 + $0x170] sm:$0xff] %v6388_v45  ;;  %v6389_v52 = vsub.f32 %v3877_v42, %v5413_v46  ;;  %v5415_v53 = vmul.f32 0.6931472, %v8473_v48  ;;  %8494 = vlog2.f32 %v247_v43 }
 0x141   : > { %v8477_v55 = vpop.eup %8476  ;;  %v3881_v56 = vmul.f32 0.6931472, %v8475_v51  ;;  %8496 = vlog2.f32 %v248_v47 }
 0x142   : > { %v8479_v58 = vpop.eup %8478  ;;  %6901 = vst [vmem:[%s12522_s20 + $0x178] sm:$0xff] %v6389_v52  ;;  %v6390_v59 = vsub.f32 %v3879_v49, %v5415_v53  ;;  %v5417_v60 = vmul.f32 0.6931472, %v8477_v55  ;;  %8498 = vlog2.f32 %v249_v50 }
 0x143   : > { %v8481_v62 = vpop.eup %8480  ;;  %v3883_v63 = vmul.f32 0.6931472, %v8479_v58  ;;  %8500 = vlog2.f32 %v250_v54 }
 0x144   : > { %v8483_v1 = vpop.eup %8482  ;;  %6902 = vst [vmem:[%s12522_s20 + $0x180] sm:$0xff] %v6390_v59  ;;  %v6391_v2 = vsub.f32 %v3881_v56, %v5417_v60  ;;  %v5419_v3 = vmul.f32 0.6931472, %v8481_v62  ;;  %8502 = vlog2.f32 %v251_v57 }
 0x145   : > { %v8485_v5 = vpop.eup %8484  ;;  %v3885_v8 = vmul.f32 0.6931472, %v8483_v1  ;;  %8504 = vlog2.f32 %v252_v61 }
 0x146   : > { %v8487_v10 = vpop.eup %8486  ;;  %6903 = vst [vmem:[%s12522_s20 + $0x188] sm:$0xff] %v6391_v2  ;;  %v6392_v11 = vsub.f32 %v3883_v63, %v5419_v3  ;;  %v5421_v12 = vmul.f32 0.6931472, %v8485_v5  ;;  %8506 = vlog2.f32 %v253_v0 }
 0x147   : > { %v8489_v13 = vpop.eup %8488  ;;  %v7537_v14 = vadd.f32 -0.99, %v8487_v10  ;;  %v4858_v15 = vsub.f32 1.0, %v8487_v10  ;;  %8508 = vlog2.f32 %v254_v4 }
 0x148   : > { %v8491_v16 = vpop.eup %8490  ;;  %6904 = vst [vmem:[%s12522_s20 + $0x190] sm:$0xff] %v6392_v11  ;;  %v6393_v17 = vsub.f32 %v3885_v8, %v5421_v12  ;;  %v7538_v7 = vadd.f32 -0.99, %v8489_v13  ;;  %v4859_v18 = vsub.f32 1.0, %v8489_v13  ;;  %8510 = vlog2.f32 %v255_v9  ;;  %v256_v8 = vld [vmem:[%s12465_s8 + $0x208] sm:$0xff]  ;;  %v257_v11 = vld [vmem:[%s12465_s8 + $0x210] sm:$0xff] }
 0x149   : > { %v8493_v19 = vpop.eup %8492  ;;  %8512 = vlog2.f32 %v7537_v14  ;;  %v7539_v20 = vadd.f32 -0.99, %v8491_v16  ;;  %v4860_v22 = vsub.f32 1.0, %v8491_v16  ;;  %v258_v14 = vld [vmem:[%s12465_s8 + $0x218] sm:$0xff] }
 0x14a   : > { %v8495_v21 = vpop.eup %8494  ;;  %6905 = vst [vmem:[%s12522_s20 + $0x198] sm:$0xff] %v6393_v17  ;;  %8514 = vlog2.f32 %v4858_v15  ;;  %v7540_v24 = vadd.f32 -0.99, %v8493_v19  ;;  %v4861_v27 = vsub.f32 1.0, %v8493_v19  ;;  %v259_v17 = vld [vmem:[%s12465_s8 + $0x220] sm:$0xff] }
 0x14b   : > { %v8497_v23 = vpop.eup %8496  ;;  %8516 = vlog2.f32 %v7538_v7  ;;  %v817_v25 = vmul.f32 0.6931472, %v8495_v21 }
 0x14c   : > { %v8499_v26 = vpop.eup %8498  ;;  %8518 = vlog2.f32 %v4859_v18  ;;  %v819_v28 = vmul.f32 0.6931472, %v8497_v23 }
 0x14d   : > { %v8501_v29 = vpop.eup %8500  ;;  %8520 = vlog2.f32 %v7539_v20  ;;  %v1790_v30 = vmul.f32 %v12594_v6, %v817_v25  ;;  %v821_v31 = vmul.f32 0.6931472, %v8499_v26 }
 0x14e   : > { %v8503_v32 = vpop.eup %8502  ;;  %8522 = vlog2.f32 %v4860_v22  ;;  %v1791_v33 = vmul.f32 %v12594_v6, %v819_v28  ;;  %v823_v34 = vmul.f32 0.6931472, %v8501_v29 }
 0x14f   : > { %v8505_v35 = vpop.eup %8504  ;;  %8524 = vlog2.f32 %v7540_v24  ;;  %v2358_v36 = vmul.f32 1.442695, %v1790_v30  ;;  %v1792_v37 = vmul.f32 %v12594_v6, %v821_v31  ;;  %v825_v38 = vmul.f32 0.6931472, %v8503_v32 }
 0x150   : > { %v8507_v39 = vpop.eup %8506  ;;  %8526 = vlog2.f32 %v4861_v27  ;;  %v2360_v40 = vmul.f32 1.442695, %v1791_v33  ;;  %v1793_v41 = vmul.f32 %v12594_v6, %v823_v34  ;;  %v827_v42 = vmul.f32 0.6931472, %v8505_v35 }
 0x151   : > { %v8509_v43 = vpop.eup %8508  ;;  %8528 = vpow2.f32 %v2358_v36  ;;  %v2362_v44 = vmul.f32 1.442695, %v1792_v37  ;;  %v1794_v45 = vmul.f32 %v12594_v6, %v825_v38  ;;  %v829_v46 = vmul.f32 0.6931472, %v8507_v39 }
 0x152   : > { %v8511_v47 = vpop.eup %8510  ;;  %8530 = vpow2.f32 %v2360_v40  ;;  %v2364_v48 = vmul.f32 1.442695, %v1793_v41  ;;  %v1795_v49 = vmul.f32 %v12594_v6, %v827_v42  ;;  %v831_v50 = vmul.f32 0.6931472, %v8509_v43 }
 0x153   : > { %v8513_v51 = vpop.eup %8512  ;;  %8532 = vpow2.f32 %v2362_v44  ;;  %v2366_v52 = vmul.f32 1.442695, %v1794_v45  ;;  %v1796_v53 = vmul.f32 %v12594_v6, %v829_v46  ;;  %v833_v54 = vmul.f32 0.6931472, %v8511_v47 }
 0x154   : > { %v8515_v55 = vpop.eup %8514  ;;  %v3887_v56 = vmul.f32 0.6931472, %v8513_v51  ;;  %8534 = vpow2.f32 %v2364_v48  ;;  %v2368_v57 = vmul.f32 1.442695, %v1795_v49  ;;  %v1797_v58 = vmul.f32 %v12594_v6, %v831_v50 }
 0x155   : > { %v8517_v59 = vpop.eup %8516  ;;  %v5423_v60 = vmul.f32 0.6931472, %v8515_v55  ;;  %8536 = vpow2.f32 %v2366_v52  ;;  %v2370_v61 = vmul.f32 1.442695, %v1796_v53  ;;  %v1798_v62 = vmul.f32 %v12594_v6, %v833_v54  ;;  %v12691_v52 = vld [vmem:[#allocation5] ss:$0 sm:$0xff] }
 0x156   : > { %v8519_v63 = vpop.eup %8518  ;;  %v3889_v0 = vmul.f32 0.6931472, %v8517_v59  ;;  %8538 = vpow2.f32 %v2368_v57  ;;  %v2372_v1 = vmul.f32 1.442695, %v1797_v58 }
 0x157   : > { %v8521_v2 = vpop.eup %8520  ;;  %v6394_v3 = vsub.f32 %v3887_v56, %v5423_v60  ;;  %v5425_v4 = vmul.f32 0.6931472, %v8519_v63  ;;  %8540 = vpow2.f32 %v2370_v61  ;;  %v2374_v5 = vmul.f32 1.442695, %v1798_v62 }
 0x158   : > { %v8523_v9 = vpop.eup %8522  ;;  %v3891_v10 = vmul.f32 0.6931472, %v8521_v2  ;;  %8542 = vpow2.f32 %v2372_v1 }
 0x159   : > { %v8525_v12 = vpop.eup %8524  ;;  %6906 = vst [vmem:[%s12522_s20 + $0x1a0] sm:$0xff] %v6394_v3  ;;  %v6395_v6 = vsub.f32 %v3889_v0, %v5425_v4  ;;  %v5427_v13 = vmul.f32 0.6931472, %v8523_v9  ;;  %8544 = vpow2.f32 %v2374_v5 }
 0x15a   : > { %v8527_v15 = vpop.eup %8526  ;;  %v3893_v16 = vmul.f32 0.6931472, %v8525_v12  ;;  %8546 = vlog2.f32 %v256_v8 }
 0x15b   : > { %v8529_v7 = vpop.eup %8528  ;;  %6907 = vst [vmem:[%s12522_s20 + $0x1a8] sm:$0xff] %v6395_v6  ;;  %v6396_v18 = vsub.f32 %v3891_v10, %v5427_v13  ;;  %v5429_v19 = vmul.f32 0.6931472, %v8527_v15  ;;  %8548 = vlog2.f32 %v257_v11 }
 0x15c   : > { %v8531_v20 = vpop.eup %8530  ;;  %v7541_v21 = vadd.f32 -0.99, %v8529_v7  ;;  %v4862_v22 = vsub.f32 1.0, %v8529_v7  ;;  %8550 = vlog2.f32 %v258_v14 }
 0x15d   : > { %v8533_v23 = vpop.eup %8532  ;;  %6908 = vst [vmem:[%s12522_s20 + $0x1b0] sm:$0xff] %v6396_v18  ;;  %v6397_v24 = vsub.f32 %v3893_v16, %v5429_v19  ;;  %v7542_v25 = vadd.f32 -0.99, %v8531_v20  ;;  %v4863_v26 = vsub.f32 1.0, %v8531_v20  ;;  %8552 = vlog2.f32 %v259_v17 }
 0x15e   : > { %v8535_v27 = vpop.eup %8534  ;;  %8554 = vlog2.f32 %v7541_v21  ;;  %v7543_v28 = vadd.f32 -0.99, %v8533_v23  ;;  %v4864_v30 = vsub.f32 1.0, %v8533_v23 }
 0x15f   : > { %v8537_v29 = vpop.eup %8536  ;;  %6909 = vst [vmem:[%s12522_s20 + $0x1b8] sm:$0xff] %v6397_v24  ;;  %8556 = vlog2.f32 %v4862_v22  ;;  %v7544_v32 = vadd.f32 -0.99, %v8535_v27  ;;  %v4865_v34 = vsub.f32 1.0, %v8535_v27  ;;  %v260_v22 = vld [vmem:[%s12465_s8 + $0x228] sm:$0xff] }
 0x160   : > { %v8539_v31 = vpop.eup %8538  ;;  %8558 = vlog2.f32 %v7542_v25  ;;  %v7545_v36 = vadd.f32 -0.99, %v8537_v29  ;;  %v4866_v38 = vsub.f32 1.0, %v8537_v29  ;;  %v262_v29 = vld [vmem:[%s12465_s8 + $0x238] sm:$0xff] }
 0x161   : > { %v8541_v33 = vpop.eup %8540  ;;  %8560 = vlog2.f32 %v4863_v26  ;;  %v7546_v40 = vadd.f32 -0.99, %v8539_v31  ;;  %v4867_v42 = vsub.f32 1.0, %v8539_v31  ;;  %v261_v26 = vld [vmem:[%s12465_s8 + $0x230] sm:$0xff] }
 0x162   : > { %v8543_v35 = vpop.eup %8542  ;;  %8562 = vlog2.f32 %v7543_v28  ;;  %v7547_v45 = vadd.f32 -0.99, %v8541_v33  ;;  %v4868_v48 = vsub.f32 1.0, %v8541_v33  ;;  %v263_v33 = vld [vmem:[%s12465_s8 + $0x240] sm:$0xff] }
 0x163   : > { %v8545_v37 = vpop.eup %8544  ;;  %8564 = vlog2.f32 %v4864_v30  ;;  %v7548_v51 = vadd.f32 -0.99, %v8543_v35  ;;  %v4869_v57 = vsub.f32 1.0, %v8543_v35 }
 0x164   : > { %v8547_v39 = vpop.eup %8546  ;;  %8566 = vlog2.f32 %v7544_v32  ;;  %v7549_v61 = vadd.f32 -0.99, %v8545_v37  ;;  %v4870_v1 = vsub.f32 1.0, %v8545_v37 }
 0x165   : > { %v8549_v41 = vpop.eup %8548  ;;  %8568 = vlog2.f32 %v4865_v34  ;;  %v835_v43 = vmul.f32 0.6931472, %v8547_v39 }
 0x166   : > { %v8551_v44 = vpop.eup %8550  ;;  %8570 = vlog2.f32 %v7545_v36  ;;  %v837_v46 = vmul.f32 0.6931472, %v8549_v41  ;;  %v264_v36 = vld [vmem:[%s12465_s8 + $0x248] sm:$0xff] }
 0x167   : > { %v8553_v47 = vpop.eup %8552  ;;  %8572 = vlog2.f32 %v4866_v38  ;;  %v839_v49 = vmul.f32 0.6931472, %v8551_v44  ;;  %v1799_v53 = vmul.f32 %v12691_v52, %v835_v43  ;;  %v266_v43 = vld [vmem:[%s12465_s8 + $0x258] sm:$0xff] }
 0x168   : > { %v8555_v50 = vpop.eup %8554  ;;  %8574 = vlog2.f32 %v7546_v40  ;;  %v841_v54 = vmul.f32 0.6931472, %v8553_v47  ;;  %v1800_v58 = vmul.f32 %v12691_v52, %v837_v46  ;;  %v265_v40 = vld [vmem:[%s12465_s8 + $0x250] sm:$0xff]  ;;  %v267_v47 = vld [vmem:[%s12465_s8 + $0x260] sm:$0xff] }
 0x169   : > { %v8557_v55 = vpop.eup %8556  ;;  %v3895_v56 = vmul.f32 0.6931472, %v8555_v50  ;;  %8576 = vlog2.f32 %v4867_v42  ;;  %v1801_v62 = vmul.f32 %v12691_v52, %v839_v49  ;;  %v2376_v8 = vmul.f32 1.442695, %v1799_v53  ;;  %v268_v50 = vld [vmem:[%s12465_s8 + $0x268] sm:$0xff] }
 0x16a   : > { %v8559_v59 = vpop.eup %8558  ;;  %v5431_v60 = vmul.f32 0.6931472, %v8557_v55  ;;  %8578 = vlog2.f32 %v7547_v45  ;;  %v1802_v2 = vmul.f32 %v12691_v52, %v841_v54  ;;  %v2378_v11 = vmul.f32 1.442695, %v1800_v58 }
 0x16b   : > { %v8561_v63 = vpop.eup %8560  ;;  %v3897_v0 = vmul.f32 0.6931472, %v8559_v59  ;;  %8580 = vlog2.f32 %v4868_v48  ;;  %v2380_v14 = vmul.f32 1.442695, %v1801_v62 }
 0x16c   : > { %v8563_v3 = vpop.eup %8562  ;;  %v6398_v4 = vsub.f32 %v3895_v56, %v5431_v60  ;;  %v5433_v5 = vmul.f32 0.6931472, %v8561_v63  ;;  %8582 = vlog2.f32 %v7548_v51  ;;  %v2382_v17 = vmul.f32 1.442695, %v1802_v2 }
 0x16d   : > { %v8565_v9 = vpop.eup %8564  ;;  %v3899_v10 = vmul.f32 0.6931472, %v8563_v3  ;;  %8584 = vlog2.f32 %v4869_v57 }
 0x16e   : > { %v8567_v12 = vpop.eup %8566  ;;  %6910 = vst [vmem:[%s12522_s20 + $0x1c0] sm:$0xff] %v6398_v4  ;;  %v6399_v6 = vsub.f32 %v3897_v0, %v5433_v5  ;;  %v5435_v13 = vmul.f32 0.6931472, %v8565_v9  ;;  %8586 = vlog2.f32 %v7549_v61 }
 0x16f   : > { %v8569_v15 = vpop.eup %8568  ;;  %v3901_v16 = vmul.f32 0.6931472, %v8567_v12  ;;  %8588 = vlog2.f32 %v4870_v1 }
 0x170   : > { %v8571_v7 = vpop.eup %8570  ;;  %6911 = vst [vmem:[%s12522_s20 + $0x1c8] sm:$0xff] %v6399_v6  ;;  %v6400_v18 = vsub.f32 %v3899_v10, %v5435_v13  ;;  %v5437_v19 = vmul.f32 0.6931472, %v8569_v15  ;;  %8590 = vpow2.f32 %v2376_v8 }
 0x171   : > { %v8573_v20 = vpop.eup %8572  ;;  %v3903_v21 = vmul.f32 0.6931472, %v8571_v7  ;;  %8592 = vpow2.f32 %v2378_v11 }
 0x172   : > { %v8575_v23 = vpop.eup %8574  ;;  %6912 = vst [vmem:[%s12522_s20 + $0x1d0] sm:$0xff] %v6400_v18  ;;  %v6401_v24 = vsub.f32 %v3901_v16, %v5437_v19  ;;  %v5439_v25 = vmul.f32 0.6931472, %v8573_v20  ;;  %8594 = vpow2.f32 %v2380_v14 }
 0x173   : > { %v8577_v27 = vpop.eup %8576  ;;  %v3905_v28 = vmul.f32 0.6931472, %v8575_v23  ;;  %8596 = vpow2.f32 %v2382_v17 }
 0x174   : > { %v8579_v30 = vpop.eup %8578  ;;  %6913 = vst [vmem:[%s12522_s20 + $0x1d8] sm:$0xff] %v6401_v24  ;;  %v6402_v31 = vsub.f32 %v3903_v21, %v5439_v25  ;;  %v5441_v32 = vmul.f32 0.6931472, %v8577_v27  ;;  %8598 = vlog2.f32 %v260_v22 }
 0x175   : > { %v8581_v34 = vpop.eup %8580  ;;  %v3907_v35 = vmul.f32 0.6931472, %v8579_v30  ;;  %8600 = vlog2.f32 %v261_v26 }
 0x176   : > { %v8583_v37 = vpop.eup %8582  ;;  %6914 = vst [vmem:[%s12522_s20 + $0x1e0] sm:$0xff] %v6402_v31  ;;  %v6403_v38 = vsub.f32 %v3905_v28, %v5441_v32  ;;  %v5443_v39 = vmul.f32 0.6931472, %v8581_v34  ;;  %8602 = vlog2.f32 %v262_v29 }
 0x177   : > { %v8585_v41 = vpop.eup %8584  ;;  %v3909_v42 = vmul.f32 0.6931472, %v8583_v37  ;;  %8604 = vlog2.f32 %v263_v33 }
 0x178   : > { %v8587_v44 = vpop.eup %8586  ;;  %6915 = vst [vmem:[%s12522_s20 + $0x1e8] sm:$0xff] %v6403_v38  ;;  %v6404_v45 = vsub.f32 %v3907_v35, %v5443_v39  ;;  %v5445_v46 = vmul.f32 0.6931472, %v8585_v41  ;;  %8606 = vlog2.f32 %v264_v36 }
 0x179   : > { %v8589_v48 = vpop.eup %8588  ;;  %v3911_v49 = vmul.f32 0.6931472, %v8587_v44  ;;  %8608 = vlog2.f32 %v265_v40 }
 0x17a   : > { %v8591_v51 = vpop.eup %8590  ;;  %6916 = vst [vmem:[%s12522_s20 + $0x1f0] sm:$0xff] %v6404_v45  ;;  %v6405_v53 = vsub.f32 %v3909_v42, %v5445_v46  ;;  %v5447_v54 = vmul.f32 0.6931472, %v8589_v48  ;;  %8610 = vlog2.f32 %v266_v43 }
 0x17b   : > { %v8593_v55 = vpop.eup %8592  ;;  %v7550_v56 = vadd.f32 -0.99, %v8591_v51  ;;  %v4871_v57 = vsub.f32 1.0, %v8591_v51  ;;  %8612 = vlog2.f32 %v267_v47 }
 0x17c   : > { %v8595_v58 = vpop.eup %8594  ;;  %6917 = vst [vmem:[%s12522_s20 + $0x1f8] sm:$0xff] %v6405_v53  ;;  %v6406_v59 = vsub.f32 %v3911_v49, %v5447_v54  ;;  %v7551_v60 = vadd.f32 -0.99, %v8593_v55  ;;  %v4872_v61 = vsub.f32 1.0, %v8593_v55  ;;  %8614 = vlog2.f32 %v268_v50  ;;  %v269_v49 = vld [vmem:[%s12465_s8 + $0x270] sm:$0xff]  ;;  %v270_v53 = vld [vmem:[%s12465_s8 + $0x278] sm:$0xff] }
 0x17d   : > { %v8597_v62 = vpop.eup %8596  ;;  %8616 = vlog2.f32 %v7550_v56  ;;  %v7552_v63 = vadd.f32 -0.99, %v8595_v58  ;;  %v4873_v1 = vsub.f32 1.0, %v8595_v58 }
 0x17e   : > { %v8599_v0 = vpop.eup %8598  ;;  %6918 = vst [vmem:[%s12522_s20 + $0x200] sm:$0xff] %v6406_v59  ;;  %8618 = vlog2.f32 %v4871_v57  ;;  %v7553_v3 = vadd.f32 -0.99, %v8597_v62  ;;  %v4874_v8 = vsub.f32 1.0, %v8597_v62  ;;  %v271_v57 = vld [vmem:[%s12465_s8 + $0x280] sm:$0xff] }
 0x17f   : > { %v8601_v2 = vpop.eup %8600  ;;  %8620 = vlog2.f32 %v7551_v60  ;;  %v843_v4 = vmul.f32 0.6931472, %v8599_v0  ;;  %v272_v60 = vld [vmem:[%s12465_s8 + $0x288] sm:$0xff] }
 0x180   : > { %v8603_v5 = vpop.eup %8602  ;;  %8622 = vlog2.f32 %v4872_v61  ;;  %v845_v9 = vmul.f32 0.6931472, %v8601_v2 }
 0x181   : > { %v8605_v10 = vpop.eup %8604  ;;  %8624 = vlog2.f32 %v7552_v63  ;;  %v1803_v11 = vmul.f32 %v12691_v52, %v843_v4  ;;  %v847_v12 = vmul.f32 0.6931472, %v8603_v5 }
 0x182   : > { %v8607_v6 = vpop.eup %8606  ;;  %8626 = vlog2.f32 %v4873_v1  ;;  %v1804_v13 = vmul.f32 %v12691_v52, %v845_v9  ;;  %v849_v14 = vmul.f32 0.6931472, %v8605_v10 }
 0x183   : > { %v8609_v15 = vpop.eup %8608  ;;  %8628 = vlog2.f32 %v7553_v3  ;;  %v2384_v16 = vmul.f32 1.442695, %v1803_v11  ;;  %v1805_v17 = vmul.f32 %v12691_v52, %v847_v12  ;;  %v851_v7 = vmul.f32 0.6931472, %v8607_v6 }
 0x184   : > { %v8611_v18 = vpop.eup %8610  ;;  %8630 = vlog2.f32 %v4874_v8  ;;  %v2386_v19 = vmul.f32 1.442695, %v1804_v13  ;;  %v1806_v20 = vmul.f32 %v12691_v52, %v849_v14  ;;  %v853_v21 = vmul.f32 0.6931472, %v8609_v15 }
 0x185   : > { %v8613_v22 = vpop.eup %8612  ;;  %8632 = vpow2.f32 %v2384_v16  ;;  %v2388_v23 = vmul.f32 1.442695, %v1805_v17  ;;  %v1807_v24 = vmul.f32 %v12691_v52, %v851_v7  ;;  %v855_v25 = vmul.f32 0.6931472, %v8611_v18 }
 0x186   : > { %v8615_v26 = vpop.eup %8614  ;;  %8634 = vpow2.f32 %v2386_v19  ;;  %v2390_v27 = vmul.f32 1.442695, %v1806_v20  ;;  %v1808_v28 = vmul.f32 %v12691_v52, %v853_v21  ;;  %v857_v29 = vmul.f32 0.6931472, %v8613_v22 }
 0x187   : > { %v8617_v30 = vpop.eup %8616  ;;  %8636 = vpow2.f32 %v2388_v23  ;;  %v2392_v31 = vmul.f32 1.442695, %v1807_v24  ;;  %v1809_v32 = vmul.f32 %v12691_v52, %v855_v25  ;;  %v859_v33 = vmul.f32 0.6931472, %v8615_v26 }
 0x188   : > { %v8619_v34 = vpop.eup %8618  ;;  %v3913_v35 = vmul.f32 0.6931472, %v8617_v30  ;;  %8638 = vpow2.f32 %v2390_v27  ;;  %v2394_v36 = vmul.f32 1.442695, %v1808_v28  ;;  %v1810_v37 = vmul.f32 %v12691_v52, %v857_v29 }
 0x189   : > { %v8621_v38 = vpop.eup %8620  ;;  %v5449_v39 = vmul.f32 0.6931472, %v8619_v34  ;;  %8640 = vpow2.f32 %v2392_v31  ;;  %v2396_v40 = vmul.f32 1.442695, %v1809_v32  ;;  %v1811_v41 = vmul.f32 %v12691_v52, %v859_v33 }
 0x18a   : > { %v8623_v42 = vpop.eup %8622  ;;  %v3915_v43 = vmul.f32 0.6931472, %v8621_v38  ;;  %8642 = vpow2.f32 %v2394_v36  ;;  %v2398_v44 = vmul.f32 1.442695, %v1810_v37 }
 0x18b   : > { %v8625_v45 = vpop.eup %8624  ;;  %v6407_v46 = vsub.f32 %v3913_v35, %v5449_v39  ;;  %v5451_v47 = vmul.f32 0.6931472, %v8623_v42  ;;  %8644 = vpow2.f32 %v2396_v40  ;;  %v2400_v48 = vmul.f32 1.442695, %v1811_v41 }
 0x18c   : > { %v8627_v50 = vpop.eup %8626  ;;  %v3917_v51 = vmul.f32 0.6931472, %v8625_v45  ;;  %8646 = vpow2.f32 %v2398_v44 }
 0x18d   : > { %v8629_v54 = vpop.eup %8628  ;;  %6919 = vst [vmem:[%s12522_s20 + $0x208] sm:$0xff] %v6407_v46  ;;  %v6408_v55 = vsub.f32 %v3915_v43, %v5451_v47  ;;  %v5453_v56 = vmul.f32 0.6931472, %v8627_v50  ;;  %8648 = vpow2.f32 %v2400_v48 }
 0x18e   : > { %v8631_v58 = vpop.eup %8630  ;;  %v3919_v59 = vmul.f32 0.6931472, %v8629_v54  ;;  %8650 = vlog2.f32 %v269_v49 }
 0x18f   : > { %v8633_v61 = vpop.eup %8632  ;;  %6920 = vst [vmem:[%s12522_s20 + $0x210] sm:$0xff] %v6408_v55  ;;  %v6409_v62 = vsub.f32 %v3917_v51, %v5453_v56  ;;  %v5455_v63 = vmul.f32 0.6931472, %v8631_v58  ;;  %8652 = vlog2.f32 %v270_v53 }
 0x190   : > { %v8635_v0 = vpop.eup %8634  ;;  %v7554_v1 = vadd.f32 -0.99, %v8633_v61  ;;  %v4875_v2 = vsub.f32 1.0, %v8633_v61  ;;  %8654 = vlog2.f32 %v271_v57 }
 0x191   : > { %v8637_v3 = vpop.eup %8636  ;;  %6921 = vst [vmem:[%s12522_s20 + $0x218] sm:$0xff] %v6409_v62  ;;  %v6410_v4 = vsub.f32 %v3919_v59, %v5455_v63  ;;  %v7555_v5 = vadd.f32 -0.99, %v8635_v0  ;;  %v4876_v8 = vsub.f32 1.0, %v8635_v0  ;;  %8656 = vlog2.f32 %v272_v60 }
 0x192   : > { %v8639_v9 = vpop.eup %8638  ;;  %8658 = vlog2.f32 %v7554_v1  ;;  %v7556_v10 = vadd.f32 -0.99, %v8637_v3  ;;  %v4877_v12 = vsub.f32 1.0, %v8637_v3 }
 0x193   : > { %v8641_v11 = vpop.eup %8640  ;;  %6922 = vst [vmem:[%s12522_s20 + $0x220] sm:$0xff] %v6410_v4  ;;  %8660 = vlog2.f32 %v4875_v2  ;;  %v7557_v13 = vadd.f32 -0.99, %v8639_v9  ;;  %v4878_v15 = vsub.f32 1.0, %v8639_v9  ;;  %v273_v2 = vld [vmem:[%s12465_s8 + $0x290] sm:$0xff] }
 0x194   : > { %v8643_v6 = vpop.eup %8642  ;;  %8662 = vlog2.f32 %v7555_v5  ;;  %v7558_v17 = vadd.f32 -0.99, %v8641_v11  ;;  %v4879_v18 = vsub.f32 1.0, %v8641_v11  ;;  %v275_v11 = vld [vmem:[%s12465_s8 + $0x2a0] sm:$0xff] }
 0x195   : > { %v8645_v14 = vpop.eup %8644  ;;  %8664 = vlog2.f32 %v4876_v8  ;;  %v7559_v20 = vadd.f32 -0.99, %v8643_v6  ;;  %v4880_v22 = vsub.f32 1.0, %v8643_v6  ;;  %v274_v8 = vld [vmem:[%s12465_s8 + $0x298] sm:$0xff] }
 0x196   : > { %v8647_v16 = vpop.eup %8646  ;;  %8666 = vlog2.f32 %v7556_v10  ;;  %v7560_v25 = vadd.f32 -0.99, %v8645_v14  ;;  %v4881_v28 = vsub.f32 1.0, %v8645_v14  ;;  %v276_v14 = vld [vmem:[%s12465_s8 + $0x2a8] sm:$0xff] }
 0x197   : > { %v8649_v7 = vpop.eup %8648  ;;  %8668 = vlog2.f32 %v4877_v12  ;;  %v7561_v31 = vadd.f32 -0.99, %v8647_v16  ;;  %v4882_v36 = vsub.f32 1.0, %v8647_v16 }
 0x198   : > { %v8651_v19 = vpop.eup %8650  ;;  %8670 = vlog2.f32 %v7557_v13  ;;  %v7562_v40 = vadd.f32 -0.99, %v8649_v7  ;;  %v4883_v44 = vsub.f32 1.0, %v8649_v7 }
 0x199   : > { %v8653_v21 = vpop.eup %8652  ;;  %8672 = vlog2.f32 %v4878_v15  ;;  %v861_v23 = vmul.f32 0.6931472, %v8651_v19 }
 0x19a   : > { %v8655_v24 = vpop.eup %8654  ;;  %8674 = vlog2.f32 %v7558_v17  ;;  %v863_v26 = vmul.f32 0.6931472, %v8653_v21  ;;  %v277_v17 = vld [vmem:[%s12465_s8 + $0x2b0] sm:$0xff] }
 0x19b   : > { %v8657_v27 = vpop.eup %8656  ;;  %8676 = vlog2.f32 %v4879_v18  ;;  %v865_v29 = vmul.f32 0.6931472, %v8655_v24  ;;  %v1812_v32 = vmul.f32 %v12691_v52, %v861_v23  ;;  %v279_v23 = vld [vmem:[%s12465_s8 + $0x2c0] sm:$0xff] }
 0x19c   : > { %v8659_v30 = vpop.eup %8658  ;;  %8678 = vlog2.f32 %v7559_v20  ;;  %v867_v33 = vmul.f32 0.6931472, %v8657_v27  ;;  %v1813_v37 = vmul.f32 %v12691_v52, %v863_v26  ;;  %v278_v20 = vld [vmem:[%s12465_s8 + $0x2b8] sm:$0xff]  ;;  %v280_v27 = vld [vmem:[%s12465_s8 + $0x2c8] sm:$0xff] }
 0x19d   : > { %v8661_v34 = vpop.eup %8660  ;;  %v3921_v35 = vmul.f32 0.6931472, %v8659_v30  ;;  %8680 = vlog2.f32 %v4880_v22  ;;  %v1814_v41 = vmul.f32 %v12691_v52, %v865_v29  ;;  %v2402_v49 = vmul.f32 1.442695, %v1812_v32  ;;  %v281_v30 = vld [vmem:[%s12465_s8 + $0x2d0] sm:$0xff] }
 0x19e   : > { %v8663_v38 = vpop.eup %8662  ;;  %v5457_v39 = vmul.f32 0.6931472, %v8661_v34  ;;  %8682 = vlog2.f32 %v7560_v25  ;;  %v1815_v45 = vmul.f32 %v12691_v52, %v867_v33  ;;  %v2404_v53 = vmul.f32 1.442695, %v1813_v37 }
 0x19f   : > { %v8665_v42 = vpop.eup %8664  ;;  %v3923_v43 = vmul.f32 0.6931472, %v8663_v38  ;;  %8684 = vlog2.f32 %v4881_v28  ;;  %v2406_v57 = vmul.f32 1.442695, %v1814_v41 }
 0x1a0   : > { %v8667_v46 = vpop.eup %8666  ;;  %v6411_v47 = vsub.f32 %v3921_v35, %v5457_v39  ;;  %v5459_v48 = vmul.f32 0.6931472, %v8665_v42  ;;  %8686 = vlog2.f32 %v7561_v31  ;;  %v2408_v60 = vmul.f32 1.442695, %v1815_v45 }
 0x1a1   : > { %v8669_v50 = vpop.eup %8668  ;;  %v3925_v51 = vmul.f32 0.6931472, %v8667_v46  ;;  %8688 = vlog2.f32 %v4882_v36 }
 0x1a2   : > { %v8671_v54 = vpop.eup %8670  ;;  %6923 = vst [vmem:[%s12522_s20 + $0x228] sm:$0xff] %v6411_v47  ;;  %v6412_v55 = vsub.f32 %v3923_v43, %v5459_v48  ;;  %v5461_v56 = vmul.f32 0.6931472, %v8669_v50  ;;  %8690 = vlog2.f32 %v7562_v40 }
 0x1a3   : > { %v8673_v58 = vpop.eup %8672  ;;  %v3927_v59 = vmul.f32 0.6931472, %v8671_v54  ;;  %8692 = vlog2.f32 %v4883_v44 }
 0x1a4   : > { %v8675_v61 = vpop.eup %8674  ;;  %6924 = vst [vmem:[%s12522_s20 + $0x230] sm:$0xff] %v6412_v55  ;;  %v6413_v62 = vsub.f32 %v3925_v51, %v5461_v56  ;;  %v5463_v63 = vmul.f32 0.6931472, %v8673_v58  ;;  %8694 = vpow2.f32 %v2402_v49 }
 0x1a5   : > { %v8677_v0 = vpop.eup %8676  ;;  %v3929_v1 = vmul.f32 0.6931472, %v8675_v61  ;;  %8696 = vpow2.f32 %v2404_v53 }
 0x1a6   : > { %v8679_v3 = vpop.eup %8678  ;;  %6925 = vst [vmem:[%s12522_s20 + $0x238] sm:$0xff] %v6413_v62  ;;  %v6414_v4 = vsub.f32 %v3927_v59, %v5463_v63  ;;  %v5465_v5 = vmul.f32 0.6931472, %v8677_v0  ;;  %8698 = vpow2.f32 %v2406_v57 }
 0x1a7   : > { %v8681_v9 = vpop.eup %8680  ;;  %v3931_v10 = vmul.f32 0.6931472, %v8679_v3  ;;  %8700 = vpow2.f32 %v2408_v60 }
 0x1a8   : > { %v8683_v12 = vpop.eup %8682  ;;  %6926 = vst [vmem:[%s12522_s20 + $0x240] sm:$0xff] %v6414_v4  ;;  %v6415_v6 = vsub.f32 %v3929_v1, %v5465_v5  ;;  %v5467_v13 = vmul.f32 0.6931472, %v8681_v9  ;;  %8702 = vlog2.f32 %v273_v2 }
 0x1a9   : > { %v8685_v15 = vpop.eup %8684  ;;  %v3933_v16 = vmul.f32 0.6931472, %v8683_v12  ;;  %8704 = vlog2.f32 %v274_v8 }
 0x1aa   : > { %v8687_v7 = vpop.eup %8686  ;;  %6927 = vst [vmem:[%s12522_s20 + $0x248] sm:$0xff] %v6415_v6  ;;  %v6416_v18 = vsub.f32 %v3931_v10, %v5467_v13  ;;  %v5469_v19 = vmul.f32 0.6931472, %v8685_v15  ;;  %8706 = vlog2.f32 %v275_v11 }
 0x1ab   : > { %v8689_v21 = vpop.eup %8688  ;;  %v3935_v22 = vmul.f32 0.6931472, %v8687_v7  ;;  %8708 = vlog2.f32 %v276_v14 }
 0x1ac   : > { %v8691_v24 = vpop.eup %8690  ;;  %6928 = vst [vmem:[%s12522_s20 + $0x250] sm:$0xff] %v6416_v18  ;;  %v6417_v25 = vsub.f32 %v3933_v16, %v5469_v19  ;;  %v5471_v26 = vmul.f32 0.6931472, %v8689_v21  ;;  %8710 = vlog2.f32 %v277_v17 }
 0x1ad   : > { %v8693_v28 = vpop.eup %8692  ;;  %v3937_v29 = vmul.f32 0.6931472, %v8691_v24  ;;  %8712 = vlog2.f32 %v278_v20 }
 0x1ae   : > { %v8695_v31 = vpop.eup %8694  ;;  %6929 = vst [vmem:[%s12522_s20 + $0x258] sm:$0xff] %v6417_v25  ;;  %v6418_v32 = vsub.f32 %v3935_v22, %v5471_v26  ;;  %v5473_v33 = vmul.f32 0.6931472, %v8693_v28  ;;  %8714 = vlog2.f32 %v279_v23 }
 0x1af   : > { %v8697_v34 = vpop.eup %8696  ;;  %v7563_v35 = vadd.f32 -0.99, %v8695_v31  ;;  %v4884_v36 = vsub.f32 1.0, %v8695_v31  ;;  %8716 = vlog2.f32 %v280_v27 }
 0x1b0   : > { %v8699_v37 = vpop.eup %8698  ;;  %6930 = vst [vmem:[%s12522_s20 + $0x260] sm:$0xff] %v6418_v32  ;;  %v6419_v38 = vsub.f32 %v3937_v29, %v5473_v33  ;;  %v7564_v39 = vadd.f32 -0.99, %v8697_v34  ;;  %v4885_v40 = vsub.f32 1.0, %v8697_v34  ;;  %8718 = vlog2.f32 %v281_v30  ;;  %v282_v29 = vld [vmem:[%s12465_s8 + $0x2d8] sm:$0xff]  ;;  %v283_v32 = vld [vmem:[%s12465_s8 + $0x2e0] sm:$0xff] }
 0x1b1   : > { %v8701_v41 = vpop.eup %8700  ;;  %8720 = vlog2.f32 %v7563_v35  ;;  %v7565_v42 = vadd.f32 -0.99, %v8699_v37  ;;  %v4886_v44 = vsub.f32 1.0, %v8699_v37 }
 0x1b2   : > { %v8703_v43 = vpop.eup %8702  ;;  %6931 = vst [vmem:[%s12522_s20 + $0x268] sm:$0xff] %v6419_v38  ;;  %8722 = vlog2.f32 %v4884_v36  ;;  %v7566_v46 = vadd.f32 -0.99, %v8701_v41  ;;  %v4887_v49 = vsub.f32 1.0, %v8701_v41  ;;  %v284_v36 = vld [vmem:[%s12465_s8 + $0x2e8] sm:$0xff] }
 0x1b3   : > { %v8705_v45 = vpop.eup %8704  ;;  %8724 = vlog2.f32 %v7564_v39  ;;  %v869_v47 = vmul.f32 0.6931472, %v8703_v43  ;;  %v285_v39 = vld [vmem:[%s12465_s8 + $0x2f0] sm:$0xff] }
 0x1b4   : > { %v8707_v48 = vpop.eup %8706  ;;  %8726 = vlog2.f32 %v4885_v40  ;;  %v871_v50 = vmul.f32 0.6931472, %v8705_v45 }
 0x1b5   : > { %v8709_v51 = vpop.eup %8708  ;;  %8728 = vlog2.f32 %v7565_v42  ;;  %v1816_v53 = vmul.f32 %v12691_v52, %v869_v47  ;;  %v873_v54 = vmul.f32 0.6931472, %v8707_v48 }
 0x1b6   : > { %v8711_v55 = vpop.eup %8710  ;;  %8730 = vlog2.f32 %v4886_v44  ;;  %v1817_v56 = vmul.f32 %v12691_v52, %v871_v50  ;;  %v875_v57 = vmul.f32 0.6931472, %v8709_v51 }
 0x1b7   : > { %v8713_v58 = vpop.eup %8712  ;;  %8732 = vlog2.f32 %v7566_v46  ;;  %v2410_v59 = vmul.f32 1.442695, %v1816_v53  ;;  %v1818_v60 = vmul.f32 %v12691_v52, %v873_v54  ;;  %v877_v61 = vmul.f32 0.6931472, %v8711_v55 }
 0x1b8   : > { %v8715_v62 = vpop.eup %8714  ;;  %8734 = vlog2.f32 %v4887_v49  ;;  %v2412_v63 = vmul.f32 1.442695, %v1817_v56  ;;  %v1819_v0 = vmul.f32 %v12691_v52, %v875_v57  ;;  %v879_v1 = vmul.f32 0.6931472, %v8713_v58 }
 0x1b9   : > { %v8717_v2 = vpop.eup %8716  ;;  %8736 = vpow2.f32 %v2410_v59  ;;  %v2414_v3 = vmul.f32 1.442695, %v1818_v60  ;;  %v1820_v4 = vmul.f32 %v12691_v52, %v877_v61  ;;  %v881_v5 = vmul.f32 0.6931472, %v8715_v62 }
 0x1ba   : > { %v8719_v8 = vpop.eup %8718  ;;  %8738 = vpow2.f32 %v2412_v63  ;;  %v2416_v9 = vmul.f32 1.442695, %v1819_v0  ;;  %v1821_v10 = vmul.f32 %v12691_v52, %v879_v1  ;;  %v883_v11 = vmul.f32 0.6931472, %v8717_v2 }
 0x1bb   : > { %v8721_v12 = vpop.eup %8720  ;;  %8740 = vpow2.f32 %v2414_v3  ;;  %v2418_v6 = vmul.f32 1.442695, %v1820_v4  ;;  %v1822_v13 = vmul.f32 %v12691_v52, %v881_v5  ;;  %v885_v14 = vmul.f32 0.6931472, %v8719_v8 }
 0x1bc   : > { %v8723_v15 = vpop.eup %8722  ;;  %v3939_v16 = vmul.f32 0.6931472, %v8721_v12  ;;  %8742 = vpow2.f32 %v2416_v9  ;;  %v2420_v17 = vmul.f32 1.442695, %v1821_v10  ;;  %v1823_v7 = vmul.f32 %v12691_v52, %v883_v11 }
 0x1bd   : > { %v8725_v18 = vpop.eup %8724  ;;  %v5475_v19 = vmul.f32 0.6931472, %v8723_v15  ;;  %8744 = vpow2.f32 %v2418_v6  ;;  %v2422_v20 = vmul.f32 1.442695, %v1822_v13  ;;  %v1824_v21 = vmul.f32 %v12691_v52, %v885_v14 }
 0x1be   : > { %v8727_v22 = vpop.eup %8726  ;;  %v3941_v23 = vmul.f32 0.6931472, %v8725_v18  ;;  %8746 = vpow2.f32 %v2420_v17  ;;  %v2424_v24 = vmul.f32 1.442695, %v1823_v7 }
 0x1bf   : > { %v8729_v25 = vpop.eup %8728  ;;  %v6420_v26 = vsub.f32 %v3939_v16, %v5475_v19  ;;  %v5477_v27 = vmul.f32 0.6931472, %v8727_v22  ;;  %8748 = vpow2.f32 %v2422_v20  ;;  %v2426_v28 = vmul.f32 1.442695, %v1824_v21 }
 0x1c0   : > { %v8731_v30 = vpop.eup %8730  ;;  %v3943_v31 = vmul.f32 0.6931472, %v8729_v25  ;;  %8750 = vpow2.f32 %v2424_v24 }
 0x1c1   : > { %v8733_v33 = vpop.eup %8732  ;;  %6932 = vst [vmem:[%s12522_s20 + $0x270] sm:$0xff] %v6420_v26  ;;  %v6421_v34 = vsub.f32 %v3941_v23, %v5477_v27  ;;  %v5479_v35 = vmul.f32 0.6931472, %v8731_v30  ;;  %8752 = vpow2.f32 %v2426_v28 }
 0x1c2   : > { %v8735_v37 = vpop.eup %8734  ;;  %v3945_v38 = vmul.f32 0.6931472, %v8733_v33  ;;  %8754 = vlog2.f32 %v282_v29 }
 0x1c3   : > { %v8737_v40 = vpop.eup %8736  ;;  %6933 = vst [vmem:[%s12522_s20 + $0x278] sm:$0xff] %v6421_v34  ;;  %v6422_v41 = vsub.f32 %v3943_v31, %v5479_v35  ;;  %v5481_v42 = vmul.f32 0.6931472, %v8735_v37  ;;  %8756 = vlog2.f32 %v283_v32 }
 0x1c4   : > { %v8739_v43 = vpop.eup %8738  ;;  %v7567_v44 = vadd.f32 -0.99, %v8737_v40  ;;  %v4888_v45 = vsub.f32 1.0, %v8737_v40  ;;  %8758 = vlog2.f32 %v284_v36 }
 0x1c5   : > { %v8741_v46 = vpop.eup %8740  ;;  %6934 = vst [vmem:[%s12522_s20 + $0x280] sm:$0xff] %v6422_v41  ;;  %v6423_v47 = vsub.f32 %v3945_v38, %v5481_v42  ;;  %v7568_v48 = vadd.f32 -0.99, %v8739_v43  ;;  %v4889_v49 = vsub.f32 1.0, %v8739_v43  ;;  %8760 = vlog2.f32 %v285_v39 }
 0x1c6   : > { %v8743_v50 = vpop.eup %8742  ;;  %8762 = vlog2.f32 %v7567_v44  ;;  %v7569_v51 = vadd.f32 -0.99, %v8741_v46  ;;  %v4890_v54 = vsub.f32 1.0, %v8741_v46  ;;  %v286_v44 = vld [vmem:[%s12465_s8 + $0x2f8] sm:$0xff] }
 0x1c7   : > { %v8745_v53 = vpop.eup %8744  ;;  %6935 = vst [vmem:[%s12522_s20 + $0x288] sm:$0xff] %v6423_v47  ;;  %8764 = vlog2.f32 %v4888_v45  ;;  %v7570_v56 = vadd.f32 -0.99, %v8743_v50  ;;  %v4891_v58 = vsub.f32 1.0, %v8743_v50 }
 0x1c8   : > { %v8747_v55 = vpop.eup %8746  ;;  %8766 = vlog2.f32 %v7568_v48  ;;  %v7571_v60 = vadd.f32 -0.99, %v8745_v53  ;;  %v4892_v62 = vsub.f32 1.0, %v8745_v53  ;;  %v287_v48 = vld [vmem:[%s12465_s8 + $0x300] sm:$0xff] }
 0x1c9   : > { %v8749_v57 = vpop.eup %8748  ;;  %8768 = vlog2.f32 %v4889_v49  ;;  %v7572_v0 = vadd.f32 -0.99, %v8747_v55  ;;  %v4893_v2 = vsub.f32 1.0, %v8747_v55 }
 0x1ca   : > { %v8751_v59 = vpop.eup %8750  ;;  %8770 = vlog2.f32 %v7569_v51  ;;  %v7573_v5 = vadd.f32 -0.99, %v8749_v57  ;;  %v4894_v10 = vsub.f32 1.0, %v8749_v57  ;;  %v288_v51 = vld [vmem:[%s12465_s8 + $0x308] sm:$0xff] }
 0x1cb   : > { %v8753_v61 = vpop.eup %8752  ;;  %8772 = vlog2.f32 %v4890_v54  ;;  %v7574_v6 = vadd.f32 -0.99, %v8751_v59  ;;  %v4895_v17 = vsub.f32 1.0, %v8751_v59  ;;  %v290_v59 = vld [vmem:[%s12465_s8 + $0x318] sm:$0xff] }
 0x1cc   : > { %v8755_v63 = vpop.eup %8754  ;;  %8774 = vlog2.f32 %v7570_v56  ;;  %v7575_v20 = vadd.f32 -0.99, %v8753_v61  ;;  %v4896_v24 = vsub.f32 1.0, %v8753_v61  ;;  %v289_v56 = vld [vmem:[%s12465_s8 + $0x310] sm:$0xff] }
 0x1cd   : > { %v8757_v1 = vpop.eup %8756  ;;  %8776 = vlog2.f32 %v4891_v58  ;;  %v887_v3 = vmul.f32 0.6931472, %v8755_v63  ;;  %v291_v63 = vld [vmem:[%s12465_s8 + $0x320] sm:$0xff] }
 0x1ce   : > { %v8759_v4 = vpop.eup %8758  ;;  %8778 = vlog2.f32 %v7571_v60  ;;  %v889_v8 = vmul.f32 0.6931472, %v8757_v1 }
 0x1cf   : > { %v8761_v9 = vpop.eup %8760  ;;  %8780 = vlog2.f32 %v4892_v62  ;;  %v891_v11 = vmul.f32 0.6931472, %v8759_v4  ;;  %v1825_v13 = vmul.f32 %v12691_v52, %v887_v3 }
 0x1d0   : > { %v8763_v12 = vpop.eup %8762  ;;  %8782 = vlog2.f32 %v7572_v0  ;;  %v893_v14 = vmul.f32 0.6931472, %v8761_v9  ;;  %v1826_v7 = vmul.f32 %v12691_v52, %v889_v8  ;;  %v293_v8 = vld [vmem:[%s12465_s8 + $0x330] sm:$0xff] }
 0x1d1   : > { %v8765_v15 = vpop.eup %8764  ;;  %v3947_v16 = vmul.f32 0.6931472, %v8763_v12  ;;  %8784 = vlog2.f32 %v4893_v2  ;;  %v1827_v21 = vmul.f32 %v12691_v52, %v891_v11  ;;  %v2428_v29 = vmul.f32 1.442695, %v1825_v13  ;;  %v292_v2 = vld [vmem:[%s12465_s8 + $0x328] sm:$0xff]  ;;  %v294_v11 = vld [vmem:[%s12465_s8 + $0x338] sm:$0xff] }
 0x1d2   : > { %v8767_v18 = vpop.eup %8766  ;;  %v5483_v19 = vmul.f32 0.6931472, %v8765_v15  ;;  %8786 = vlog2.f32 %v7573_v5  ;;  %v1828_v25 = vmul.f32 %v12691_v52, %v893_v14  ;;  %v2430_v32 = vmul.f32 1.442695, %v1826_v7 }
 0x1d3   : > { %v8769_v22 = vpop.eup %8768  ;;  %v3949_v23 = vmul.f32 0.6931472, %v8767_v18  ;;  %8788 = vlog2.f32 %v4894_v10  ;;  %v2432_v36 = vmul.f32 1.442695, %v1827_v21 }
 0x1d4   : > { %v8771_v26 = vpop.eup %8770  ;;  %v6424_v27 = vsub.f32 %v3947_v16, %v5483_v19  ;;  %v5485_v28 = vmul.f32 0.6931472, %v8769_v22  ;;  %8790 = vlog2.f32 %v7574_v6  ;;  %v2434_v38 = vmul.f32 1.442695, %v1828_v25 }
 0x1d5   : > { %v8773_v30 = vpop.eup %8772  ;;  %v3951_v31 = vmul.f32 0.6931472, %v8771_v26  ;;  %8792 = vlog2.f32 %v4895_v17 }
 0x1d6   : > { %v8775_v33 = vpop.eup %8774  ;;  %6936 = vst [vmem:[%s12522_s20 + $0x290] sm:$0xff] %v6424_v27  ;;  %v6425_v34 = vsub.f32 %v3949_v23, %v5485_v28  ;;  %v5487_v35 = vmul.f32 0.6931472, %v8773_v30  ;;  %8794 = vlog2.f32 %v7575_v20 }
 0x1d7   : > { %v8777_v37 = vpop.eup %8776  ;;  %v3953_v52 = vmul.f32 0.6931472, %v8775_v33  ;;  %8796 = vlog2.f32 %v4896_v24 }
 0x1d8   : > { %v8779_v39 = vpop.eup %8778  ;;  %6937 = vst [vmem:[%s12522_s20 + $0x298] sm:$0xff] %v6425_v34  ;;  %v6426_v40 = vsub.f32 %v3951_v31, %v5487_v35  ;;  %v5489_v41 = vmul.f32 0.6931472, %v8777_v37  ;;  %8798 = vpow2.f32 %v2428_v29  ;;  %v12793_v31 = vld [vmem:[#allocation5] ss:$0 sm:$0xff] }
 0x1d9   : > { %v8781_v42 = vpop.eup %8780  ;;  %v3955_v43 = vmul.f32 0.6931472, %v8779_v39  ;;  %8800 = vpow2.f32 %v2430_v32 }
 0x1da   : > { %v8783_v45 = vpop.eup %8782  ;;  %6938 = vst [vmem:[%s12522_s20 + $0x2a0] sm:$0xff] %v6426_v40  ;;  %v6427_v46 = vsub.f32 %v3953_v52, %v5489_v41  ;;  %v5491_v47 = vmul.f32 0.6931472, %v8781_v42  ;;  %8802 = vpow2.f32 %v2432_v36 }
 0x1db   : > { %v8785_v49 = vpop.eup %8784  ;;  %v3957_v50 = vmul.f32 0.6931472, %v8783_v45  ;;  %8804 = vpow2.f32 %v2434_v38 }
 0x1dc   : > { %v8787_v53 = vpop.eup %8786  ;;  %6939 = vst [vmem:[%s12522_s20 + $0x2a8] sm:$0xff] %v6427_v46  ;;  %v6428_v54 = vsub.f32 %v3955_v43, %v5491_v47  ;;  %v5493_v55 = vmul.f32 0.6931472, %v8785_v49  ;;  %8806 = vlog2.f32 %v286_v44 }
 0x1dd   : > { %v8789_v57 = vpop.eup %8788  ;;  %v3959_v58 = vmul.f32 0.6931472, %v8787_v53  ;;  %8808 = vlog2.f32 %v287_v48 }
 0x1de   : > { %v8791_v60 = vpop.eup %8790  ;;  %6940 = vst [vmem:[%s12522_s20 + $0x2b0] sm:$0xff] %v6428_v54  ;;  %v6429_v61 = vsub.f32 %v3957_v50, %v5493_v55  ;;  %v5495_v62 = vmul.f32 0.6931472, %v8789_v57  ;;  %8810 = vlog2.f32 %v288_v51 }
 0x1df   : > { %v8793_v0 = vpop.eup %8792  ;;  %v3961_v1 = vmul.f32 0.6931472, %v8791_v60  ;;  %8812 = vlog2.f32 %v289_v56 }
 0x1e0   : > { %v8795_v3 = vpop.eup %8794  ;;  %6941 = vst [vmem:[%s12522_s20 + $0x2b8] sm:$0xff] %v6429_v61  ;;  %v6430_v4 = vsub.f32 %v3959_v58, %v5495_v62  ;;  %v5497_v5 = vmul.f32 0.6931472, %v8793_v0  ;;  %8814 = vlog2.f32 %v290_v59 }
 0x1e1   : > { %v8797_v9 = vpop.eup %8796  ;;  %v3963_v10 = vmul.f32 0.6931472, %v8795_v3  ;;  %8816 = vlog2.f32 %v291_v63 }
 0x1e2   : > { %v8799_v12 = vpop.eup %8798  ;;  %6942 = vst [vmem:[%s12522_s20 + $0x2c0] sm:$0xff] %v6430_v4  ;;  %v6431_v6 = vsub.f32 %v3961_v1, %v5497_v5  ;;  %v5499_v13 = vmul.f32 0.6931472, %v8797_v9  ;;  %8818 = vlog2.f32 %v292_v2 }
 0x1e3   : > { %v8801_v14 = vpop.eup %8800  ;;  %v7576_v15 = vadd.f32 -0.99, %v8799_v12  ;;  %v4897_v16 = vsub.f32 1.0, %v8799_v12  ;;  %8820 = vlog2.f32 %v293_v8 }
 0x1e4   : > { %v8803_v17 = vpop.eup %8802  ;;  %6943 = vst [vmem:[%s12522_s20 + $0x2c8] sm:$0xff] %v6431_v6  ;;  %v6432_v7 = vsub.f32 %v3963_v10, %v5499_v13  ;;  %v7577_v18 = vadd.f32 -0.99, %v8801_v14  ;;  %v4898_v19 = vsub.f32 1.0, %v8801_v14  ;;  %8822 = vlog2.f32 %v294_v11  ;;  %v295_v10 = vld [vmem:[%s12465_s8 + $0x340] sm:$0xff]  ;;  %v296_v6 = vld [vmem:[%s12465_s8 + $0x348] sm:$0xff] }
 0x1e5   : > { %v8805_v20 = vpop.eup %8804  ;;  %8824 = vlog2.f32 %v7576_v15  ;;  %v7578_v21 = vadd.f32 -0.99, %v8803_v17  ;;  %v4899_v23 = vsub.f32 1.0, %v8803_v17 }
 0x1e6   : > { %v8807_v22 = vpop.eup %8806  ;;  %6944 = vst [vmem:[%s12522_s20 + $0x2d0] sm:$0xff] %v6432_v7  ;;  %8826 = vlog2.f32 %v4897_v16  ;;  %v7579_v25 = vadd.f32 -0.99, %v8805_v20  ;;  %v4900_v28 = vsub.f32 1.0, %v8805_v20  ;;  %v297_v16 = vld [vmem:[%s12465_s8 + $0x350] sm:$0xff] }
 0x1e7   : > { %v8809_v24 = vpop.eup %8808  ;;  %8828 = vlog2.f32 %v7577_v18  ;;  %v895_v26 = vmul.f32 0.6931472, %v8807_v22  ;;  %v298_v18 = vld [vmem:[%s12465_s8 + $0x358] sm:$0xff] }
 0x1e8   : > { %v8811_v27 = vpop.eup %8810  ;;  %8830 = vlog2.f32 %v4898_v19  ;;  %v897_v29 = vmul.f32 0.6931472, %v8809_v24 }
 0x1e9   : > { %v8813_v30 = vpop.eup %8812  ;;  %8832 = vlog2.f32 %v7578_v21  ;;  %v1829_v32 = vmul.f32 %v12793_v31, %v895_v26  ;;  %v899_v33 = vmul.f32 0.6931472, %v8811_v27 }
 0x1ea   : > { %v8815_v34 = vpop.eup %8814  ;;  %8834 = vlog2.f32 %v4899_v23  ;;  %v1830_v35 = vmul.f32 %v12793_v31, %v897_v29  ;;  %v901_v36 = vmul.f32 0.6931472, %v8813_v30 }
 0x1eb   : > { %v8817_v37 = vpop.eup %8816  ;;  %8836 = vlog2.f32 %v7579_v25  ;;  %v2436_v52 = vmul.f32 1.442695, %v1829_v32  ;;  %v1831_v38 = vmul.f32 %v12793_v31, %v899_v33  ;;  %v903_v39 = vmul.f32 0.6931472, %v8815_v34 }
 0x1ec   : > { %v8819_v40 = vpop.eup %8818  ;;  %8838 = vlog2.f32 %v4900_v28  ;;  %v2438_v41 = vmul.f32 1.442695, %v1830_v35  ;;  %v1832_v42 = vmul.f32 %v12793_v31, %v901_v36  ;;  %v905_v43 = vmul.f32 0.6931472, %v8817_v37 }
 0x1ed   : > { %v8821_v44 = vpop.eup %8820  ;;  %8840 = vpow2.f32 %v2436_v52  ;;  %v2440_v45 = vmul.f32 1.442695, %v1831_v38  ;;  %v1833_v46 = vmul.f32 %v12793_v31, %v903_v39  ;;  %v907_v47 = vmul.f32 0.6931472, %v8819_v40 }
 0x1ee   : > { %v8823_v48 = vpop.eup %8822  ;;  %8842 = vpow2.f32 %v2438_v41  ;;  %v2442_v49 = vmul.f32 1.442695, %v1832_v42  ;;  %v1834_v50 = vmul.f32 %v12793_v31, %v905_v43  ;;  %v909_v51 = vmul.f32 0.6931472, %v8821_v44 }
 0x1ef   : > { %v8825_v53 = vpop.eup %8824  ;;  %8844 = vpow2.f32 %v2440_v45  ;;  %v2444_v54 = vmul.f32 1.442695, %v1833_v46  ;;  %v1835_v55 = vmul.f32 %v12793_v31, %v907_v47  ;;  %v911_v56 = vmul.f32 0.6931472, %v8823_v48 }
 0x1f0   : > { %v8827_v57 = vpop.eup %8826  ;;  %v3965_v58 = vmul.f32 0.6931472, %v8825_v53  ;;  %8846 = vpow2.f32 %v2442_v49  ;;  %v2446_v59 = vmul.f32 1.442695, %v1834_v50  ;;  %v1836_v60 = vmul.f32 %v12793_v31, %v909_v51 }
 0x1f1   : > { %v8829_v61 = vpop.eup %8828  ;;  %v5501_v62 = vmul.f32 0.6931472, %v8827_v57  ;;  %8848 = vpow2.f32 %v2444_v54  ;;  %v2448_v63 = vmul.f32 1.442695, %v1835_v55  ;;  %v1837_v0 = vmul.f32 %v12793_v31, %v911_v56 }
 0x1f2   : > { %v8831_v1 = vpop.eup %8830  ;;  %v3967_v2 = vmul.f32 0.6931472, %v8829_v61  ;;  %8850 = vpow2.f32 %v2446_v59  ;;  %v2450_v3 = vmul.f32 1.442695, %v1836_v60 }
 0x1f3   : > { %v8833_v4 = vpop.eup %8832  ;;  %v6433_v5 = vsub.f32 %v3965_v58, %v5501_v62  ;;  %v5503_v8 = vmul.f32 0.6931472, %v8831_v1  ;;  %8852 = vpow2.f32 %v2448_v63  ;;  %v2452_v9 = vmul.f32 1.442695, %v1837_v0 }
 0x1f4   : > { %v8835_v11 = vpop.eup %8834  ;;  %v3969_v12 = vmul.f32 0.6931472, %v8833_v4  ;;  %8854 = vpow2.f32 %v2450_v3 }
 0x1f5   : > { %v8837_v13 = vpop.eup %8836  ;;  %6945 = vst [vmem:[%s12522_s20 + $0x2d8] sm:$0xff] %v6433_v5  ;;  %v6434_v14 = vsub.f32 %v3967_v2, %v5503_v8  ;;  %v5505_v15 = vmul.f32 0.6931472, %v8835_v11  ;;  %8856 = vpow2.f32 %v2452_v9 }
 0x1f6   : > { %v8839_v17 = vpop.eup %8838  ;;  %v3971_v7 = vmul.f32 0.6931472, %v8837_v13  ;;  %8858 = vlog2.f32 %v295_v10 }
 0x1f7   : > { %v8841_v19 = vpop.eup %8840  ;;  %6946 = vst [vmem:[%s12522_s20 + $0x2e0] sm:$0xff] %v6434_v14  ;;  %v6435_v20 = vsub.f32 %v3969_v12, %v5505_v15  ;;  %v5507_v21 = vmul.f32 0.6931472, %v8839_v17  ;;  %8860 = vlog2.f32 %v296_v6 }
 0x1f8   : > { %v8843_v22 = vpop.eup %8842  ;;  %v7580_v23 = vadd.f32 -0.99, %v8841_v19  ;;  %v4901_v24 = vsub.f32 1.0, %v8841_v19  ;;  %8862 = vlog2.f32 %v297_v16 }
 0x1f9   : > { %v8845_v25 = vpop.eup %8844  ;;  %6947 = vst [vmem:[%s12522_s20 + $0x2e8] sm:$0xff] %v6435_v20  ;;  %v6436_v26 = vsub.f32 %v3971_v7, %v5507_v21  ;;  %v7581_v27 = vadd.f32 -0.99, %v8843_v22  ;;  %v4902_v28 = vsub.f32 1.0, %v8843_v22  ;;  %8864 = vlog2.f32 %v298_v18 }
 0x1fa   : > { %v8847_v29 = vpop.eup %8846  ;;  %8866 = vlog2.f32 %v7580_v23  ;;  %v7582_v30 = vadd.f32 -0.99, %v8845_v25  ;;  %v4903_v33 = vsub.f32 1.0, %v8845_v25 }
 0x1fb   : > { %v8849_v32 = vpop.eup %8848  ;;  %6948 = vst [vmem:[%s12522_s20 + $0x2f0] sm:$0xff] %v6436_v26  ;;  %8868 = vlog2.f32 %v4901_v24  ;;  %v7583_v35 = vadd.f32 -0.99, %v8847_v29  ;;  %v4904_v37 = vsub.f32 1.0, %v8847_v29  ;;  %v299_v24 = vld [vmem:[%s12465_s8 + $0x360] sm:$0xff] }
 0x1fc   : > { %v8851_v34 = vpop.eup %8850  ;;  %8870 = vlog2.f32 %v7581_v27  ;;  %v7584_v38 = vadd.f32 -0.99, %v8849_v32  ;;  %v4905_v40 = vsub.f32 1.0, %v8849_v32  ;;  %v301_v32 = vld [vmem:[%s12465_s8 + $0x370] sm:$0xff] }
 0x1fd   : > { %v8853_v36 = vpop.eup %8852  ;;  %8872 = vlog2.f32 %v4902_v28  ;;  %v7585_v42 = vadd.f32 -0.99, %v8851_v34  ;;  %v4906_v44 = vsub.f32 1.0, %v8851_v34  ;;  %v300_v28 = vld [vmem:[%s12465_s8 + $0x368] sm:$0xff] }
 0x1fe   : > { %v8855_v52 = vpop.eup %8854  ;;  %8874 = vlog2.f32 %v7582_v30  ;;  %v7586_v47 = vadd.f32 -0.99, %v8853_v36  ;;  %v4907_v50 = vsub.f32 1.0, %v8853_v36  ;;  %v302_v36 = vld [vmem:[%s12465_s8 + $0x378] sm:$0xff] }
 0x1ff   : > { %v8857_v39 = vpop.eup %8856  ;;  %8876 = vlog2.f32 %v4903_v33  ;;  %v7587_v54 = vadd.f32 -0.99, %v8855_v52  ;;  %v4908_v59 = vsub.f32 1.0, %v8855_v52 }
 0x200   : > { %v8859_v41 = vpop.eup %8858  ;;  %8878 = vlog2.f32 %v7583_v35  ;;  %v7588_v63 = vadd.f32 -0.99, %v8857_v39  ;;  %v4909_v3 = vsub.f32 1.0, %v8857_v39 }
 0x201   : > { %v8861_v43 = vpop.eup %8860  ;;  %8880 = vlog2.f32 %v4904_v37  ;;  %v913_v45 = vmul.f32 0.6931472, %v8859_v41 }
 0x202   : > { %v8863_v46 = vpop.eup %8862  ;;  %8882 = vlog2.f32 %v7584_v38  ;;  %v915_v48 = vmul.f32 0.6931472, %v8861_v43  ;;  %v303_v38 = vld [vmem:[%s12465_s8 + $0x380] sm:$0xff] }
 0x203   : > { %v8865_v49 = vpop.eup %8864  ;;  %8884 = vlog2.f32 %v4905_v40  ;;  %v917_v51 = vmul.f32 0.6931472, %v8863_v46  ;;  %v1838_v55 = vmul.f32 %v12793_v31, %v913_v45  ;;  %v305_v45 = vld [vmem:[%s12465_s8 + $0x390] sm:$0xff] }
 0x204   : > { %v8867_v53 = vpop.eup %8866  ;;  %8886 = vlog2.f32 %v7585_v42  ;;  %v919_v56 = vmul.f32 0.6931472, %v8865_v49  ;;  %v1839_v60 = vmul.f32 %v12793_v31, %v915_v48  ;;  %v304_v42 = vld [vmem:[%s12465_s8 + $0x388] sm:$0xff]  ;;  %v306_v49 = vld [vmem:[%s12465_s8 + $0x398] sm:$0xff] }
 0x205   : > { %v8869_v57 = vpop.eup %8868  ;;  %v3973_v58 = vmul.f32 0.6931472, %v8867_v53  ;;  %8888 = vlog2.f32 %v4906_v44  ;;  %v1840_v0 = vmul.f32 %v12793_v31, %v917_v51  ;;  %v2454_v10 = vmul.f32 1.442695, %v1838_v55  ;;  %v307_v53 = vld [vmem:[%s12465_s8 + $0x3a0] sm:$0xff] }
 0x206   : > { %v8871_v61 = vpop.eup %8870  ;;  %v5509_v62 = vmul.f32 0.6931472, %v8869_v57  ;;  %8890 = vlog2.f32 %v7586_v47  ;;  %v1841_v4 = vmul.f32 %v12793_v31, %v919_v56  ;;  %v2456_v6 = vmul.f32 1.442695, %v1839_v60 }
 0x207   : > { %v8873_v1 = vpop.eup %8872  ;;  %v3975_v2 = vmul.f32 0.6931472, %v8871_v61  ;;  %8892 = vlog2.f32 %v4907_v50  ;;  %v2458_v16 = vmul.f32 1.442695, %v1840_v0 }
 0x208   : > { %v8875_v5 = vpop.eup %8874  ;;  %v6437_v8 = vsub.f32 %v3973_v58, %v5509_v62  ;;  %v5511_v9 = vmul.f32 0.6931472, %v8873_v1  ;;  %8894 = vlog2.f32 %v7587_v54  ;;  %v2460_v18 = vmul.f32 1.442695, %v1841_v4 }
 0x209   : > { %v8877_v11 = vpop.eup %8876  ;;  %v3977_v12 = vmul.f32 0.6931472, %v8875_v5  ;;  %8896 = vlog2.f32 %v4908_v59 }
 0x20a   : > { %v8879_v13 = vpop.eup %8878  ;;  %6949 = vst [vmem:[%s12522_s20 + $0x2f8] sm:$0xff] %v6437_v8  ;;  %v6438_v14 = vsub.f32 %v3975_v2, %v5511_v9  ;;  %v5513_v15 = vmul.f32 0.6931472, %v8877_v11  ;;  %8898 = vlog2.f32 %v7588_v63 }
 0x20b   : > { %v8881_v17 = vpop.eup %8880  ;;  %v3979_v7 = vmul.f32 0.6931472, %v8879_v13  ;;  %8900 = vlog2.f32 %v4909_v3 }
 0x20c   : > { %v8883_v19 = vpop.eup %8882  ;;  %6950 = vst [vmem:[%s12522_s20 + $0x300] sm:$0xff] %v6438_v14  ;;  %v6439_v20 = vsub.f32 %v3977_v12, %v5513_v15  ;;  %v5515_v21 = vmul.f32 0.6931472, %v8881_v17  ;;  %8902 = vpow2.f32 %v2454_v10 }
 0x20d   : > { %v8885_v22 = vpop.eup %8884  ;;  %v3981_v23 = vmul.f32 0.6931472, %v8883_v19  ;;  %8904 = vpow2.f32 %v2456_v6 }
 0x20e   : > { %v8887_v25 = vpop.eup %8886  ;;  %6951 = vst [vmem:[%s12522_s20 + $0x308] sm:$0xff] %v6439_v20  ;;  %v6440_v26 = vsub.f32 %v3979_v7, %v5515_v21  ;;  %v5517_v27 = vmul.f32 0.6931472, %v8885_v22  ;;  %8906 = vpow2.f32 %v2458_v16 }
 0x20f   : > { %v8889_v29 = vpop.eup %8888  ;;  %v3983_v30 = vmul.f32 0.6931472, %v8887_v25  ;;  %8908 = vpow2.f32 %v2460_v18 }
 0x210   : > { %v8891_v33 = vpop.eup %8890  ;;  %6952 = vst [vmem:[%s12522_s20 + $0x310] sm:$0xff] %v6440_v26  ;;  %v6441_v34 = vsub.f32 %v3981_v23, %v5517_v27  ;;  %v5519_v35 = vmul.f32 0.6931472, %v8889_v29  ;;  %8910 = vlog2.f32 %v299_v24 }
 0x211   : > { %v8893_v37 = vpop.eup %8892  ;;  %v3985_v52 = vmul.f32 0.6931472, %v8891_v33  ;;  %8912 = vlog2.f32 %v300_v28 }
 0x212   : > { %v8895_v39 = vpop.eup %8894  ;;  %6953 = vst [vmem:[%s12522_s20 + $0x318] sm:$0xff] %v6441_v34  ;;  %v6442_v40 = vsub.f32 %v3983_v30, %v5519_v35  ;;  %v5521_v41 = vmul.f32 0.6931472, %v8893_v37  ;;  %8914 = vlog2.f32 %v301_v32 }
 0x213   : > { %v8897_v43 = vpop.eup %8896  ;;  %v3987_v44 = vmul.f32 0.6931472, %v8895_v39  ;;  %8916 = vlog2.f32 %v302_v36 }
 0x214   : > { %v8899_v46 = vpop.eup %8898  ;;  %6954 = vst [vmem:[%s12522_s20 + $0x320] sm:$0xff] %v6442_v40  ;;  %v6443_v47 = vsub.f32 %v3985_v52, %v5521_v41  ;;  %v5523_v48 = vmul.f32 0.6931472, %v8897_v43  ;;  %8918 = vlog2.f32 %v303_v38 }
 0x215   : > { %v8901_v50 = vpop.eup %8900  ;;  %v3989_v51 = vmul.f32 0.6931472, %v8899_v46  ;;  %8920 = vlog2.f32 %v304_v42 }
 0x216   : > { %v8903_v54 = vpop.eup %8902  ;;  %6955 = vst [vmem:[%s12522_s20 + $0x328] sm:$0xff] %v6443_v47  ;;  %v6444_v55 = vsub.f32 %v3987_v44, %v5523_v48  ;;  %v5525_v56 = vmul.f32 0.6931472, %v8901_v50  ;;  %8922 = vlog2.f32 %v305_v45 }
 0x217   : > { %v8905_v57 = vpop.eup %8904  ;;  %v7589_v58 = vadd.f32 -0.99, %v8903_v54  ;;  %v4910_v59 = vsub.f32 1.0, %v8903_v54  ;;  %8924 = vlog2.f32 %v306_v49 }
 0x218   : > { %v8907_v60 = vpop.eup %8906  ;;  %6956 = vst [vmem:[%s12522_s20 + $0x330] sm:$0xff] %v6444_v55  ;;  %v6445_v61 = vsub.f32 %v3989_v51, %v5525_v56  ;;  %v7590_v62 = vadd.f32 -0.99, %v8905_v57  ;;  %v4911_v63 = vsub.f32 1.0, %v8905_v57  ;;  %8926 = vlog2.f32 %v307_v53  ;;  %v308_v51 = vld [vmem:[%s12465_s8 + $0x3a8] sm:$0xff]  ;;  %v309_v55 = vld [vmem:[%s12465_s8 + $0x3b0] sm:$0xff] }
 0x219   : > { %v8909_v0 = vpop.eup %8908  ;;  %8928 = vlog2.f32 %v7589_v58  ;;  %v7591_v1 = vadd.f32 -0.99, %v8907_v60  ;;  %v4912_v3 = vsub.f32 1.0, %v8907_v60 }
 0x21a   : > { %v8911_v2 = vpop.eup %8910  ;;  %6957 = vst [vmem:[%s12522_s20 + $0x338] sm:$0xff] %v6445_v61  ;;  %8930 = vlog2.f32 %v4910_v59  ;;  %v7592_v5 = vadd.f32 -0.99, %v8909_v0  ;;  %v4913_v10 = vsub.f32 1.0, %v8909_v0  ;;  %v310_v59 = vld [vmem:[%s12465_s8 + $0x3b8] sm:$0xff] }
 0x21b   : > { %v8913_v4 = vpop.eup %8912  ;;  %8932 = vlog2.f32 %v7590_v62  ;;  %v921_v8 = vmul.f32 0.6931472, %v8911_v2  ;;  %v311_v62 = vld [vmem:[%s12465_s8 + $0x3c0] sm:$0xff] }
 0x21c   : > { %v8915_v9 = vpop.eup %8914  ;;  %8934 = vlog2.f32 %v4911_v63  ;;  %v923_v11 = vmul.f32 0.6931472, %v8913_v4 }
 0x21d   : > { %v8917_v12 = vpop.eup %8916  ;;  %8936 = vlog2.f32 %v7591_v1  ;;  %v1842_v6 = vmul.f32 %v12793_v31, %v921_v8  ;;  %v925_v13 = vmul.f32 0.6931472, %v8915_v9 }
 0x21e   : > { %v8919_v14 = vpop.eup %8918  ;;  %8938 = vlog2.f32 %v4912_v3  ;;  %v1843_v15 = vmul.f32 %v12793_v31, %v923_v11  ;;  %v927_v16 = vmul.f32 0.6931472, %v8917_v12 }
 0x21f   : > { %v8921_v17 = vpop.eup %8920  ;;  %8940 = vlog2.f32 %v7592_v5  ;;  %v2462_v7 = vmul.f32 1.442695, %v1842_v6  ;;  %v1844_v18 = vmul.f32 %v12793_v31, %v925_v13  ;;  %v929_v19 = vmul.f32 0.6931472, %v8919_v14 }
 0x220   : > { %v8923_v20 = vpop.eup %8922  ;;  %8942 = vlog2.f32 %v4913_v10  ;;  %v2464_v21 = vmul.f32 1.442695, %v1843_v15  ;;  %v1845_v22 = vmul.f32 %v12793_v31, %v927_v16  ;;  %v931_v23 = vmul.f32 0.6931472, %v8921_v17 }
 0x221   : > { %v8925_v24 = vpop.eup %8924  ;;  %8944 = vpow2.f32 %v2462_v7  ;;  %v2466_v25 = vmul.f32 1.442695, %v1844_v18  ;;  %v1846_v26 = vmul.f32 %v12793_v31, %v929_v19  ;;  %v933_v27 = vmul.f32 0.6931472, %v8923_v20 }
 0x222   : > { %v8927_v28 = vpop.eup %8926  ;;  %8946 = vpow2.f32 %v2464_v21  ;;  %v2468_v29 = vmul.f32 1.442695, %v1845_v22  ;;  %v1847_v30 = vmul.f32 %v12793_v31, %v931_v23  ;;  %v935_v32 = vmul.f32 0.6931472, %v8925_v24 }
 0x223   : > { %v8929_v33 = vpop.eup %8928  ;;  %8948 = vpow2.f32 %v2466_v25  ;;  %v2470_v34 = vmul.f32 1.442695, %v1846_v26  ;;  %v1848_v35 = vmul.f32 %v12793_v31, %v933_v27  ;;  %v937_v36 = vmul.f32 0.6931472, %v8927_v28 }
 0x224   : > { %v8931_v37 = vpop.eup %8930  ;;  %v3991_v52 = vmul.f32 0.6931472, %v8929_v33  ;;  %8950 = vpow2.f32 %v2468_v29  ;;  %v2472_v38 = vmul.f32 1.442695, %v1847_v30  ;;  %v1849_v39 = vmul.f32 %v12793_v31, %v935_v32 }
 0x225   : > { %v8933_v40 = vpop.eup %8932  ;;  %v5527_v41 = vmul.f32 0.6931472, %v8931_v37  ;;  %8952 = vpow2.f32 %v2470_v34  ;;  %v2474_v42 = vmul.f32 1.442695, %v1848_v35  ;;  %v1850_v43 = vmul.f32 %v12793_v31, %v937_v36 }
 0x226   : > { %v8935_v44 = vpop.eup %8934  ;;  %v3993_v45 = vmul.f32 0.6931472, %v8933_v40  ;;  %8954 = vpow2.f32 %v2472_v38  ;;  %v2476_v46 = vmul.f32 1.442695, %v1849_v39 }
 0x227   : > { %v8937_v47 = vpop.eup %8936  ;;  %v6446_v48 = vsub.f32 %v3991_v52, %v5527_v41  ;;  %v5529_v49 = vmul.f32 0.6931472, %v8935_v44  ;;  %8956 = vpow2.f32 %v2474_v42  ;;  %v2478_v50 = vmul.f32 1.442695, %v1850_v43 }
 0x228   : > { %v8939_v53 = vpop.eup %8938  ;;  %v3995_v54 = vmul.f32 0.6931472, %v8937_v47  ;;  %8958 = vpow2.f32 %v2476_v46 }
 0x229   : > { %v8941_v56 = vpop.eup %8940  ;;  %6958 = vst [vmem:[%s12522_s20 + $0x340] sm:$0xff] %v6446_v48  ;;  %v6447_v57 = vsub.f32 %v3993_v45, %v5529_v49  ;;  %v5531_v58 = vmul.f32 0.6931472, %v8939_v53  ;;  %8960 = vpow2.f32 %v2478_v50 }
 0x22a   : > { %v8943_v60 = vpop.eup %8942  ;;  %v3997_v61 = vmul.f32 0.6931472, %v8941_v56  ;;  %8962 = vlog2.f32 %v308_v51 }
 0x22b   : > { %v8945_v63 = vpop.eup %8944  ;;  %6959 = vst [vmem:[%s12522_s20 + $0x348] sm:$0xff] %v6447_v57  ;;  %v6448_v0 = vsub.f32 %v3995_v54, %v5531_v58  ;;  %v5533_v1 = vmul.f32 0.6931472, %v8943_v60  ;;  %8964 = vlog2.f32 %v309_v55 }
 0x22c   : > { %v8947_v2 = vpop.eup %8946  ;;  %v7593_v3 = vadd.f32 -0.99, %v8945_v63  ;;  %v4914_v4 = vsub.f32 1.0, %v8945_v63  ;;  %8966 = vlog2.f32 %v310_v59 }
 0x22d   : > { %v8949_v5 = vpop.eup %8948  ;;  %6960 = vst [vmem:[%s12522_s20 + $0x350] sm:$0xff] %v6448_v0  ;;  %v6449_v8 = vsub.f32 %v3997_v61, %v5533_v1  ;;  %v7594_v9 = vadd.f32 -0.99, %v8947_v2  ;;  %v4915_v10 = vsub.f32 1.0, %v8947_v2  ;;  %8968 = vlog2.f32 %v311_v62 }
 0x22e   : > { %v8951_v11 = vpop.eup %8950  ;;  %8970 = vlog2.f32 %v7593_v3  ;;  %v7595_v12 = vadd.f32 -0.99, %v8949_v5  ;;  %v4916_v13 = vsub.f32 1.0, %v8949_v5 }
 0x22f   : > { %v8953_v6 = vpop.eup %8952  ;;  %6961 = vst [vmem:[%s12522_s20 + $0x358] sm:$0xff] %v6449_v8  ;;  %8972 = vlog2.f32 %v4914_v4  ;;  %v7596_v15 = vadd.f32 -0.99, %v8951_v11  ;;  %v4917_v17 = vsub.f32 1.0, %v8951_v11  ;;  %v312_v4 = vld [vmem:[%s12465_s8 + $0x3c8] sm:$0xff] }
 0x230   : > { %v8955_v14 = vpop.eup %8954  ;;  %8974 = vlog2.f32 %v7594_v9  ;;  %v7597_v18 = vadd.f32 -0.99, %v8953_v6  ;;  %v4918_v20 = vsub.f32 1.0, %v8953_v6  ;;  %v314_v6 = vld [vmem:[%s12465_s8 + $0x3d8] sm:$0xff] }
 0x231   : > { %v8957_v16 = vpop.eup %8956  ;;  %8976 = vlog2.f32 %v4915_v10  ;;  %v7598_v22 = vadd.f32 -0.99, %v8955_v14  ;;  %v4919_v24 = vsub.f32 1.0, %v8955_v14  ;;  %v313_v10 = vld [vmem:[%s12465_s8 + $0x3d0] sm:$0xff] }
 0x232   : > { %v8959_v7 = vpop.eup %8958  ;;  %8978 = vlog2.f32 %v7595_v12  ;;  %v7599_v27 = vadd.f32 -0.99, %v8957_v16  ;;  %v4920_v30 = vsub.f32 1.0, %v8957_v16  ;;  %v315_v16 = vld [vmem:[%s12465_s8 + $0x3e0] sm:$0xff] }
 0x233   : > { %v8961_v19 = vpop.eup %8960  ;;  %8980 = vlog2.f32 %v4916_v13  ;;  %v7600_v34 = vadd.f32 -0.99, %v8959_v7  ;;  %v4921_v38 = vsub.f32 1.0, %v8959_v7 }
 0x234   : > { %v8963_v21 = vpop.eup %8962  ;;  %8982 = vlog2.f32 %v7596_v15  ;;  %v7601_v42 = vadd.f32 -0.99, %v8961_v19  ;;  %v4922_v46 = vsub.f32 1.0, %v8961_v19 }
 0x235   : > { %v8965_v23 = vpop.eup %8964  ;;  %8984 = vlog2.f32 %v4917_v17  ;;  %v939_v25 = vmul.f32 0.6931472, %v8963_v21 }
 0x236   : > { %v8967_v26 = vpop.eup %8966  ;;  %8986 = vlog2.f32 %v7597_v18  ;;  %v941_v28 = vmul.f32 0.6931472, %v8965_v23  ;;  %v316_v18 = vld [vmem:[%s12465_s8 + $0x3e8] sm:$0xff] }
 0x237   : > { %v8969_v29 = vpop.eup %8968  ;;  %8988 = vlog2.f32 %v4918_v20  ;;  %v943_v32 = vmul.f32 0.6931472, %v8967_v26  ;;  %v1851_v35 = vmul.f32 %v12793_v31, %v939_v25  ;;  %v318_v25 = vld [vmem:[%s12465_s8 + $0x3f8] sm:$0xff] }
 0x238   : > { %v8971_v33 = vpop.eup %8970  ;;  %8990 = vlog2.f32 %v7598_v22  ;;  %v945_v36 = vmul.f32 0.6931472, %v8969_v29  ;;  %v1852_v39 = vmul.f32 %v12793_v31, %v941_v28  ;;  %v317_v22 = vld [vmem:[%s12465_s8 + $0x3f0] sm:$0xff]  ;;  %v319_v29 = vld [vmem:[%s12465_s8 + $0x400] sm:$0xff] }
 0x239   : > { %v8973_v37 = vpop.eup %8972  ;;  %v3999_v52 = vmul.f32 0.6931472, %v8971_v33  ;;  %8992 = vlog2.f32 %v4919_v24  ;;  %v1853_v43 = vmul.f32 %v12793_v31, %v943_v32  ;;  %v2480_v51 = vmul.f32 1.442695, %v1851_v35  ;;  %v320_v33 = vld [vmem:[%s12465_s8 + $0x408] sm:$0xff] }
 0x23a   : > { %v8975_v40 = vpop.eup %8974  ;;  %v5535_v41 = vmul.f32 0.6931472, %v8973_v37  ;;  %8994 = vlog2.f32 %v7599_v27  ;;  %v1854_v47 = vmul.f32 %v12793_v31, %v945_v36  ;;  %v2482_v55 = vmul.f32 1.442695, %v1852_v39 }
 0x23b   : > { %v8977_v44 = vpop.eup %8976  ;;  %v4001_v45 = vmul.f32 0.6931472, %v8975_v40  ;;  %8996 = vlog2.f32 %v4920_v30  ;;  %v2484_v59 = vmul.f32 1.442695, %v1853_v43 }
 0x23c   : > { %v8979_v48 = vpop.eup %8978  ;;  %v6450_v49 = vsub.f32 %v3999_v52, %v5535_v41  ;;  %v5537_v50 = vmul.f32 0.6931472, %v8977_v44  ;;  %8998 = vlog2.f32 %v7600_v34  ;;  %v2486_v62 = vmul.f32 1.442695, %v1854_v47 }
 0x23d   : > { %v8981_v53 = vpop.eup %8980  ;;  %v4003_v54 = vmul.f32 0.6931472, %v8979_v48  ;;  %9000 = vlog2.f32 %v4921_v38 }
 0x23e   : > { %v8983_v56 = vpop.eup %8982  ;;  %6962 = vst [vmem:[%s12522_s20 + $0x360] sm:$0xff] %v6450_v49  ;;  %v6451_v57 = vsub.f32 %v4001_v45, %v5537_v50  ;;  %v5539_v58 = vmul.f32 0.6931472, %v8981_v53  ;;  %9002 = vlog2.f32 %v7601_v42 }
 0x23f   : > { %v8985_v60 = vpop.eup %8984  ;;  %v4005_v61 = vmul.f32 0.6931472, %v8983_v56  ;;  %9004 = vlog2.f32 %v4922_v46 }
 0x240   : > { %v8987_v63 = vpop.eup %8986  ;;  %6963 = vst [vmem:[%s12522_s20 + $0x368] sm:$0xff] %v6451_v57  ;;  %v6452_v0 = vsub.f32 %v4003_v54, %v5539_v58  ;;  %v5541_v1 = vmul.f32 0.6931472, %v8985_v60  ;;  %9006 = vpow2.f32 %v2480_v51 }
 0x241   : > { %v8989_v2 = vpop.eup %8988  ;;  %v4007_v3 = vmul.f32 0.6931472, %v8987_v63  ;;  %9008 = vpow2.f32 %v2482_v55 }
 0x242   : > { %v8991_v5 = vpop.eup %8990  ;;  %6964 = vst [vmem:[%s12522_s20 + $0x370] sm:$0xff] %v6452_v0  ;;  %v6453_v8 = vsub.f32 %v4005_v61, %v5541_v1  ;;  %v5543_v9 = vmul.f32 0.6931472, %v8989_v2  ;;  %9010 = vpow2.f32 %v2484_v59 }
 0x243   : > { %v8993_v11 = vpop.eup %8992  ;;  %v4009_v12 = vmul.f32 0.6931472, %v8991_v5  ;;  %9012 = vpow2.f32 %v2486_v62 }
 0x244   : > { %v8995_v13 = vpop.eup %8994  ;;  %6965 = vst [vmem:[%s12522_s20 + $0x378] sm:$0xff] %v6453_v8  ;;  %v6454_v14 = vsub.f32 %v4007_v3, %v5543_v9  ;;  %v5545_v15 = vmul.f32 0.6931472, %v8993_v11  ;;  %9014 = vlog2.f32 %v312_v4 }
 0x245   : > { %v8997_v17 = vpop.eup %8996  ;;  %v4011_v7 = vmul.f32 0.6931472, %v8995_v13  ;;  %9016 = vlog2.f32 %v313_v10 }
 0x246   : > { %v8999_v19 = vpop.eup %8998  ;;  %6966 = vst [vmem:[%s12522_s20 + $0x380] sm:$0xff] %v6454_v14  ;;  %v6455_v20 = vsub.f32 %v4009_v12, %v5545_v15  ;;  %v5547_v21 = vmul.f32 0.6931472, %v8997_v17  ;;  %9018 = vlog2.f32 %v314_v6 }
 0x247   : > { %v9001_v23 = vpop.eup %9000  ;;  %v4013_v24 = vmul.f32 0.6931472, %v8999_v19  ;;  %9020 = vlog2.f32 %v315_v16 }
 0x248   : > { %v9003_v26 = vpop.eup %9002  ;;  %6967 = vst [vmem:[%s12522_s20 + $0x388] sm:$0xff] %v6455_v20  ;;  %v6456_v27 = vsub.f32 %v4011_v7, %v5547_v21  ;;  %v5549_v28 = vmul.f32 0.6931472, %v9001_v23  ;;  %9022 = vlog2.f32 %v316_v18 }
 0x249   : > { %v9005_v30 = vpop.eup %9004  ;;  %v4015_v32 = vmul.f32 0.6931472, %v9003_v26  ;;  %9024 = vlog2.f32 %v317_v22 }
 0x24a   : > { %v9007_v34 = vpop.eup %9006  ;;  %6968 = vst [vmem:[%s12522_s20 + $0x390] sm:$0xff] %v6456_v27  ;;  %v6457_v35 = vsub.f32 %v4013_v24, %v5549_v28  ;;  %v5551_v36 = vmul.f32 0.6931472, %v9005_v30  ;;  %9026 = vlog2.f32 %v318_v25 }
 0x24b   : > { %v9009_v37 = vpop.eup %9008  ;;  %v7602_v52 = vadd.f32 -0.99, %v9007_v34  ;;  %v4923_v38 = vsub.f32 1.0, %v9007_v34  ;;  %9028 = vlog2.f32 %v319_v29 }
 0x24c   : > { %v9011_v39 = vpop.eup %9010  ;;  %6969 = vst [vmem:[%s12522_s20 + $0x398] sm:$0xff] %v6457_v35  ;;  %v6458_v40 = vsub.f32 %v4015_v32, %v5551_v36  ;;  %v7603_v41 = vadd.f32 -0.99, %v9009_v37  ;;  %v4924_v42 = vsub.f32 1.0, %v9009_v37  ;;  %9030 = vlog2.f32 %v320_v33  ;;  %v321_v32 = vld [vmem:[%s12465_s8 + $0x410] sm:$0xff]  ;;  %v322_v35 = vld [vmem:[%s12465_s8 + $0x418] sm:$0xff] }
 0x24d   : > { %v9013_v43 = vpop.eup %9012  ;;  %9032 = vlog2.f32 %v7602_v52  ;;  %v7604_v44 = vadd.f32 -0.99, %v9011_v39  ;;  %v4925_v46 = vsub.f32 1.0, %v9011_v39  ;;  %v323_v52 = vld [vmem:[%s12465_s8 + $0x420] sm:$0xff] }
 0x24e   : > { %v9015_v45 = vpop.eup %9014  ;;  %6970 = vst [vmem:[%s12522_s20 + $0x3a0] sm:$0xff] %v6458_v40  ;;  %9034 = vlog2.f32 %v4923_v38  ;;  %v7605_v48 = vadd.f32 -0.99, %v9013_v43  ;;  %v4926_v51 = vsub.f32 1.0, %v9013_v43  ;;  %v324_v40 = vld [vmem:[%s12465_s8 + $0x428] sm:$0xff] }
 0x24f   : > { %v9017_v47 = vpop.eup %9016  ;;  %9036 = vlog2.f32 %v7603_v41  ;;  %v947_v49 = vmul.f32 0.6931472, %v9015_v45 }
 0x250   : > { %v9019_v50 = vpop.eup %9018  ;;  %9038 = vlog2.f32 %v4924_v42  ;;  %v949_v53 = vmul.f32 0.6931472, %v9017_v47 }
 0x251   : > { %v9021_v54 = vpop.eup %9020  ;;  %9040 = vlog2.f32 %v7604_v44  ;;  %v1855_v55 = vmul.f32 %v12793_v31, %v947_v49  ;;  %v951_v56 = vmul.f32 0.6931472, %v9019_v50 }
 0x252   : > { %v9023_v57 = vpop.eup %9022  ;;  %9042 = vlog2.f32 %v4925_v46  ;;  %v1856_v58 = vmul.f32 %v12793_v31, %v949_v53  ;;  %v953_v59 = vmul.f32 0.6931472, %v9021_v54 }
 0x253   : > { %v9025_v60 = vpop.eup %9024  ;;  %9044 = vlog2.f32 %v7605_v48  ;;  %v2488_v61 = vmul.f32 1.442695, %v1855_v55  ;;  %v1857_v62 = vmul.f32 %v12793_v31, %v951_v56  ;;  %v955_v63 = vmul.f32 0.6931472, %v9023_v57 }
 0x254   : > { %v9027_v0 = vpop.eup %9026  ;;  %9046 = vlog2.f32 %v4926_v51  ;;  %v2490_v1 = vmul.f32 1.442695, %v1856_v58  ;;  %v1858_v2 = vmul.f32 %v12793_v31, %v953_v59  ;;  %v957_v3 = vmul.f32 0.6931472, %v9025_v60 }
 0x255   : > { %v9029_v4 = vpop.eup %9028  ;;  %9048 = vpow2.f32 %v2488_v61  ;;  %v2492_v5 = vmul.f32 1.442695, %v1857_v62  ;;  %v1859_v8 = vmul.f32 %v12793_v31, %v955_v63  ;;  %v959_v9 = vmul.f32 0.6931472, %v9027_v0 }
 0x256   : > { %v9031_v10 = vpop.eup %9030  ;;  %9050 = vpow2.f32 %v2490_v1  ;;  %v2494_v11 = vmul.f32 1.442695, %v1858_v2  ;;  %v1860_v12 = vmul.f32 %v12793_v31, %v957_v3  ;;  %v961_v6 = vmul.f32 0.6931472, %v9029_v4 }
 0x257   : > { %v9033_v13 = vpop.eup %9032  ;;  %9052 = vpow2.f32 %v2492_v5  ;;  %v2496_v14 = vmul.f32 1.442695, %v1859_v8  ;;  %v1861_v15 = vmul.f32 %v12793_v31, %v959_v9  ;;  %v963_v16 = vmul.f32 0.6931472, %v9031_v10 }
 0x258   : > { %v9035_v17 = vpop.eup %9034  ;;  %v4017_v7 = vmul.f32 0.6931472, %v9033_v13  ;;  %9054 = vpow2.f32 %v2494_v11  ;;  %v2498_v18 = vmul.f32 1.442695, %v1860_v12  ;;  %v1862_v19 = vmul.f32 %v12793_v31, %v961_v6 }
 0x259   : > { %v9037_v20 = vpop.eup %9036  ;;  %v5553_v21 = vmul.f32 0.6931472, %v9035_v17  ;;  %9056 = vpow2.f32 %v2496_v14  ;;  %v2500_v22 = vmul.f32 1.442695, %v1861_v15  ;;  %v1863_v23 = vmul.f32 %v12793_v31, %v963_v16  ;;  %v12890_v14 = vld [vmem:[#allocation5] ss:$0 sm:$0xff] }
 0x25a   : > { %v9039_v24 = vpop.eup %9038  ;;  %v4019_v25 = vmul.f32 0.6931472, %v9037_v20  ;;  %9058 = vpow2.f32 %v2498_v18  ;;  %v2502_v26 = vmul.f32 1.442695, %v1862_v19 }
 0x25b   : > { %v9041_v27 = vpop.eup %9040  ;;  %v6459_v28 = vsub.f32 %v4017_v7, %v5553_v21  ;;  %v5555_v29 = vmul.f32 0.6931472, %v9039_v24  ;;  %9060 = vpow2.f32 %v2500_v22  ;;  %v2504_v30 = vmul.f32 1.442695, %v1863_v23 }
 0x25c   : > { %v9043_v33 = vpop.eup %9042  ;;  %v4021_v34 = vmul.f32 0.6931472, %v9041_v27  ;;  %9062 = vpow2.f32 %v2502_v26 }
 0x25d   : > { %v9045_v36 = vpop.eup %9044  ;;  %6971 = vst [vmem:[%s12522_s20 + $0x3a8] sm:$0xff] %v6459_v28  ;;  %v6460_v31 = vsub.f32 %v4019_v25, %v5555_v29  ;;  %v5557_v37 = vmul.f32 0.6931472, %v9043_v33  ;;  %9064 = vpow2.f32 %v2504_v30 }
 0x25e   : > { %v9047_v38 = vpop.eup %9046  ;;  %v4023_v39 = vmul.f32 0.6931472, %v9045_v36  ;;  %9066 = vlog2.f32 %v321_v32 }
 0x25f   : > { %v9049_v41 = vpop.eup %9048  ;;  %6972 = vst [vmem:[%s12522_s20 + $0x3b0] sm:$0xff] %v6460_v31  ;;  %v6461_v42 = vsub.f32 %v4021_v34, %v5557_v37  ;;  %v5559_v43 = vmul.f32 0.6931472, %v9047_v38  ;;  %9068 = vlog2.f32 %v322_v35 }
 0x260   : > { %v9051_v44 = vpop.eup %9050  ;;  %v7606_v45 = vadd.f32 -0.99, %v9049_v41  ;;  %v4927_v46 = vsub.f32 1.0, %v9049_v41  ;;  %9070 = vlog2.f32 %v323_v52 }
 0x261   : > { %v9053_v47 = vpop.eup %9052  ;;  %6973 = vst [vmem:[%s12522_s20 + $0x3b8] sm:$0xff] %v6461_v42  ;;  %v6462_v48 = vsub.f32 %v4023_v39, %v5559_v43  ;;  %v7607_v49 = vadd.f32 -0.99, %v9051_v44  ;;  %v4928_v50 = vsub.f32 1.0, %v9051_v44  ;;  %9072 = vlog2.f32 %v324_v40 }
 0x262   : > { %v9055_v51 = vpop.eup %9054  ;;  %9074 = vlog2.f32 %v7606_v45  ;;  %v7608_v53 = vadd.f32 -0.99, %v9053_v47  ;;  %v4929_v55 = vsub.f32 1.0, %v9053_v47 }
 0x263   : > { %v9057_v54 = vpop.eup %9056  ;;  %6974 = vst [vmem:[%s12522_s20 + $0x3c0] sm:$0xff] %v6462_v48  ;;  %9076 = vlog2.f32 %v4927_v46  ;;  %v7609_v57 = vadd.f32 -0.99, %v9055_v51  ;;  %v4930_v59 = vsub.f32 1.0, %v9055_v51  ;;  %v325_v46 = vld [vmem:[%s12465_s8 + $0x430] sm:$0xff] }
 0x264   : > { %v9059_v56 = vpop.eup %9058  ;;  %9078 = vlog2.f32 %v7607_v49  ;;  %v7610_v61 = vadd.f32 -0.99, %v9057_v54  ;;  %v4931_v63 = vsub.f32 1.0, %v9057_v54  ;;  %v327_v54 = vld [vmem:[%s12465_s8 + $0x440] sm:$0xff] }
 0x265   : > { %v9061_v58 = vpop.eup %9060  ;;  %9080 = vlog2.f32 %v4928_v50  ;;  %v7611_v1 = vadd.f32 -0.99, %v9059_v56  ;;  %v4932_v3 = vsub.f32 1.0, %v9059_v56  ;;  %v326_v50 = vld [vmem:[%s12465_s8 + $0x438] sm:$0xff] }
 0x266   : > { %v9063_v60 = vpop.eup %9062  ;;  %9082 = vlog2.f32 %v7608_v53  ;;  %v7612_v8 = vadd.f32 -0.99, %v9061_v58  ;;  %v4933_v11 = vsub.f32 1.0, %v9061_v58  ;;  %v328_v58 = vld [vmem:[%s12465_s8 + $0x448] sm:$0xff] }
 0x267   : > { %v9065_v62 = vpop.eup %9064  ;;  %9084 = vlog2.f32 %v4929_v55  ;;  %v7613_v13 = vadd.f32 -0.99, %v9063_v60  ;;  %v4934_v18 = vsub.f32 1.0, %v9063_v60 }
 0x268   : > { %v9067_v0 = vpop.eup %9066  ;;  %9086 = vlog2.f32 %v7609_v57  ;;  %v7614_v22 = vadd.f32 -0.99, %v9065_v62  ;;  %v4935_v26 = vsub.f32 1.0, %v9065_v62 }
 0x269   : > { %v9069_v2 = vpop.eup %9068  ;;  %9088 = vlog2.f32 %v4930_v59  ;;  %v965_v4 = vmul.f32 0.6931472, %v9067_v0 }
 0x26a   : > { %v9071_v5 = vpop.eup %9070  ;;  %9090 = vlog2.f32 %v7610_v61  ;;  %v967_v9 = vmul.f32 0.6931472, %v9069_v2  ;;  %v329_v61 = vld [vmem:[%s12465_s8 + $0x450] sm:$0xff] }
 0x26b   : > { %v9073_v10 = vpop.eup %9072  ;;  %9092 = vlog2.f32 %v4931_v63  ;;  %v969_v12 = vmul.f32 0.6931472, %v9071_v5  ;;  %v1864_v15 = vmul.f32 %v12890_v14, %v965_v4  ;;  %v331_v4 = vld [vmem:[%s12465_s8 + $0x460] sm:$0xff] }
 0x26c   : > { %v9075_v6 = vpop.eup %9074  ;;  %9094 = vlog2.f32 %v7611_v1  ;;  %v971_v16 = vmul.f32 0.6931472, %v9073_v10  ;;  %v1865_v19 = vmul.f32 %v12890_v14, %v967_v9  ;;  %v330_v1 = vld [vmem:[%s12465_s8 + $0x458] sm:$0xff]  ;;  %v332_v10 = vld [vmem:[%s12465_s8 + $0x468] sm:$0xff] }
 0x26d   : > { %v9077_v17 = vpop.eup %9076  ;;  %v4025_v7 = vmul.f32 0.6931472, %v9075_v6  ;;  %9096 = vlog2.f32 %v4932_v3  ;;  %v1866_v23 = vmul.f32 %v12890_v14, %v969_v12  ;;  %v2506_v32 = vmul.f32 1.442695, %v1864_v15  ;;  %v333_v6 = vld [vmem:[%s12465_s8 + $0x470] sm:$0xff] }
 0x26e   : > { %v9079_v20 = vpop.eup %9078  ;;  %v5561_v21 = vmul.f32 0.6931472, %v9077_v17  ;;  %9098 = vlog2.f32 %v7612_v8  ;;  %v1867_v27 = vmul.f32 %v12890_v14, %v971_v16  ;;  %v2508_v35 = vmul.f32 1.442695, %v1865_v19 }
 0x26f   : > { %v9081_v24 = vpop.eup %9080  ;;  %v4027_v25 = vmul.f32 0.6931472, %v9079_v20  ;;  %9100 = vlog2.f32 %v4933_v11  ;;  %v2510_v52 = vmul.f32 1.442695, %v1866_v23 }
 0x270   : > { %v9083_v28 = vpop.eup %9082  ;;  %v6463_v29 = vsub.f32 %v4025_v7, %v5561_v21  ;;  %v5563_v30 = vmul.f32 0.6931472, %v9081_v24  ;;  %9102 = vlog2.f32 %v7613_v13  ;;  %v2512_v40 = vmul.f32 1.442695, %v1867_v27 }
 0x271   : > { %v9085_v33 = vpop.eup %9084  ;;  %v4029_v34 = vmul.f32 0.6931472, %v9083_v28  ;;  %9104 = vlog2.f32 %v4934_v18 }
 0x272   : > { %v9087_v36 = vpop.eup %9086  ;;  %6975 = vst [vmem:[%s12522_s20 + $0x3c8] sm:$0xff] %v6463_v29  ;;  %v6464_v31 = vsub.f32 %v4027_v25, %v5563_v30  ;;  %v5565_v37 = vmul.f32 0.6931472, %v9085_v33  ;;  %9106 = vlog2.f32 %v7614_v22 }
 0x273   : > { %v9089_v38 = vpop.eup %9088  ;;  %v4031_v39 = vmul.f32 0.6931472, %v9087_v36  ;;  %9108 = vlog2.f32 %v4935_v26 }
 0x274   : > { %v9091_v41 = vpop.eup %9090  ;;  %6976 = vst [vmem:[%s12522_s20 + $0x3d0] sm:$0xff] %v6464_v31  ;;  %v6465_v42 = vsub.f32 %v4029_v34, %v5565_v37  ;;  %v5567_v43 = vmul.f32 0.6931472, %v9089_v38  ;;  %9110 = vpow2.f32 %v2506_v32 }
 0x275   : > { %v9093_v44 = vpop.eup %9092  ;;  %v4033_v45 = vmul.f32 0.6931472, %v9091_v41  ;;  %9112 = vpow2.f32 %v2508_v35 }
 0x276   : > { %v9095_v47 = vpop.eup %9094  ;;  %6977 = vst [vmem:[%s12522_s20 + $0x3d8] sm:$0xff] %v6465_v42  ;;  %v6466_v48 = vsub.f32 %v4031_v39, %v5567_v43  ;;  %v5569_v49 = vmul.f32 0.6931472, %v9093_v44  ;;  %9114 = vpow2.f32 %v2510_v52 }
 0x277   : > { %v9097_v51 = vpop.eup %9096  ;;  %v4035_v53 = vmul.f32 0.6931472, %v9095_v47  ;;  %9116 = vpow2.f32 %v2512_v40 }
 0x278   : > { %v9099_v55 = vpop.eup %9098  ;;  %6978 = vst [vmem:[%s12522_s20 + $0x3e0] sm:$0xff] %v6466_v48  ;;  %v6467_v56 = vsub.f32 %v4033_v45, %v5569_v49  ;;  %v5571_v57 = vmul.f32 0.6931472, %v9097_v51  ;;  %9118 = vlog2.f32 %v325_v46 }
 0x279   : > { %v9101_v59 = vpop.eup %9100  ;;  %v4037_v60 = vmul.f32 0.6931472, %v9099_v55  ;;  %9120 = vlog2.f32 %v326_v50 }
 0x27a   : > { %v9103_v62 = vpop.eup %9102  ;;  %6979 = vst [vmem:[%s12522_s20 + $0x3e8] sm:$0xff] %v6467_v56  ;;  %v6468_v63 = vsub.f32 %v4035_v53, %v5571_v57  ;;  %v5573_v0 = vmul.f32 0.6931472, %v9101_v59  ;;  %9122 = vlog2.f32 %v327_v54 }
 0x27b   : > { %v9105_v2 = vpop.eup %9104  ;;  %v4039_v3 = vmul.f32 0.6931472, %v9103_v62  ;;  %9124 = vlog2.f32 %v328_v58 }
 0x27c   : > { %v9107_v5 = vpop.eup %9106  ;;  %6980 = vst [vmem:[%s12522_s20 + $0x3f0] sm:$0xff] %v6468_v63  ;;  %v6469_v8 = vsub.f32 %v4037_v60, %v5573_v0  ;;  %v5575_v9 = vmul.f32 0.6931472, %v9105_v2  ;;  %9126 = vlog2.f32 %v329_v61 }
 0x27d   : > { %v9109_v11 = vpop.eup %9108  ;;  %v4041_v12 = vmul.f32 0.6931472, %v9107_v5  ;;  %9128 = vlog2.f32 %v330_v1 }
 0x27e   : > { %v9111_v13 = vpop.eup %9110  ;;  %6981 = vst [vmem:[%s12522_s20 + $0x3f8] sm:$0xff] %v6469_v8  ;;  %v6470_v15 = vsub.f32 %v4039_v3, %v5575_v9  ;;  %v5577_v16 = vmul.f32 0.6931472, %v9109_v11  ;;  %9130 = vlog2.f32 %v331_v4 }
 0x27f   : > { %v9113_v17 = vpop.eup %9112  ;;  %v7615_v7 = vadd.f32 -0.99, %v9111_v13  ;;  %v4936_v18 = vsub.f32 1.0, %v9111_v13  ;;  %9132 = vlog2.f32 %v332_v10 }
 0x280   : > { %v9115_v19 = vpop.eup %9114  ;;  %6982 = vst [vmem:[%s12522_s20 + $0x400] sm:$0xff] %v6470_v15  ;;  %v6471_v20 = vsub.f32 %v4041_v12, %v5577_v16  ;;  %v7616_v21 = vadd.f32 -0.99, %v9113_v17  ;;  %v4937_v22 = vsub.f32 1.0, %v9113_v17  ;;  %9134 = vlog2.f32 %v333_v6  ;;  %v334_v12 = vld [vmem:[%s12465_s8 + $0x478] sm:$0xff]  ;;  %v335_v15 = vld [vmem:[%s12465_s8 + $0x480] sm:$0xff] }
 0x281   : > { %v9117_v23 = vpop.eup %9116  ;;  %9136 = vlog2.f32 %v7615_v7  ;;  %v7617_v24 = vadd.f32 -0.99, %v9115_v19  ;;  %v4938_v26 = vsub.f32 1.0, %v9115_v19 }
 0x282   : > { %v9119_v25 = vpop.eup %9118  ;;  %6983 = vst [vmem:[%s12522_s20 + $0x408] sm:$0xff] %v6471_v20  ;;  %9138 = vlog2.f32 %v4936_v18  ;;  %v7618_v28 = vadd.f32 -0.99, %v9117_v23  ;;  %v4939_v32 = vsub.f32 1.0, %v9117_v23  ;;  %v336_v18 = vld [vmem:[%s12465_s8 + $0x488] sm:$0xff] }
 0x283   : > { %v9121_v27 = vpop.eup %9120  ;;  %9140 = vlog2.f32 %v7616_v21  ;;  %v973_v29 = vmul.f32 0.6931472, %v9119_v25  ;;  %v337_v21 = vld [vmem:[%s12465_s8 + $0x490] sm:$0xff] }
 0x284   : > { %v9123_v30 = vpop.eup %9122  ;;  %9142 = vlog2.f32 %v4937_v22  ;;  %v975_v33 = vmul.f32 0.6931472, %v9121_v27 }
 0x285   : > { %v9125_v34 = vpop.eup %9124  ;;  %9144 = vlog2.f32 %v7617_v24  ;;  %v1868_v35 = vmul.f32 %v12890_v14, %v973_v29  ;;  %v977_v36 = vmul.f32 0.6931472, %v9123_v30 }
 0x286   : > { %v9127_v31 = vpop.eup %9126  ;;  %9146 = vlog2.f32 %v4938_v26  ;;  %v1869_v37 = vmul.f32 %v12890_v14, %v975_v33  ;;  %v979_v52 = vmul.f32 0.6931472, %v9125_v34 }
 0x287   : > { %v9129_v38 = vpop.eup %9128  ;;  %9148 = vlog2.f32 %v7618_v28  ;;  %v2514_v39 = vmul.f32 1.442695, %v1868_v35  ;;  %v1870_v40 = vmul.f32 %v12890_v14, %v977_v36  ;;  %v981_v41 = vmul.f32 0.6931472, %v9127_v31 }
 0x288   : > { %v9131_v42 = vpop.eup %9130  ;;  %9150 = vlog2.f32 %v4939_v32  ;;  %v2516_v43 = vmul.f32 1.442695, %v1869_v37  ;;  %v1871_v44 = vmul.f32 %v12890_v14, %v979_v52  ;;  %v983_v45 = vmul.f32 0.6931472, %v9129_v38 }
 0x289   : > { %v9133_v46 = vpop.eup %9132  ;;  %9152 = vpow2.f32 %v2514_v39  ;;  %v2518_v47 = vmul.f32 1.442695, %v1870_v40  ;;  %v1872_v48 = vmul.f32 %v12890_v14, %v981_v41  ;;  %v985_v49 = vmul.f32 0.6931472, %v9131_v42 }
 0x28a   : > { %v9135_v50 = vpop.eup %9134  ;;  %9154 = vpow2.f32 %v2516_v43  ;;  %v2520_v51 = vmul.f32 1.442695, %v1871_v44  ;;  %v1873_v53 = vmul.f32 %v12890_v14, %v983_v45  ;;  %v987_v54 = vmul.f32 0.6931472, %v9133_v46 }
 0x28b   : > { %v9137_v55 = vpop.eup %9136  ;;  %9156 = vpow2.f32 %v2518_v47  ;;  %v2522_v56 = vmul.f32 1.442695, %v1872_v48  ;;  %v1874_v57 = vmul.f32 %v12890_v14, %v985_v49  ;;  %v989_v58 = vmul.f32 0.6931472, %v9135_v50 }
 0x28c   : > { %v9139_v59 = vpop.eup %9138  ;;  %v4043_v60 = vmul.f32 0.6931472, %v9137_v55  ;;  %9158 = vpow2.f32 %v2520_v51  ;;  %v2524_v61 = vmul.f32 1.442695, %v1873_v53  ;;  %v1875_v62 = vmul.f32 %v12890_v14, %v987_v54 }
 0x28d   : > { %v9141_v63 = vpop.eup %9140  ;;  %v5579_v0 = vmul.f32 0.6931472, %v9139_v59  ;;  %9160 = vpow2.f32 %v2522_v56  ;;  %v2526_v1 = vmul.f32 1.442695, %v1874_v57  ;;  %v1876_v2 = vmul.f32 %v12890_v14, %v989_v58 }
 0x28e   : > { %v9143_v3 = vpop.eup %9142  ;;  %v4045_v4 = vmul.f32 0.6931472, %v9141_v63  ;;  %9162 = vpow2.f32 %v2524_v61  ;;  %v2528_v5 = vmul.f32 1.442695, %v1875_v62 }
 0x28f   : > { %v9145_v8 = vpop.eup %9144  ;;  %v6472_v9 = vsub.f32 %v4043_v60, %v5579_v0  ;;  %v5581_v10 = vmul.f32 0.6931472, %v9143_v3  ;;  %9164 = vpow2.f32 %v2526_v1  ;;  %v2530_v11 = vmul.f32 1.442695, %v1876_v2 }
 0x290   : > { %v9147_v6 = vpop.eup %9146  ;;  %v4047_v13 = vmul.f32 0.6931472, %v9145_v8  ;;  %9166 = vpow2.f32 %v2528_v5 }
 0x291   : > { %v9149_v16 = vpop.eup %9148  ;;  %6984 = vst [vmem:[%s12522_s20 + $0x410] sm:$0xff] %v6472_v9  ;;  %v6473_v17 = vsub.f32 %v4045_v4, %v5581_v10  ;;  %v5583_v7 = vmul.f32 0.6931472, %v9147_v6  ;;  %9168 = vpow2.f32 %v2530_v11 }
 0x292   : > { %v9151_v19 = vpop.eup %9150  ;;  %v4049_v20 = vmul.f32 0.6931472, %v9149_v16  ;;  %9170 = vlog2.f32 %v334_v12 }
 0x293   : > { %v9153_v22 = vpop.eup %9152  ;;  %6985 = vst [vmem:[%s12522_s20 + $0x418] sm:$0xff] %v6473_v17  ;;  %v6474_v23 = vsub.f32 %v4047_v13, %v5583_v7  ;;  %v5585_v24 = vmul.f32 0.6931472, %v9151_v19  ;;  %9172 = vlog2.f32 %v335_v15 }
 0x294   : > { %v9155_v25 = vpop.eup %9154  ;;  %v7619_v26 = vadd.f32 -0.99, %v9153_v22  ;;  %v4940_v27 = vsub.f32 1.0, %v9153_v22  ;;  %9174 = vlog2.f32 %v336_v18 }
 0x295   : > { %v9157_v28 = vpop.eup %9156  ;;  %6986 = vst [vmem:[%s12522_s20 + $0x420] sm:$0xff] %v6474_v23  ;;  %v6475_v29 = vsub.f32 %v4049_v20, %v5585_v24  ;;  %v7620_v30 = vadd.f32 -0.99, %v9155_v25  ;;  %v4941_v32 = vsub.f32 1.0, %v9155_v25  ;;  %9176 = vlog2.f32 %v337_v21 }
 0x296   : > { %v9159_v33 = vpop.eup %9158  ;;  %9178 = vlog2.f32 %v7619_v26  ;;  %v7621_v34 = vadd.f32 -0.99, %v9157_v28  ;;  %v4942_v36 = vsub.f32 1.0, %v9157_v28 }
 0x297   : > { %v9161_v35 = vpop.eup %9160  ;;  %6987 = vst [vmem:[%s12522_s20 + $0x428] sm:$0xff] %v6475_v29  ;;  %9180 = vlog2.f32 %v4940_v27  ;;  %v7622_v37 = vadd.f32 -0.99, %v9159_v33  ;;  %v4943_v38 = vsub.f32 1.0, %v9159_v33  ;;  %v338_v27 = vld [vmem:[%s12465_s8 + $0x498] sm:$0xff] }
 0x298   : > { %v9163_v31 = vpop.eup %9162  ;;  %9182 = vlog2.f32 %v7620_v30  ;;  %v7623_v40 = vadd.f32 -0.99, %v9161_v35  ;;  %v4944_v42 = vsub.f32 1.0, %v9161_v35  ;;  %v340_v35 = vld [vmem:[%s12465_s8 + $0x4a8] sm:$0xff] }
 0x299   : > { %v9165_v52 = vpop.eup %9164  ;;  %9184 = vlog2.f32 %v4941_v32  ;;  %v7624_v44 = vadd.f32 -0.99, %v9163_v31  ;;  %v4945_v46 = vsub.f32 1.0, %v9163_v31  ;;  %v339_v32 = vld [vmem:[%s12465_s8 + $0x4a0] sm:$0xff] }
 0x29a   : > { %v9167_v39 = vpop.eup %9166  ;;  %9186 = vlog2.f32 %v7621_v34  ;;  %v7625_v49 = vadd.f32 -0.99, %v9165_v52  ;;  %v4946_v53 = vsub.f32 1.0, %v9165_v52  ;;  %v341_v52 = vld [vmem:[%s12465_s8 + $0x4b0] sm:$0xff] }
 0x29b   : > { %v9169_v41 = vpop.eup %9168  ;;  %9188 = vlog2.f32 %v4942_v36  ;;  %v7626_v56 = vadd.f32 -0.99, %v9167_v39  ;;  %v4947_v61 = vsub.f32 1.0, %v9167_v39 }
 0x29c   : > { %v9171_v43 = vpop.eup %9170  ;;  %9190 = vlog2.f32 %v7622_v37  ;;  %v7627_v1 = vadd.f32 -0.99, %v9169_v41  ;;  %v4948_v5 = vsub.f32 1.0, %v9169_v41 }
 0x29d   : > { %v9173_v45 = vpop.eup %9172  ;;  %9192 = vlog2.f32 %v4943_v38  ;;  %v991_v47 = vmul.f32 0.6931472, %v9171_v43 }
 0x29e   : > { %v9175_v48 = vpop.eup %9174  ;;  %9194 = vlog2.f32 %v7623_v40  ;;  %v993_v50 = vmul.f32 0.6931472, %v9173_v45  ;;  %v342_v40 = vld [vmem:[%s12465_s8 + $0x4b8] sm:$0xff] }
 0x29f   : > { %v9177_v51 = vpop.eup %9176  ;;  %9196 = vlog2.f32 %v4944_v42  ;;  %v995_v54 = vmul.f32 0.6931472, %v9175_v48  ;;  %v1877_v57 = vmul.f32 %v12890_v14, %v991_v47  ;;  %v344_v47 = vld [vmem:[%s12465_s8 + $0x4c8] sm:$0xff] }
 0x2a0   : > { %v9179_v55 = vpop.eup %9178  ;;  %9198 = vlog2.f32 %v7624_v44  ;;  %v997_v58 = vmul.f32 0.6931472, %v9177_v51  ;;  %v1878_v62 = vmul.f32 %v12890_v14, %v993_v50  ;;  %v343_v44 = vld [vmem:[%s12465_s8 + $0x4c0] sm:$0xff]  ;;  %v345_v51 = vld [vmem:[%s12465_s8 + $0x4d0] sm:$0xff] }
 0x2a1   : > { %v9181_v59 = vpop.eup %9180  ;;  %v4051_v60 = vmul.f32 0.6931472, %v9179_v55  ;;  %9200 = vlog2.f32 %v4945_v46  ;;  %v1879_v2 = vmul.f32 %v12890_v14, %v995_v54  ;;  %v2532_v12 = vmul.f32 1.442695, %v1877_v57  ;;  %v346_v55 = vld [vmem:[%s12465_s8 + $0x4d8] sm:$0xff] }
 0x2a2   : > { %v9183_v63 = vpop.eup %9182  ;;  %v5587_v0 = vmul.f32 0.6931472, %v9181_v59  ;;  %9202 = vlog2.f32 %v7625_v49  ;;  %v1880_v8 = vmul.f32 %v12890_v14, %v997_v58  ;;  %v2534_v15 = vmul.f32 1.442695, %v1878_v62 }
 0x2a3   : > { %v9185_v3 = vpop.eup %9184  ;;  %v4053_v4 = vmul.f32 0.6931472, %v9183_v63  ;;  %9204 = vlog2.f32 %v4946_v53  ;;  %v2536_v18 = vmul.f32 1.442695, %v1879_v2 }
 0x2a4   : > { %v9187_v9 = vpop.eup %9186  ;;  %v6476_v10 = vsub.f32 %v4051_v60, %v5587_v0  ;;  %v5589_v11 = vmul.f32 0.6931472, %v9185_v3  ;;  %9206 = vlog2.f32 %v7626_v56  ;;  %v2538_v21 = vmul.f32 1.442695, %v1880_v8 }
 0x2a5   : > { %v9189_v6 = vpop.eup %9188  ;;  %v4055_v13 = vmul.f32 0.6931472, %v9187_v9  ;;  %9208 = vlog2.f32 %v4947_v61 }
 0x2a6   : > { %v9191_v16 = vpop.eup %9190  ;;  %6988 = vst [vmem:[%s12522_s20 + $0x430] sm:$0xff] %v6476_v10  ;;  %v6477_v17 = vsub.f32 %v4053_v4, %v5589_v11  ;;  %v5591_v7 = vmul.f32 0.6931472, %v9189_v6  ;;  %9210 = vlog2.f32 %v7627_v1 }
 0x2a7   : > { %v9193_v19 = vpop.eup %9192  ;;  %v4057_v20 = vmul.f32 0.6931472, %v9191_v16  ;;  %9212 = vlog2.f32 %v4948_v5 }
 0x2a8   : > { %v9195_v22 = vpop.eup %9194  ;;  %6989 = vst [vmem:[%s12522_s20 + $0x438] sm:$0xff] %v6477_v17  ;;  %v6478_v23 = vsub.f32 %v4055_v13, %v5591_v7  ;;  %v5593_v24 = vmul.f32 0.6931472, %v9193_v19  ;;  %9214 = vpow2.f32 %v2532_v12 }
 0x2a9   : > { %v9197_v25 = vpop.eup %9196  ;;  %v4059_v26 = vmul.f32 0.6931472, %v9195_v22  ;;  %9216 = vpow2.f32 %v2534_v15 }
 0x2aa   : > { %v9199_v28 = vpop.eup %9198  ;;  %6990 = vst [vmem:[%s12522_s20 + $0x440] sm:$0xff] %v6478_v23  ;;  %v6479_v29 = vsub.f32 %v4057_v20, %v5593_v24  ;;  %v5595_v30 = vmul.f32 0.6931472, %v9197_v25  ;;  %9218 = vpow2.f32 %v2536_v18 }
 0x2ab   : > { %v9201_v33 = vpop.eup %9200  ;;  %v4061_v34 = vmul.f32 0.6931472, %v9199_v28  ;;  %9220 = vpow2.f32 %v2538_v21 }
 0x2ac   : > { %v9203_v36 = vpop.eup %9202  ;;  %6991 = vst [vmem:[%s12522_s20 + $0x448] sm:$0xff] %v6479_v29  ;;  %v6480_v31 = vsub.f32 %v4059_v26, %v5595_v30  ;;  %v5597_v37 = vmul.f32 0.6931472, %v9201_v33  ;;  %9222 = vlog2.f32 %v338_v27 }
 0x2ad   : > { %v9205_v38 = vpop.eup %9204  ;;  %v4063_v39 = vmul.f32 0.6931472, %v9203_v36  ;;  %9224 = vlog2.f32 %v339_v32 }
 0x2ae   : > { %v9207_v41 = vpop.eup %9206  ;;  %6992 = vst [vmem:[%s12522_s20 + $0x450] sm:$0xff] %v6480_v31  ;;  %v6481_v42 = vsub.f32 %v4061_v34, %v5597_v37  ;;  %v5599_v43 = vmul.f32 0.6931472, %v9205_v38  ;;  %9226 = vlog2.f32 %v340_v35 }
 0x2af   : > { %v9209_v45 = vpop.eup %9208  ;;  %v4065_v46 = vmul.f32 0.6931472, %v9207_v41  ;;  %9228 = vlog2.f32 %v341_v52 }
 0x2b0   : > { %v9211_v48 = vpop.eup %9210  ;;  %6993 = vst [vmem:[%s12522_s20 + $0x458] sm:$0xff] %v6481_v42  ;;  %v6482_v49 = vsub.f32 %v4063_v39, %v5599_v43  ;;  %v5601_v50 = vmul.f32 0.6931472, %v9209_v45  ;;  %9230 = vlog2.f32 %v342_v40 }
 0x2b1   : > { %v9213_v53 = vpop.eup %9212  ;;  %v4067_v54 = vmul.f32 0.6931472, %v9211_v48  ;;  %9232 = vlog2.f32 %v343_v44 }
 0x2b2   : > { %v9215_v56 = vpop.eup %9214  ;;  %6994 = vst [vmem:[%s12522_s20 + $0x460] sm:$0xff] %v6482_v49  ;;  %v6483_v57 = vsub.f32 %v4065_v46, %v5601_v50  ;;  %v5603_v58 = vmul.f32 0.6931472, %v9213_v53  ;;  %9234 = vlog2.f32 %v344_v47 }
 0x2b3   : > { %v9217_v59 = vpop.eup %9216  ;;  %v7628_v60 = vadd.f32 -0.99, %v9215_v56  ;;  %v4949_v61 = vsub.f32 1.0, %v9215_v56  ;;  %9236 = vlog2.f32 %v345_v51 }
 0x2b4   : > { %v9219_v62 = vpop.eup %9218  ;;  %6995 = vst [vmem:[%s12522_s20 + $0x468] sm:$0xff] %v6483_v57  ;;  %v6484_v63 = vsub.f32 %v4067_v54, %v5603_v58  ;;  %v7629_v0 = vadd.f32 -0.99, %v9217_v59  ;;  %v4950_v1 = vsub.f32 1.0, %v9217_v59  ;;  %9238 = vlog2.f32 %v346_v55  ;;  %v347_v54 = vld [vmem:[%s12465_s8 + $0x4e0] sm:$0xff]  ;;  %v348_v57 = vld [vmem:[%s12465_s8 + $0x4e8] sm:$0xff] }
 0x2b5   : > { %v9221_v2 = vpop.eup %9220  ;;  %9240 = vlog2.f32 %v7628_v60  ;;  %v7630_v3 = vadd.f32 -0.99, %v9219_v62  ;;  %v4951_v5 = vsub.f32 1.0, %v9219_v62 }
 0x2b6   : > { %v9223_v4 = vpop.eup %9222  ;;  %6996 = vst [vmem:[%s12522_s20 + $0x470] sm:$0xff] %v6484_v63  ;;  %9242 = vlog2.f32 %v4949_v61  ;;  %v7631_v9 = vadd.f32 -0.99, %v9221_v2  ;;  %v4952_v12 = vsub.f32 1.0, %v9221_v2  ;;  %v349_v61 = vld [vmem:[%s12465_s8 + $0x4f0] sm:$0xff] }
 0x2b7   : > { %v9225_v8 = vpop.eup %9224  ;;  %9244 = vlog2.f32 %v7629_v0  ;;  %v999_v10 = vmul.f32 0.6931472, %v9223_v4  ;;  %v350_v0 = vld [vmem:[%s12465_s8 + $0x4f8] sm:$0xff] }
 0x2b8   : > { %v9227_v11 = vpop.eup %9226  ;;  %9246 = vlog2.f32 %v4950_v1  ;;  %v1001_v6 = vmul.f32 0.6931472, %v9225_v8 }
 0x2b9   : > { %v9229_v13 = vpop.eup %9228  ;;  %9248 = vlog2.f32 %v7630_v3  ;;  %v1881_v15 = vmul.f32 %v12890_v14, %v999_v10  ;;  %v1003_v16 = vmul.f32 0.6931472, %v9227_v11 }
 0x2ba   : > { %v9231_v17 = vpop.eup %9230  ;;  %9250 = vlog2.f32 %v4951_v5  ;;  %v1882_v7 = vmul.f32 %v12890_v14, %v1001_v6  ;;  %v1005_v18 = vmul.f32 0.6931472, %v9229_v13 }
 0x2bb   : > { %v9233_v19 = vpop.eup %9232  ;;  %9252 = vlog2.f32 %v7631_v9  ;;  %v2540_v20 = vmul.f32 1.442695, %v1881_v15  ;;  %v1883_v21 = vmul.f32 %v12890_v14, %v1003_v16  ;;  %v1007_v22 = vmul.f32 0.6931472, %v9231_v17 }
 0x2bc   : > { %v9235_v23 = vpop.eup %9234  ;;  %9254 = vlog2.f32 %v4952_v12  ;;  %v2542_v24 = vmul.f32 1.442695, %v1882_v7  ;;  %v1884_v25 = vmul.f32 %v12890_v14, %v1005_v18  ;;  %v1009_v26 = vmul.f32 0.6931472, %v9233_v19 }
 0x2bd   : > { %v9237_v27 = vpop.eup %9236  ;;  %9256 = vpow2.f32 %v2540_v20  ;;  %v2544_v28 = vmul.f32 1.442695, %v1883_v21  ;;  %v1885_v29 = vmul.f32 %v12890_v14, %v1007_v22  ;;  %v1011_v30 = vmul.f32 0.6931472, %v9235_v23 }
 0x2be   : > { %v9239_v32 = vpop.eup %9238  ;;  %9258 = vpow2.f32 %v2542_v24  ;;  %v2546_v33 = vmul.f32 1.442695, %v1884_v25  ;;  %v1886_v34 = vmul.f32 %v12890_v14, %v1009_v26  ;;  %v1013_v35 = vmul.f32 0.6931472, %v9237_v27 }
 0x2bf   : > { %v9241_v36 = vpop.eup %9240  ;;  %9260 = vpow2.f32 %v2544_v28  ;;  %v2548_v31 = vmul.f32 1.442695, %v1885_v29  ;;  %v1887_v37 = vmul.f32 %v12890_v14, %v1011_v30  ;;  %v1015_v52 = vmul.f32 0.6931472, %v9239_v32 }
 0x2c0   : > { %v9243_v38 = vpop.eup %9242  ;;  %v4069_v39 = vmul.f32 0.6931472, %v9241_v36  ;;  %9262 = vpow2.f32 %v2546_v33  ;;  %v2550_v40 = vmul.f32 1.442695, %v1886_v34  ;;  %v1888_v41 = vmul.f32 %v12890_v14, %v1013_v35 }
 0x2c1   : > { %v9245_v42 = vpop.eup %9244  ;;  %v5605_v43 = vmul.f32 0.6931472, %v9243_v38  ;;  %9264 = vpow2.f32 %v2548_v31  ;;  %v2552_v44 = vmul.f32 1.442695, %v1887_v37  ;;  %v1889_v45 = vmul.f32 %v12890_v14, %v1015_v52 }
 0x2c2   : > { %v9247_v46 = vpop.eup %9246  ;;  %v4071_v47 = vmul.f32 0.6931472, %v9245_v42  ;;  %9266 = vpow2.f32 %v2550_v40  ;;  %v2554_v48 = vmul.f32 1.442695, %v1888_v41 }
 0x2c3   : > { %v9249_v49 = vpop.eup %9248  ;;  %v6485_v50 = vsub.f32 %v4069_v39, %v5605_v43  ;;  %v5607_v51 = vmul.f32 0.6931472, %v9247_v46  ;;  %9268 = vpow2.f32 %v2552_v44  ;;  %v2556_v53 = vmul.f32 1.442695, %v1889_v45 }
 0x2c4   : > { %v9251_v55 = vpop.eup %9250  ;;  %v4073_v56 = vmul.f32 0.6931472, %v9249_v49  ;;  %9270 = vpow2.f32 %v2554_v48 }
 0x2c5   : > { %v9253_v58 = vpop.eup %9252  ;;  %6997 = vst [vmem:[%s12522_s20 + $0x478] sm:$0xff] %v6485_v50  ;;  %v6486_v59 = vsub.f32 %v4071_v47, %v5607_v51  ;;  %v5609_v60 = vmul.f32 0.6931472, %v9251_v55  ;;  %9272 = vpow2.f32 %v2556_v53 }
 0x2c6   : > { %v9255_v62 = vpop.eup %9254  ;;  %v4075_v63 = vmul.f32 0.6931472, %v9253_v58  ;;  %9274 = vlog2.f32 %v347_v54 }
 0x2c7   : > { %v9257_v1 = vpop.eup %9256  ;;  %6998 = vst [vmem:[%s12522_s20 + $0x480] sm:$0xff] %v6486_v59  ;;  %v6487_v2 = vsub.f32 %v4073_v56, %v5609_v60  ;;  %v5611_v3 = vmul.f32 0.6931472, %v9255_v62  ;;  %9276 = vlog2.f32 %v348_v57 }
 0x2c8   : > { %v9259_v4 = vpop.eup %9258  ;;  %v7632_v5 = vadd.f32 -0.99, %v9257_v1  ;;  %v4953_v8 = vsub.f32 1.0, %v9257_v1  ;;  %9278 = vlog2.f32 %v349_v61 }
 0x2c9   : > { %v9261_v9 = vpop.eup %9260  ;;  %6999 = vst [vmem:[%s12522_s20 + $0x488] sm:$0xff] %v6487_v2  ;;  %v6488_v10 = vsub.f32 %v4075_v63, %v5611_v3  ;;  %v7633_v11 = vadd.f32 -0.99, %v9259_v4  ;;  %v4954_v12 = vsub.f32 1.0, %v9259_v4  ;;  %9280 = vlog2.f32 %v350_v0 }
 0x2ca   : > { %v9263_v6 = vpop.eup %9262  ;;  %9282 = vlog2.f32 %v7632_v5  ;;  %v7634_v13 = vadd.f32 -0.99, %v9261_v9  ;;  %v4955_v16 = vsub.f32 1.0, %v9261_v9  ;;  %v351_v5 = vld [vmem:[%s12465_s8 + $0x500] sm:$0xff] }
 0x2cb   : > { %v9265_v15 = vpop.eup %9264  ;;  %7000 = vst [vmem:[%s12522_s20 + $0x490] sm:$0xff] %v6488_v10  ;;  %9284 = vlog2.f32 %v4953_v8  ;;  %v7635_v7 = vadd.f32 -0.99, %v9263_v6  ;;  %v4956_v19 = vsub.f32 1.0, %v9263_v6 }
 0x2cc   : > { %v9267_v17 = vpop.eup %9266  ;;  %9286 = vlog2.f32 %v7633_v11  ;;  %v7636_v21 = vadd.f32 -0.99, %v9265_v15  ;;  %v4957_v23 = vsub.f32 1.0, %v9265_v15  ;;  %v352_v11 = vld [vmem:[%s12465_s8 + $0x508] sm:$0xff] }
 0x2cd   : > { %v9269_v18 = vpop.eup %9268  ;;  %9288 = vlog2.f32 %v4954_v12  ;;  %v7637_v25 = vadd.f32 -0.99, %v9267_v17  ;;  %v4958_v27 = vsub.f32 1.0, %v9267_v17 }
 0x2ce   : > { %v9271_v20 = vpop.eup %9270  ;;  %9290 = vlog2.f32 %v7634_v13  ;;  %v7638_v30 = vadd.f32 -0.99, %v9269_v18  ;;  %v4959_v34 = vsub.f32 1.0, %v9269_v18  ;;  %v353_v13 = vld [vmem:[%s12465_s8 + $0x510] sm:$0xff] }
 0x2cf   : > { %v9273_v22 = vpop.eup %9272  ;;  %9292 = vlog2.f32 %v4955_v16  ;;  %v7639_v31 = vadd.f32 -0.99, %v9271_v20  ;;  %v4960_v40 = vsub.f32 1.0, %v9271_v20  ;;  %v355_v20 = vld [vmem:[%s12465_s8 + $0x520] sm:$0xff] }
 0x2d0   : > { %v9275_v24 = vpop.eup %9274  ;;  %9294 = vlog2.f32 %v7635_v7  ;;  %v7640_v44 = vadd.f32 -0.99, %v9273_v22  ;;  %v4961_v48 = vsub.f32 1.0, %v9273_v22  ;;  %v354_v7 = vld [vmem:[%s12465_s8 + $0x518] sm:$0xff] }
 0x2d1   : > { %v9277_v26 = vpop.eup %9276  ;;  %9296 = vlog2.f32 %v4956_v19  ;;  %v1017_v28 = vmul.f32 0.6931472, %v9275_v24  ;;  %v356_v24 = vld [vmem:[%s12465_s8 + $0x528] sm:$0xff] }
 0x2d2   : > { %v9279_v29 = vpop.eup %9278  ;;  %9298 = vlog2.f32 %v7636_v21  ;;  %v1019_v32 = vmul.f32 0.6931472, %v9277_v26 }
 0x2d3   : > { %v9281_v33 = vpop.eup %9280  ;;  %9300 = vlog2.f32 %v4957_v23  ;;  %v1021_v35 = vmul.f32 0.6931472, %v9279_v29  ;;  %v1890_v37 = vmul.f32 %v12890_v14, %v1017_v28 }
 0x2d4   : > { %v9283_v36 = vpop.eup %9282  ;;  %9302 = vlog2.f32 %v7637_v25  ;;  %v1023_v52 = vmul.f32 0.6931472, %v9281_v33  ;;  %v1891_v41 = vmul.f32 %v12890_v14, %v1019_v32  ;;  %v358_v32 = vld [vmem:[%s12465_s8 + $0x538] sm:$0xff] }
 0x2d5   : > { %v9285_v38 = vpop.eup %9284  ;;  %v4077_v39 = vmul.f32 0.6931472, %v9283_v36  ;;  %9304 = vlog2.f32 %v4958_v27  ;;  %v1892_v45 = vmul.f32 %v12890_v14, %v1021_v35  ;;  %v2558_v54 = vmul.f32 1.442695, %v1890_v37  ;;  %v357_v27 = vld [vmem:[%s12465_s8 + $0x530] sm:$0xff]  ;;  %v359_v35 = vld [vmem:[%s12465_s8 + $0x540] sm:$0xff] }
 0x2d6   : > { %v9287_v42 = vpop.eup %9286  ;;  %v5613_v43 = vmul.f32 0.6931472, %v9285_v38  ;;  %9306 = vlog2.f32 %v7638_v30  ;;  %v1893_v49 = vmul.f32 %v12890_v14, %v1023_v52  ;;  %v2560_v57 = vmul.f32 1.442695, %v1891_v41 }
 0x2d7   : > { %v9289_v46 = vpop.eup %9288  ;;  %v4079_v47 = vmul.f32 0.6931472, %v9287_v42  ;;  %9308 = vlog2.f32 %v4959_v34  ;;  %v2562_v61 = vmul.f32 1.442695, %v1892_v45 }
 0x2d8   : > { %v9291_v50 = vpop.eup %9290  ;;  %v6489_v51 = vsub.f32 %v4077_v39, %v5613_v43  ;;  %v5615_v53 = vmul.f32 0.6931472, %v9289_v46  ;;  %9310 = vlog2.f32 %v7639_v31  ;;  %v2564_v63 = vmul.f32 1.442695, %v1893_v49 }
 0x2d9   : > { %v9293_v55 = vpop.eup %9292  ;;  %v4081_v56 = vmul.f32 0.6931472, %v9291_v50  ;;  %9312 = vlog2.f32 %v4960_v40 }
 0x2da   : > { %v9295_v58 = vpop.eup %9294  ;;  %7001 = vst [vmem:[%s12522_s20 + $0x498] sm:$0xff] %v6489_v51  ;;  %v6490_v59 = vsub.f32 %v4079_v47, %v5615_v53  ;;  %v5617_v60 = vmul.f32 0.6931472, %v9293_v55  ;;  %9314 = vlog2.f32 %v7640_v44 }
 0x2db   : > { %v9297_v62 = vpop.eup %9296  ;;  %v4083_v14 = vmul.f32 0.6931472, %v9295_v58  ;;  %9316 = vlog2.f32 %v4961_v48 }
 0x2dc   : > { %v9299_v0 = vpop.eup %9298  ;;  %7002 = vst [vmem:[%s12522_s20 + $0x4a0] sm:$0xff] %v6490_v59  ;;  %v6491_v1 = vsub.f32 %v4081_v56, %v5617_v60  ;;  %v5619_v2 = vmul.f32 0.6931472, %v9297_v62  ;;  %9318 = vpow2.f32 %v2558_v54  ;;  %v12992_v56 = vld [vmem:[#allocation5] ss:$0 sm:$0xff] }
 0x2dd   : > { %v9301_v3 = vpop.eup %9300  ;;  %v4085_v4 = vmul.f32 0.6931472, %v9299_v0  ;;  %9320 = vpow2.f32 %v2560_v57 }
 0x2de   : > { %v9303_v8 = vpop.eup %9302  ;;  %7003 = vst [vmem:[%s12522_s20 + $0x4a8] sm:$0xff] %v6491_v1  ;;  %v6492_v9 = vsub.f32 %v4083_v14, %v5619_v2  ;;  %v5621_v10 = vmul.f32 0.6931472, %v9301_v3  ;;  %9322 = vpow2.f32 %v2562_v61 }
 0x2df   : > { %v9305_v12 = vpop.eup %9304  ;;  %v4087_v6 = vmul.f32 0.6931472, %v9303_v8  ;;  %9324 = vpow2.f32 %v2564_v63 }
 0x2e0   : > { %v9307_v15 = vpop.eup %9306  ;;  %7004 = vst [vmem:[%s12522_s20 + $0x4b0] sm:$0xff] %v6492_v9  ;;  %v6493_v16 = vsub.f32 %v4085_v4, %v5621_v10  ;;  %v5623_v17 = vmul.f32 0.6931472, %v9305_v12  ;;  %9326 = vlog2.f32 %v351_v5 }
 0x2e1   : > { %v9309_v18 = vpop.eup %9308  ;;  %v4089_v19 = vmul.f32 0.6931472, %v9307_v15  ;;  %9328 = vlog2.f32 %v352_v11 }
 0x2e2   : > { %v9311_v21 = vpop.eup %9310  ;;  %7005 = vst [vmem:[%s12522_s20 + $0x4b8] sm:$0xff] %v6493_v16  ;;  %v6494_v22 = vsub.f32 %v4087_v6, %v5623_v17  ;;  %v5625_v23 = vmul.f32 0.6931472, %v9309_v18  ;;  %9330 = vlog2.f32 %v353_v13 }
 0x2e3   : > { %v9313_v25 = vpop.eup %9312  ;;  %v4091_v26 = vmul.f32 0.6931472, %v9311_v21  ;;  %9332 = vlog2.f32 %v354_v7 }
 0x2e4   : > { %v9315_v28 = vpop.eup %9314  ;;  %7006 = vst [vmem:[%s12522_s20 + $0x4c0] sm:$0xff] %v6494_v22  ;;  %v6495_v29 = vsub.f32 %v4089_v19, %v5625_v23  ;;  %v5627_v30 = vmul.f32 0.6931472, %v9313_v25  ;;  %9334 = vlog2.f32 %v355_v20 }
 0x2e5   : > { %v9317_v33 = vpop.eup %9316  ;;  %v4093_v34 = vmul.f32 0.6931472, %v9315_v28  ;;  %9336 = vlog2.f32 %v356_v24 }
 0x2e6   : > { %v9319_v36 = vpop.eup %9318  ;;  %7007 = vst [vmem:[%s12522_s20 + $0x4c8] sm:$0xff] %v6495_v29  ;;  %v6496_v31 = vsub.f32 %v4091_v26, %v5627_v30  ;;  %v5629_v37 = vmul.f32 0.6931472, %v9317_v33  ;;  %9338 = vlog2.f32 %v357_v27 }
 0x2e7   : > { %v9321_v52 = vpop.eup %9320  ;;  %v7641_v38 = vadd.f32 -0.99, %v9319_v36  ;;  %v4962_v39 = vsub.f32 1.0, %v9319_v36  ;;  %9340 = vlog2.f32 %v358_v32 }
 0x2e8   : > { %v9323_v40 = vpop.eup %9322  ;;  %7008 = vst [vmem:[%s12522_s20 + $0x4d0] sm:$0xff] %v6496_v31  ;;  %v6497_v41 = vsub.f32 %v4093_v34, %v5629_v37  ;;  %v7642_v42 = vadd.f32 -0.99, %v9321_v52  ;;  %v4963_v43 = vsub.f32 1.0, %v9321_v52  ;;  %9342 = vlog2.f32 %v359_v35  ;;  %v360_v34 = vld [vmem:[%s12465_s8 + $0x548] sm:$0xff]  ;;  %v361_v31 = vld [vmem:[%s12465_s8 + $0x550] sm:$0xff] }
 0x2e9   : > { %v9325_v44 = vpop.eup %9324  ;;  %9344 = vlog2.f32 %v7641_v38  ;;  %v7643_v45 = vadd.f32 -0.99, %v9323_v40  ;;  %v4964_v47 = vsub.f32 1.0, %v9323_v40 }
 0x2ea   : > { %v9327_v46 = vpop.eup %9326  ;;  %7009 = vst [vmem:[%s12522_s20 + $0x4d8] sm:$0xff] %v6497_v41  ;;  %9346 = vlog2.f32 %v4962_v39  ;;  %v7644_v49 = vadd.f32 -0.99, %v9325_v44  ;;  %v4965_v53 = vsub.f32 1.0, %v9325_v44  ;;  %v362_v39 = vld [vmem:[%s12465_s8 + $0x558] sm:$0xff] }
 0x2eb   : > { %v9329_v48 = vpop.eup %9328  ;;  %9348 = vlog2.f32 %v7642_v42  ;;  %v1025_v50 = vmul.f32 0.6931472, %v9327_v46  ;;  %v363_v42 = vld [vmem:[%s12465_s8 + $0x560] sm:$0xff] }
 0x2ec   : > { %v9331_v51 = vpop.eup %9330  ;;  %9350 = vlog2.f32 %v4963_v43  ;;  %v1027_v54 = vmul.f32 0.6931472, %v9329_v48 }
 0x2ed   : > { %v9333_v55 = vpop.eup %9332  ;;  %9352 = vlog2.f32 %v7643_v45  ;;  %v1894_v57 = vmul.f32 %v12992_v56, %v1025_v50  ;;  %v1029_v58 = vmul.f32 0.6931472, %v9331_v51 }
 0x2ee   : > { %v9335_v59 = vpop.eup %9334  ;;  %9354 = vlog2.f32 %v4964_v47  ;;  %v1895_v60 = vmul.f32 %v12992_v56, %v1027_v54  ;;  %v1031_v61 = vmul.f32 0.6931472, %v9333_v55 }
 0x2ef   : > { %v9337_v62 = vpop.eup %9336  ;;  %9356 = vlog2.f32 %v7644_v49  ;;  %v2566_v14 = vmul.f32 1.442695, %v1894_v57  ;;  %v1896_v63 = vmul.f32 %v12992_v56, %v1029_v58  ;;  %v1033_v0 = vmul.f32 0.6931472, %v9335_v59 }
 0x2f0   : > { %v9339_v1 = vpop.eup %9338  ;;  %9358 = vlog2.f32 %v4965_v53  ;;  %v2568_v2 = vmul.f32 1.442695, %v1895_v60  ;;  %v1897_v3 = vmul.f32 %v12992_v56, %v1031_v61  ;;  %v1035_v4 = vmul.f32 0.6931472, %v9337_v62 }
 0x2f1   : > { %v9341_v5 = vpop.eup %9340  ;;  %9360 = vpow2.f32 %v2566_v14  ;;  %v2570_v8 = vmul.f32 1.442695, %v1896_v63  ;;  %v1898_v9 = vmul.f32 %v12992_v56, %v1033_v0  ;;  %v1037_v10 = vmul.f32 0.6931472, %v9339_v1 }
 0x2f2   : > { %v9343_v11 = vpop.eup %9342  ;;  %9362 = vpow2.f32 %v2568_v2  ;;  %v2572_v12 = vmul.f32 1.442695, %v1897_v3  ;;  %v1899_v6 = vmul.f32 %v12992_v56, %v1035_v4  ;;  %v1039_v13 = vmul.f32 0.6931472, %v9341_v5 }
 0x2f3   : > { %v9345_v15 = vpop.eup %9344  ;;  %9364 = vpow2.f32 %v2570_v8  ;;  %v2574_v16 = vmul.f32 1.442695, %v1898_v9  ;;  %v1900_v17 = vmul.f32 %v12992_v56, %v1037_v10  ;;  %v1041_v7 = vmul.f32 0.6931472, %v9343_v11 }
 0x2f4   : > { %v9347_v18 = vpop.eup %9346  ;;  %v4095_v19 = vmul.f32 0.6931472, %v9345_v15  ;;  %9366 = vpow2.f32 %v2572_v12  ;;  %v2576_v20 = vmul.f32 1.442695, %v1899_v6  ;;  %v1901_v21 = vmul.f32 %v12992_v56, %v1039_v13 }
 0x2f5   : > { %v9349_v22 = vpop.eup %9348  ;;  %v5631_v23 = vmul.f32 0.6931472, %v9347_v18  ;;  %9368 = vpow2.f32 %v2574_v16  ;;  %v2578_v24 = vmul.f32 1.442695, %v1900_v17  ;;  %v1902_v25 = vmul.f32 %v12992_v56, %v1041_v7 }
 0x2f6   : > { %v9351_v26 = vpop.eup %9350  ;;  %v4097_v27 = vmul.f32 0.6931472, %v9349_v22  ;;  %9370 = vpow2.f32 %v2576_v20  ;;  %v2580_v28 = vmul.f32 1.442695, %v1901_v21 }
 0x2f7   : > { %v9353_v29 = vpop.eup %9352  ;;  %v6498_v30 = vsub.f32 %v4095_v19, %v5631_v23  ;;  %v5633_v32 = vmul.f32 0.6931472, %v9351_v26  ;;  %9372 = vpow2.f32 %v2578_v24  ;;  %v2582_v33 = vmul.f32 1.442695, %v1902_v25 }
 0x2f8   : > { %v9355_v35 = vpop.eup %9354  ;;  %v4099_v36 = vmul.f32 0.6931472, %v9353_v29  ;;  %9374 = vpow2.f32 %v2580_v28 }
 0x2f9   : > { %v9357_v37 = vpop.eup %9356  ;;  %7010 = vst [vmem:[%s12522_s20 + $0x4e0] sm:$0xff] %v6498_v30  ;;  %v6499_v52 = vsub.f32 %v4097_v27, %v5633_v32  ;;  %v5635_v38 = vmul.f32 0.6931472, %v9355_v35  ;;  %9376 = vpow2.f32 %v2582_v33 }
 0x2fa   : > { %v9359_v40 = vpop.eup %9358  ;;  %v4101_v41 = vmul.f32 0.6931472, %v9357_v37  ;;  %9378 = vlog2.f32 %v360_v34 }
 0x2fb   : > { %v9361_v43 = vpop.eup %9360  ;;  %7011 = vst [vmem:[%s12522_s20 + $0x4e8] sm:$0xff] %v6499_v52  ;;  %v6500_v44 = vsub.f32 %v4099_v36, %v5635_v38  ;;  %v5637_v45 = vmul.f32 0.6931472, %v9359_v40  ;;  %9380 = vlog2.f32 %v361_v31 }
 0x2fc   : > { %v9363_v46 = vpop.eup %9362  ;;  %v7645_v47 = vadd.f32 -0.99, %v9361_v43  ;;  %v4966_v48 = vsub.f32 1.0, %v9361_v43  ;;  %9382 = vlog2.f32 %v362_v39 }
 0x2fd   : > { %v9365_v49 = vpop.eup %9364  ;;  %7012 = vst [vmem:[%s12522_s20 + $0x4f0] sm:$0xff] %v6500_v44  ;;  %v6501_v50 = vsub.f32 %v4101_v41, %v5637_v45  ;;  %v7646_v51 = vadd.f32 -0.99, %v9363_v46  ;;  %v4967_v53 = vsub.f32 1.0, %v9363_v46  ;;  %9384 = vlog2.f32 %v363_v42 }
 0x2fe   : > { %v9367_v54 = vpop.eup %9366  ;;  %9386 = vlog2.f32 %v7645_v47  ;;  %v7647_v55 = vadd.f32 -0.99, %v9365_v49  ;;  %v4968_v58 = vsub.f32 1.0, %v9365_v49 }
 0x2ff   : > { %v9369_v57 = vpop.eup %9368  ;;  %7013 = vst [vmem:[%s12522_s20 + $0x4f8] sm:$0xff] %v6501_v50  ;;  %9388 = vlog2.f32 %v4966_v48  ;;  %v7648_v60 = vadd.f32 -0.99, %v9367_v54  ;;  %v4969_v62 = vsub.f32 1.0, %v9367_v54  ;;  %v364_v48 = vld [vmem:[%s12465_s8 + $0x568] sm:$0xff] }
 0x300   : > { %v9371_v59 = vpop.eup %9370  ;;  %9390 = vlog2.f32 %v7646_v51  ;;  %v7649_v63 = vadd.f32 -0.99, %v9369_v57  ;;  %v4970_v1 = vsub.f32 1.0, %v9369_v57  ;;  %v366_v57 = vld [vmem:[%s12465_s8 + $0x578] sm:$0xff] }
 0x301   : > { %v9373_v61 = vpop.eup %9372  ;;  %9392 = vlog2.f32 %v4967_v53  ;;  %v7650_v3 = vadd.f32 -0.99, %v9371_v59  ;;  %v4971_v5 = vsub.f32 1.0, %v9371_v59  ;;  %v365_v53 = vld [vmem:[%s12465_s8 + $0x570] sm:$0xff] }
 0x302   : > { %v9375_v14 = vpop.eup %9374  ;;  %9394 = vlog2.f32 %v7647_v55  ;;  %v7651_v10 = vadd.f32 -0.99, %v9373_v61  ;;  %v4972_v6 = vsub.f32 1.0, %v9373_v61  ;;  %v367_v61 = vld [vmem:[%s12465_s8 + $0x580] sm:$0xff] }
 0x303   : > { %v9377_v0 = vpop.eup %9376  ;;  %9396 = vlog2.f32 %v4968_v58  ;;  %v7652_v16 = vadd.f32 -0.99, %v9375_v14  ;;  %v4973_v20 = vsub.f32 1.0, %v9375_v14 }
 0x304   : > { %v9379_v2 = vpop.eup %9378  ;;  %9398 = vlog2.f32 %v7648_v60  ;;  %v7653_v24 = vadd.f32 -0.99, %v9377_v0  ;;  %v4974_v28 = vsub.f32 1.0, %v9377_v0 }
 0x305   : > { %v9381_v4 = vpop.eup %9380  ;;  %9400 = vlog2.f32 %v4969_v62  ;;  %v1043_v8 = vmul.f32 0.6931472, %v9379_v2 }
 0x306   : > { %v9383_v9 = vpop.eup %9382  ;;  %9402 = vlog2.f32 %v7649_v63  ;;  %v1045_v11 = vmul.f32 0.6931472, %v9381_v4  ;;  %v368_v63 = vld [vmem:[%s12465_s8 + $0x588] sm:$0xff] }
 0x307   : > { %v9385_v12 = vpop.eup %9384  ;;  %9404 = vlog2.f32 %v4970_v1  ;;  %v1047_v13 = vmul.f32 0.6931472, %v9383_v9  ;;  %v1903_v17 = vmul.f32 %v12992_v56, %v1043_v8  ;;  %v370_v8 = vld [vmem:[%s12465_s8 + $0x598] sm:$0xff] }
 0x308   : > { %v9387_v15 = vpop.eup %9386  ;;  %9406 = vlog2.f32 %v7650_v3  ;;  %v1049_v7 = vmul.f32 0.6931472, %v9385_v12  ;;  %v1904_v21 = vmul.f32 %v12992_v56, %v1045_v11  ;;  %v369_v3 = vld [vmem:[%s12465_s8 + $0x590] sm:$0xff]  ;;  %v371_v12 = vld [vmem:[%s12465_s8 + $0x5a0] sm:$0xff] }
 0x309   : > { %v9389_v18 = vpop.eup %9388  ;;  %v4103_v19 = vmul.f32 0.6931472, %v9387_v15  ;;  %9408 = vlog2.f32 %v4971_v5  ;;  %v1905_v25 = vmul.f32 %v12992_v56, %v1047_v13  ;;  %v2584_v34 = vmul.f32 1.442695, %v1903_v17  ;;  %v372_v15 = vld [vmem:[%s12465_s8 + $0x5a8] sm:$0xff] }
 0x30a   : > { %v9391_v22 = vpop.eup %9390  ;;  %v5639_v23 = vmul.f32 0.6931472, %v9389_v18  ;;  %9410 = vlog2.f32 %v7651_v10  ;;  %v1906_v29 = vmul.f32 %v12992_v56, %v1049_v7  ;;  %v2586_v31 = vmul.f32 1.442695, %v1904_v21 }
 0x30b   : > { %v9393_v26 = vpop.eup %9392  ;;  %v4105_v27 = vmul.f32 0.6931472, %v9391_v22  ;;  %9412 = vlog2.f32 %v4972_v6  ;;  %v2588_v39 = vmul.f32 1.442695, %v1905_v25 }
 0x30c   : > { %v9395_v30 = vpop.eup %9394  ;;  %v6502_v32 = vsub.f32 %v4103_v19, %v5639_v23  ;;  %v5641_v33 = vmul.f32 0.6931472, %v9393_v26  ;;  %9414 = vlog2.f32 %v7652_v16  ;;  %v2590_v42 = vmul.f32 1.442695, %v1906_v29 }
 0x30d   : > { %v9397_v35 = vpop.eup %9396  ;;  %v4107_v36 = vmul.f32 0.6931472, %v9395_v30  ;;  %9416 = vlog2.f32 %v4973_v20 }
 0x30e   : > { %v9399_v37 = vpop.eup %9398  ;;  %7014 = vst [vmem:[%s12522_s20 + $0x500] sm:$0xff] %v6502_v32  ;;  %v6503_v52 = vsub.f32 %v4105_v27, %v5641_v33  ;;  %v5643_v38 = vmul.f32 0.6931472, %v9397_v35  ;;  %9418 = vlog2.f32 %v7653_v24 }
 0x30f   : > { %v9401_v40 = vpop.eup %9400  ;;  %v4109_v41 = vmul.f32 0.6931472, %v9399_v37  ;;  %9420 = vlog2.f32 %v4974_v28 }
 0x310   : > { %v9403_v43 = vpop.eup %9402  ;;  %7015 = vst [vmem:[%s12522_s20 + $0x508] sm:$0xff] %v6503_v52  ;;  %v6504_v44 = vsub.f32 %v4107_v36, %v5643_v38  ;;  %v5645_v45 = vmul.f32 0.6931472, %v9401_v40  ;;  %9422 = vpow2.f32 %v2584_v34 }
 0x311   : > { %v9405_v46 = vpop.eup %9404  ;;  %v4111_v47 = vmul.f32 0.6931472, %v9403_v43  ;;  %9424 = vpow2.f32 %v2586_v31 }
 0x312   : > { %v9407_v49 = vpop.eup %9406  ;;  %7016 = vst [vmem:[%s12522_s20 + $0x510] sm:$0xff] %v6504_v44  ;;  %v6505_v50 = vsub.f32 %v4109_v41, %v5645_v45  ;;  %v5647_v51 = vmul.f32 0.6931472, %v9405_v46  ;;  %9426 = vpow2.f32 %v2588_v39 }
 0x313   : > { %v9409_v54 = vpop.eup %9408  ;;  %v4113_v55 = vmul.f32 0.6931472, %v9407_v49  ;;  %9428 = vpow2.f32 %v2590_v42 }
 0x314   : > { %v9411_v58 = vpop.eup %9410  ;;  %7017 = vst [vmem:[%s12522_s20 + $0x518] sm:$0xff] %v6505_v50  ;;  %v6506_v59 = vsub.f32 %v4111_v47, %v5647_v51  ;;  %v5649_v60 = vmul.f32 0.6931472, %v9409_v54  ;;  %9430 = vlog2.f32 %v364_v48 }
 0x315   : > { %v9413_v62 = vpop.eup %9412  ;;  %v4115_v14 = vmul.f32 0.6931472, %v9411_v58  ;;  %9432 = vlog2.f32 %v365_v53 }
 0x316   : > { %v9415_v0 = vpop.eup %9414  ;;  %7018 = vst [vmem:[%s12522_s20 + $0x520] sm:$0xff] %v6506_v59  ;;  %v6507_v1 = vsub.f32 %v4113_v55, %v5649_v60  ;;  %v5651_v2 = vmul.f32 0.6931472, %v9413_v62  ;;  %9434 = vlog2.f32 %v366_v57 }
 0x317   : > { %v9417_v4 = vpop.eup %9416  ;;  %v4117_v5 = vmul.f32 0.6931472, %v9415_v0  ;;  %9436 = vlog2.f32 %v367_v61 }
 0x318   : > { %v9419_v9 = vpop.eup %9418  ;;  %7019 = vst [vmem:[%s12522_s20 + $0x528] sm:$0xff] %v6507_v1  ;;  %v6508_v10 = vsub.f32 %v4115_v14, %v5651_v2  ;;  %v5653_v11 = vmul.f32 0.6931472, %v9417_v4  ;;  %9438 = vlog2.f32 %v368_v63 }
 0x319   : > { %v9421_v6 = vpop.eup %9420  ;;  %v4119_v13 = vmul.f32 0.6931472, %v9419_v9  ;;  %9440 = vlog2.f32 %v369_v3 }
 0x31a   : > { %v9423_v16 = vpop.eup %9422  ;;  %7020 = vst [vmem:[%s12522_s20 + $0x530] sm:$0xff] %v6508_v10  ;;  %v6509_v17 = vsub.f32 %v4117_v5, %v5653_v11  ;;  %v5655_v7 = vmul.f32 0.6931472, %v9421_v6  ;;  %9442 = vlog2.f32 %v370_v8 }
 0x31b   : > { %v9425_v18 = vpop.eup %9424  ;;  %v7654_v19 = vadd.f32 -0.99, %v9423_v16  ;;  %v4975_v20 = vsub.f32 1.0, %v9423_v16  ;;  %9444 = vlog2.f32 %v371_v12 }
 0x31c   : > { %v9427_v21 = vpop.eup %9426  ;;  %7021 = vst [vmem:[%s12522_s20 + $0x538] sm:$0xff] %v6509_v17  ;;  %v6510_v22 = vsub.f32 %v4119_v13, %v5655_v7  ;;  %v7655_v23 = vadd.f32 -0.99, %v9425_v18  ;;  %v4976_v24 = vsub.f32 1.0, %v9425_v18  ;;  %9446 = vlog2.f32 %v372_v15  ;;  %v373_v13 = vld [vmem:[%s12465_s8 + $0x5b0] sm:$0xff]  ;;  %v374_v17 = vld [vmem:[%s12465_s8 + $0x5b8] sm:$0xff] }
 0x31d   : > { %v9429_v25 = vpop.eup %9428  ;;  %9448 = vlog2.f32 %v7654_v19  ;;  %v7656_v26 = vadd.f32 -0.99, %v9427_v21  ;;  %v4977_v28 = vsub.f32 1.0, %v9427_v21 }
 0x31e   : > { %v9431_v27 = vpop.eup %9430  ;;  %7022 = vst [vmem:[%s12522_s20 + $0x540] sm:$0xff] %v6510_v22  ;;  %9450 = vlog2.f32 %v4975_v20  ;;  %v7657_v30 = vadd.f32 -0.99, %v9429_v25  ;;  %v4978_v34 = vsub.f32 1.0, %v9429_v25  ;;  %v375_v20 = vld [vmem:[%s12465_s8 + $0x5c0] sm:$0xff] }
 0x31f   : > { %v9433_v29 = vpop.eup %9432  ;;  %9452 = vlog2.f32 %v7655_v23  ;;  %v1051_v32 = vmul.f32 0.6931472, %v9431_v27  ;;  %v376_v23 = vld [vmem:[%s12465_s8 + $0x5c8] sm:$0xff] }
 0x320   : > { %v9435_v33 = vpop.eup %9434  ;;  %9454 = vlog2.f32 %v4976_v24  ;;  %v1053_v35 = vmul.f32 0.6931472, %v9433_v29 }
 0x321   : > { %v9437_v36 = vpop.eup %9436  ;;  %9456 = vlog2.f32 %v7656_v26  ;;  %v1907_v31 = vmul.f32 %v12992_v56, %v1051_v32  ;;  %v1055_v37 = vmul.f32 0.6931472, %v9435_v33 }
 0x322   : > { %v9439_v52 = vpop.eup %9438  ;;  %9458 = vlog2.f32 %v4977_v28  ;;  %v1908_v38 = vmul.f32 %v12992_v56, %v1053_v35  ;;  %v1057_v39 = vmul.f32 0.6931472, %v9437_v36 }
 0x323   : > { %v9441_v40 = vpop.eup %9440  ;;  %9460 = vlog2.f32 %v7657_v30  ;;  %v2592_v41 = vmul.f32 1.442695, %v1907_v31  ;;  %v1909_v42 = vmul.f32 %v12992_v56, %v1055_v37  ;;  %v1059_v43 = vmul.f32 0.6931472, %v9439_v52 }
 0x324   : > { %v9443_v44 = vpop.eup %9442  ;;  %9462 = vlog2.f32 %v4978_v34  ;;  %v2594_v45 = vmul.f32 1.442695, %v1908_v38  ;;  %v1910_v46 = vmul.f32 %v12992_v56, %v1057_v39  ;;  %v1061_v47 = vmul.f32 0.6931472, %v9441_v40 }
 0x325   : > { %v9445_v48 = vpop.eup %9444  ;;  %9464 = vpow2.f32 %v2592_v41  ;;  %v2596_v49 = vmul.f32 1.442695, %v1909_v42  ;;  %v1911_v50 = vmul.f32 %v12992_v56, %v1059_v43  ;;  %v1063_v51 = vmul.f32 0.6931472, %v9443_v44 }
 0x326   : > { %v9447_v53 = vpop.eup %9446  ;;  %9466 = vpow2.f32 %v2594_v45  ;;  %v2598_v54 = vmul.f32 1.442695, %v1910_v46  ;;  %v1912_v55 = vmul.f32 %v12992_v56, %v1061_v47  ;;  %v1065_v57 = vmul.f32 0.6931472, %v9445_v48 }
 0x327   : > { %v9449_v58 = vpop.eup %9448  ;;  %9468 = vpow2.f32 %v2596_v49  ;;  %v2600_v59 = vmul.f32 1.442695, %v1911_v50  ;;  %v1913_v60 = vmul.f32 %v12992_v56, %v1063_v51  ;;  %v1067_v61 = vmul.f32 0.6931472, %v9447_v53 }
 0x328   : > { %v9451_v62 = vpop.eup %9450  ;;  %v4121_v14 = vmul.f32 0.6931472, %v9449_v58  ;;  %9470 = vpow2.f32 %v2598_v54  ;;  %v2602_v63 = vmul.f32 1.442695, %v1912_v55  ;;  %v1914_v0 = vmul.f32 %v12992_v56, %v1065_v57 }
 0x329   : > { %v9453_v1 = vpop.eup %9452  ;;  %v5657_v2 = vmul.f32 0.6931472, %v9451_v62  ;;  %9472 = vpow2.f32 %v2600_v59  ;;  %v2604_v3 = vmul.f32 1.442695, %v1913_v60  ;;  %v1915_v4 = vmul.f32 %v12992_v56, %v1067_v61 }
 0x32a   : > { %v9455_v5 = vpop.eup %9454  ;;  %v4123_v8 = vmul.f32 0.6931472, %v9453_v1  ;;  %9474 = vpow2.f32 %v2602_v63  ;;  %v2606_v9 = vmul.f32 1.442695, %v1914_v0 }
 0x32b   : > { %v9457_v10 = vpop.eup %9456  ;;  %v6511_v11 = vsub.f32 %v4121_v14, %v5657_v2  ;;  %v5659_v12 = vmul.f32 0.6931472, %v9455_v5  ;;  %9476 = vpow2.f32 %v2604_v3  ;;  %v2608_v6 = vmul.f32 1.442695, %v1915_v4 }
 0x32c   : > { %v9459_v15 = vpop.eup %9458  ;;  %v4125_v16 = vmul.f32 0.6931472, %v9457_v10  ;;  %9478 = vpow2.f32 %v2606_v9 }
 0x32d   : > { %v9461_v7 = vpop.eup %9460  ;;  %7023 = vst [vmem:[%s12522_s20 + $0x548] sm:$0xff] %v6511_v11  ;;  %v6512_v18 = vsub.f32 %v4123_v8, %v5659_v12  ;;  %v5661_v19 = vmul.f32 0.6931472, %v9459_v15  ;;  %9480 = vpow2.f32 %v2608_v6 }
 0x32e   : > { %v9463_v21 = vpop.eup %9462  ;;  %v4127_v22 = vmul.f32 0.6931472, %v9461_v7  ;;  %9482 = vlog2.f32 %v373_v13 }
 0x32f   : > { %v9465_v24 = vpop.eup %9464  ;;  %7024 = vst [vmem:[%s12522_s20 + $0x550] sm:$0xff] %v6512_v18  ;;  %v6513_v25 = vsub.f32 %v4125_v16, %v5661_v19  ;;  %v5663_v26 = vmul.f32 0.6931472, %v9463_v21  ;;  %9484 = vlog2.f32 %v374_v17 }
 0x330   : > { %v9467_v27 = vpop.eup %9466  ;;  %v7658_v28 = vadd.f32 -0.99, %v9465_v24  ;;  %v4979_v29 = vsub.f32 1.0, %v9465_v24  ;;  %9486 = vlog2.f32 %v375_v20 }
 0x331   : > { %v9469_v30 = vpop.eup %9468  ;;  %7025 = vst [vmem:[%s12522_s20 + $0x558] sm:$0xff] %v6513_v25  ;;  %v6514_v32 = vsub.f32 %v4127_v22, %v5663_v26  ;;  %v7659_v33 = vadd.f32 -0.99, %v9467_v27  ;;  %v4980_v34 = vsub.f32 1.0, %v9467_v27  ;;  %9488 = vlog2.f32 %v376_v23 }
 0x332   : > { %v9471_v35 = vpop.eup %9470  ;;  %9490 = vlog2.f32 %v7658_v28  ;;  %v7660_v36 = vadd.f32 -0.99, %v9469_v30  ;;  %v4981_v37 = vsub.f32 1.0, %v9469_v30 }
 0x333   : > { %v9473_v31 = vpop.eup %9472  ;;  %7026 = vst [vmem:[%s12522_s20 + $0x560] sm:$0xff] %v6514_v32  ;;  %9492 = vlog2.f32 %v4979_v29  ;;  %v7661_v38 = vadd.f32 -0.99, %v9471_v35  ;;  %v4982_v40 = vsub.f32 1.0, %v9471_v35  ;;  %v377_v29 = vld [vmem:[%s12465_s8 + $0x5d0] sm:$0xff] }
 0x334   : > { %v9475_v52 = vpop.eup %9474  ;;  %9494 = vlog2.f32 %v7659_v33  ;;  %v7662_v42 = vadd.f32 -0.99, %v9473_v31  ;;  %v4983_v44 = vsub.f32 1.0, %v9473_v31  ;;  %v379_v31 = vld [vmem:[%s12465_s8 + $0x5e0] sm:$0xff] }
 0x335   : > { %v9477_v39 = vpop.eup %9476  ;;  %9496 = vlog2.f32 %v4980_v34  ;;  %v7663_v46 = vadd.f32 -0.99, %v9475_v52  ;;  %v4984_v48 = vsub.f32 1.0, %v9475_v52  ;;  %v378_v34 = vld [vmem:[%s12465_s8 + $0x5d8] sm:$0xff] }
 0x336   : > { %v9479_v41 = vpop.eup %9478  ;;  %9498 = vlog2.f32 %v7660_v36  ;;  %v7664_v51 = vadd.f32 -0.99, %v9477_v39  ;;  %v4985_v55 = vsub.f32 1.0, %v9477_v39  ;;  %v380_v39 = vld [vmem:[%s12465_s8 + $0x5e8] sm:$0xff] }
 0x337   : > { %v9481_v43 = vpop.eup %9480  ;;  %9500 = vlog2.f32 %v4981_v37  ;;  %v7665_v59 = vadd.f32 -0.99, %v9479_v41  ;;  %v4986_v63 = vsub.f32 1.0, %v9479_v41 }
 0x338   : > { %v9483_v45 = vpop.eup %9482  ;;  %9502 = vlog2.f32 %v7661_v38  ;;  %v7666_v3 = vadd.f32 -0.99, %v9481_v43  ;;  %v4987_v9 = vsub.f32 1.0, %v9481_v43 }
 0x339   : > { %v9485_v47 = vpop.eup %9484  ;;  %9504 = vlog2.f32 %v4982_v40  ;;  %v1069_v49 = vmul.f32 0.6931472, %v9483_v45 }
 0x33a   : > { %v9487_v50 = vpop.eup %9486  ;;  %9506 = vlog2.f32 %v7662_v42  ;;  %v1071_v53 = vmul.f32 0.6931472, %v9485_v47  ;;  %v381_v42 = vld [vmem:[%s12465_s8 + $0x5f0] sm:$0xff] }
 0x33b   : > { %v9489_v54 = vpop.eup %9488  ;;  %9508 = vlog2.f32 %v4983_v44  ;;  %v1073_v57 = vmul.f32 0.6931472, %v9487_v50  ;;  %v1916_v60 = vmul.f32 %v12992_v56, %v1069_v49  ;;  %v383_v49 = vld [vmem:[%s12465_s8 + $0x600] sm:$0xff] }
 0x33c   : > { %v9491_v58 = vpop.eup %9490  ;;  %9510 = vlog2.f32 %v7663_v46  ;;  %v1075_v61 = vmul.f32 0.6931472, %v9489_v54  ;;  %v1917_v0 = vmul.f32 %v12992_v56, %v1071_v53  ;;  %v382_v46 = vld [vmem:[%s12465_s8 + $0x5f8] sm:$0xff]  ;;  %v384_v54 = vld [vmem:[%s12465_s8 + $0x608] sm:$0xff] }
 0x33d   : > { %v9493_v62 = vpop.eup %9492  ;;  %v4129_v14 = vmul.f32 0.6931472, %v9491_v58  ;;  %9512 = vlog2.f32 %v4984_v48  ;;  %v1918_v4 = vmul.f32 %v12992_v56, %v1073_v57  ;;  %v2610_v13 = vmul.f32 1.442695, %v1916_v60  ;;  %v385_v58 = vld [vmem:[%s12465_s8 + $0x610] sm:$0xff] }
 0x33e   : > { %v9495_v1 = vpop.eup %9494  ;;  %v5665_v2 = vmul.f32 0.6931472, %v9493_v62  ;;  %9514 = vlog2.f32 %v7664_v51  ;;  %v1919_v10 = vmul.f32 %v12992_v56, %v1075_v61  ;;  %v2612_v17 = vmul.f32 1.442695, %v1917_v0 }
 0x33f   : > { %v9497_v5 = vpop.eup %9496  ;;  %v4131_v8 = vmul.f32 0.6931472, %v9495_v1  ;;  %9516 = vlog2.f32 %v4985_v55  ;;  %v2614_v20 = vmul.f32 1.442695, %v1918_v4 }
 0x340   : > { %v9499_v11 = vpop.eup %9498  ;;  %v6515_v12 = vsub.f32 %v4129_v14, %v5665_v2  ;;  %v5667_v6 = vmul.f32 0.6931472, %v9497_v5  ;;  %9518 = vlog2.f32 %v7665_v59  ;;  %v2616_v23 = vmul.f32 1.442695, %v1919_v10 }
 0x341   : > { %v9501_v15 = vpop.eup %9500  ;;  %v4133_v16 = vmul.f32 0.6931472, %v9499_v11  ;;  %9520 = vlog2.f32 %v4986_v63 }
 0x342   : > { %v9503_v7 = vpop.eup %9502  ;;  %7027 = vst [vmem:[%s12522_s20 + $0x568] sm:$0xff] %v6515_v12  ;;  %v6516_v18 = vsub.f32 %v4131_v8, %v5667_v6  ;;  %v5669_v19 = vmul.f32 0.6931472, %v9501_v15  ;;  %9522 = vlog2.f32 %v7666_v3 }
 0x343   : > { %v9505_v21 = vpop.eup %9504  ;;  %v4135_v22 = vmul.f32 0.6931472, %v9503_v7  ;;  %9524 = vlog2.f32 %v4987_v9 }
 0x344   : > { %v9507_v24 = vpop.eup %9506  ;;  %7028 = vst [vmem:[%s12522_s20 + $0x570] sm:$0xff] %v6516_v18  ;;  %v6517_v25 = vsub.f32 %v4133_v16, %v5669_v19  ;;  %v5671_v26 = vmul.f32 0.6931472, %v9505_v21  ;;  %9526 = vpow2.f32 %v2610_v13 }
 0x345   : > { %v9509_v27 = vpop.eup %9508  ;;  %v4137_v28 = vmul.f32 0.6931472, %v9507_v24  ;;  %9528 = vpow2.f32 %v2612_v17 }
 0x346   : > { %v9511_v30 = vpop.eup %9510  ;;  %7029 = vst [vmem:[%s12522_s20 + $0x578] sm:$0xff] %v6517_v25  ;;  %v6518_v32 = vsub.f32 %v4135_v22, %v5671_v26  ;;  %v5673_v33 = vmul.f32 0.6931472, %v9509_v27  ;;  %9530 = vpow2.f32 %v2614_v20 }
 0x347   : > { %v9513_v35 = vpop.eup %9512  ;;  %v4139_v36 = vmul.f32 0.6931472, %v9511_v30  ;;  %9532 = vpow2.f32 %v2616_v23 }
 0x348   : > { %v9515_v37 = vpop.eup %9514  ;;  %7030 = vst [vmem:[%s12522_s20 + $0x580] sm:$0xff] %v6518_v32  ;;  %v6519_v52 = vsub.f32 %v4137_v28, %v5673_v33  ;;  %v5675_v38 = vmul.f32 0.6931472, %v9513_v35  ;;  %9534 = vlog2.f32 %v377_v29 }
 0x349   : > { %v9517_v40 = vpop.eup %9516  ;;  %v4141_v41 = vmul.f32 0.6931472, %v9515_v37  ;;  %9536 = vlog2.f32 %v378_v34 }
 0x34a   : > { %v9519_v43 = vpop.eup %9518  ;;  %7031 = vst [vmem:[%s12522_s20 + $0x588] sm:$0xff] %v6519_v52  ;;  %v6520_v44 = vsub.f32 %v4139_v36, %v5675_v38  ;;  %v5677_v45 = vmul.f32 0.6931472, %v9517_v40  ;;  %9538 = vlog2.f32 %v379_v31 }
 0x34b   : > { %v9521_v47 = vpop.eup %9520  ;;  %v4143_v48 = vmul.f32 0.6931472, %v9519_v43  ;;  %9540 = vlog2.f32 %v380_v39 }
 0x34c   : > { %v9523_v50 = vpop.eup %9522  ;;  %7032 = vst [vmem:[%s12522_s20 + $0x590] sm:$0xff] %v6520_v44  ;;  %v6521_v51 = vsub.f32 %v4141_v41, %v5677_v45  ;;  %v5679_v53 = vmul.f32 0.6931472, %v9521_v47  ;;  %9542 = vlog2.f32 %v381_v42 }
 0x34d   : > { %v9525_v55 = vpop.eup %9524  ;;  %v4145_v57 = vmul.f32 0.6931472, %v9523_v50  ;;  %9544 = vlog2.f32 %v382_v46 }
 0x34e   : > { %v9527_v59 = vpop.eup %9526  ;;  %7033 = vst [vmem:[%s12522_s20 + $0x598] sm:$0xff] %v6521_v51  ;;  %v6522_v60 = vsub.f32 %v4143_v48, %v5679_v53  ;;  %v5681_v61 = vmul.f32 0.6931472, %v9525_v55  ;;  %9546 = vlog2.f32 %v383_v49 }
 0x34f   : > { %v9529_v62 = vpop.eup %9528  ;;  %v7667_v14 = vadd.f32 -0.99, %v9527_v59  ;;  %v4988_v63 = vsub.f32 1.0, %v9527_v59  ;;  %9548 = vlog2.f32 %v384_v54 }
 0x350   : > { %v9531_v0 = vpop.eup %9530  ;;  %7034 = vst [vmem:[%s12522_s20 + $0x5a0] sm:$0xff] %v6522_v60  ;;  %v6523_v1 = vsub.f32 %v4145_v57, %v5681_v61  ;;  %v7668_v2 = vadd.f32 -0.99, %v9529_v62  ;;  %v4989_v3 = vsub.f32 1.0, %v9529_v62  ;;  %9550 = vlog2.f32 %v385_v58  ;;  %v386_v57 = vld [vmem:[%s12465_s8 + $0x618] sm:$0xff]  ;;  %v387_v60 = vld [vmem:[%s12465_s8 + $0x620] sm:$0xff] }
 0x351   : > { %v9533_v4 = vpop.eup %9532  ;;  %9552 = vlog2.f32 %v7667_v14  ;;  %v7669_v5 = vadd.f32 -0.99, %v9531_v0  ;;  %v4990_v9 = vsub.f32 1.0, %v9531_v0  ;;  %v388_v14 = vld [vmem:[%s12465_s8 + $0x628] sm:$0xff] }
 0x352   : > { %v9535_v8 = vpop.eup %9534  ;;  %7035 = vst [vmem:[%s12522_s20 + $0x5a8] sm:$0xff] %v6523_v1  ;;  %9554 = vlog2.f32 %v4988_v63  ;;  %v7670_v11 = vadd.f32 -0.99, %v9533_v4  ;;  %v4991_v13 = vsub.f32 1.0, %v9533_v4  ;;  %v389_v1 = vld [vmem:[%s12465_s8 + $0x630] sm:$0xff] }
 0x353   : > { %v9537_v10 = vpop.eup %9536  ;;  %9556 = vlog2.f32 %v7668_v2  ;;  %v1077_v12 = vmul.f32 0.6931472, %v9535_v8 }
 0x354   : > { %v9539_v6 = vpop.eup %9538  ;;  %9558 = vlog2.f32 %v4989_v3  ;;  %v1079_v15 = vmul.f32 0.6931472, %v9537_v10 }
 0x355   : > { %v9541_v16 = vpop.eup %9540  ;;  %9560 = vlog2.f32 %v7669_v5  ;;  %v1920_v17 = vmul.f32 %v12992_v56, %v1077_v12  ;;  %v1081_v7 = vmul.f32 0.6931472, %v9539_v6 }
 0x356   : > { %v9543_v18 = vpop.eup %9542  ;;  %9562 = vlog2.f32 %v4990_v9  ;;  %v1921_v19 = vmul.f32 %v12992_v56, %v1079_v15  ;;  %v1083_v20 = vmul.f32 0.6931472, %v9541_v16 }
 0x357   : > { %v9545_v21 = vpop.eup %9544  ;;  %9564 = vlog2.f32 %v7670_v11  ;;  %v2618_v22 = vmul.f32 1.442695, %v1920_v17  ;;  %v1922_v23 = vmul.f32 %v12992_v56, %v1081_v7  ;;  %v1085_v24 = vmul.f32 0.6931472, %v9543_v18 }
 0x358   : > { %v9547_v25 = vpop.eup %9546  ;;  %9566 = vlog2.f32 %v4991_v13  ;;  %v2620_v26 = vmul.f32 1.442695, %v1921_v19  ;;  %v1923_v27 = vmul.f32 %v12992_v56, %v1083_v20  ;;  %v1087_v28 = vmul.f32 0.6931472, %v9545_v21 }
 0x359   : > { %v9549_v29 = vpop.eup %9548  ;;  %9568 = vpow2.f32 %v2618_v22  ;;  %v2622_v30 = vmul.f32 1.442695, %v1922_v23  ;;  %v1924_v32 = vmul.f32 %v12992_v56, %v1085_v24  ;;  %v1089_v33 = vmul.f32 0.6931472, %v9547_v25 }
 0x35a   : > { %v9551_v34 = vpop.eup %9550  ;;  %9570 = vpow2.f32 %v2620_v26  ;;  %v2624_v35 = vmul.f32 1.442695, %v1923_v27  ;;  %v1925_v36 = vmul.f32 %v12992_v56, %v1087_v28  ;;  %v1091_v31 = vmul.f32 0.6931472, %v9549_v29 }
 0x35b   : > { %v9553_v37 = vpop.eup %9552  ;;  %9572 = vpow2.f32 %v2622_v30  ;;  %v2626_v52 = vmul.f32 1.442695, %v1924_v32  ;;  %v1926_v38 = vmul.f32 %v12992_v56, %v1089_v33  ;;  %v1093_v39 = vmul.f32 0.6931472, %v9551_v34 }
 0x35c   : > { %v9555_v40 = vpop.eup %9554  ;;  %v4147_v41 = vmul.f32 0.6931472, %v9553_v37  ;;  %9574 = vpow2.f32 %v2624_v35  ;;  %v2628_v42 = vmul.f32 1.442695, %v1925_v36  ;;  %v1927_v43 = vmul.f32 %v12992_v56, %v1091_v31 }
 0x35d   : > { %v9557_v44 = vpop.eup %9556  ;;  %v5683_v45 = vmul.f32 0.6931472, %v9555_v40  ;;  %9576 = vpow2.f32 %v2626_v52  ;;  %v2630_v46 = vmul.f32 1.442695, %v1926_v38  ;;  %v1928_v47 = vmul.f32 %v12992_v56, %v1093_v39  ;;  %v13089_v52 = vld [vmem:[#allocation5] ss:$0 sm:$0xff] }
 0x35e   : > { %v9559_v48 = vpop.eup %9558  ;;  %v4149_v49 = vmul.f32 0.6931472, %v9557_v44  ;;  %9578 = vpow2.f32 %v2628_v42  ;;  %v2632_v50 = vmul.f32 1.442695, %v1927_v43 }
 0x35f   : > { %v9561_v51 = vpop.eup %9560  ;;  %v6524_v53 = vsub.f32 %v4147_v41, %v5683_v45  ;;  %v5685_v54 = vmul.f32 0.6931472, %v9559_v48  ;;  %9580 = vpow2.f32 %v2630_v46  ;;  %v2634_v55 = vmul.f32 1.442695, %v1928_v47 }
 0x360   : > { %v9563_v58 = vpop.eup %9562  ;;  %v4151_v59 = vmul.f32 0.6931472, %v9561_v51  ;;  %9582 = vpow2.f32 %v2632_v50 }
 0x361   : > { %v9565_v61 = vpop.eup %9564  ;;  %7036 = vst [vmem:[%s12522_s20 + $0x5b0] sm:$0xff] %v6524_v53  ;;  %v6525_v56 = vsub.f32 %v4149_v49, %v5685_v54  ;;  %v5687_v62 = vmul.f32 0.6931472, %v9563_v58  ;;  %9584 = vpow2.f32 %v2634_v55 }
 0x362   : > { %v9567_v63 = vpop.eup %9566  ;;  %v4153_v0 = vmul.f32 0.6931472, %v9565_v61  ;;  %9586 = vlog2.f32 %v386_v57 }
 0x363   : > { %v9569_v2 = vpop.eup %9568  ;;  %7037 = vst [vmem:[%s12522_s20 + $0x5b8] sm:$0xff] %v6525_v56  ;;  %v6526_v3 = vsub.f32 %v4151_v59, %v5687_v62  ;;  %v5689_v4 = vmul.f32 0.6931472, %v9567_v63  ;;  %9588 = vlog2.f32 %v387_v60 }
 0x364   : > { %v9571_v5 = vpop.eup %9570  ;;  %v7671_v8 = vadd.f32 -0.99, %v9569_v2  ;;  %v4992_v9 = vsub.f32 1.0, %v9569_v2  ;;  %9590 = vlog2.f32 %v388_v14 }
 0x365   : > { %v9573_v10 = vpop.eup %9572  ;;  %7038 = vst [vmem:[%s12522_s20 + $0x5c0] sm:$0xff] %v6526_v3  ;;  %v6527_v11 = vsub.f32 %v4153_v0, %v5689_v4  ;;  %v7672_v12 = vadd.f32 -0.99, %v9571_v5  ;;  %v4993_v6 = vsub.f32 1.0, %v9571_v5  ;;  %9592 = vlog2.f32 %v389_v1 }
 0x366   : > { %v9575_v13 = vpop.eup %9574  ;;  %9594 = vlog2.f32 %v7671_v8  ;;  %v7673_v15 = vadd.f32 -0.99, %v9573_v10  ;;  %v4994_v17 = vsub.f32 1.0, %v9573_v10 }
 0x367   : > { %v9577_v16 = vpop.eup %9576  ;;  %7039 = vst [vmem:[%s12522_s20 + $0x5c8] sm:$0xff] %v6527_v11  ;;  %9596 = vlog2.f32 %v4992_v9  ;;  %v7674_v18 = vadd.f32 -0.99, %v9575_v13  ;;  %v4995_v20 = vsub.f32 1.0, %v9575_v13  ;;  %v390_v9 = vld [vmem:[%s12465_s8 + $0x638] sm:$0xff] }
 0x368   : > { %v9579_v7 = vpop.eup %9578  ;;  %9598 = vlog2.f32 %v7672_v12  ;;  %v7675_v22 = vadd.f32 -0.99, %v9577_v16  ;;  %v4996_v24 = vsub.f32 1.0, %v9577_v16  ;;  %v392_v16 = vld [vmem:[%s12465_s8 + $0x648] sm:$0xff] }
 0x369   : > { %v9581_v19 = vpop.eup %9580  ;;  %9600 = vlog2.f32 %v4993_v6  ;;  %v7676_v26 = vadd.f32 -0.99, %v9579_v7  ;;  %v4997_v28 = vsub.f32 1.0, %v9579_v7  ;;  %v391_v6 = vld [vmem:[%s12465_s8 + $0x640] sm:$0xff] }
 0x36a   : > { %v9583_v21 = vpop.eup %9582  ;;  %9602 = vlog2.f32 %v7673_v15  ;;  %v7677_v32 = vadd.f32 -0.99, %v9581_v19  ;;  %v4998_v35 = vsub.f32 1.0, %v9581_v19  ;;  %v393_v19 = vld [vmem:[%s12465_s8 + $0x650] sm:$0xff] }
 0x36b   : > { %v9585_v23 = vpop.eup %9584  ;;  %9604 = vlog2.f32 %v4994_v17  ;;  %v7678_v37 = vadd.f32 -0.99, %v9583_v21  ;;  %v4999_v42 = vsub.f32 1.0, %v9583_v21 }
 0x36c   : > { %v9587_v25 = vpop.eup %9586  ;;  %9606 = vlog2.f32 %v7674_v18  ;;  %v7679_v46 = vadd.f32 -0.99, %v9585_v23  ;;  %v5000_v50 = vsub.f32 1.0, %v9585_v23 }
 0x36d   : > { %v9589_v27 = vpop.eup %9588  ;;  %9608 = vlog2.f32 %v4995_v20  ;;  %v1095_v29 = vmul.f32 0.6931472, %v9587_v25 }
 0x36e   : > { %v9591_v30 = vpop.eup %9590  ;;  %9610 = vlog2.f32 %v7675_v22  ;;  %v1097_v33 = vmul.f32 0.6931472, %v9589_v27  ;;  %v394_v22 = vld [vmem:[%s12465_s8 + $0x658] sm:$0xff] }
 0x36f   : > { %v9593_v34 = vpop.eup %9592  ;;  %9612 = vlog2.f32 %v4996_v24  ;;  %v1099_v36 = vmul.f32 0.6931472, %v9591_v30  ;;  %v1929_v38 = vmul.f32 %v13089_v52, %v1095_v29  ;;  %v396_v29 = vld [vmem:[%s12465_s8 + $0x668] sm:$0xff] }
 0x370   : > { %v9595_v31 = vpop.eup %9594  ;;  %9614 = vlog2.f32 %v7676_v26  ;;  %v1101_v39 = vmul.f32 0.6931472, %v9593_v34  ;;  %v1930_v43 = vmul.f32 %v13089_v52, %v1097_v33  ;;  %v395_v26 = vld [vmem:[%s12465_s8 + $0x660] sm:$0xff]  ;;  %v397_v34 = vld [vmem:[%s12465_s8 + $0x670] sm:$0xff] }
 0x371   : > { %v9597_v40 = vpop.eup %9596  ;;  %v4155_v41 = vmul.f32 0.6931472, %v9595_v31  ;;  %9616 = vlog2.f32 %v4997_v28  ;;  %v1931_v47 = vmul.f32 %v13089_v52, %v1099_v36  ;;  %v2636_v57 = vmul.f32 1.442695, %v1929_v38  ;;  %v398_v31 = vld [vmem:[%s12465_s8 + $0x678] sm:$0xff] }
 0x372   : > { %v9599_v44 = vpop.eup %9598  ;;  %v5691_v45 = vmul.f32 0.6931472, %v9597_v40  ;;  %9618 = vlog2.f32 %v7677_v32  ;;  %v1932_v51 = vmul.f32 %v13089_v52, %v1101_v39  ;;  %v2638_v60 = vmul.f32 1.442695, %v1930_v43 }
 0x373   : > { %v9601_v48 = vpop.eup %9600  ;;  %v4157_v49 = vmul.f32 0.6931472, %v9599_v44  ;;  %9620 = vlog2.f32 %v4998_v35  ;;  %v2640_v14 = vmul.f32 1.442695, %v1931_v47 }
 0x374   : > { %v9603_v53 = vpop.eup %9602  ;;  %v6528_v54 = vsub.f32 %v4155_v41, %v5691_v45  ;;  %v5693_v55 = vmul.f32 0.6931472, %v9601_v48  ;;  %9622 = vlog2.f32 %v7678_v37  ;;  %v2642_v1 = vmul.f32 1.442695, %v1932_v51 }
 0x375   : > { %v9605_v58 = vpop.eup %9604  ;;  %v4159_v59 = vmul.f32 0.6931472, %v9603_v53  ;;  %9624 = vlog2.f32 %v4999_v42 }
 0x376   : > { %v9607_v61 = vpop.eup %9606  ;;  %7040 = vst [vmem:[%s12522_s20 + $0x5d0] sm:$0xff] %v6528_v54  ;;  %v6529_v56 = vsub.f32 %v4157_v49, %v5693_v55  ;;  %v5695_v62 = vmul.f32 0.6931472, %v9605_v58  ;;  %9626 = vlog2.f32 %v7679_v46 }
 0x377   : > { %v9609_v63 = vpop.eup %9608  ;;  %v4161_v0 = vmul.f32 0.6931472, %v9607_v61  ;;  %9628 = vlog2.f32 %v5000_v50 }
 0x378   : > { %v9611_v2 = vpop.eup %9610  ;;  %7041 = vst [vmem:[%s12522_s20 + $0x5d8] sm:$0xff] %v6529_v56  ;;  %v6530_v3 = vsub.f32 %v4159_v59, %v5695_v62  ;;  %v5697_v4 = vmul.f32 0.6931472, %v9609_v63  ;;  %9630 = vpow2.f32 %v2636_v57 }
 0x379   : > { %v9613_v5 = vpop.eup %9612  ;;  %v4163_v8 = vmul.f32 0.6931472, %v9611_v2  ;;  %9632 = vpow2.f32 %v2638_v60 }
 0x37a   : > { %v9615_v10 = vpop.eup %9614  ;;  %7042 = vst [vmem:[%s12522_s20 + $0x5e0] sm:$0xff] %v6530_v3  ;;  %v6531_v11 = vsub.f32 %v4161_v0, %v5697_v4  ;;  %v5699_v12 = vmul.f32 0.6931472, %v9613_v5  ;;  %9634 = vpow2.f32 %v2640_v14 }
 0x37b   : > { %v9617_v13 = vpop.eup %9616  ;;  %v4165_v15 = vmul.f32 0.6931472, %v9615_v10  ;;  %9636 = vpow2.f32 %v2642_v1 }
 0x37c   : > { %v9619_v17 = vpop.eup %9618  ;;  %7043 = vst [vmem:[%s12522_s20 + $0x5e8] sm:$0xff] %v6531_v11  ;;  %v6532_v7 = vsub.f32 %v4163_v8, %v5699_v12  ;;  %v5701_v18 = vmul.f32 0.6931472, %v9617_v13  ;;  %9638 = vlog2.f32 %v390_v9 }
 0x37d   : > { %v9621_v20 = vpop.eup %9620  ;;  %v4167_v21 = vmul.f32 0.6931472, %v9619_v17  ;;  %9640 = vlog2.f32 %v391_v6 }
 0x37e   : > { %v9623_v23 = vpop.eup %9622  ;;  %7044 = vst [vmem:[%s12522_s20 + $0x5f0] sm:$0xff] %v6532_v7  ;;  %v6533_v24 = vsub.f32 %v4165_v15, %v5701_v18  ;;  %v5703_v25 = vmul.f32 0.6931472, %v9621_v20  ;;  %9642 = vlog2.f32 %v392_v16 }
 0x37f   : > { %v9625_v27 = vpop.eup %9624  ;;  %v4169_v28 = vmul.f32 0.6931472, %v9623_v23  ;;  %9644 = vlog2.f32 %v393_v19 }
 0x380   : > { %v9627_v30 = vpop.eup %9626  ;;  %7045 = vst [vmem:[%s12522_s20 + $0x5f8] sm:$0xff] %v6533_v24  ;;  %v6534_v32 = vsub.f32 %v4167_v21, %v5703_v25  ;;  %v5705_v33 = vmul.f32 0.6931472, %v9625_v27  ;;  %9646 = vlog2.f32 %v394_v22 }
 0x381   : > { %v9629_v35 = vpop.eup %9628  ;;  %v4171_v36 = vmul.f32 0.6931472, %v9627_v30  ;;  %9648 = vlog2.f32 %v395_v26 }
 0x382   : > { %v9631_v37 = vpop.eup %9630  ;;  %7046 = vst [vmem:[%s12522_s20 + $0x600] sm:$0xff] %v6534_v32  ;;  %v6535_v38 = vsub.f32 %v4169_v28, %v5705_v33  ;;  %v5707_v39 = vmul.f32 0.6931472, %v9629_v35  ;;  %9650 = vlog2.f32 %v396_v29 }
 0x383   : > { %v9633_v40 = vpop.eup %9632  ;;  %v7680_v41 = vadd.f32 -0.99, %v9631_v37  ;;  %v5001_v42 = vsub.f32 1.0, %v9631_v37  ;;  %9652 = vlog2.f32 %v397_v34 }
 0x384   : > { %v9635_v43 = vpop.eup %9634  ;;  %7047 = vst [vmem:[%s12522_s20 + $0x608] sm:$0xff] %v6535_v38  ;;  %v6536_v44 = vsub.f32 %v4171_v36, %v5707_v39  ;;  %v7681_v45 = vadd.f32 -0.99, %v9633_v40  ;;  %v5002_v46 = vsub.f32 1.0, %v9633_v40  ;;  %9654 = vlog2.f32 %v398_v31  ;;  %v399_v36 = vld [vmem:[%s12465_s8 + $0x680] sm:$0xff]  ;;  %v400_v38 = vld [vmem:[%s12465_s8 + $0x688] sm:$0xff] }
 0x385   : > { %v9637_v47 = vpop.eup %9636  ;;  %9656 = vlog2.f32 %v7680_v41  ;;  %v7682_v48 = vadd.f32 -0.99, %v9635_v43  ;;  %v5003_v50 = vsub.f32 1.0, %v9635_v43 }
 0x386   : > { %v9639_v49 = vpop.eup %9638  ;;  %7048 = vst [vmem:[%s12522_s20 + $0x610] sm:$0xff] %v6536_v44  ;;  %9658 = vlog2.f32 %v5001_v42  ;;  %v7683_v53 = vadd.f32 -0.99, %v9637_v47  ;;  %v5004_v57 = vsub.f32 1.0, %v9637_v47  ;;  %v401_v42 = vld [vmem:[%s12465_s8 + $0x690] sm:$0xff] }
 0x387   : > { %v9641_v51 = vpop.eup %9640  ;;  %9660 = vlog2.f32 %v7681_v45  ;;  %v1103_v54 = vmul.f32 0.6931472, %v9639_v49  ;;  %v402_v45 = vld [vmem:[%s12465_s8 + $0x698] sm:$0xff] }
 0x388   : > { %v9643_v55 = vpop.eup %9642  ;;  %9662 = vlog2.f32 %v5002_v46  ;;  %v1105_v58 = vmul.f32 0.6931472, %v9641_v51 }
 0x389   : > { %v9645_v59 = vpop.eup %9644  ;;  %9664 = vlog2.f32 %v7682_v48  ;;  %v1933_v60 = vmul.f32 %v13089_v52, %v1103_v54  ;;  %v1107_v61 = vmul.f32 0.6931472, %v9643_v55 }
 0x38a   : > { %v9647_v56 = vpop.eup %9646  ;;  %9666 = vlog2.f32 %v5003_v50  ;;  %v1934_v62 = vmul.f32 %v13089_v52, %v1105_v58  ;;  %v1109_v14 = vmul.f32 0.6931472, %v9645_v59 }
 0x38b   : > { %v9649_v63 = vpop.eup %9648  ;;  %9668 = vlog2.f32 %v7683_v53  ;;  %v2644_v0 = vmul.f32 1.442695, %v1933_v60  ;;  %v1935_v1 = vmul.f32 %v13089_v52, %v1107_v61  ;;  %v1111_v2 = vmul.f32 0.6931472, %v9647_v56 }
 0x38c   : > { %v9651_v3 = vpop.eup %9650  ;;  %9670 = vlog2.f32 %v5004_v57  ;;  %v2646_v4 = vmul.f32 1.442695, %v1934_v62  ;;  %v1936_v5 = vmul.f32 %v13089_v52, %v1109_v14  ;;  %v1113_v8 = vmul.f32 0.6931472, %v9649_v63 }
 0x38d   : > { %v9653_v9 = vpop.eup %9652  ;;  %9672 = vpow2.f32 %v2644_v0  ;;  %v2648_v10 = vmul.f32 1.442695, %v1935_v1  ;;  %v1937_v11 = vmul.f32 %v13089_v52, %v1111_v2  ;;  %v1115_v12 = vmul.f32 0.6931472, %v9651_v3 }
 0x38e   : > { %v9655_v6 = vpop.eup %9654  ;;  %9674 = vpow2.f32 %v2646_v4  ;;  %v2650_v13 = vmul.f32 1.442695, %v1936_v5  ;;  %v1938_v15 = vmul.f32 %v13089_v52, %v1113_v8  ;;  %v1117_v16 = vmul.f32 0.6931472, %v9653_v9 }
 0x38f   : > { %v9657_v17 = vpop.eup %9656  ;;  %9676 = vpow2.f32 %v2648_v10  ;;  %v2652_v7 = vmul.f32 1.442695, %v1937_v11  ;;  %v1939_v18 = vmul.f32 %v13089_v52, %v1115_v12  ;;  %v1119_v19 = vmul.f32 0.6931472, %v9655_v6 }
 0x390   : > { %v9659_v20 = vpop.eup %9658  ;;  %v4173_v21 = vmul.f32 0.6931472, %v9657_v17  ;;  %9678 = vpow2.f32 %v2650_v13  ;;  %v2654_v22 = vmul.f32 1.442695, %v1938_v15  ;;  %v1940_v23 = vmul.f32 %v13089_v52, %v1117_v16 }
 0x391   : > { %v9661_v24 = vpop.eup %9660  ;;  %v5709_v25 = vmul.f32 0.6931472, %v9659_v20  ;;  %9680 = vpow2.f32 %v2652_v7  ;;  %v2656_v26 = vmul.f32 1.442695, %v1939_v18  ;;  %v1941_v27 = vmul.f32 %v13089_v52, %v1119_v19 }
 0x392   : > { %v9663_v28 = vpop.eup %9662  ;;  %v4175_v29 = vmul.f32 0.6931472, %v9661_v24  ;;  %9682 = vpow2.f32 %v2654_v22  ;;  %v2658_v30 = vmul.f32 1.442695, %v1940_v23 }
 0x393   : > { %v9665_v32 = vpop.eup %9664  ;;  %v6537_v33 = vsub.f32 %v4173_v21, %v5709_v25  ;;  %v5711_v34 = vmul.f32 0.6931472, %v9663_v28  ;;  %9684 = vpow2.f32 %v2656_v26  ;;  %v2660_v35 = vmul.f32 1.442695, %v1941_v27 }
 0x394   : > { %v9667_v31 = vpop.eup %9666  ;;  %v4177_v37 = vmul.f32 0.6931472, %v9665_v32  ;;  %9686 = vpow2.f32 %v2658_v30 }
 0x395   : > { %v9669_v39 = vpop.eup %9668  ;;  %7049 = vst [vmem:[%s12522_s20 + $0x618] sm:$0xff] %v6537_v33  ;;  %v6538_v40 = vsub.f32 %v4175_v29, %v5711_v34  ;;  %v5713_v41 = vmul.f32 0.6931472, %v9667_v31  ;;  %9688 = vpow2.f32 %v2660_v35 }
 0x396   : > { %v9671_v43 = vpop.eup %9670  ;;  %v4179_v44 = vmul.f32 0.6931472, %v9669_v39  ;;  %9690 = vlog2.f32 %v399_v36 }
 0x397   : > { %v9673_v46 = vpop.eup %9672  ;;  %7050 = vst [vmem:[%s12522_s20 + $0x620] sm:$0xff] %v6538_v40  ;;  %v6539_v47 = vsub.f32 %v4177_v37, %v5713_v41  ;;  %v5715_v48 = vmul.f32 0.6931472, %v9671_v43  ;;  %9692 = vlog2.f32 %v400_v38 }
 0x398   : > { %v9675_v49 = vpop.eup %9674  ;;  %v7684_v50 = vadd.f32 -0.99, %v9673_v46  ;;  %v5005_v51 = vsub.f32 1.0, %v9673_v46  ;;  %9694 = vlog2.f32 %v401_v42 }
 0x399   : > { %v9677_v53 = vpop.eup %9676  ;;  %7051 = vst [vmem:[%s12522_s20 + $0x628] sm:$0xff] %v6539_v47  ;;  %v6540_v54 = vsub.f32 %v4179_v44, %v5715_v48  ;;  %v7685_v55 = vadd.f32 -0.99, %v9675_v49  ;;  %v5006_v57 = vsub.f32 1.0, %v9675_v49  ;;  %9696 = vlog2.f32 %v402_v45 }
 0x39a   : > { %v9679_v58 = vpop.eup %9678  ;;  %9698 = vlog2.f32 %v7684_v50  ;;  %v7686_v59 = vadd.f32 -0.99, %v9677_v53  ;;  %v5007_v61 = vsub.f32 1.0, %v9677_v53 }
 0x39b   : > { %v9681_v60 = vpop.eup %9680  ;;  %7052 = vst [vmem:[%s12522_s20 + $0x630] sm:$0xff] %v6540_v54  ;;  %9700 = vlog2.f32 %v5005_v51  ;;  %v7687_v62 = vadd.f32 -0.99, %v9679_v58  ;;  %v5008_v63 = vsub.f32 1.0, %v9679_v58  ;;  %v403_v51 = vld [vmem:[%s12465_s8 + $0x6a0] sm:$0xff] }
 0x39c   : > { %v9683_v56 = vpop.eup %9682  ;;  %9702 = vlog2.f32 %v7685_v55  ;;  %v7688_v1 = vadd.f32 -0.99, %v9681_v60  ;;  %v5009_v3 = vsub.f32 1.0, %v9681_v60  ;;  %v405_v60 = vld [vmem:[%s12465_s8 + $0x6b0] sm:$0xff] }
 0x39d   : > { %v9685_v14 = vpop.eup %9684  ;;  %9704 = vlog2.f32 %v5006_v57  ;;  %v7689_v5 = vadd.f32 -0.99, %v9683_v56  ;;  %v5010_v9 = vsub.f32 1.0, %v9683_v56  ;;  %v404_v57 = vld [vmem:[%s12465_s8 + $0x6a8] sm:$0xff] }
 0x39e   : > { %v9687_v0 = vpop.eup %9686  ;;  %9706 = vlog2.f32 %v7686_v59  ;;  %v7690_v12 = vadd.f32 -0.99, %v9685_v14  ;;  %v5011_v15 = vsub.f32 1.0, %v9685_v14  ;;  %v406_v14 = vld [vmem:[%s12465_s8 + $0x6b8] sm:$0xff] }
 0x39f   : > { %v9689_v2 = vpop.eup %9688  ;;  %9708 = vlog2.f32 %v5007_v61  ;;  %v7691_v7 = vadd.f32 -0.99, %v9687_v0  ;;  %v5012_v22 = vsub.f32 1.0, %v9687_v0 }
 0x3a0   : > { %v9691_v4 = vpop.eup %9690  ;;  %9710 = vlog2.f32 %v7687_v62  ;;  %v7692_v26 = vadd.f32 -0.99, %v9689_v2  ;;  %v5013_v30 = vsub.f32 1.0, %v9689_v2 }
 0x3a1   : > { %v9693_v8 = vpop.eup %9692  ;;  %9712 = vlog2.f32 %v5008_v63  ;;  %v1121_v10 = vmul.f32 0.6931472, %v9691_v4 }
 0x3a2   : > { %v9695_v11 = vpop.eup %9694  ;;  %9714 = vlog2.f32 %v7688_v1  ;;  %v1123_v6 = vmul.f32 0.6931472, %v9693_v8  ;;  %v407_v1 = vld [vmem:[%s12465_s8 + $0x6c0] sm:$0xff] }
 0x3a3   : > { %v9697_v13 = vpop.eup %9696  ;;  %9716 = vlog2.f32 %v5009_v3  ;;  %v1125_v16 = vmul.f32 0.6931472, %v9695_v11  ;;  %v1942_v18 = vmul.f32 %v13089_v52, %v1121_v10  ;;  %v409_v10 = vld [vmem:[%s12465_s8 + $0x6d0] sm:$0xff] }
 0x3a4   : > { %v9699_v17 = vpop.eup %9698  ;;  %9718 = vlog2.f32 %v7689_v5  ;;  %v1127_v19 = vmul.f32 0.6931472, %v9697_v13  ;;  %v1943_v23 = vmul.f32 %v13089_v52, %v1123_v6  ;;  %v408_v5 = vld [vmem:[%s12465_s8 + $0x6c8] sm:$0xff]  ;;  %v410_v13 = vld [vmem:[%s12465_s8 + $0x6d8] sm:$0xff] }
 0x3a5   : > { %v9701_v20 = vpop.eup %9700  ;;  %v4181_v21 = vmul.f32 0.6931472, %v9699_v17  ;;  %9720 = vlog2.f32 %v5010_v9  ;;  %v1944_v27 = vmul.f32 %v13089_v52, %v1125_v16  ;;  %v2662_v36 = vmul.f32 1.442695, %v1942_v18  ;;  %v411_v17 = vld [vmem:[%s12465_s8 + $0x6e0] sm:$0xff] }
 0x3a6   : > { %v9703_v24 = vpop.eup %9702  ;;  %v5717_v25 = vmul.f32 0.6931472, %v9701_v20  ;;  %9722 = vlog2.f32 %v7690_v12  ;;  %v1945_v32 = vmul.f32 %v13089_v52, %v1127_v19  ;;  %v2664_v38 = vmul.f32 1.442695, %v1943_v23 }
 0x3a7   : > { %v9705_v28 = vpop.eup %9704  ;;  %v4183_v29 = vmul.f32 0.6931472, %v9703_v24  ;;  %9724 = vlog2.f32 %v5011_v15  ;;  %v2666_v42 = vmul.f32 1.442695, %v1944_v27 }
 0x3a8   : > { %v9707_v33 = vpop.eup %9706  ;;  %v6541_v34 = vsub.f32 %v4181_v21, %v5717_v25  ;;  %v5719_v35 = vmul.f32 0.6931472, %v9705_v28  ;;  %9726 = vlog2.f32 %v7691_v7  ;;  %v2668_v45 = vmul.f32 1.442695, %v1945_v32 }
 0x3a9   : > { %v9709_v31 = vpop.eup %9708  ;;  %v4185_v37 = vmul.f32 0.6931472, %v9707_v33  ;;  %9728 = vlog2.f32 %v5012_v22 }
 0x3aa   : > { %v9711_v39 = vpop.eup %9710  ;;  %7053 = vst [vmem:[%s12522_s20 + $0x638] sm:$0xff] %v6541_v34  ;;  %v6542_v40 = vsub.f32 %v4183_v29, %v5719_v35  ;;  %v5721_v41 = vmul.f32 0.6931472, %v9709_v31  ;;  %9730 = vlog2.f32 %v7692_v26 }
 0x3ab   : > { %v9713_v43 = vpop.eup %9712  ;;  %v4187_v44 = vmul.f32 0.6931472, %v9711_v39  ;;  %9732 = vlog2.f32 %v5013_v30 }
 0x3ac   : > { %v9715_v46 = vpop.eup %9714  ;;  %7054 = vst [vmem:[%s12522_s20 + $0x640] sm:$0xff] %v6542_v40  ;;  %v6543_v47 = vsub.f32 %v4185_v37, %v5721_v41  ;;  %v5723_v48 = vmul.f32 0.6931472, %v9713_v43  ;;  %9734 = vpow2.f32 %v2662_v36 }
 0x3ad   : > { %v9717_v49 = vpop.eup %9716  ;;  %v4189_v50 = vmul.f32 0.6931472, %v9715_v46  ;;  %9736 = vpow2.f32 %v2664_v38 }
 0x3ae   : > { %v9719_v53 = vpop.eup %9718  ;;  %7055 = vst [vmem:[%s12522_s20 + $0x648] sm:$0xff] %v6543_v47  ;;  %v6544_v54 = vsub.f32 %v4187_v44, %v5723_v48  ;;  %v5725_v55 = vmul.f32 0.6931472, %v9717_v49  ;;  %9738 = vpow2.f32 %v2666_v42 }
 0x3af   : > { %v9721_v58 = vpop.eup %9720  ;;  %v4191_v59 = vmul.f32 0.6931472, %v9719_v53  ;;  %9740 = vpow2.f32 %v2668_v45 }
 0x3b0   : > { %v9723_v61 = vpop.eup %9722  ;;  %7056 = vst [vmem:[%s12522_s20 + $0x650] sm:$0xff] %v6544_v54  ;;  %v6545_v56 = vsub.f32 %v4189_v50, %v5725_v55  ;;  %v5727_v62 = vmul.f32 0.6931472, %v9721_v58  ;;  %9742 = vlog2.f32 %v403_v51 }
 0x3b1   : > { %v9725_v63 = vpop.eup %9724  ;;  %v4193_v0 = vmul.f32 0.6931472, %v9723_v61  ;;  %9744 = vlog2.f32 %v404_v57 }
 0x3b2   : > { %v9727_v2 = vpop.eup %9726  ;;  %7057 = vst [vmem:[%s12522_s20 + $0x658] sm:$0xff] %v6545_v56  ;;  %v6546_v3 = vsub.f32 %v4191_v59, %v5727_v62  ;;  %v5729_v4 = vmul.f32 0.6931472, %v9725_v63  ;;  %9746 = vlog2.f32 %v405_v60 }
 0x3b3   : > { %v9729_v8 = vpop.eup %9728  ;;  %v4195_v9 = vmul.f32 0.6931472, %v9727_v2  ;;  %9748 = vlog2.f32 %v406_v14 }
 0x3b4   : > { %v9731_v11 = vpop.eup %9730  ;;  %7058 = vst [vmem:[%s12522_s20 + $0x660] sm:$0xff] %v6546_v3  ;;  %v6547_v12 = vsub.f32 %v4193_v0, %v5729_v4  ;;  %v5731_v6 = vmul.f32 0.6931472, %v9729_v8  ;;  %9750 = vlog2.f32 %v407_v1 }
 0x3b5   : > { %v9733_v15 = vpop.eup %9732  ;;  %v4197_v16 = vmul.f32 0.6931472, %v9731_v11  ;;  %9752 = vlog2.f32 %v408_v5 }
 0x3b6   : > { %v9735_v7 = vpop.eup %9734  ;;  %7059 = vst [vmem:[%s12522_s20 + $0x668] sm:$0xff] %v6547_v12  ;;  %v6548_v18 = vsub.f32 %v4195_v9, %v5731_v6  ;;  %v5733_v19 = vmul.f32 0.6931472, %v9733_v15  ;;  %9754 = vlog2.f32 %v409_v10 }
 0x3b7   : > { %v9737_v20 = vpop.eup %9736  ;;  %v7693_v21 = vadd.f32 -0.99, %v9735_v7  ;;  %v5014_v22 = vsub.f32 1.0, %v9735_v7  ;;  %9756 = vlog2.f32 %v410_v13 }
 0x3b8   : > { %v9739_v23 = vpop.eup %9738  ;;  %7060 = vst [vmem:[%s12522_s20 + $0x670] sm:$0xff] %v6548_v18  ;;  %v6549_v24 = vsub.f32 %v4197_v16, %v5733_v19  ;;  %v7694_v25 = vadd.f32 -0.99, %v9737_v20  ;;  %v5015_v26 = vsub.f32 1.0, %v9737_v20  ;;  %9758 = vlog2.f32 %v411_v17  ;;  %v412_v16 = vld [vmem:[%s12465_s8 + $0x6e8] sm:$0xff]  ;;  %v413_v18 = vld [vmem:[%s12465_s8 + $0x6f0] sm:$0xff] }
 0x3b9   : > { %v9741_v27 = vpop.eup %9740  ;;  %9760 = vlog2.f32 %v7693_v21  ;;  %v7695_v28 = vadd.f32 -0.99, %v9739_v23  ;;  %v5016_v30 = vsub.f32 1.0, %v9739_v23 }
 0x3ba   : > { %v9743_v29 = vpop.eup %9742  ;;  %7061 = vst [vmem:[%s12522_s20 + $0x678] sm:$0xff] %v6549_v24  ;;  %9762 = vlog2.f32 %v5014_v22  ;;  %v7696_v33 = vadd.f32 -0.99, %v9741_v27  ;;  %v5017_v36 = vsub.f32 1.0, %v9741_v27  ;;  %v414_v22 = vld [vmem:[%s12465_s8 + $0x6f8] sm:$0xff] }
 0x3bb   : > { %v9745_v32 = vpop.eup %9744  ;;  %9764 = vlog2.f32 %v7694_v25  ;;  %v1129_v34 = vmul.f32 0.6931472, %v9743_v29  ;;  %v415_v25 = vld [vmem:[%s12465_s8 + $0x700] sm:$0xff] }
 0x3bc   : > { %v9747_v35 = vpop.eup %9746  ;;  %9766 = vlog2.f32 %v5015_v26  ;;  %v1131_v31 = vmul.f32 0.6931472, %v9745_v32 }
 0x3bd   : > { %v9749_v37 = vpop.eup %9748  ;;  %9768 = vlog2.f32 %v7695_v28  ;;  %v1946_v38 = vmul.f32 %v13089_v52, %v1129_v34  ;;  %v1133_v39 = vmul.f32 0.6931472, %v9747_v35 }
 0x3be   : > { %v9751_v40 = vpop.eup %9750  ;;  %9770 = vlog2.f32 %v5016_v30  ;;  %v1947_v41 = vmul.f32 %v13089_v52, %v1131_v31  ;;  %v1135_v42 = vmul.f32 0.6931472, %v9749_v37 }
 0x3bf   : > { %v9753_v43 = vpop.eup %9752  ;;  %9772 = vlog2.f32 %v7696_v33  ;;  %v2670_v44 = vmul.f32 1.442695, %v1946_v38  ;;  %v1948_v45 = vmul.f32 %v13089_v52, %v1133_v39  ;;  %v1137_v46 = vmul.f32 0.6931472, %v9751_v40 }
 0x3c0   : > { %v9755_v47 = vpop.eup %9754  ;;  %9774 = vlog2.f32 %v5017_v36  ;;  %v2672_v48 = vmul.f32 1.442695, %v1947_v41  ;;  %v1949_v49 = vmul.f32 %v13089_v52, %v1135_v42  ;;  %v1139_v50 = vmul.f32 0.6931472, %v9753_v43 }
 0x3c1   : > { %v9757_v51 = vpop.eup %9756  ;;  %9776 = vpow2.f32 %v2670_v44  ;;  %v2674_v53 = vmul.f32 1.442695, %v1948_v45  ;;  %v1950_v54 = vmul.f32 %v13089_v52, %v1137_v46  ;;  %v1141_v55 = vmul.f32 0.6931472, %v9755_v47 }
 0x3c2   : > { %v9759_v57 = vpop.eup %9758  ;;  %9778 = vpow2.f32 %v2672_v48  ;;  %v2676_v58 = vmul.f32 1.442695, %v1949_v49  ;;  %v1951_v59 = vmul.f32 %v13089_v52, %v1139_v50  ;;  %v1143_v60 = vmul.f32 0.6931472, %v9757_v51 }
 0x3c3   : > { %v9761_v61 = vpop.eup %9760  ;;  %9780 = vpow2.f32 %v2674_v53  ;;  %v2678_v56 = vmul.f32 1.442695, %v1950_v54  ;;  %v1952_v62 = vmul.f32 %v13089_v52, %v1141_v55  ;;  %v1145_v14 = vmul.f32 0.6931472, %v9759_v57 }
 0x3c4   : > { %v9763_v63 = vpop.eup %9762  ;;  %v4199_v0 = vmul.f32 0.6931472, %v9761_v61  ;;  %9782 = vpow2.f32 %v2676_v58  ;;  %v2680_v1 = vmul.f32 1.442695, %v1951_v59  ;;  %v1953_v2 = vmul.f32 %v13089_v52, %v1143_v60 }
 0x3c5   : > { %v9765_v3 = vpop.eup %9764  ;;  %v5735_v4 = vmul.f32 0.6931472, %v9763_v63  ;;  %9784 = vpow2.f32 %v2678_v56  ;;  %v2682_v5 = vmul.f32 1.442695, %v1952_v62  ;;  %v1954_v8 = vmul.f32 %v13089_v52, %v1145_v14 }
 0x3c6   : > { %v9767_v9 = vpop.eup %9766  ;;  %v4201_v10 = vmul.f32 0.6931472, %v9765_v3  ;;  %9786 = vpow2.f32 %v2680_v1  ;;  %v2684_v11 = vmul.f32 1.442695, %v1953_v2 }
 0x3c7   : > { %v9769_v12 = vpop.eup %9768  ;;  %v6550_v6 = vsub.f32 %v4199_v0, %v5735_v4  ;;  %v5737_v13 = vmul.f32 0.6931472, %v9767_v9  ;;  %9788 = vpow2.f32 %v2682_v5  ;;  %v2686_v15 = vmul.f32 1.442695, %v1954_v8 }
 0x3c8   : > { %v9771_v17 = vpop.eup %9770  ;;  %v4203_v7 = vmul.f32 0.6931472, %v9769_v12  ;;  %9790 = vpow2.f32 %v2684_v11 }
 0x3c9   : > { %v9773_v19 = vpop.eup %9772  ;;  %7062 = vst [vmem:[%s12522_s20 + $0x680] sm:$0xff] %v6550_v6  ;;  %v6551_v20 = vsub.f32 %v4201_v10, %v5737_v13  ;;  %v5739_v21 = vmul.f32 0.6931472, %v9771_v17  ;;  %9792 = vpow2.f32 %v2686_v15 }
 0x3ca   : > { %v9775_v23 = vpop.eup %9774  ;;  %v4205_v24 = vmul.f32 0.6931472, %v9773_v19  ;;  %9794 = vlog2.f32 %v412_v16 }
 0x3cb   : > { %v9777_v26 = vpop.eup %9776  ;;  %7063 = vst [vmem:[%s12522_s20 + $0x688] sm:$0xff] %v6551_v20  ;;  %v6552_v27 = vsub.f32 %v4203_v7, %v5739_v21  ;;  %v5741_v28 = vmul.f32 0.6931472, %v9775_v23  ;;  %9796 = vlog2.f32 %v413_v18 }
 0x3cc   : > { %v9779_v29 = vpop.eup %9778  ;;  %v7697_v30 = vadd.f32 -0.99, %v9777_v26  ;;  %v5018_v32 = vsub.f32 1.0, %v9777_v26  ;;  %9798 = vlog2.f32 %v414_v22 }
 0x3cd   : > { %v9781_v33 = vpop.eup %9780  ;;  %7064 = vst [vmem:[%s12522_s20 + $0x690] sm:$0xff] %v6552_v27  ;;  %v6553_v34 = vsub.f32 %v4205_v24, %v5741_v28  ;;  %v7698_v35 = vadd.f32 -0.99, %v9779_v29  ;;  %v5019_v36 = vsub.f32 1.0, %v9779_v29  ;;  %9800 = vlog2.f32 %v415_v25 }
 0x3ce   : > { %v9783_v31 = vpop.eup %9782  ;;  %9802 = vlog2.f32 %v7697_v30  ;;  %v7699_v37 = vadd.f32 -0.99, %v9781_v33  ;;  %v5020_v39 = vsub.f32 1.0, %v9781_v33  ;;  %v416_v30 = vld [vmem:[%s12465_s8 + $0x708] sm:$0xff] }
 0x3cf   : > { %v9785_v38 = vpop.eup %9784  ;;  %7065 = vst [vmem:[%s12522_s20 + $0x698] sm:$0xff] %v6553_v34  ;;  %9804 = vlog2.f32 %v5018_v32  ;;  %v7700_v41 = vadd.f32 -0.99, %v9783_v31  ;;  %v5021_v43 = vsub.f32 1.0, %v9783_v31 }
 0x3d0   : > { %v9787_v40 = vpop.eup %9786  ;;  %9806 = vlog2.f32 %v7698_v35  ;;  %v7701_v45 = vadd.f32 -0.99, %v9785_v38  ;;  %v5022_v47 = vsub.f32 1.0, %v9785_v38  ;;  %v417_v35 = vld [vmem:[%s12465_s8 + $0x710] sm:$0xff] }
 0x3d1   : > { %v9789_v42 = vpop.eup %9788  ;;  %9808 = vlog2.f32 %v5019_v36  ;;  %v7702_v49 = vadd.f32 -0.99, %v9787_v40  ;;  %v5023_v51 = vsub.f32 1.0, %v9787_v40 }
 0x3d2   : > { %v9791_v44 = vpop.eup %9790  ;;  %9810 = vlog2.f32 %v7699_v37  ;;  %v7703_v55 = vadd.f32 -0.99, %v9789_v42  ;;  %v5024_v59 = vsub.f32 1.0, %v9789_v42  ;;  %v418_v37 = vld [vmem:[%s12465_s8 + $0x718] sm:$0xff] }
 0x3d3   : > { %v9793_v46 = vpop.eup %9792  ;;  %9812 = vlog2.f32 %v5020_v39  ;;  %v7704_v56 = vadd.f32 -0.99, %v9791_v44  ;;  %v5025_v1 = vsub.f32 1.0, %v9791_v44  ;;  %v420_v44 = vld [vmem:[%s12465_s8 + $0x728] sm:$0xff] }
 0x3d4   : > { %v9795_v48 = vpop.eup %9794  ;;  %9814 = vlog2.f32 %v7700_v41  ;;  %v7705_v5 = vadd.f32 -0.99, %v9793_v46  ;;  %v5026_v11 = vsub.f32 1.0, %v9793_v46  ;;  %v419_v41 = vld [vmem:[%s12465_s8 + $0x720] sm:$0xff] }
 0x3d5   : > { %v9797_v50 = vpop.eup %9796  ;;  %9816 = vlog2.f32 %v5021_v43  ;;  %v1147_v53 = vmul.f32 0.6931472, %v9795_v48  ;;  %v421_v48 = vld [vmem:[%s12465_s8 + $0x730] sm:$0xff] }
 0x3d6   : > { %v9799_v54 = vpop.eup %9798  ;;  %9818 = vlog2.f32 %v7701_v45  ;;  %v1149_v57 = vmul.f32 0.6931472, %v9797_v50 }
 0x3d7   : > { %v9801_v58 = vpop.eup %9800  ;;  %9820 = vlog2.f32 %v5022_v47  ;;  %v1151_v60 = vmul.f32 0.6931472, %v9799_v54  ;;  %v1955_v62 = vmul.f32 %v13089_v52, %v1147_v53 }
 0x3d8   : > { %v9803_v61 = vpop.eup %9802  ;;  %9822 = vlog2.f32 %v7702_v49  ;;  %v1153_v14 = vmul.f32 0.6931472, %v9801_v58  ;;  %v1956_v2 = vmul.f32 %v13089_v52, %v1149_v57  ;;  %v423_v57 = vld [vmem:[%s12465_s8 + $0x740] sm:$0xff] }
 0x3d9   : > { %v9805_v63 = vpop.eup %9804  ;;  %v4207_v0 = vmul.f32 0.6931472, %v9803_v61  ;;  %9824 = vlog2.f32 %v5023_v51  ;;  %v1957_v8 = vmul.f32 %v13089_v52, %v1151_v60  ;;  %v2688_v16 = vmul.f32 1.442695, %v1955_v62  ;;  %v422_v51 = vld [vmem:[%s12465_s8 + $0x738] sm:$0xff]  ;;  %v424_v60 = vld [vmem:[%s12465_s8 + $0x748] sm:$0xff] }
 0x3da   : > { %v9807_v3 = vpop.eup %9806  ;;  %v5743_v4 = vmul.f32 0.6931472, %v9805_v63  ;;  %9826 = vlog2.f32 %v7703_v55  ;;  %v1958_v12 = vmul.f32 %v13089_v52, %v1153_v14  ;;  %v2690_v18 = vmul.f32 1.442695, %v1956_v2 }
 0x3db   : > { %v9809_v9 = vpop.eup %9808  ;;  %v4209_v10 = vmul.f32 0.6931472, %v9807_v3  ;;  %9828 = vlog2.f32 %v5024_v59  ;;  %v2692_v22 = vmul.f32 1.442695, %v1957_v8 }
 0x3dc   : > { %v9811_v6 = vpop.eup %9810  ;;  %v6554_v13 = vsub.f32 %v4207_v0, %v5743_v4  ;;  %v5745_v15 = vmul.f32 0.6931472, %v9809_v9  ;;  %9830 = vlog2.f32 %v7704_v56  ;;  %v2694_v24 = vmul.f32 1.442695, %v1958_v12 }
 0x3dd   : > { %v9813_v17 = vpop.eup %9812  ;;  %v4211_v7 = vmul.f32 0.6931472, %v9811_v6  ;;  %9832 = vlog2.f32 %v5025_v1 }
 0x3de   : > { %v9815_v19 = vpop.eup %9814  ;;  %7066 = vst [vmem:[%s12522_s20 + $0x6a0] sm:$0xff] %v6554_v13  ;;  %v6555_v20 = vsub.f32 %v4209_v10, %v5745_v15  ;;  %v5747_v21 = vmul.f32 0.6931472, %v9813_v17  ;;  %9834 = vlog2.f32 %v7705_v5 }
 0x3df   : > { %v9817_v23 = vpop.eup %9816  ;;  %v4213_v52 = vmul.f32 0.6931472, %v9815_v19  ;;  %9836 = vlog2.f32 %v5026_v11 }
 0x3e0   : > { %v9819_v25 = vpop.eup %9818  ;;  %7067 = vst [vmem:[%s12522_s20 + $0x6a8] sm:$0xff] %v6555_v20  ;;  %v6556_v26 = vsub.f32 %v4211_v7, %v5747_v21  ;;  %v5749_v27 = vmul.f32 0.6931472, %v9817_v23  ;;  %9838 = vpow2.f32 %v2688_v16  ;;  %v13191_v7 = vld [vmem:[#allocation5] ss:$0 sm:$0xff] }
 0x3e1   : > { %v9821_v28 = vpop.eup %9820  ;;  %v4215_v29 = vmul.f32 0.6931472, %v9819_v25  ;;  %9840 = vpow2.f32 %v2690_v18 }
 0x3e2   : > { %v9823_v32 = vpop.eup %9822  ;;  %7068 = vst [vmem:[%s12522_s20 + $0x6b0] sm:$0xff] %v6556_v26  ;;  %v6557_v33 = vsub.f32 %v4213_v52, %v5749_v27  ;;  %v5751_v34 = vmul.f32 0.6931472, %v9821_v28  ;;  %9842 = vpow2.f32 %v2692_v22 }
 0x3e3   : > { %v9825_v36 = vpop.eup %9824  ;;  %v4217_v31 = vmul.f32 0.6931472, %v9823_v32  ;;  %9844 = vpow2.f32 %v2694_v24 }
 0x3e4   : > { %v9827_v38 = vpop.eup %9826  ;;  %7069 = vst [vmem:[%s12522_s20 + $0x6b8] sm:$0xff] %v6557_v33  ;;  %v6558_v39 = vsub.f32 %v4215_v29, %v5751_v34  ;;  %v5753_v40 = vmul.f32 0.6931472, %v9825_v36  ;;  %9846 = vlog2.f32 %v416_v30 }
 0x3e5   : > { %v9829_v42 = vpop.eup %9828  ;;  %v4219_v43 = vmul.f32 0.6931472, %v9827_v38  ;;  %9848 = vlog2.f32 %v417_v35 }
 0x3e6   : > { %v9831_v45 = vpop.eup %9830  ;;  %7070 = vst [vmem:[%s12522_s20 + $0x6c0] sm:$0xff] %v6558_v39  ;;  %v6559_v46 = vsub.f32 %v4217_v31, %v5753_v40  ;;  %v5755_v47 = vmul.f32 0.6931472, %v9829_v42  ;;  %9850 = vlog2.f32 %v418_v37 }
 0x3e7   : > { %v9833_v49 = vpop.eup %9832  ;;  %v4221_v50 = vmul.f32 0.6931472, %v9831_v45  ;;  %9852 = vlog2.f32 %v419_v41 }
 0x3e8   : > { %v9835_v53 = vpop.eup %9834  ;;  %7071 = vst [vmem:[%s12522_s20 + $0x6c8] sm:$0xff] %v6559_v46  ;;  %v6560_v54 = vsub.f32 %v4219_v43, %v5755_v47  ;;  %v5757_v55 = vmul.f32 0.6931472, %v9833_v49  ;;  %9854 = vlog2.f32 %v420_v44 }
 0x3e9   : > { %v9837_v58 = vpop.eup %9836  ;;  %v4223_v59 = vmul.f32 0.6931472, %v9835_v53  ;;  %9856 = vlog2.f32 %v421_v48 }
 0x3ea   : > { %v9839_v61 = vpop.eup %9838  ;;  %7072 = vst [vmem:[%s12522_s20 + $0x6d0] sm:$0xff] %v6560_v54  ;;  %v6561_v56 = vsub.f32 %v4221_v50, %v5757_v55  ;;  %v5759_v62 = vmul.f32 0.6931472, %v9837_v58  ;;  %9858 = vlog2.f32 %v422_v51 }
 0x3eb   : > { %v9841_v14 = vpop.eup %9840  ;;  %v7706_v63 = vadd.f32 -0.99, %v9839_v61  ;;  %v5027_v0 = vsub.f32 1.0, %v9839_v61  ;;  %9860 = vlog2.f32 %v423_v57 }
 0x3ec   : > { %v9843_v1 = vpop.eup %9842  ;;  %7073 = vst [vmem:[%s12522_s20 + $0x6d8] sm:$0xff] %v6561_v56  ;;  %v6562_v2 = vsub.f32 %v4223_v59, %v5759_v62  ;;  %v7707_v3 = vadd.f32 -0.99, %v9841_v14  ;;  %v5028_v4 = vsub.f32 1.0, %v9841_v14  ;;  %9862 = vlog2.f32 %v424_v60  ;;  %v425_v59 = vld [vmem:[%s12465_s8 + $0x750] sm:$0xff]  ;;  %v426_v56 = vld [vmem:[%s12465_s8 + $0x758] sm:$0xff] }
 0x3ed   : > { %v9845_v5 = vpop.eup %9844  ;;  %9864 = vlog2.f32 %v7706_v63  ;;  %v7708_v8 = vadd.f32 -0.99, %v9843_v1  ;;  %v5029_v10 = vsub.f32 1.0, %v9843_v1 }
 0x3ee   : > { %v9847_v9 = vpop.eup %9846  ;;  %7074 = vst [vmem:[%s12522_s20 + $0x6e0] sm:$0xff] %v6562_v2  ;;  %9866 = vlog2.f32 %v5027_v0  ;;  %v7709_v12 = vadd.f32 -0.99, %v9845_v5  ;;  %v5030_v15 = vsub.f32 1.0, %v9845_v5  ;;  %v427_v0 = vld [vmem:[%s12465_s8 + $0x760] sm:$0xff] }
 0x3ef   : > { %v9849_v11 = vpop.eup %9848  ;;  %9868 = vlog2.f32 %v7707_v3  ;;  %v1155_v6 = vmul.f32 0.6931472, %v9847_v9  ;;  %v428_v3 = vld [vmem:[%s12465_s8 + $0x768] sm:$0xff] }
 0x3f0   : > { %v9851_v13 = vpop.eup %9850  ;;  %9870 = vlog2.f32 %v5028_v4  ;;  %v1157_v16 = vmul.f32 0.6931472, %v9849_v11 }
 0x3f1   : > { %v9853_v17 = vpop.eup %9852  ;;  %9872 = vlog2.f32 %v7708_v8  ;;  %v1959_v18 = vmul.f32 %v13191_v7, %v1155_v6  ;;  %v1159_v19 = vmul.f32 0.6931472, %v9851_v13 }
 0x3f2   : > { %v9855_v20 = vpop.eup %9854  ;;  %9874 = vlog2.f32 %v5029_v10  ;;  %v1960_v21 = vmul.f32 %v13191_v7, %v1157_v16  ;;  %v1161_v22 = vmul.f32 0.6931472, %v9853_v17 }
 0x3f3   : > { %v9857_v23 = vpop.eup %9856  ;;  %9876 = vlog2.f32 %v7709_v12  ;;  %v2696_v52 = vmul.f32 1.442695, %v1959_v18  ;;  %v1961_v24 = vmul.f32 %v13191_v7, %v1159_v19  ;;  %v1163_v25 = vmul.f32 0.6931472, %v9855_v20 }
 0x3f4   : > { %v9859_v26 = vpop.eup %9858  ;;  %9878 = vlog2.f32 %v5030_v15  ;;  %v2698_v27 = vmul.f32 1.442695, %v1960_v21  ;;  %v1962_v28 = vmul.f32 %v13191_v7, %v1161_v22  ;;  %v1165_v29 = vmul.f32 0.6931472, %v9857_v23 }
 0x3f5   : > { %v9861_v30 = vpop.eup %9860  ;;  %9880 = vpow2.f32 %v2696_v52  ;;  %v2700_v32 = vmul.f32 1.442695, %v1961_v24  ;;  %v1963_v33 = vmul.f32 %v13191_v7, %v1163_v25  ;;  %v1167_v34 = vmul.f32 0.6931472, %v9859_v26 }
 0x3f6   : > { %v9863_v35 = vpop.eup %9862  ;;  %9882 = vpow2.f32 %v2698_v27  ;;  %v2702_v36 = vmul.f32 1.442695, %v1962_v28  ;;  %v1964_v31 = vmul.f32 %v13191_v7, %v1165_v29  ;;  %v1169_v37 = vmul.f32 0.6931472, %v9861_v30 }
 0x3f7   : > { %v9865_v38 = vpop.eup %9864  ;;  %9884 = vpow2.f32 %v2700_v32  ;;  %v2704_v39 = vmul.f32 1.442695, %v1963_v33  ;;  %v1965_v40 = vmul.f32 %v13191_v7, %v1167_v34  ;;  %v1171_v41 = vmul.f32 0.6931472, %v9863_v35 }
 0x3f8   : > { %v9867_v42 = vpop.eup %9866  ;;  %v4225_v43 = vmul.f32 0.6931472, %v9865_v38  ;;  %9886 = vpow2.f32 %v2702_v36  ;;  %v2706_v44 = vmul.f32 1.442695, %v1964_v31  ;;  %v1966_v45 = vmul.f32 %v13191_v7, %v1169_v37 }
 0x3f9   : > { %v9869_v46 = vpop.eup %9868  ;;  %v5761_v47 = vmul.f32 0.6931472, %v9867_v42  ;;  %9888 = vpow2.f32 %v2704_v39  ;;  %v2708_v48 = vmul.f32 1.442695, %v1965_v40  ;;  %v1967_v49 = vmul.f32 %v13191_v7, %v1171_v41 }
 0x3fa   : > { %v9871_v50 = vpop.eup %9870  ;;  %v4227_v51 = vmul.f32 0.6931472, %v9869_v46  ;;  %9890 = vpow2.f32 %v2706_v44  ;;  %v2710_v53 = vmul.f32 1.442695, %v1966_v45 }
 0x3fb   : > { %v9873_v54 = vpop.eup %9872  ;;  %v6563_v55 = vsub.f32 %v4225_v43, %v5761_v47  ;;  %v5763_v57 = vmul.f32 0.6931472, %v9871_v50  ;;  %9892 = vpow2.f32 %v2708_v48  ;;  %v2712_v58 = vmul.f32 1.442695, %v1967_v49 }
 0x3fc   : > { %v9875_v60 = vpop.eup %9874  ;;  %v4229_v61 = vmul.f32 0.6931472, %v9873_v54  ;;  %9894 = vpow2.f32 %v2710_v53 }
 0x3fd   : > { %v9877_v62 = vpop.eup %9876  ;;  %7075 = vst [vmem:[%s12522_s20 + $0x6e8] sm:$0xff] %v6563_v55  ;;  %v6564_v14 = vsub.f32 %v4227_v51, %v5763_v57  ;;  %v5765_v63 = vmul.f32 0.6931472, %v9875_v60  ;;  %9896 = vpow2.f32 %v2712_v58 }
 0x3fe   : > { %v9879_v1 = vpop.eup %9878  ;;  %v4231_v2 = vmul.f32 0.6931472, %v9877_v62  ;;  %9898 = vlog2.f32 %v425_v59 }
 0x3ff   : > { %v9881_v4 = vpop.eup %9880  ;;  %7076 = vst [vmem:[%s12522_s20 + $0x6f0] sm:$0xff] %v6564_v14  ;;  %v6565_v5 = vsub.f32 %v4229_v61, %v5765_v63  ;;  %v5767_v8 = vmul.f32 0.6931472, %v9879_v1  ;;  %9900 = vlog2.f32 %v426_v56 }
 0x400   : > { %v9883_v9 = vpop.eup %9882  ;;  %v7710_v10 = vadd.f32 -0.99, %v9881_v4  ;;  %v5031_v11 = vsub.f32 1.0, %v9881_v4  ;;  %9902 = vlog2.f32 %v427_v0 }
 0x401   : > { %v9885_v12 = vpop.eup %9884  ;;  %7077 = vst [vmem:[%s12522_s20 + $0x6f8] sm:$0xff] %v6565_v5  ;;  %v6566_v6 = vsub.f32 %v4231_v2, %v5767_v8  ;;  %v7711_v13 = vadd.f32 -0.99, %v9883_v9  ;;  %v5032_v15 = vsub.f32 1.0, %v9883_v9  ;;  %9904 = vlog2.f32 %v428_v3 }
 0x402   : > { %v9887_v16 = vpop.eup %9886  ;;  %9906 = vlog2.f32 %v7710_v10  ;;  %v7712_v17 = vadd.f32 -0.99, %v9885_v12  ;;  %v5033_v19 = vsub.f32 1.0, %v9885_v12 }
 0x403   : > { %v9889_v18 = vpop.eup %9888  ;;  %7078 = vst [vmem:[%s12522_s20 + $0x700] sm:$0xff] %v6566_v6  ;;  %9908 = vlog2.f32 %v5031_v11  ;;  %v7713_v21 = vadd.f32 -0.99, %v9887_v16  ;;  %v5034_v23 = vsub.f32 1.0, %v9887_v16  ;;  %v429_v11 = vld [vmem:[%s12465_s8 + $0x770] sm:$0xff] }
 0x404   : > { %v9891_v20 = vpop.eup %9890  ;;  %9910 = vlog2.f32 %v7711_v13  ;;  %v7714_v24 = vadd.f32 -0.99, %v9889_v18  ;;  %v5035_v26 = vsub.f32 1.0, %v9889_v18  ;;  %v431_v18 = vld [vmem:[%s12465_s8 + $0x780] sm:$0xff] }
 0x405   : > { %v9893_v22 = vpop.eup %9892  ;;  %9912 = vlog2.f32 %v5032_v15  ;;  %v7715_v28 = vadd.f32 -0.99, %v9891_v20  ;;  %v5036_v30 = vsub.f32 1.0, %v9891_v20  ;;  %v430_v15 = vld [vmem:[%s12465_s8 + $0x778] sm:$0xff] }
 0x406   : > { %v9895_v52 = vpop.eup %9894  ;;  %9914 = vlog2.f32 %v7712_v17  ;;  %v7716_v34 = vadd.f32 -0.99, %v9893_v22  ;;  %v5037_v31 = vsub.f32 1.0, %v9893_v22  ;;  %v432_v22 = vld [vmem:[%s12465_s8 + $0x788] sm:$0xff] }
 0x407   : > { %v9897_v25 = vpop.eup %9896  ;;  %9916 = vlog2.f32 %v5033_v19  ;;  %v7717_v39 = vadd.f32 -0.99, %v9895_v52  ;;  %v5038_v44 = vsub.f32 1.0, %v9895_v52 }
 0x408   : > { %v9899_v27 = vpop.eup %9898  ;;  %9918 = vlog2.f32 %v7713_v21  ;;  %v7718_v48 = vadd.f32 -0.99, %v9897_v25  ;;  %v5039_v53 = vsub.f32 1.0, %v9897_v25 }
 0x409   : > { %v9901_v29 = vpop.eup %9900  ;;  %9920 = vlog2.f32 %v5034_v23  ;;  %v1173_v32 = vmul.f32 0.6931472, %v9899_v27 }
 0x40a   : > { %v9903_v33 = vpop.eup %9902  ;;  %9922 = vlog2.f32 %v7714_v24  ;;  %v1175_v35 = vmul.f32 0.6931472, %v9901_v29  ;;  %v433_v24 = vld [vmem:[%s12465_s8 + $0x790] sm:$0xff] }
 0x40b   : > { %v9905_v36 = vpop.eup %9904  ;;  %9924 = vlog2.f32 %v5035_v26  ;;  %v1177_v37 = vmul.f32 0.6931472, %v9903_v33  ;;  %v1968_v40 = vmul.f32 %v13191_v7, %v1173_v32  ;;  %v435_v32 = vld [vmem:[%s12465_s8 + $0x7a0] sm:$0xff] }
 0x40c   : > { %v9907_v38 = vpop.eup %9906  ;;  %9926 = vlog2.f32 %v7715_v28  ;;  %v1179_v41 = vmul.f32 0.6931472, %v9905_v36  ;;  %v1969_v45 = vmul.f32 %v13191_v7, %v1175_v35  ;;  %v434_v28 = vld [vmem:[%s12465_s8 + $0x798] sm:$0xff]  ;;  %v436_v36 = vld [vmem:[%s12465_s8 + $0x7a8] sm:$0xff] }
 0x40d   : > { %v9909_v42 = vpop.eup %9908  ;;  %v4233_v43 = vmul.f32 0.6931472, %v9907_v38  ;;  %9928 = vlog2.f32 %v5036_v30  ;;  %v1970_v49 = vmul.f32 %v13191_v7, %v1177_v37  ;;  %v2714_v59 = vmul.f32 1.442695, %v1968_v40  ;;  %v437_v38 = vld [vmem:[%s12465_s8 + $0x7b0] sm:$0xff] }
 0x40e   : > { %v9911_v46 = vpop.eup %9910  ;;  %v5769_v47 = vmul.f32 0.6931472, %v9909_v42  ;;  %9930 = vlog2.f32 %v7716_v34  ;;  %v1971_v54 = vmul.f32 %v13191_v7, %v1179_v41  ;;  %v2716_v56 = vmul.f32 1.442695, %v1969_v45 }
 0x40f   : > { %v9913_v50 = vpop.eup %9912  ;;  %v4235_v51 = vmul.f32 0.6931472, %v9911_v46  ;;  %9932 = vlog2.f32 %v5037_v31  ;;  %v2718_v0 = vmul.f32 1.442695, %v1970_v49 }
 0x410   : > { %v9915_v55 = vpop.eup %9914  ;;  %v6567_v57 = vsub.f32 %v4233_v43, %v5769_v47  ;;  %v5771_v58 = vmul.f32 0.6931472, %v9913_v50  ;;  %9934 = vlog2.f32 %v7717_v39  ;;  %v2720_v3 = vmul.f32 1.442695, %v1971_v54 }
 0x411   : > { %v9917_v60 = vpop.eup %9916  ;;  %v4237_v61 = vmul.f32 0.6931472, %v9915_v55  ;;  %9936 = vlog2.f32 %v5038_v44 }
 0x412   : > { %v9919_v62 = vpop.eup %9918  ;;  %7079 = vst [vmem:[%s12522_s20 + $0x708] sm:$0xff] %v6567_v57  ;;  %v6568_v14 = vsub.f32 %v4235_v51, %v5771_v58  ;;  %v5773_v63 = vmul.f32 0.6931472, %v9917_v60  ;;  %9938 = vlog2.f32 %v7718_v48 }
 0x413   : > { %v9921_v1 = vpop.eup %9920  ;;  %v4239_v2 = vmul.f32 0.6931472, %v9919_v62  ;;  %9940 = vlog2.f32 %v5039_v53 }
 0x414   : > { %v9923_v4 = vpop.eup %9922  ;;  %7080 = vst [vmem:[%s12522_s20 + $0x710] sm:$0xff] %v6568_v14  ;;  %v6569_v5 = vsub.f32 %v4237_v61, %v5773_v63  ;;  %v5775_v8 = vmul.f32 0.6931472, %v9921_v1  ;;  %9942 = vpow2.f32 %v2714_v59 }
 0x415   : > { %v9925_v9 = vpop.eup %9924  ;;  %v4241_v10 = vmul.f32 0.6931472, %v9923_v4  ;;  %9944 = vpow2.f32 %v2716_v56 }
 0x416   : > { %v9927_v12 = vpop.eup %9926  ;;  %7081 = vst [vmem:[%s12522_s20 + $0x718] sm:$0xff] %v6569_v5  ;;  %v6570_v6 = vsub.f32 %v4239_v2, %v5775_v8  ;;  %v5777_v13 = vmul.f32 0.6931472, %v9925_v9  ;;  %9946 = vpow2.f32 %v2718_v0 }
 0x417   : > { %v9929_v16 = vpop.eup %9928  ;;  %v4243_v17 = vmul.f32 0.6931472, %v9927_v12  ;;  %9948 = vpow2.f32 %v2720_v3 }
 0x418   : > { %v9931_v19 = vpop.eup %9930  ;;  %7082 = vst [vmem:[%s12522_s20 + $0x720] sm:$0xff] %v6570_v6  ;;  %v6571_v20 = vsub.f32 %v4241_v10, %v5777_v13  ;;  %v5779_v21 = vmul.f32 0.6931472, %v9929_v16  ;;  %9950 = vlog2.f32 %v429_v11 }
 0x419   : > { %v9933_v23 = vpop.eup %9932  ;;  %v4245_v52 = vmul.f32 0.6931472, %v9931_v19  ;;  %9952 = vlog2.f32 %v430_v15 }
 0x41a   : > { %v9935_v25 = vpop.eup %9934  ;;  %7083 = vst [vmem:[%s12522_s20 + $0x728] sm:$0xff] %v6571_v20  ;;  %v6572_v26 = vsub.f32 %v4243_v17, %v5779_v21  ;;  %v5781_v27 = vmul.f32 0.6931472, %v9933_v23  ;;  %9954 = vlog2.f32 %v431_v18 }
 0x41b   : > { %v9937_v29 = vpop.eup %9936  ;;  %v4247_v30 = vmul.f32 0.6931472, %v9935_v25  ;;  %9956 = vlog2.f32 %v432_v22 }
 0x41c   : > { %v9939_v33 = vpop.eup %9938  ;;  %7084 = vst [vmem:[%s12522_s20 + $0x730] sm:$0xff] %v6572_v26  ;;  %v6573_v34 = vsub.f32 %v4245_v52, %v5781_v27  ;;  %v5783_v35 = vmul.f32 0.6931472, %v9937_v29  ;;  %9958 = vlog2.f32 %v433_v24 }
 0x41d   : > { %v9941_v31 = vpop.eup %9940  ;;  %v4249_v37 = vmul.f32 0.6931472, %v9939_v33  ;;  %9960 = vlog2.f32 %v434_v28 }
 0x41e   : > { %v9943_v39 = vpop.eup %9942  ;;  %7085 = vst [vmem:[%s12522_s20 + $0x738] sm:$0xff] %v6573_v34  ;;  %v6574_v40 = vsub.f32 %v4247_v30, %v5783_v35  ;;  %v5785_v41 = vmul.f32 0.6931472, %v9941_v31  ;;  %9962 = vlog2.f32 %v435_v32 }
 0x41f   : > { %v9945_v42 = vpop.eup %9944  ;;  %v7719_v43 = vadd.f32 -0.99, %v9943_v39  ;;  %v5040_v44 = vsub.f32 1.0, %v9943_v39  ;;  %9964 = vlog2.f32 %v436_v36 }
 0x420   : > { %v9947_v45 = vpop.eup %9946  ;;  %7086 = vst [vmem:[%s12522_s20 + $0x740] sm:$0xff] %v6574_v40  ;;  %v6575_v46 = vsub.f32 %v4249_v37, %v5785_v41  ;;  %v7720_v47 = vadd.f32 -0.99, %v9945_v42  ;;  %v5041_v48 = vsub.f32 1.0, %v9945_v42  ;;  %9966 = vlog2.f32 %v437_v38  ;;  %v438_v37 = vld [vmem:[%s12465_s8 + $0x7b8] sm:$0xff]  ;;  %v439_v40 = vld [vmem:[%s12465_s8 + $0x7c0] sm:$0xff] }
 0x421   : > { %v9949_v49 = vpop.eup %9948  ;;  %9968 = vlog2.f32 %v7719_v43  ;;  %v7721_v50 = vadd.f32 -0.99, %v9947_v45  ;;  %v5042_v53 = vsub.f32 1.0, %v9947_v45 }
 0x422   : > { %v9951_v51 = vpop.eup %9950  ;;  %7087 = vst [vmem:[%s12522_s20 + $0x748] sm:$0xff] %v6575_v46  ;;  %9970 = vlog2.f32 %v5040_v44  ;;  %v7722_v55 = vadd.f32 -0.99, %v9949_v49  ;;  %v5043_v59 = vsub.f32 1.0, %v9949_v49  ;;  %v440_v44 = vld [vmem:[%s12465_s8 + $0x7c8] sm:$0xff] }
 0x423   : > { %v9953_v54 = vpop.eup %9952  ;;  %9972 = vlog2.f32 %v7720_v47  ;;  %v1181_v57 = vmul.f32 0.6931472, %v9951_v51  ;;  %v441_v47 = vld [vmem:[%s12465_s8 + $0x7d0] sm:$0xff] }
 0x424   : > { %v9955_v58 = vpop.eup %9954  ;;  %9974 = vlog2.f32 %v5041_v48  ;;  %v1183_v60 = vmul.f32 0.6931472, %v9953_v54 }
 0x425   : > { %v9957_v61 = vpop.eup %9956  ;;  %9976 = vlog2.f32 %v7721_v50  ;;  %v1972_v56 = vmul.f32 %v13191_v7, %v1181_v57  ;;  %v1185_v62 = vmul.f32 0.6931472, %v9955_v58 }
 0x426   : > { %v9959_v14 = vpop.eup %9958  ;;  %9978 = vlog2.f32 %v5042_v53  ;;  %v1973_v63 = vmul.f32 %v13191_v7, %v1183_v60  ;;  %v1187_v0 = vmul.f32 0.6931472, %v9957_v61 }
 0x427   : > { %v9961_v1 = vpop.eup %9960  ;;  %9980 = vlog2.f32 %v7722_v55  ;;  %v2722_v2 = vmul.f32 1.442695, %v1972_v56  ;;  %v1974_v3 = vmul.f32 %v13191_v7, %v1185_v62  ;;  %v1189_v4 = vmul.f32 0.6931472, %v9959_v14 }
 0x428   : > { %v9963_v5 = vpop.eup %9962  ;;  %9982 = vlog2.f32 %v5043_v59  ;;  %v2724_v8 = vmul.f32 1.442695, %v1973_v63  ;;  %v1975_v9 = vmul.f32 %v13191_v7, %v1187_v0  ;;  %v1191_v10 = vmul.f32 0.6931472, %v9961_v1 }
 0x429   : > { %v9965_v11 = vpop.eup %9964  ;;  %9984 = vpow2.f32 %v2722_v2  ;;  %v2726_v12 = vmul.f32 1.442695, %v1974_v3  ;;  %v1976_v6 = vmul.f32 %v13191_v7, %v1189_v4  ;;  %v1193_v13 = vmul.f32 0.6931472, %v9963_v5 }
 0x42a   : > { %v9967_v15 = vpop.eup %9966  ;;  %9986 = vpow2.f32 %v2724_v8  ;;  %v2728_v16 = vmul.f32 1.442695, %v1975_v9  ;;  %v1977_v17 = vmul.f32 %v13191_v7, %v1191_v10  ;;  %v1195_v18 = vmul.f32 0.6931472, %v9965_v11 }
 0x42b   : > { %v9969_v19 = vpop.eup %9968  ;;  %9988 = vpow2.f32 %v2726_v12  ;;  %v2730_v20 = vmul.f32 1.442695, %v1976_v6  ;;  %v1978_v21 = vmul.f32 %v13191_v7, %v1193_v13  ;;  %v1197_v22 = vmul.f32 0.6931472, %v9967_v15 }
 0x42c   : > { %v9971_v23 = vpop.eup %9970  ;;  %v4251_v52 = vmul.f32 0.6931472, %v9969_v19  ;;  %9990 = vpow2.f32 %v2728_v16  ;;  %v2732_v24 = vmul.f32 1.442695, %v1977_v17  ;;  %v1979_v25 = vmul.f32 %v13191_v7, %v1195_v18 }
 0x42d   : > { %v9973_v26 = vpop.eup %9972  ;;  %v5787_v27 = vmul.f32 0.6931472, %v9971_v23  ;;  %9992 = vpow2.f32 %v2730_v20  ;;  %v2734_v28 = vmul.f32 1.442695, %v1978_v21  ;;  %v1980_v29 = vmul.f32 %v13191_v7, %v1197_v22 }
 0x42e   : > { %v9975_v30 = vpop.eup %9974  ;;  %v4253_v32 = vmul.f32 0.6931472, %v9973_v26  ;;  %9994 = vpow2.f32 %v2732_v24  ;;  %v2736_v33 = vmul.f32 1.442695, %v1979_v25 }
 0x42f   : > { %v9977_v34 = vpop.eup %9976  ;;  %v6576_v35 = vsub.f32 %v4251_v52, %v5787_v27  ;;  %v5789_v36 = vmul.f32 0.6931472, %v9975_v30  ;;  %9996 = vpow2.f32 %v2734_v28  ;;  %v2738_v31 = vmul.f32 1.442695, %v1980_v29 }
 0x430   : > { %v9979_v38 = vpop.eup %9978  ;;  %v4255_v39 = vmul.f32 0.6931472, %v9977_v34  ;;  %9998 = vpow2.f32 %v2736_v33 }
 0x431   : > { %v9981_v41 = vpop.eup %9980  ;;  %7088 = vst [vmem:[%s12522_s20 + $0x750] sm:$0xff] %v6576_v35  ;;  %v6577_v42 = vsub.f32 %v4253_v32, %v5789_v36  ;;  %v5791_v43 = vmul.f32 0.6931472, %v9979_v38  ;;  %10000 = vpow2.f32 %v2738_v31 }
 0x432   : > { %v9983_v45 = vpop.eup %9982  ;;  %v4257_v46 = vmul.f32 0.6931472, %v9981_v41  ;;  %10002 = vlog2.f32 %v438_v37 }
 0x433   : > { %v9985_v48 = vpop.eup %9984  ;;  %7089 = vst [vmem:[%s12522_s20 + $0x758] sm:$0xff] %v6577_v42  ;;  %v6578_v49 = vsub.f32 %v4255_v39, %v5791_v43  ;;  %v5793_v50 = vmul.f32 0.6931472, %v9983_v45  ;;  %10004 = vlog2.f32 %v439_v40 }
 0x434   : > { %v9987_v51 = vpop.eup %9986  ;;  %v7723_v53 = vadd.f32 -0.99, %v9985_v48  ;;  %v5044_v54 = vsub.f32 1.0, %v9985_v48  ;;  %10006 = vlog2.f32 %v440_v44 }
 0x435   : > { %v9989_v55 = vpop.eup %9988  ;;  %7090 = vst [vmem:[%s12522_s20 + $0x760] sm:$0xff] %v6578_v49  ;;  %v6579_v57 = vsub.f32 %v4257_v46, %v5793_v50  ;;  %v7724_v58 = vadd.f32 -0.99, %v9987_v51  ;;  %v5045_v59 = vsub.f32 1.0, %v9987_v51  ;;  %10008 = vlog2.f32 %v441_v47 }
 0x436   : > { %v9991_v60 = vpop.eup %9990  ;;  %10010 = vlog2.f32 %v7723_v53  ;;  %v7725_v61 = vadd.f32 -0.99, %v9989_v55  ;;  %v5046_v62 = vsub.f32 1.0, %v9989_v55 }
 0x437   : > { %v9993_v56 = vpop.eup %9992  ;;  %7091 = vst [vmem:[%s12522_s20 + $0x768] sm:$0xff] %v6579_v57  ;;  %10012 = vlog2.f32 %v5044_v54  ;;  %v7726_v63 = vadd.f32 -0.99, %v9991_v60  ;;  %v5047_v1 = vsub.f32 1.0, %v9991_v60  ;;  %v442_v54 = vld [vmem:[%s12465_s8 + $0x7d8] sm:$0xff] }
 0x438   : > { %v9995_v14 = vpop.eup %9994  ;;  %10014 = vlog2.f32 %v7724_v58  ;;  %v7727_v3 = vadd.f32 -0.99, %v9993_v56  ;;  %v5048_v5 = vsub.f32 1.0, %v9993_v56  ;;  %v444_v56 = vld [vmem:[%s12465_s8 + $0x7e8] sm:$0xff] }
 0x439   : > { %v9997_v0 = vpop.eup %9996  ;;  %10016 = vlog2.f32 %v5045_v59  ;;  %v7728_v9 = vadd.f32 -0.99, %v9995_v14  ;;  %v5049_v11 = vsub.f32 1.0, %v9995_v14  ;;  %v443_v59 = vld [vmem:[%s12465_s8 + $0x7e0] sm:$0xff] }
 0x43a   : > { %v9999_v2 = vpop.eup %9998  ;;  %10018 = vlog2.f32 %v7725_v61  ;;  %v7729_v13 = vadd.f32 -0.99, %v9997_v0  ;;  %v5050_v17 = vsub.f32 1.0, %v9997_v0  ;;  %v445_v0 = vld [vmem:[%s12465_s8 + $0x7f0] sm:$0xff] }
 0x43b   : > { %v10001_v4 = vpop.eup %10000  ;;  %10020 = vlog2.f32 %v5046_v62  ;;  %v7730_v20 = vadd.f32 -0.99, %v9999_v2  ;;  %v5051_v24 = vsub.f32 1.0, %v9999_v2 }
 0x43c   : > { %v10003_v8 = vpop.eup %10002  ;;  %10022 = vlog2.f32 %v7726_v63  ;;  %v7731_v28 = vadd.f32 -0.99, %v10001_v4  ;;  %v5052_v33 = vsub.f32 1.0, %v10001_v4 }
 0x43d   : > { %v10005_v10 = vpop.eup %10004  ;;  %10024 = vlog2.f32 %v5047_v1  ;;  %v1199_v12 = vmul.f32 0.6931472, %v10003_v8 }
 0x43e   : > { %v10007_v6 = vpop.eup %10006  ;;  %10026 = vlog2.f32 %v7727_v3  ;;  %v1201_v15 = vmul.f32 0.6931472, %v10005_v10  ;;  %v446_v3 = vld [vmem:[%s12465_s8 + $0x7f8] sm:$0xff] }
 0x43f   : > { %v10009_v16 = vpop.eup %10008  ;;  %10028 = vlog2.f32 %v5048_v5  ;;  %v1203_v18 = vmul.f32 0.6931472, %v10007_v6  ;;  %v1981_v21 = vmul.f32 %v13191_v7, %v1199_v12  ;;  %v448_v12 = vld [vmem:[%s12465_s8 + $0x808] sm:$0xff] }
 0x440   : > { %v10011_v19 = vpop.eup %10010  ;;  %10030 = vlog2.f32 %v7728_v9  ;;  %v1205_v22 = vmul.f32 0.6931472, %v10009_v16  ;;  %v1982_v25 = vmul.f32 %v13191_v7, %v1201_v15  ;;  %v447_v9 = vld [vmem:[%s12465_s8 + $0x800] sm:$0xff]  ;;  %v449_v16 = vld [vmem:[%s12465_s8 + $0x810] sm:$0xff] }
 0x441   : > { %v10013_v23 = vpop.eup %10012  ;;  %v4259_v52 = vmul.f32 0.6931472, %v10011_v19  ;;  %10032 = vlog2.f32 %v5049_v11  ;;  %v1983_v29 = vmul.f32 %v13191_v7, %v1203_v18  ;;  %v2740_v37 = vmul.f32 1.442695, %v1981_v21  ;;  %v450_v19 = vld [vmem:[%s12465_s8 + $0x818] sm:$0xff] }
 0x442   : > { %v10015_v26 = vpop.eup %10014  ;;  %v5795_v27 = vmul.f32 0.6931472, %v10013_v23  ;;  %10034 = vlog2.f32 %v7729_v13  ;;  %v1984_v34 = vmul.f32 %v13191_v7, %v1205_v22  ;;  %v2742_v40 = vmul.f32 1.442695, %v1982_v25 }
 0x443   : > { %v10017_v30 = vpop.eup %10016  ;;  %v4261_v32 = vmul.f32 0.6931472, %v10015_v26  ;;  %10036 = vlog2.f32 %v5050_v17  ;;  %v2744_v44 = vmul.f32 1.442695, %v1983_v29 }
 0x444   : > { %v10019_v35 = vpop.eup %10018  ;;  %v6580_v36 = vsub.f32 %v4259_v52, %v5795_v27  ;;  %v5797_v31 = vmul.f32 0.6931472, %v10017_v30  ;;  %10038 = vlog2.f32 %v7730_v20  ;;  %v2746_v47 = vmul.f32 1.442695, %v1984_v34 }
 0x445   : > { %v10021_v38 = vpop.eup %10020  ;;  %v4263_v39 = vmul.f32 0.6931472, %v10019_v35  ;;  %10040 = vlog2.f32 %v5051_v24 }
 0x446   : > { %v10023_v41 = vpop.eup %10022  ;;  %7092 = vst [vmem:[%s12522_s20 + $0x770] sm:$0xff] %v6580_v36  ;;  %v6581_v42 = vsub.f32 %v4261_v32, %v5797_v31  ;;  %v5799_v43 = vmul.f32 0.6931472, %v10021_v38  ;;  %10042 = vlog2.f32 %v7731_v28 }
 0x447   : > { %v10025_v45 = vpop.eup %10024  ;;  %v4265_v46 = vmul.f32 0.6931472, %v10023_v41  ;;  %10044 = vlog2.f32 %v5052_v33 }
 0x448   : > { %v10027_v48 = vpop.eup %10026  ;;  %7093 = vst [vmem:[%s12522_s20 + $0x778] sm:$0xff] %v6581_v42  ;;  %v6582_v49 = vsub.f32 %v4263_v39, %v5799_v43  ;;  %v5801_v50 = vmul.f32 0.6931472, %v10025_v45  ;;  %10046 = vpow2.f32 %v2740_v37 }
 0x449   : > { %v10029_v51 = vpop.eup %10028  ;;  %v4267_v53 = vmul.f32 0.6931472, %v10027_v48  ;;  %10048 = vpow2.f32 %v2742_v40 }
 0x44a   : > { %v10031_v55 = vpop.eup %10030  ;;  %7094 = vst [vmem:[%s12522_s20 + $0x780] sm:$0xff] %v6582_v49  ;;  %v6583_v57 = vsub.f32 %v4265_v46, %v5801_v50  ;;  %v5803_v58 = vmul.f32 0.6931472, %v10029_v51  ;;  %10050 = vpow2.f32 %v2744_v44 }
 0x44b   : > { %v10033_v60 = vpop.eup %10032  ;;  %v4269_v61 = vmul.f32 0.6931472, %v10031_v55  ;;  %10052 = vpow2.f32 %v2746_v47 }
 0x44c   : > { %v10035_v62 = vpop.eup %10034  ;;  %7095 = vst [vmem:[%s12522_s20 + $0x788] sm:$0xff] %v6583_v57  ;;  %v6584_v14 = vsub.f32 %v4267_v53, %v5803_v58  ;;  %v5805_v63 = vmul.f32 0.6931472, %v10033_v60  ;;  %10054 = vlog2.f32 %v442_v54 }
 0x44d   : > { %v10037_v1 = vpop.eup %10036  ;;  %v4271_v2 = vmul.f32 0.6931472, %v10035_v62  ;;  %10056 = vlog2.f32 %v443_v59 }
 0x44e   : > { %v10039_v4 = vpop.eup %10038  ;;  %7096 = vst [vmem:[%s12522_s20 + $0x790] sm:$0xff] %v6584_v14  ;;  %v6585_v5 = vsub.f32 %v4269_v61, %v5805_v63  ;;  %v5807_v8 = vmul.f32 0.6931472, %v10037_v1  ;;  %10058 = vlog2.f32 %v444_v56 }
 0x44f   : > { %v10041_v10 = vpop.eup %10040  ;;  %v4273_v11 = vmul.f32 0.6931472, %v10039_v4  ;;  %10060 = vlog2.f32 %v445_v0 }
 0x450   : > { %v10043_v6 = vpop.eup %10042  ;;  %7097 = vst [vmem:[%s12522_s20 + $0x798] sm:$0xff] %v6585_v5  ;;  %v6586_v13 = vsub.f32 %v4271_v2, %v5807_v8  ;;  %v5809_v15 = vmul.f32 0.6931472, %v10041_v10  ;;  %10062 = vlog2.f32 %v446_v3 }
 0x451   : > { %v10045_v17 = vpop.eup %10044  ;;  %v4275_v18 = vmul.f32 0.6931472, %v10043_v6  ;;  %10064 = vlog2.f32 %v447_v9 }
 0x452   : > { %v10047_v20 = vpop.eup %10046  ;;  %7098 = vst [vmem:[%s12522_s20 + $0x7a0] sm:$0xff] %v6586_v13  ;;  %v6587_v21 = vsub.f32 %v4273_v11, %v5809_v15  ;;  %v5811_v22 = vmul.f32 0.6931472, %v10045_v17  ;;  %10066 = vlog2.f32 %v448_v12 }
 0x453   : > { %v10049_v23 = vpop.eup %10048  ;;  %v7732_v52 = vadd.f32 -0.99, %v10047_v20  ;;  %v5053_v24 = vsub.f32 1.0, %v10047_v20  ;;  %10068 = vlog2.f32 %v449_v16 }
 0x454   : > { %v10051_v25 = vpop.eup %10050  ;;  %7099 = vst [vmem:[%s12522_s20 + $0x7a8] sm:$0xff] %v6587_v21  ;;  %v6588_v26 = vsub.f32 %v4275_v18, %v5811_v22  ;;  %v7733_v27 = vadd.f32 -0.99, %v10049_v23  ;;  %v5054_v28 = vsub.f32 1.0, %v10049_v23  ;;  %10070 = vlog2.f32 %v450_v19  ;;  %v451_v18 = vld [vmem:[%s12465_s8 + $0x820] sm:$0xff]  ;;  %v452_v21 = vld [vmem:[%s12465_s8 + $0x828] sm:$0xff] }
 0x455   : > { %v10053_v29 = vpop.eup %10052  ;;  %10072 = vlog2.f32 %v7732_v52  ;;  %v7734_v30 = vadd.f32 -0.99, %v10051_v25  ;;  %v5055_v33 = vsub.f32 1.0, %v10051_v25  ;;  %v453_v52 = vld [vmem:[%s12465_s8 + $0x830] sm:$0xff] }
 0x456   : > { %v10055_v32 = vpop.eup %10054  ;;  %7100 = vst [vmem:[%s12522_s20 + $0x7b0] sm:$0xff] %v6588_v26  ;;  %10074 = vlog2.f32 %v5053_v24  ;;  %v7735_v35 = vadd.f32 -0.99, %v10053_v29  ;;  %v5056_v37 = vsub.f32 1.0, %v10053_v29  ;;  %v454_v26 = vld [vmem:[%s12465_s8 + $0x838] sm:$0xff] }
 0x457   : > { %v10057_v34 = vpop.eup %10056  ;;  %10076 = vlog2.f32 %v7733_v27  ;;  %v1207_v36 = vmul.f32 0.6931472, %v10055_v32 }
 0x458   : > { %v10059_v31 = vpop.eup %10058  ;;  %10078 = vlog2.f32 %v5054_v28  ;;  %v1209_v38 = vmul.f32 0.6931472, %v10057_v34 }
 0x459   : > { %v10061_v39 = vpop.eup %10060  ;;  %10080 = vlog2.f32 %v7734_v30  ;;  %v1985_v40 = vmul.f32 %v13191_v7, %v1207_v36  ;;  %v1211_v41 = vmul.f32 0.6931472, %v10059_v31 }
 0x45a   : > { %v10063_v42 = vpop.eup %10062  ;;  %10082 = vlog2.f32 %v5055_v33  ;;  %v1986_v43 = vmul.f32 %v13191_v7, %v1209_v38  ;;  %v1213_v44 = vmul.f32 0.6931472, %v10061_v39 }
 0x45b   : > { %v10065_v45 = vpop.eup %10064  ;;  %10084 = vlog2.f32 %v7735_v35  ;;  %v2748_v46 = vmul.f32 1.442695, %v1985_v40  ;;  %v1987_v47 = vmul.f32 %v13191_v7, %v1211_v41  ;;  %v1215_v48 = vmul.f32 0.6931472, %v10063_v42 }
 0x45c   : > { %v10067_v49 = vpop.eup %10066  ;;  %10086 = vlog2.f32 %v5056_v37  ;;  %v2750_v50 = vmul.f32 1.442695, %v1986_v43  ;;  %v1988_v51 = vmul.f32 %v13191_v7, %v1213_v44  ;;  %v1217_v53 = vmul.f32 0.6931472, %v10065_v45 }
 0x45d   : > { %v10069_v54 = vpop.eup %10068  ;;  %10088 = vpow2.f32 %v2748_v46  ;;  %v2752_v55 = vmul.f32 1.442695, %v1987_v47  ;;  %v1989_v57 = vmul.f32 %v13191_v7, %v1215_v48  ;;  %v1219_v58 = vmul.f32 0.6931472, %v10067_v49 }
 0x45e   : > { %v10071_v59 = vpop.eup %10070  ;;  %10090 = vpow2.f32 %v2750_v50  ;;  %v2754_v60 = vmul.f32 1.442695, %v1988_v51  ;;  %v1990_v61 = vmul.f32 %v13191_v7, %v1217_v53  ;;  %v1221_v56 = vmul.f32 0.6931472, %v10069_v54 }
 0x45f   : > { %v10073_v62 = vpop.eup %10072  ;;  %10092 = vpow2.f32 %v2752_v55  ;;  %v2756_v14 = vmul.f32 1.442695, %v1989_v57  ;;  %v1991_v63 = vmul.f32 %v13191_v7, %v1219_v58  ;;  %v1223_v0 = vmul.f32 0.6931472, %v10071_v59 }
 0x460   : > { %v10075_v1 = vpop.eup %10074  ;;  %v4277_v2 = vmul.f32 0.6931472, %v10073_v62  ;;  %10094 = vpow2.f32 %v2754_v60  ;;  %v2758_v3 = vmul.f32 1.442695, %v1990_v61  ;;  %v1992_v4 = vmul.f32 %v13191_v7, %v1221_v56 }
 0x461   : > { %v10077_v5 = vpop.eup %10076  ;;  %v5813_v8 = vmul.f32 0.6931472, %v10075_v1  ;;  %10096 = vpow2.f32 %v2756_v14  ;;  %v2760_v9 = vmul.f32 1.442695, %v1991_v63  ;;  %v1993_v10 = vmul.f32 %v13191_v7, %v1223_v0  ;;  %v13288_v14 = vld [vmem:[#allocation5] ss:$0 sm:$0xff] }
 0x462   : > { %v10079_v11 = vpop.eup %10078  ;;  %v4279_v12 = vmul.f32 0.6931472, %v10077_v5  ;;  %10098 = vpow2.f32 %v2758_v3  ;;  %v2762_v6 = vmul.f32 1.442695, %v1992_v4 }
 0x463   : > { %v10081_v13 = vpop.eup %10080  ;;  %v6589_v15 = vsub.f32 %v4277_v2, %v5813_v8  ;;  %v5815_v16 = vmul.f32 0.6931472, %v10079_v11  ;;  %10100 = vpow2.f32 %v2760_v9  ;;  %v2764_v17 = vmul.f32 1.442695, %v1993_v10 }
 0x464   : > { %v10083_v19 = vpop.eup %10082  ;;  %v4281_v20 = vmul.f32 0.6931472, %v10081_v13  ;;  %10102 = vpow2.f32 %v2762_v6 }
 0x465   : > { %v10085_v22 = vpop.eup %10084  ;;  %7101 = vst [vmem:[%s12522_s20 + $0x7b8] sm:$0xff] %v6589_v15  ;;  %v6590_v7 = vsub.f32 %v4279_v12, %v5815_v16  ;;  %v5817_v23 = vmul.f32 0.6931472, %v10083_v19  ;;  %10104 = vpow2.f32 %v2764_v17 }
 0x466   : > { %v10087_v24 = vpop.eup %10086  ;;  %v4283_v25 = vmul.f32 0.6931472, %v10085_v22  ;;  %10106 = vlog2.f32 %v451_v18 }
 0x467   : > { %v10089_v27 = vpop.eup %10088  ;;  %7102 = vst [vmem:[%s12522_s20 + $0x7c0] sm:$0xff] %v6590_v7  ;;  %v6591_v28 = vsub.f32 %v4281_v20, %v5817_v23  ;;  %v5819_v29 = vmul.f32 0.6931472, %v10087_v24  ;;  %10108 = vlog2.f32 %v452_v21 }
 0x468   : > { %v10091_v30 = vpop.eup %10090  ;;  %v7736_v32 = vadd.f32 -0.99, %v10089_v27  ;;  %v5057_v33 = vsub.f32 1.0, %v10089_v27  ;;  %10110 = vlog2.f32 %v453_v52 }
 0x469   : > { %v10093_v34 = vpop.eup %10092  ;;  %7103 = vst [vmem:[%s12522_s20 + $0x7c8] sm:$0xff] %v6591_v28  ;;  %v6592_v35 = vsub.f32 %v4283_v25, %v5819_v29  ;;  %v7737_v36 = vadd.f32 -0.99, %v10091_v30  ;;  %v5058_v31 = vsub.f32 1.0, %v10091_v30  ;;  %10112 = vlog2.f32 %v454_v26 }
 0x46a   : > { %v10095_v37 = vpop.eup %10094  ;;  %10114 = vlog2.f32 %v7736_v32  ;;  %v7738_v38 = vadd.f32 -0.99, %v10093_v34  ;;  %v5059_v40 = vsub.f32 1.0, %v10093_v34 }
 0x46b   : > { %v10097_v39 = vpop.eup %10096  ;;  %7104 = vst [vmem:[%s12522_s20 + $0x7d0] sm:$0xff] %v6592_v35  ;;  %10116 = vlog2.f32 %v5057_v33  ;;  %v7739_v42 = vadd.f32 -0.99, %v10095_v37  ;;  %v5060_v44 = vsub.f32 1.0, %v10095_v37  ;;  %v455_v33 = vld [vmem:[%s12465_s8 + $0x840] sm:$0xff] }
 0x46c   : > { %v10099_v41 = vpop.eup %10098  ;;  %10118 = vlog2.f32 %v7737_v36  ;;  %v7740_v46 = vadd.f32 -0.99, %v10097_v39  ;;  %v5061_v48 = vsub.f32 1.0, %v10097_v39  ;;  %v457_v39 = vld [vmem:[%s12465_s8 + $0x850] sm:$0xff] }
 0x46d   : > { %v10101_v43 = vpop.eup %10100  ;;  %10120 = vlog2.f32 %v5058_v31  ;;  %v7741_v50 = vadd.f32 -0.99, %v10099_v41  ;;  %v5062_v53 = vsub.f32 1.0, %v10099_v41  ;;  %v456_v31 = vld [vmem:[%s12465_s8 + $0x848] sm:$0xff] }
 0x46e   : > { %v10103_v45 = vpop.eup %10102  ;;  %10122 = vlog2.f32 %v7738_v38  ;;  %v7742_v57 = vadd.f32 -0.99, %v10101_v43  ;;  %v5063_v60 = vsub.f32 1.0, %v10101_v43  ;;  %v458_v43 = vld [vmem:[%s12465_s8 + $0x858] sm:$0xff] }
 0x46f   : > { %v10105_v47 = vpop.eup %10104  ;;  %10124 = vlog2.f32 %v5059_v40  ;;  %v7743_v62 = vadd.f32 -0.99, %v10103_v45  ;;  %v5064_v3 = vsub.f32 1.0, %v10103_v45 }
 0x470   : > { %v10107_v49 = vpop.eup %10106  ;;  %10126 = vlog2.f32 %v7739_v42  ;;  %v7744_v9 = vadd.f32 -0.99, %v10105_v47  ;;  %v5065_v6 = vsub.f32 1.0, %v10105_v47 }
 0x471   : > { %v10109_v51 = vpop.eup %10108  ;;  %10128 = vlog2.f32 %v5060_v44  ;;  %v1225_v54 = vmul.f32 0.6931472, %v10107_v49 }
 0x472   : > { %v10111_v55 = vpop.eup %10110  ;;  %10130 = vlog2.f32 %v7740_v46  ;;  %v1227_v58 = vmul.f32 0.6931472, %v10109_v51  ;;  %v459_v46 = vld [vmem:[%s12465_s8 + $0x860] sm:$0xff] }
 0x473   : > { %v10113_v59 = vpop.eup %10112  ;;  %10132 = vlog2.f32 %v5061_v48  ;;  %v1229_v61 = vmul.f32 0.6931472, %v10111_v55  ;;  %v1994_v63 = vmul.f32 %v13288_v14, %v1225_v54  ;;  %v461_v54 = vld [vmem:[%s12465_s8 + $0x870] sm:$0xff] }
 0x474   : > { %v10115_v56 = vpop.eup %10114  ;;  %10134 = vlog2.f32 %v7741_v50  ;;  %v1231_v0 = vmul.f32 0.6931472, %v10113_v59  ;;  %v1995_v4 = vmul.f32 %v13288_v14, %v1227_v58  ;;  %v460_v50 = vld [vmem:[%s12465_s8 + $0x868] sm:$0xff]  ;;  %v462_v59 = vld [vmem:[%s12465_s8 + $0x878] sm:$0xff] }
 0x475   : > { %v10117_v1 = vpop.eup %10116  ;;  %v4285_v2 = vmul.f32 0.6931472, %v10115_v56  ;;  %10136 = vlog2.f32 %v5062_v53  ;;  %v1996_v10 = vmul.f32 %v13288_v14, %v1229_v61  ;;  %v2766_v18 = vmul.f32 1.442695, %v1994_v63  ;;  %v463_v56 = vld [vmem:[%s12465_s8 + $0x880] sm:$0xff] }
 0x476   : > { %v10119_v5 = vpop.eup %10118  ;;  %v5821_v8 = vmul.f32 0.6931472, %v10117_v1  ;;  %10138 = vlog2.f32 %v7742_v57  ;;  %v1997_v13 = vmul.f32 %v13288_v14, %v1231_v0  ;;  %v2768_v21 = vmul.f32 1.442695, %v1995_v4 }
 0x477   : > { %v10121_v11 = vpop.eup %10120  ;;  %v4287_v12 = vmul.f32 0.6931472, %v10119_v5  ;;  %10140 = vlog2.f32 %v5063_v60  ;;  %v2770_v52 = vmul.f32 1.442695, %v1996_v10 }
 0x478   : > { %v10123_v15 = vpop.eup %10122  ;;  %v6593_v16 = vsub.f32 %v4285_v2, %v5821_v8  ;;  %v5823_v17 = vmul.f32 0.6931472, %v10121_v11  ;;  %10142 = vlog2.f32 %v7743_v62  ;;  %v2772_v26 = vmul.f32 1.442695, %v1997_v13 }
 0x479   : > { %v10125_v19 = vpop.eup %10124  ;;  %v4289_v20 = vmul.f32 0.6931472, %v10123_v15  ;;  %10144 = vlog2.f32 %v5064_v3 }
 0x47a   : > { %v10127_v22 = vpop.eup %10126  ;;  %7105 = vst [vmem:[%s12522_s20 + $0x7d8] sm:$0xff] %v6593_v16  ;;  %v6594_v7 = vsub.f32 %v4287_v12, %v5823_v17  ;;  %v5825_v23 = vmul.f32 0.6931472, %v10125_v19  ;;  %10146 = vlog2.f32 %v7744_v9 }
 0x47b   : > { %v10129_v24 = vpop.eup %10128  ;;  %v4291_v25 = vmul.f32 0.6931472, %v10127_v22  ;;  %10148 = vlog2.f32 %v5065_v6 }
 0x47c   : > { %v10131_v27 = vpop.eup %10130  ;;  %7106 = vst [vmem:[%s12522_s20 + $0x7e0] sm:$0xff] %v6594_v7  ;;  %v6595_v28 = vsub.f32 %v4289_v20, %v5825_v23  ;;  %v5827_v29 = vmul.f32 0.6931472, %v10129_v24  ;;  %10150 = vpow2.f32 %v2766_v18 }
 0x47d   : > { %v10133_v30 = vpop.eup %10132  ;;  %v4293_v32 = vmul.f32 0.6931472, %v10131_v27  ;;  %10152 = vpow2.f32 %v2768_v21 }
 0x47e   : > { %v10135_v34 = vpop.eup %10134  ;;  %7107 = vst [vmem:[%s12522_s20 + $0x7e8] sm:$0xff] %v6595_v28  ;;  %v6596_v35 = vsub.f32 %v4291_v25, %v5827_v29  ;;  %v5829_v36 = vmul.f32 0.6931472, %v10133_v30  ;;  %10154 = vpow2.f32 %v2770_v52 }
 0x47f   : > { %v10137_v37 = vpop.eup %10136  ;;  %v4295_v38 = vmul.f32 0.6931472, %v10135_v34  ;;  %10156 = vpow2.f32 %v2772_v26 }
 0x480   : > { %v10139_v40 = vpop.eup %10138  ;;  %7108 = vst [vmem:[%s12522_s20 + $0x7f0] sm:$0xff] %v6596_v35  ;;  %v6597_v41 = vsub.f32 %v4293_v32, %v5829_v36  ;;  %v5831_v42 = vmul.f32 0.6931472, %v10137_v37  ;;  %10158 = vlog2.f32 %v455_v33 }
 0x481   : > { %v10141_v44 = vpop.eup %10140  ;;  %v4297_v45 = vmul.f32 0.6931472, %v10139_v40  ;;  %10160 = vlog2.f32 %v456_v31 }
 0x482   : > { %v10143_v47 = vpop.eup %10142  ;;  %7109 = vst [vmem:[%s12522_s20 + $0x7f8] sm:$0xff] %v6597_v41  ;;  %v6598_v48 = vsub.f32 %v4295_v38, %v5831_v42  ;;  %v5833_v49 = vmul.f32 0.6931472, %v10141_v44  ;;  %10162 = vlog2.f32 %v457_v39 }
 0x483   : > { %v10145_v51 = vpop.eup %10144  ;;  %v4299_v53 = vmul.f32 0.6931472, %v10143_v47  ;;  %10164 = vlog2.f32 %v458_v43 }
 0x484   : > { %v10147_v55 = vpop.eup %10146  ;;  %7110 = vst [vmem:[%s12522_s20 + $0x800] sm:$0xff] %v6598_v48  ;;  %v6599_v57 = vsub.f32 %v4297_v45, %v5833_v49  ;;  %v5835_v58 = vmul.f32 0.6931472, %v10145_v51  ;;  %10166 = vlog2.f32 %v459_v46 }
 0x485   : > { %v10149_v60 = vpop.eup %10148  ;;  %v4301_v61 = vmul.f32 0.6931472, %v10147_v55  ;;  %10168 = vlog2.f32 %v460_v50 }
 0x486   : > { %v10151_v62 = vpop.eup %10150  ;;  %7111 = vst [vmem:[%s12522_s20 + $0x808] sm:$0xff] %v6599_v57  ;;  %v6600_v63 = vsub.f32 %v4299_v53, %v5835_v58  ;;  %v5837_v0 = vmul.f32 0.6931472, %v10149_v60  ;;  %10170 = vlog2.f32 %v461_v54 }
 0x487   : > { %v10153_v1 = vpop.eup %10152  ;;  %v7745_v2 = vadd.f32 -0.99, %v10151_v62  ;;  %v5066_v3 = vsub.f32 1.0, %v10151_v62  ;;  %10172 = vlog2.f32 %v462_v59 }
 0x488   : > { %v10155_v4 = vpop.eup %10154  ;;  %7112 = vst [vmem:[%s12522_s20 + $0x810] sm:$0xff] %v6600_v63  ;;  %v6601_v5 = vsub.f32 %v4301_v61, %v5837_v0  ;;  %v7746_v8 = vadd.f32 -0.99, %v10153_v1  ;;  %v5067_v9 = vsub.f32 1.0, %v10153_v1  ;;  %10174 = vlog2.f32 %v463_v56  ;;  %v464_v61 = vld [vmem:[%s12465_s8 + $0x888] sm:$0xff]  ;;  %v465_v63 = vld [vmem:[%s12465_s8 + $0x890] sm:$0xff] }
 0x489   : > { %v10157_v10 = vpop.eup %10156  ;;  %10176 = vlog2.f32 %v7745_v2  ;;  %v7747_v11 = vadd.f32 -0.99, %v10155_v4  ;;  %v5068_v6 = vsub.f32 1.0, %v10155_v4 }
 0x48a   : > { %v10159_v12 = vpop.eup %10158  ;;  %7113 = vst [vmem:[%s12522_s20 + $0x818] sm:$0xff] %v6601_v5  ;;  %10178 = vlog2.f32 %v5066_v3  ;;  %v7748_v15 = vadd.f32 -0.99, %v10157_v10  ;;  %v5069_v18 = vsub.f32 1.0, %v10157_v10  ;;  %v466_v3 = vld [vmem:[%s12465_s8 + $0x898] sm:$0xff] }
 0x48b   : > { %v10161_v13 = vpop.eup %10160  ;;  %10180 = vlog2.f32 %v7746_v8  ;;  %v1233_v16 = vmul.f32 0.6931472, %v10159_v12  ;;  %v467_v8 = vld [vmem:[%s12465_s8 + $0x8a0] sm:$0xff] }
 0x48c   : > { %v10163_v17 = vpop.eup %10162  ;;  %10182 = vlog2.f32 %v5067_v9  ;;  %v1235_v19 = vmul.f32 0.6931472, %v10161_v13 }
 0x48d   : > { %v10165_v20 = vpop.eup %10164  ;;  %10184 = vlog2.f32 %v7747_v11  ;;  %v1998_v21 = vmul.f32 %v13288_v14, %v1233_v16  ;;  %v1237_v22 = vmul.f32 0.6931472, %v10163_v17 }
 0x48e   : > { %v10167_v7 = vpop.eup %10166  ;;  %10186 = vlog2.f32 %v5068_v6  ;;  %v1999_v23 = vmul.f32 %v13288_v14, %v1235_v19  ;;  %v1239_v52 = vmul.f32 0.6931472, %v10165_v20 }
 0x48f   : > { %v10169_v24 = vpop.eup %10168  ;;  %10188 = vlog2.f32 %v7748_v15  ;;  %v2774_v25 = vmul.f32 1.442695, %v1998_v21  ;;  %v2000_v26 = vmul.f32 %v13288_v14, %v1237_v22  ;;  %v1241_v27 = vmul.f32 0.6931472, %v10167_v7 }
 0x490   : > { %v10171_v28 = vpop.eup %10170  ;;  %10190 = vlog2.f32 %v5069_v18  ;;  %v2776_v29 = vmul.f32 1.442695, %v1999_v23  ;;  %v2001_v30 = vmul.f32 %v13288_v14, %v1239_v52  ;;  %v1243_v32 = vmul.f32 0.6931472, %v10169_v24 }
 0x491   : > { %v10173_v33 = vpop.eup %10172  ;;  %10192 = vpow2.f32 %v2774_v25  ;;  %v2778_v34 = vmul.f32 1.442695, %v2000_v26  ;;  %v2002_v35 = vmul.f32 %v13288_v14, %v1241_v27  ;;  %v1245_v36 = vmul.f32 0.6931472, %v10171_v28 }
 0x492   : > { %v10175_v31 = vpop.eup %10174  ;;  %10194 = vpow2.f32 %v2776_v29  ;;  %v2780_v37 = vmul.f32 1.442695, %v2001_v30  ;;  %v2003_v38 = vmul.f32 %v13288_v14, %v1243_v32  ;;  %v1247_v39 = vmul.f32 0.6931472, %v10173_v33 }
 0x493   : > { %v10177_v40 = vpop.eup %10176  ;;  %10196 = vpow2.f32 %v2778_v34  ;;  %v2782_v41 = vmul.f32 1.442695, %v2002_v35  ;;  %v2004_v42 = vmul.f32 %v13288_v14, %v1245_v36  ;;  %v1249_v43 = vmul.f32 0.6931472, %v10175_v31 }
 0x494   : > { %v10179_v44 = vpop.eup %10178  ;;  %v4303_v45 = vmul.f32 0.6931472, %v10177_v40  ;;  %10198 = vpow2.f32 %v2780_v37  ;;  %v2784_v46 = vmul.f32 1.442695, %v2003_v38  ;;  %v2005_v47 = vmul.f32 %v13288_v14, %v1247_v39 }
 0x495   : > { %v10181_v48 = vpop.eup %10180  ;;  %v5839_v49 = vmul.f32 0.6931472, %v10179_v44  ;;  %10200 = vpow2.f32 %v2782_v41  ;;  %v2786_v50 = vmul.f32 1.442695, %v2004_v42  ;;  %v2006_v51 = vmul.f32 %v13288_v14, %v1249_v43 }
 0x496   : > { %v10183_v53 = vpop.eup %10182  ;;  %v4305_v54 = vmul.f32 0.6931472, %v10181_v48  ;;  %10202 = vpow2.f32 %v2784_v46  ;;  %v2788_v55 = vmul.f32 1.442695, %v2005_v47 }
 0x497   : > { %v10185_v57 = vpop.eup %10184  ;;  %v6602_v58 = vsub.f32 %v4303_v45, %v5839_v49  ;;  %v5841_v59 = vmul.f32 0.6931472, %v10183_v53  ;;  %10204 = vpow2.f32 %v2786_v50  ;;  %v2790_v60 = vmul.f32 1.442695, %v2006_v51 }
 0x498   : > { %v10187_v56 = vpop.eup %10186  ;;  %v4307_v62 = vmul.f32 0.6931472, %v10185_v57  ;;  %10206 = vpow2.f32 %v2788_v55 }
 0x499   : > { %v10189_v0 = vpop.eup %10188  ;;  %7114 = vst [vmem:[%s12522_s20 + $0x820] sm:$0xff] %v6602_v58  ;;  %v6603_v1 = vsub.f32 %v4305_v54, %v5841_v59  ;;  %v5843_v2 = vmul.f32 0.6931472, %v10187_v56  ;;  %10208 = vpow2.f32 %v2790_v60 }
 0x49a   : > { %v10191_v4 = vpop.eup %10190  ;;  %v4309_v5 = vmul.f32 0.6931472, %v10189_v0  ;;  %10210 = vlog2.f32 %v464_v61 }
 0x49b   : > { %v10193_v9 = vpop.eup %10192  ;;  %7115 = vst [vmem:[%s12522_s20 + $0x828] sm:$0xff] %v6603_v1  ;;  %v6604_v10 = vsub.f32 %v4307_v62, %v5843_v2  ;;  %v5845_v11 = vmul.f32 0.6931472, %v10191_v4  ;;  %10212 = vlog2.f32 %v465_v63 }
 0x49c   : > { %v10195_v12 = vpop.eup %10194  ;;  %v7749_v6 = vadd.f32 -0.99, %v10193_v9  ;;  %v5070_v13 = vsub.f32 1.0, %v10193_v9  ;;  %10214 = vlog2.f32 %v466_v3 }
 0x49d   : > { %v10197_v15 = vpop.eup %10196  ;;  %7116 = vst [vmem:[%s12522_s20 + $0x830] sm:$0xff] %v6604_v10  ;;  %v6605_v16 = vsub.f32 %v4309_v5, %v5845_v11  ;;  %v7750_v17 = vadd.f32 -0.99, %v10195_v12  ;;  %v5071_v18 = vsub.f32 1.0, %v10195_v12  ;;  %10216 = vlog2.f32 %v467_v8 }
 0x49e   : > { %v10199_v19 = vpop.eup %10198  ;;  %10218 = vlog2.f32 %v7749_v6  ;;  %v7751_v20 = vadd.f32 -0.99, %v10197_v15  ;;  %v5072_v22 = vsub.f32 1.0, %v10197_v15 }
 0x49f   : > { %v10201_v21 = vpop.eup %10200  ;;  %7117 = vst [vmem:[%s12522_s20 + $0x838] sm:$0xff] %v6605_v16  ;;  %10220 = vlog2.f32 %v5070_v13  ;;  %v7752_v23 = vadd.f32 -0.99, %v10199_v19  ;;  %v5073_v24 = vsub.f32 1.0, %v10199_v19  ;;  %v468_v13 = vld [vmem:[%s12465_s8 + $0x8a8] sm:$0xff] }
 0x4a0   : > { %v10203_v7 = vpop.eup %10202  ;;  %10222 = vlog2.f32 %v7750_v17  ;;  %v7753_v26 = vadd.f32 -0.99, %v10201_v21  ;;  %v5074_v28 = vsub.f32 1.0, %v10201_v21  ;;  %v470_v21 = vld [vmem:[%s12465_s8 + $0x8b8] sm:$0xff] }
 0x4a1   : > { %v10205_v52 = vpop.eup %10204  ;;  %10224 = vlog2.f32 %v5071_v18  ;;  %v7754_v30 = vadd.f32 -0.99, %v10203_v7  ;;  %v5075_v33 = vsub.f32 1.0, %v10203_v7  ;;  %v469_v18 = vld [vmem:[%s12465_s8 + $0x8b0] sm:$0xff] }
 0x4a2   : > { %v10207_v25 = vpop.eup %10206  ;;  %10226 = vlog2.f32 %v7751_v20  ;;  %v7755_v36 = vadd.f32 -0.99, %v10205_v52  ;;  %v5076_v38 = vsub.f32 1.0, %v10205_v52  ;;  %v471_v52 = vld [vmem:[%s12465_s8 + $0x8c0] sm:$0xff] }
 0x4a3   : > { %v10209_v27 = vpop.eup %10208  ;;  %10228 = vlog2.f32 %v5072_v22  ;;  %v7756_v41 = vadd.f32 -0.99, %v10207_v25  ;;  %v5077_v46 = vsub.f32 1.0, %v10207_v25 }
 0x4a4   : > { %v10211_v29 = vpop.eup %10210  ;;  %10230 = vlog2.f32 %v7752_v23  ;;  %v7757_v50 = vadd.f32 -0.99, %v10209_v27  ;;  %v5078_v55 = vsub.f32 1.0, %v10209_v27 }
 0x4a5   : > { %v10213_v32 = vpop.eup %10212  ;;  %10232 = vlog2.f32 %v5073_v24  ;;  %v1251_v34 = vmul.f32 0.6931472, %v10211_v29 }
 0x4a6   : > { %v10215_v35 = vpop.eup %10214  ;;  %10234 = vlog2.f32 %v7753_v26  ;;  %v1253_v31 = vmul.f32 0.6931472, %v10213_v32  ;;  %v472_v26 = vld [vmem:[%s12465_s8 + $0x8c8] sm:$0xff] }
 0x4a7   : > { %v10217_v37 = vpop.eup %10216  ;;  %10236 = vlog2.f32 %v5074_v28  ;;  %v1255_v39 = vmul.f32 0.6931472, %v10215_v35  ;;  %v2007_v42 = vmul.f32 %v13288_v14, %v1251_v34  ;;  %v474_v34 = vld [vmem:[%s12465_s8 + $0x8d8] sm:$0xff] }
 0x4a8   : > { %v10219_v40 = vpop.eup %10218  ;;  %10238 = vlog2.f32 %v7754_v30  ;;  %v1257_v43 = vmul.f32 0.6931472, %v10217_v37  ;;  %v2008_v47 = vmul.f32 %v13288_v14, %v1253_v31  ;;  %v473_v30 = vld [vmem:[%s12465_s8 + $0x8d0] sm:$0xff]  ;;  %v475_v37 = vld [vmem:[%s12465_s8 + $0x8e0] sm:$0xff] }
 0x4a9   : > { %v10221_v44 = vpop.eup %10220  ;;  %v4311_v45 = vmul.f32 0.6931472, %v10219_v40  ;;  %10240 = vlog2.f32 %v5075_v33  ;;  %v2009_v51 = vmul.f32 %v13288_v14, %v1255_v39  ;;  %v2792_v61 = vmul.f32 1.442695, %v2007_v42  ;;  %v476_v40 = vld [vmem:[%s12465_s8 + $0x8e8] sm:$0xff] }
 0x4aa   : > { %v10223_v48 = vpop.eup %10222  ;;  %v5847_v49 = vmul.f32 0.6931472, %v10221_v44  ;;  %10242 = vlog2.f32 %v7755_v36  ;;  %v2010_v57 = vmul.f32 %v13288_v14, %v1257_v43  ;;  %v2794_v63 = vmul.f32 1.442695, %v2008_v47 }
 0x4ab   : > { %v10225_v53 = vpop.eup %10224  ;;  %v4313_v54 = vmul.f32 0.6931472, %v10223_v48  ;;  %10244 = vlog2.f32 %v5076_v38  ;;  %v2796_v3 = vmul.f32 1.442695, %v2009_v51 }
 0x4ac   : > { %v10227_v58 = vpop.eup %10226  ;;  %v6606_v59 = vsub.f32 %v4311_v45, %v5847_v49  ;;  %v5849_v60 = vmul.f32 0.6931472, %v10225_v53  ;;  %10246 = vlog2.f32 %v7756_v41  ;;  %v2798_v8 = vmul.f32 1.442695, %v2010_v57 }
 0x4ad   : > { %v10229_v56 = vpop.eup %10228  ;;  %v4315_v62 = vmul.f32 0.6931472, %v10227_v58  ;;  %10248 = vlog2.f32 %v5077_v46 }
 0x4ae   : > { %v10231_v0 = vpop.eup %10230  ;;  %7118 = vst [vmem:[%s12522_s20 + $0x840] sm:$0xff] %v6606_v59  ;;  %v6607_v1 = vsub.f32 %v4313_v54, %v5849_v60  ;;  %v5851_v2 = vmul.f32 0.6931472, %v10229_v56  ;;  %10250 = vlog2.f32 %v7757_v50 }
 0x4af   : > { %v10233_v4 = vpop.eup %10232  ;;  %v4317_v5 = vmul.f32 0.6931472, %v10231_v0  ;;  %10252 = vlog2.f32 %v5078_v55 }
 0x4b0   : > { %v10235_v9 = vpop.eup %10234  ;;  %7119 = vst [vmem:[%s12522_s20 + $0x848] sm:$0xff] %v6607_v1  ;;  %v6608_v10 = vsub.f32 %v4315_v62, %v5851_v2  ;;  %v5853_v11 = vmul.f32 0.6931472, %v10233_v4  ;;  %10254 = vpow2.f32 %v2792_v61 }
 0x4b1   : > { %v10237_v12 = vpop.eup %10236  ;;  %v4319_v6 = vmul.f32 0.6931472, %v10235_v9  ;;  %10256 = vpow2.f32 %v2794_v63 }
 0x4b2   : > { %v10239_v15 = vpop.eup %10238  ;;  %7120 = vst [vmem:[%s12522_s20 + $0x850] sm:$0xff] %v6608_v10  ;;  %v6609_v16 = vsub.f32 %v4317_v5, %v5853_v11  ;;  %v5855_v17 = vmul.f32 0.6931472, %v10237_v12  ;;  %10258 = vpow2.f32 %v2796_v3 }
 0x4b3   : > { %v10241_v19 = vpop.eup %10240  ;;  %v4321_v20 = vmul.f32 0.6931472, %v10239_v15  ;;  %10260 = vpow2.f32 %v2798_v8 }
 0x4b4   : > { %v10243_v22 = vpop.eup %10242  ;;  %7121 = vst [vmem:[%s12522_s20 + $0x858] sm:$0xff] %v6609_v16  ;;  %v6610_v7 = vsub.f32 %v4319_v6, %v5855_v17  ;;  %v5857_v23 = vmul.f32 0.6931472, %v10241_v19  ;;  %10262 = vlog2.f32 %v468_v13 }
 0x4b5   : > { %v10245_v24 = vpop.eup %10244  ;;  %v4323_v25 = vmul.f32 0.6931472, %v10243_v22  ;;  %10264 = vlog2.f32 %v469_v18 }
 0x4b6   : > { %v10247_v27 = vpop.eup %10246  ;;  %7122 = vst [vmem:[%s12522_s20 + $0x860] sm:$0xff] %v6610_v7  ;;  %v6611_v28 = vsub.f32 %v4321_v20, %v5857_v23  ;;  %v5859_v29 = vmul.f32 0.6931472, %v10245_v24  ;;  %10266 = vlog2.f32 %v470_v21 }
 0x4b7   : > { %v10249_v32 = vpop.eup %10248  ;;  %v4325_v33 = vmul.f32 0.6931472, %v10247_v27  ;;  %10268 = vlog2.f32 %v471_v52 }
 0x4b8   : > { %v10251_v35 = vpop.eup %10250  ;;  %7123 = vst [vmem:[%s12522_s20 + $0x868] sm:$0xff] %v6611_v28  ;;  %v6612_v36 = vsub.f32 %v4323_v25, %v5859_v29  ;;  %v5861_v31 = vmul.f32 0.6931472, %v10249_v32  ;;  %10270 = vlog2.f32 %v472_v26 }
 0x4b9   : > { %v10253_v38 = vpop.eup %10252  ;;  %v4327_v39 = vmul.f32 0.6931472, %v10251_v35  ;;  %10272 = vlog2.f32 %v473_v30 }
 0x4ba   : > { %v10255_v41 = vpop.eup %10254  ;;  %7124 = vst [vmem:[%s12522_s20 + $0x870] sm:$0xff] %v6612_v36  ;;  %v6613_v42 = vsub.f32 %v4325_v33, %v5861_v31  ;;  %v5863_v43 = vmul.f32 0.6931472, %v10253_v38  ;;  %10274 = vlog2.f32 %v474_v34 }
 0x4bb   : > { %v10257_v44 = vpop.eup %10256  ;;  %v7758_v45 = vadd.f32 -0.99, %v10255_v41  ;;  %v5079_v46 = vsub.f32 1.0, %v10255_v41  ;;  %10276 = vlog2.f32 %v475_v37 }
 0x4bc   : > { %v10259_v47 = vpop.eup %10258  ;;  %7125 = vst [vmem:[%s12522_s20 + $0x878] sm:$0xff] %v6613_v42  ;;  %v6614_v48 = vsub.f32 %v4327_v39, %v5863_v43  ;;  %v7759_v49 = vadd.f32 -0.99, %v10257_v44  ;;  %v5080_v50 = vsub.f32 1.0, %v10257_v44  ;;  %10278 = vlog2.f32 %v476_v40  ;;  %v477_v39 = vld [vmem:[%s12465_s8 + $0x8f0] sm:$0xff]  ;;  %v478_v42 = vld [vmem:[%s12465_s8 + $0x8f8] sm:$0xff] }
 0x4bd   : > { %v10261_v51 = vpop.eup %10260  ;;  %10280 = vlog2.f32 %v7758_v45  ;;  %v7760_v53 = vadd.f32 -0.99, %v10259_v47  ;;  %v5081_v55 = vsub.f32 1.0, %v10259_v47 }
 0x4be   : > { %v10263_v54 = vpop.eup %10262  ;;  %7126 = vst [vmem:[%s12522_s20 + $0x880] sm:$0xff] %v6614_v48  ;;  %10282 = vlog2.f32 %v5079_v46  ;;  %v7761_v58 = vadd.f32 -0.99, %v10261_v51  ;;  %v5082_v61 = vsub.f32 1.0, %v10261_v51  ;;  %v479_v46 = vld [vmem:[%s12465_s8 + $0x900] sm:$0xff] }
 0x4bf   : > { %v10265_v57 = vpop.eup %10264  ;;  %10284 = vlog2.f32 %v7759_v49  ;;  %v1259_v59 = vmul.f32 0.6931472, %v10263_v54  ;;  %v480_v49 = vld [vmem:[%s12465_s8 + $0x908] sm:$0xff] }
 0x4c0   : > { %v10267_v60 = vpop.eup %10266  ;;  %10286 = vlog2.f32 %v5080_v50  ;;  %v1261_v56 = vmul.f32 0.6931472, %v10265_v57 }
 0x4c1   : > { %v10269_v62 = vpop.eup %10268  ;;  %10288 = vlog2.f32 %v7760_v53  ;;  %v2011_v63 = vmul.f32 %v13288_v14, %v1259_v59  ;;  %v1263_v0 = vmul.f32 0.6931472, %v10267_v60 }
 0x4c2   : > { %v10271_v1 = vpop.eup %10270  ;;  %10290 = vlog2.f32 %v5081_v55  ;;  %v2012_v2 = vmul.f32 %v13288_v14, %v1261_v56  ;;  %v1265_v3 = vmul.f32 0.6931472, %v10269_v62 }
 0x4c3   : > { %v10273_v4 = vpop.eup %10272  ;;  %10292 = vlog2.f32 %v7761_v58  ;;  %v2800_v5 = vmul.f32 1.442695, %v2011_v63  ;;  %v2013_v8 = vmul.f32 %v13288_v14, %v1263_v0  ;;  %v1267_v9 = vmul.f32 0.6931472, %v10271_v1 }
 0x4c4   : > { %v10275_v10 = vpop.eup %10274  ;;  %10294 = vlog2.f32 %v5082_v61  ;;  %v2802_v11 = vmul.f32 1.442695, %v2012_v2  ;;  %v2014_v12 = vmul.f32 %v13288_v14, %v1265_v3  ;;  %v1269_v6 = vmul.f32 0.6931472, %v10273_v4 }
 0x4c5   : > { %v10277_v13 = vpop.eup %10276  ;;  %10296 = vpow2.f32 %v2800_v5  ;;  %v2804_v15 = vmul.f32 1.442695, %v2013_v8  ;;  %v2015_v16 = vmul.f32 %v13288_v14, %v1267_v9  ;;  %v1271_v17 = vmul.f32 0.6931472, %v10275_v10 }
 0x4c6   : > { %v10279_v18 = vpop.eup %10278  ;;  %10298 = vpow2.f32 %v2802_v11  ;;  %v2806_v19 = vmul.f32 1.442695, %v2014_v12  ;;  %v2016_v20 = vmul.f32 %v13288_v14, %v1269_v6  ;;  %v1273_v21 = vmul.f32 0.6931472, %v10277_v13 }
 0x4c7   : > { %v10281_v22 = vpop.eup %10280  ;;  %10300 = vpow2.f32 %v2804_v15  ;;  %v2808_v7 = vmul.f32 1.442695, %v2015_v16  ;;  %v2017_v23 = vmul.f32 %v13288_v14, %v1271_v17  ;;  %v1275_v52 = vmul.f32 0.6931472, %v10279_v18 }
 0x4c8   : > { %v10283_v24 = vpop.eup %10282  ;;  %v4329_v25 = vmul.f32 0.6931472, %v10281_v22  ;;  %10302 = vpow2.f32 %v2806_v19  ;;  %v2810_v26 = vmul.f32 1.442695, %v2016_v20  ;;  %v2018_v27 = vmul.f32 %v13288_v14, %v1273_v21 }
 0x4c9   : > { %v10285_v28 = vpop.eup %10284  ;;  %v5865_v29 = vmul.f32 0.6931472, %v10283_v24  ;;  %10304 = vpow2.f32 %v2808_v7  ;;  %v2812_v30 = vmul.f32 1.442695, %v2017_v23  ;;  %v2019_v32 = vmul.f32 %v13288_v14, %v1275_v52 }
 0x4ca   : > { %v10287_v33 = vpop.eup %10286  ;;  %v4331_v34 = vmul.f32 0.6931472, %v10285_v28  ;;  %10306 = vpow2.f32 %v2810_v26  ;;  %v2814_v35 = vmul.f32 1.442695, %v2018_v27 }
 0x4cb   : > { %v10289_v36 = vpop.eup %10288  ;;  %v6615_v31 = vsub.f32 %v4329_v25, %v5865_v29  ;;  %v5867_v37 = vmul.f32 0.6931472, %v10287_v33  ;;  %10308 = vpow2.f32 %v2812_v30  ;;  %v2816_v38 = vmul.f32 1.442695, %v2019_v32 }
 0x4cc   : > { %v10291_v40 = vpop.eup %10290  ;;  %v4333_v41 = vmul.f32 0.6931472, %v10289_v36  ;;  %10310 = vpow2.f32 %v2814_v35 }
 0x4cd   : > { %v10293_v43 = vpop.eup %10292  ;;  %7127 = vst [vmem:[%s12522_s20 + $0x888] sm:$0xff] %v6615_v31  ;;  %v6616_v44 = vsub.f32 %v4331_v34, %v5867_v37  ;;  %v5869_v45 = vmul.f32 0.6931472, %v10291_v40  ;;  %10312 = vpow2.f32 %v2816_v38 }
 0x4ce   : > { %v10295_v47 = vpop.eup %10294  ;;  %v4335_v48 = vmul.f32 0.6931472, %v10293_v43  ;;  %10314 = vlog2.f32 %v477_v39 }
 0x4cf   : > { %v10297_v50 = vpop.eup %10296  ;;  %7128 = vst [vmem:[%s12522_s20 + $0x890] sm:$0xff] %v6616_v44  ;;  %v6617_v51 = vsub.f32 %v4333_v41, %v5869_v45  ;;  %v5871_v53 = vmul.f32 0.6931472, %v10295_v47  ;;  %10316 = vlog2.f32 %v478_v42 }
 0x4d0   : > { %v10299_v54 = vpop.eup %10298  ;;  %v7762_v55 = vadd.f32 -0.99, %v10297_v50  ;;  %v5083_v57 = vsub.f32 1.0, %v10297_v50  ;;  %10318 = vlog2.f32 %v479_v46 }
 0x4d1   : > { %v10301_v58 = vpop.eup %10300  ;;  %7129 = vst [vmem:[%s12522_s20 + $0x898] sm:$0xff] %v6617_v51  ;;  %v6618_v59 = vsub.f32 %v4335_v48, %v5871_v53  ;;  %v7763_v60 = vadd.f32 -0.99, %v10299_v54  ;;  %v5084_v61 = vsub.f32 1.0, %v10299_v54  ;;  %10320 = vlog2.f32 %v480_v49 }
 0x4d2   : > { %v10303_v56 = vpop.eup %10302  ;;  %10322 = vlog2.f32 %v7762_v55  ;;  %v7764_v62 = vadd.f32 -0.99, %v10301_v58  ;;  %v5085_v0 = vsub.f32 1.0, %v10301_v58  ;;  %v481_v55 = vld [vmem:[%s12465_s8 + $0x910] sm:$0xff] }
 0x4d3   : > { %v10305_v63 = vpop.eup %10304  ;;  %7130 = vst [vmem:[%s12522_s20 + $0x8a0] sm:$0xff] %v6618_v59  ;;  %10324 = vlog2.f32 %v5083_v57  ;;  %v7765_v2 = vadd.f32 -0.99, %v10303_v56  ;;  %v5086_v4 = vsub.f32 1.0, %v10303_v56 }
 0x4d4   : > { %v10307_v1 = vpop.eup %10306  ;;  %10326 = vlog2.f32 %v7763_v60  ;;  %v7766_v8 = vadd.f32 -0.99, %v10305_v63  ;;  %v5087_v10 = vsub.f32 1.0, %v10305_v63  ;;  %v482_v60 = vld [vmem:[%s12465_s8 + $0x918] sm:$0xff] }
 0x4d5   : > { %v10309_v3 = vpop.eup %10308  ;;  %10328 = vlog2.f32 %v5084_v61  ;;  %v7767_v12 = vadd.f32 -0.99, %v10307_v1  ;;  %v5088_v13 = vsub.f32 1.0, %v10307_v1 }
 0x4d6   : > { %v10311_v5 = vpop.eup %10310  ;;  %10330 = vlog2.f32 %v7764_v62  ;;  %v7768_v17 = vadd.f32 -0.99, %v10309_v3  ;;  %v5089_v20 = vsub.f32 1.0, %v10309_v3  ;;  %v483_v62 = vld [vmem:[%s12465_s8 + $0x920] sm:$0xff] }
 0x4d7   : > { %v10313_v9 = vpop.eup %10312  ;;  %10332 = vlog2.f32 %v5085_v0  ;;  %v7769_v7 = vadd.f32 -0.99, %v10311_v5  ;;  %v5090_v26 = vsub.f32 1.0, %v10311_v5  ;;  %v485_v5 = vld [vmem:[%s12465_s8 + $0x930] sm:$0xff] }
 0x4d8   : > { %v10315_v11 = vpop.eup %10314  ;;  %10334 = vlog2.f32 %v7765_v2  ;;  %v7770_v30 = vadd.f32 -0.99, %v10313_v9  ;;  %v5091_v35 = vsub.f32 1.0, %v10313_v9  ;;  %v484_v2 = vld [vmem:[%s12465_s8 + $0x928] sm:$0xff] }
 0x4d9   : > { %v10317_v6 = vpop.eup %10316  ;;  %10336 = vlog2.f32 %v5086_v4  ;;  %v1277_v15 = vmul.f32 0.6931472, %v10315_v11  ;;  %v486_v11 = vld [vmem:[%s12465_s8 + $0x938] sm:$0xff] }
 0x4da   : > { %v10319_v16 = vpop.eup %10318  ;;  %10338 = vlog2.f32 %v7766_v8  ;;  %v1279_v18 = vmul.f32 0.6931472, %v10317_v6 }
 0x4db   : > { %v10321_v19 = vpop.eup %10320  ;;  %10340 = vlog2.f32 %v5087_v10  ;;  %v1281_v21 = vmul.f32 0.6931472, %v10319_v16  ;;  %v2020_v23 = vmul.f32 %v13288_v14, %v1277_v15 }
 0x4dc   : > { %v10323_v22 = vpop.eup %10322  ;;  %10342 = vlog2.f32 %v7767_v12  ;;  %v1283_v52 = vmul.f32 0.6931472, %v10321_v19  ;;  %v2021_v27 = vmul.f32 %v13288_v14, %v1279_v18  ;;  %v488_v18 = vld [vmem:[%s12465_s8 + $0x948] sm:$0xff] }
 0x4dd   : > { %v10325_v24 = vpop.eup %10324  ;;  %v4337_v25 = vmul.f32 0.6931472, %v10323_v22  ;;  %10344 = vlog2.f32 %v5088_v13  ;;  %v2022_v32 = vmul.f32 %v13288_v14, %v1281_v21  ;;  %v2818_v39 = vmul.f32 1.442695, %v2020_v23  ;;  %v487_v13 = vld [vmem:[%s12465_s8 + $0x940] sm:$0xff]  ;;  %v489_v21 = vld [vmem:[%s12465_s8 + $0x950] sm:$0xff] }
 0x4de   : > { %v10327_v28 = vpop.eup %10326  ;;  %v5873_v29 = vmul.f32 0.6931472, %v10325_v24  ;;  %10346 = vlog2.f32 %v7768_v17  ;;  %v2023_v36 = vmul.f32 %v13288_v14, %v1283_v52  ;;  %v2820_v42 = vmul.f32 1.442695, %v2021_v27 }
 0x4df   : > { %v10329_v33 = vpop.eup %10328  ;;  %v4339_v34 = vmul.f32 0.6931472, %v10327_v28  ;;  %10348 = vlog2.f32 %v5089_v20  ;;  %v2822_v46 = vmul.f32 1.442695, %v2022_v32 }
 0x4e0   : > { %v10331_v31 = vpop.eup %10330  ;;  %v6619_v37 = vsub.f32 %v4337_v25, %v5873_v29  ;;  %v5875_v38 = vmul.f32 0.6931472, %v10329_v33  ;;  %10350 = vlog2.f32 %v7769_v7  ;;  %v2824_v48 = vmul.f32 1.442695, %v2023_v36 }
 0x4e1   : > { %v10333_v40 = vpop.eup %10332  ;;  %v4341_v41 = vmul.f32 0.6931472, %v10331_v31  ;;  %10352 = vlog2.f32 %v5090_v26 }
 0x4e2   : > { %v10335_v43 = vpop.eup %10334  ;;  %7131 = vst [vmem:[%s12522_s20 + $0x8a8] sm:$0xff] %v6619_v37  ;;  %v6620_v44 = vsub.f32 %v4339_v34, %v5875_v38  ;;  %v5877_v45 = vmul.f32 0.6931472, %v10333_v40  ;;  %10354 = vlog2.f32 %v7770_v30 }
 0x4e3   : > { %v10337_v47 = vpop.eup %10336  ;;  %v4343_v14 = vmul.f32 0.6931472, %v10335_v43  ;;  %10356 = vlog2.f32 %v5091_v35 }
 0x4e4   : > { %v10339_v49 = vpop.eup %10338  ;;  %7132 = vst [vmem:[%s12522_s20 + $0x8b0] sm:$0xff] %v6620_v44  ;;  %v6621_v50 = vsub.f32 %v4341_v41, %v5877_v45  ;;  %v5879_v51 = vmul.f32 0.6931472, %v10337_v47  ;;  %10358 = vpow2.f32 %v2818_v39  ;;  %v13390_v41 = vld [vmem:[#allocation5] ss:$0 sm:$0xff] }
 0x4e5   : > { %v10341_v53 = vpop.eup %10340  ;;  %v4345_v54 = vmul.f32 0.6931472, %v10339_v49  ;;  %10360 = vpow2.f32 %v2820_v42 }
 0x4e6   : > { %v10343_v57 = vpop.eup %10342  ;;  %7133 = vst [vmem:[%s12522_s20 + $0x8b8] sm:$0xff] %v6621_v50  ;;  %v6622_v58 = vsub.f32 %v4343_v14, %v5879_v51  ;;  %v5881_v59 = vmul.f32 0.6931472, %v10341_v53  ;;  %10362 = vpow2.f32 %v2822_v46 }
 0x4e7   : > { %v10345_v61 = vpop.eup %10344  ;;  %v4347_v56 = vmul.f32 0.6931472, %v10343_v57  ;;  %10364 = vpow2.f32 %v2824_v48 }
 0x4e8   : > { %v10347_v63 = vpop.eup %10346  ;;  %7134 = vst [vmem:[%s12522_s20 + $0x8c0] sm:$0xff] %v6622_v58  ;;  %v6623_v0 = vsub.f32 %v4345_v54, %v5881_v59  ;;  %v5883_v1 = vmul.f32 0.6931472, %v10345_v61  ;;  %10366 = vlog2.f32 %v481_v55 }
 0x4e9   : > { %v10349_v3 = vpop.eup %10348  ;;  %v4349_v4 = vmul.f32 0.6931472, %v10347_v63  ;;  %10368 = vlog2.f32 %v482_v60 }
 0x4ea   : > { %v10351_v8 = vpop.eup %10350  ;;  %7135 = vst [vmem:[%s12522_s20 + $0x8c8] sm:$0xff] %v6623_v0  ;;  %v6624_v9 = vsub.f32 %v4347_v56, %v5883_v1  ;;  %v5885_v10 = vmul.f32 0.6931472, %v10349_v3  ;;  %10370 = vlog2.f32 %v483_v62 }
 0x4eb   : > { %v10353_v12 = vpop.eup %10352  ;;  %v4351_v6 = vmul.f32 0.6931472, %v10351_v8  ;;  %10372 = vlog2.f32 %v484_v2 }
 0x4ec   : > { %v10355_v15 = vpop.eup %10354  ;;  %7136 = vst [vmem:[%s12522_s20 + $0x8d0] sm:$0xff] %v6624_v9  ;;  %v6625_v16 = vsub.f32 %v4349_v4, %v5885_v10  ;;  %v5887_v17 = vmul.f32 0.6931472, %v10353_v12  ;;  %10374 = vlog2.f32 %v485_v5 }
 0x4ed   : > { %v10357_v19 = vpop.eup %10356  ;;  %v4353_v20 = vmul.f32 0.6931472, %v10355_v15  ;;  %10376 = vlog2.f32 %v486_v11 }
 0x4ee   : > { %v10359_v22 = vpop.eup %10358  ;;  %7137 = vst [vmem:[%s12522_s20 + $0x8d8] sm:$0xff] %v6625_v16  ;;  %v6626_v7 = vsub.f32 %v4351_v6, %v5887_v17  ;;  %v5889_v23 = vmul.f32 0.6931472, %v10357_v19  ;;  %10378 = vlog2.f32 %v487_v13 }
 0x4ef   : > { %v10361_v52 = vpop.eup %10360  ;;  %v7771_v24 = vadd.f32 -0.99, %v10359_v22  ;;  %v5092_v25 = vsub.f32 1.0, %v10359_v22  ;;  %10380 = vlog2.f32 %v488_v18 }
 0x4f0   : > { %v10363_v26 = vpop.eup %10362  ;;  %7138 = vst [vmem:[%s12522_s20 + $0x8e0] sm:$0xff] %v6626_v7  ;;  %v6627_v27 = vsub.f32 %v4353_v20, %v5889_v23  ;;  %v7772_v28 = vadd.f32 -0.99, %v10361_v52  ;;  %v5093_v29 = vsub.f32 1.0, %v10361_v52  ;;  %10382 = vlog2.f32 %v489_v21  ;;  %v490_v20 = vld [vmem:[%s12465_s8 + $0x958] sm:$0xff]  ;;  %v491_v7 = vld [vmem:[%s12465_s8 + $0x960] sm:$0xff] }
 0x4f1   : > { %v10365_v30 = vpop.eup %10364  ;;  %10384 = vlog2.f32 %v7771_v24  ;;  %v7773_v32 = vadd.f32 -0.99, %v10363_v26  ;;  %v5094_v34 = vsub.f32 1.0, %v10363_v26 }
 0x4f2   : > { %v10367_v33 = vpop.eup %10366  ;;  %7139 = vst [vmem:[%s12522_s20 + $0x8e8] sm:$0xff] %v6627_v27  ;;  %10386 = vlog2.f32 %v5092_v25  ;;  %v7774_v36 = vadd.f32 -0.99, %v10365_v30  ;;  %v5095_v38 = vsub.f32 1.0, %v10365_v30  ;;  %v492_v25 = vld [vmem:[%s12465_s8 + $0x968] sm:$0xff] }
 0x4f3   : > { %v10369_v35 = vpop.eup %10368  ;;  %10388 = vlog2.f32 %v7772_v28  ;;  %v1285_v31 = vmul.f32 0.6931472, %v10367_v33  ;;  %v493_v28 = vld [vmem:[%s12465_s8 + $0x970] sm:$0xff] }
 0x4f4   : > { %v10371_v37 = vpop.eup %10370  ;;  %10390 = vlog2.f32 %v5093_v29  ;;  %v1287_v39 = vmul.f32 0.6931472, %v10369_v35 }
 0x4f5   : > { %v10373_v40 = vpop.eup %10372  ;;  %10392 = vlog2.f32 %v7773_v32  ;;  %v2024_v42 = vmul.f32 %v13390_v41, %v1285_v31  ;;  %v1289_v43 = vmul.f32 0.6931472, %v10371_v37 }
 0x4f6   : > { %v10375_v44 = vpop.eup %10374  ;;  %10394 = vlog2.f32 %v5094_v34  ;;  %v2025_v45 = vmul.f32 %v13390_v41, %v1287_v39  ;;  %v1291_v46 = vmul.f32 0.6931472, %v10373_v40 }
 0x4f7   : > { %v10377_v47 = vpop.eup %10376  ;;  %10396 = vlog2.f32 %v7774_v36  ;;  %v2826_v14 = vmul.f32 1.442695, %v2024_v42  ;;  %v2026_v48 = vmul.f32 %v13390_v41, %v1289_v43  ;;  %v1293_v49 = vmul.f32 0.6931472, %v10375_v44 }
 0x4f8   : > { %v10379_v50 = vpop.eup %10378  ;;  %10398 = vlog2.f32 %v5095_v38  ;;  %v2828_v51 = vmul.f32 1.442695, %v2025_v45  ;;  %v2027_v53 = vmul.f32 %v13390_v41, %v1291_v46  ;;  %v1295_v54 = vmul.f32 0.6931472, %v10377_v47 }
 0x4f9   : > { %v10381_v55 = vpop.eup %10380  ;;  %10400 = vpow2.f32 %v2826_v14  ;;  %v2830_v57 = vmul.f32 1.442695, %v2026_v48  ;;  %v2028_v58 = vmul.f32 %v13390_v41, %v1293_v49  ;;  %v1297_v59 = vmul.f32 0.6931472, %v10379_v50 }
 0x4fa   : > { %v10383_v60 = vpop.eup %10382  ;;  %10402 = vpow2.f32 %v2828_v51  ;;  %v2832_v61 = vmul.f32 1.442695, %v2027_v53  ;;  %v2029_v56 = vmul.f32 %v13390_v41, %v1295_v54  ;;  %v1299_v62 = vmul.f32 0.6931472, %v10381_v55 }
 0x4fb   : > { %v10385_v63 = vpop.eup %10384  ;;  %10404 = vpow2.f32 %v2830_v57  ;;  %v2834_v0 = vmul.f32 1.442695, %v2028_v58  ;;  %v2030_v1 = vmul.f32 %v13390_v41, %v1297_v59  ;;  %v1301_v2 = vmul.f32 0.6931472, %v10383_v60 }
 0x4fc   : > { %v10387_v3 = vpop.eup %10386  ;;  %v4355_v4 = vmul.f32 0.6931472, %v10385_v63  ;;  %10406 = vpow2.f32 %v2832_v61  ;;  %v2836_v5 = vmul.f32 1.442695, %v2029_v56  ;;  %v2031_v8 = vmul.f32 %v13390_v41, %v1299_v62 }
 0x4fd   : > { %v10389_v9 = vpop.eup %10388  ;;  %v5891_v10 = vmul.f32 0.6931472, %v10387_v3  ;;  %10408 = vpow2.f32 %v2834_v0  ;;  %v2838_v11 = vmul.f32 1.442695, %v2030_v1  ;;  %v2032_v12 = vmul.f32 %v13390_v41, %v1301_v2 }
 0x4fe   : > { %v10391_v6 = vpop.eup %10390  ;;  %v4357_v13 = vmul.f32 0.6931472, %v10389_v9  ;;  %10410 = vpow2.f32 %v2836_v5  ;;  %v2840_v15 = vmul.f32 1.442695, %v2031_v8 }
 0x4ff   : > { %v10393_v16 = vpop.eup %10392  ;;  %v6628_v17 = vsub.f32 %v4355_v4, %v5891_v10  ;;  %v5893_v18 = vmul.f32 0.6931472, %v10391_v6  ;;  %10412 = vpow2.f32 %v2838_v11  ;;  %v2842_v19 = vmul.f32 1.442695, %v2032_v12 }
 0x500   : > { %v10395_v21 = vpop.eup %10394  ;;  %v4359_v22 = vmul.f32 0.6931472, %v10393_v16  ;;  %10414 = vpow2.f32 %v2840_v15 }
 0x501   : > { %v10397_v23 = vpop.eup %10396  ;;  %7140 = vst [vmem:[%s12522_s20 + $0x8f0] sm:$0xff] %v6628_v17  ;;  %v6629_v52 = vsub.f32 %v4357_v13, %v5893_v18  ;;  %v5895_v24 = vmul.f32 0.6931472, %v10395_v21  ;;  %10416 = vpow2.f32 %v2842_v19 }
 0x502   : > { %v10399_v26 = vpop.eup %10398  ;;  %v4361_v27 = vmul.f32 0.6931472, %v10397_v23  ;;  %10418 = vlog2.f32 %v490_v20 }
 0x503   : > { %v10401_v29 = vpop.eup %10400  ;;  %7141 = vst [vmem:[%s12522_s20 + $0x8f8] sm:$0xff] %v6629_v52  ;;  %v6630_v30 = vsub.f32 %v4359_v22, %v5895_v24  ;;  %v5897_v32 = vmul.f32 0.6931472, %v10399_v26  ;;  %10420 = vlog2.f32 %v491_v7 }
 0x504   : > { %v10403_v33 = vpop.eup %10402  ;;  %v7775_v34 = vadd.f32 -0.99, %v10401_v29  ;;  %v5096_v35 = vsub.f32 1.0, %v10401_v29  ;;  %10422 = vlog2.f32 %v492_v25 }
 0x505   : > { %v10405_v36 = vpop.eup %10404  ;;  %7142 = vst [vmem:[%s12522_s20 + $0x900] sm:$0xff] %v6630_v30  ;;  %v6631_v31 = vsub.f32 %v4361_v27, %v5897_v32  ;;  %v7776_v37 = vadd.f32 -0.99, %v10403_v33  ;;  %v5097_v38 = vsub.f32 1.0, %v10403_v33  ;;  %10424 = vlog2.f32 %v493_v28 }
 0x506   : > { %v10407_v39 = vpop.eup %10406  ;;  %10426 = vlog2.f32 %v7775_v34  ;;  %v7777_v40 = vadd.f32 -0.99, %v10405_v36  ;;  %v5098_v43 = vsub.f32 1.0, %v10405_v36 }
 0x507   : > { %v10409_v42 = vpop.eup %10408  ;;  %7143 = vst [vmem:[%s12522_s20 + $0x908] sm:$0xff] %v6631_v31  ;;  %10428 = vlog2.f32 %v5096_v35  ;;  %v7778_v45 = vadd.f32 -0.99, %v10407_v39  ;;  %v5099_v47 = vsub.f32 1.0, %v10407_v39  ;;  %v494_v35 = vld [vmem:[%s12465_s8 + $0x978] sm:$0xff] }
 0x508   : > { %v10411_v44 = vpop.eup %10410  ;;  %10430 = vlog2.f32 %v7776_v37  ;;  %v7779_v48 = vadd.f32 -0.99, %v10409_v42  ;;  %v5100_v50 = vsub.f32 1.0, %v10409_v42  ;;  %v496_v42 = vld [vmem:[%s12465_s8 + $0x988] sm:$0xff] }
 0x509   : > { %v10413_v46 = vpop.eup %10412  ;;  %10432 = vlog2.f32 %v5097_v38  ;;  %v7780_v53 = vadd.f32 -0.99, %v10411_v44  ;;  %v5101_v55 = vsub.f32 1.0, %v10411_v44  ;;  %v495_v38 = vld [vmem:[%s12465_s8 + $0x980] sm:$0xff] }
 0x50a   : > { %v10415_v14 = vpop.eup %10414  ;;  %10434 = vlog2.f32 %v7777_v40  ;;  %v7781_v59 = vadd.f32 -0.99, %v10413_v46  ;;  %v5102_v56 = vsub.f32 1.0, %v10413_v46  ;;  %v497_v46 = vld [vmem:[%s12465_s8 + $0x990] sm:$0xff] }
 0x50b   : > { %v10417_v49 = vpop.eup %10416  ;;  %10436 = vlog2.f32 %v5098_v43  ;;  %v7782_v0 = vadd.f32 -0.99, %v10415_v14  ;;  %v5103_v5 = vsub.f32 1.0, %v10415_v14 }
 0x50c   : > { %v10419_v51 = vpop.eup %10418  ;;  %10438 = vlog2.f32 %v7778_v45  ;;  %v7783_v11 = vadd.f32 -0.99, %v10417_v49  ;;  %v5104_v15 = vsub.f32 1.0, %v10417_v49 }
 0x50d   : > { %v10421_v54 = vpop.eup %10420  ;;  %10440 = vlog2.f32 %v5099_v47  ;;  %v1303_v57 = vmul.f32 0.6931472, %v10419_v51 }
 0x50e   : > { %v10423_v58 = vpop.eup %10422  ;;  %10442 = vlog2.f32 %v7779_v48  ;;  %v1305_v60 = vmul.f32 0.6931472, %v10421_v54  ;;  %v498_v48 = vld [vmem:[%s12465_s8 + $0x998] sm:$0xff] }
 0x50f   : > { %v10425_v61 = vpop.eup %10424  ;;  %10444 = vlog2.f32 %v5100_v50  ;;  %v1307_v62 = vmul.f32 0.6931472, %v10423_v58  ;;  %v2033_v1 = vmul.f32 %v13390_v41, %v1303_v57  ;;  %v500_v57 = vld [vmem:[%s12465_s8 + $0x9a8] sm:$0xff] }
 0x510   : > { %v10427_v63 = vpop.eup %10426  ;;  %10446 = vlog2.f32 %v7780_v53  ;;  %v1309_v2 = vmul.f32 0.6931472, %v10425_v61  ;;  %v2034_v8 = vmul.f32 %v13390_v41, %v1305_v60  ;;  %v499_v53 = vld [vmem:[%s12465_s8 + $0x9a0] sm:$0xff]  ;;  %v501_v61 = vld [vmem:[%s12465_s8 + $0x9b0] sm:$0xff] }
 0x511   : > { %v10429_v3 = vpop.eup %10428  ;;  %v4363_v4 = vmul.f32 0.6931472, %v10427_v63  ;;  %10448 = vlog2.f32 %v5101_v55  ;;  %v2035_v12 = vmul.f32 %v13390_v41, %v1307_v62  ;;  %v2844_v20 = vmul.f32 1.442695, %v2033_v1  ;;  %v502_v63 = vld [vmem:[%s12465_s8 + $0x9b8] sm:$0xff] }
 0x512   : > { %v10431_v9 = vpop.eup %10430  ;;  %v5899_v10 = vmul.f32 0.6931472, %v10429_v3  ;;  %10450 = vlog2.f32 %v7781_v59  ;;  %v2036_v16 = vmul.f32 %v13390_v41, %v1309_v2  ;;  %v2846_v7 = vmul.f32 1.442695, %v2034_v8 }
 0x513   : > { %v10433_v6 = vpop.eup %10432  ;;  %v4365_v13 = vmul.f32 0.6931472, %v10431_v9  ;;  %10452 = vlog2.f32 %v5102_v56  ;;  %v2848_v25 = vmul.f32 1.442695, %v2035_v12 }
 0x514   : > { %v10435_v17 = vpop.eup %10434  ;;  %v6632_v18 = vsub.f32 %v4363_v4, %v5899_v10  ;;  %v5901_v19 = vmul.f32 0.6931472, %v10433_v6  ;;  %10454 = vlog2.f32 %v7782_v0  ;;  %v2850_v28 = vmul.f32 1.442695, %v2036_v16 }
 0x515   : > { %v10437_v21 = vpop.eup %10436  ;;  %v4367_v22 = vmul.f32 0.6931472, %v10435_v17  ;;  %10456 = vlog2.f32 %v5103_v5 }
 0x516   : > { %v10439_v23 = vpop.eup %10438  ;;  %7144 = vst [vmem:[%s12522_s20 + $0x910] sm:$0xff] %v6632_v18  ;;  %v6633_v52 = vsub.f32 %v4365_v13, %v5901_v19  ;;  %v5903_v24 = vmul.f32 0.6931472, %v10437_v21  ;;  %10458 = vlog2.f32 %v7783_v11 }
 0x517   : > { %v10441_v26 = vpop.eup %10440  ;;  %v4369_v27 = vmul.f32 0.6931472, %v10439_v23  ;;  %10460 = vlog2.f32 %v5104_v15 }
 0x518   : > { %v10443_v29 = vpop.eup %10442  ;;  %7145 = vst [vmem:[%s12522_s20 + $0x918] sm:$0xff] %v6633_v52  ;;  %v6634_v30 = vsub.f32 %v4367_v22, %v5903_v24  ;;  %v5905_v32 = vmul.f32 0.6931472, %v10441_v26  ;;  %10462 = vpow2.f32 %v2844_v20 }
 0x519   : > { %v10445_v33 = vpop.eup %10444  ;;  %v4371_v34 = vmul.f32 0.6931472, %v10443_v29  ;;  %10464 = vpow2.f32 %v2846_v7 }
 0x51a   : > { %v10447_v36 = vpop.eup %10446  ;;  %7146 = vst [vmem:[%s12522_s20 + $0x920] sm:$0xff] %v6634_v30  ;;  %v6635_v31 = vsub.f32 %v4369_v27, %v5905_v32  ;;  %v5907_v37 = vmul.f32 0.6931472, %v10445_v33  ;;  %10466 = vpow2.f32 %v2848_v25 }
 0x51b   : > { %v10449_v39 = vpop.eup %10448  ;;  %v4373_v40 = vmul.f32 0.6931472, %v10447_v36  ;;  %10468 = vpow2.f32 %v2850_v28 }
 0x51c   : > { %v10451_v43 = vpop.eup %10450  ;;  %7147 = vst [vmem:[%s12522_s20 + $0x928] sm:$0xff] %v6635_v31  ;;  %v6636_v44 = vsub.f32 %v4371_v34, %v5907_v37  ;;  %v5909_v45 = vmul.f32 0.6931472, %v10449_v39  ;;  %10470 = vlog2.f32 %v494_v35 }
 0x51d   : > { %v10453_v47 = vpop.eup %10452  ;;  %v4375_v14 = vmul.f32 0.6931472, %v10451_v43  ;;  %10472 = vlog2.f32 %v495_v38 }
 0x51e   : > { %v10455_v49 = vpop.eup %10454  ;;  %7148 = vst [vmem:[%s12522_s20 + $0x930] sm:$0xff] %v6636_v44  ;;  %v6637_v50 = vsub.f32 %v4373_v40, %v5909_v45  ;;  %v5911_v51 = vmul.f32 0.6931472, %v10453_v47  ;;  %10474 = vlog2.f32 %v496_v42 }
 0x51f   : > { %v10457_v54 = vpop.eup %10456  ;;  %v4377_v55 = vmul.f32 0.6931472, %v10455_v49  ;;  %10476 = vlog2.f32 %v497_v46 }
 0x520   : > { %v10459_v58 = vpop.eup %10458  ;;  %7149 = vst [vmem:[%s12522_s20 + $0x938] sm:$0xff] %v6637_v50  ;;  %v6638_v59 = vsub.f32 %v4375_v14, %v5911_v51  ;;  %v5913_v60 = vmul.f32 0.6931472, %v10457_v54  ;;  %10478 = vlog2.f32 %v498_v48 }
 0x521   : > { %v10461_v56 = vpop.eup %10460  ;;  %v4379_v62 = vmul.f32 0.6931472, %v10459_v58  ;;  %10480 = vlog2.f32 %v499_v53 }
 0x522   : > { %v10463_v0 = vpop.eup %10462  ;;  %7150 = vst [vmem:[%s12522_s20 + $0x940] sm:$0xff] %v6638_v59  ;;  %v6639_v1 = vsub.f32 %v4377_v55, %v5913_v60  ;;  %v5915_v2 = vmul.f32 0.6931472, %v10461_v56  ;;  %10482 = vlog2.f32 %v500_v57 }
 0x523   : > { %v10465_v3 = vpop.eup %10464  ;;  %v7784_v4 = vadd.f32 -0.99, %v10463_v0  ;;  %v5105_v5 = vsub.f32 1.0, %v10463_v0  ;;  %10484 = vlog2.f32 %v501_v61 }
 0x524   : > { %v10467_v8 = vpop.eup %10466  ;;  %7151 = vst [vmem:[%s12522_s20 + $0x948] sm:$0xff] %v6639_v1  ;;  %v6640_v9 = vsub.f32 %v4379_v62, %v5915_v2  ;;  %v7785_v10 = vadd.f32 -0.99, %v10465_v3  ;;  %v5106_v11 = vsub.f32 1.0, %v10465_v3  ;;  %10486 = vlog2.f32 %v502_v63  ;;  %v503_v62 = vld [vmem:[%s12465_s8 + $0x9c0] sm:$0xff]  ;;  %v504_v1 = vld [vmem:[%s12465_s8 + $0x9c8] sm:$0xff] }
 0x525   : > { %v10469_v12 = vpop.eup %10468  ;;  %10488 = vlog2.f32 %v7784_v4  ;;  %v7786_v6 = vadd.f32 -0.99, %v10467_v8  ;;  %v5107_v15 = vsub.f32 1.0, %v10467_v8 }
 0x526   : > { %v10471_v13 = vpop.eup %10470  ;;  %7152 = vst [vmem:[%s12522_s20 + $0x950] sm:$0xff] %v6640_v9  ;;  %10490 = vlog2.f32 %v5105_v5  ;;  %v7787_v17 = vadd.f32 -0.99, %v10469_v12  ;;  %v5108_v20 = vsub.f32 1.0, %v10469_v12  ;;  %v505_v5 = vld [vmem:[%s12465_s8 + $0x9d0] sm:$0xff] }
 0x527   : > { %v10473_v16 = vpop.eup %10472  ;;  %10492 = vlog2.f32 %v7785_v10  ;;  %v1311_v18 = vmul.f32 0.6931472, %v10471_v13  ;;  %v506_v10 = vld [vmem:[%s12465_s8 + $0x9d8] sm:$0xff] }
 0x528   : > { %v10475_v19 = vpop.eup %10474  ;;  %10494 = vlog2.f32 %v5106_v11  ;;  %v1313_v21 = vmul.f32 0.6931472, %v10473_v16 }
 0x529   : > { %v10477_v22 = vpop.eup %10476  ;;  %10496 = vlog2.f32 %v7786_v6  ;;  %v2037_v7 = vmul.f32 %v13390_v41, %v1311_v18  ;;  %v1315_v23 = vmul.f32 0.6931472, %v10475_v19 }
 0x52a   : > { %v10479_v52 = vpop.eup %10478  ;;  %10498 = vlog2.f32 %v5107_v15  ;;  %v2038_v24 = vmul.f32 %v13390_v41, %v1313_v21  ;;  %v1317_v25 = vmul.f32 0.6931472, %v10477_v22 }
 0x52b   : > { %v10481_v26 = vpop.eup %10480  ;;  %10500 = vlog2.f32 %v7787_v17  ;;  %v2852_v27 = vmul.f32 1.442695, %v2037_v7  ;;  %v2039_v28 = vmul.f32 %v13390_v41, %v1315_v23  ;;  %v1319_v29 = vmul.f32 0.6931472, %v10479_v52 }
 0x52c   : > { %v10483_v30 = vpop.eup %10482  ;;  %10502 = vlog2.f32 %v5108_v20  ;;  %v2854_v32 = vmul.f32 1.442695, %v2038_v24  ;;  %v2040_v33 = vmul.f32 %v13390_v41, %v1317_v25  ;;  %v1321_v34 = vmul.f32 0.6931472, %v10481_v26 }
 0x52d   : > { %v10485_v35 = vpop.eup %10484  ;;  %10504 = vpow2.f32 %v2852_v27  ;;  %v2856_v36 = vmul.f32 1.442695, %v2039_v28  ;;  %v2041_v31 = vmul.f32 %v13390_v41, %v1319_v29  ;;  %v1323_v37 = vmul.f32 0.6931472, %v10483_v30 }
 0x52e   : > { %v10487_v38 = vpop.eup %10486  ;;  %10506 = vpow2.f32 %v2854_v32  ;;  %v2858_v39 = vmul.f32 1.442695, %v2040_v33  ;;  %v2042_v40 = vmul.f32 %v13390_v41, %v1321_v34  ;;  %v1325_v42 = vmul.f32 0.6931472, %v10485_v35 }
 0x52f   : > { %v10489_v43 = vpop.eup %10488  ;;  %10508 = vpow2.f32 %v2856_v36  ;;  %v2860_v44 = vmul.f32 1.442695, %v2041_v31  ;;  %v2043_v45 = vmul.f32 %v13390_v41, %v1323_v37  ;;  %v1327_v46 = vmul.f32 0.6931472, %v10487_v38 }
 0x530   : > { %v10491_v47 = vpop.eup %10490  ;;  %v4381_v14 = vmul.f32 0.6931472, %v10489_v43  ;;  %10510 = vpow2.f32 %v2858_v39  ;;  %v2862_v48 = vmul.f32 1.442695, %v2042_v40  ;;  %v2044_v49 = vmul.f32 %v13390_v41, %v1325_v42 }
 0x531   : > { %v10493_v50 = vpop.eup %10492  ;;  %v5917_v51 = vmul.f32 0.6931472, %v10491_v47  ;;  %10512 = vpow2.f32 %v2860_v44  ;;  %v2864_v53 = vmul.f32 1.442695, %v2043_v45  ;;  %v2045_v54 = vmul.f32 %v13390_v41, %v1327_v46 }
 0x532   : > { %v10495_v55 = vpop.eup %10494  ;;  %v4383_v57 = vmul.f32 0.6931472, %v10493_v50  ;;  %10514 = vpow2.f32 %v2862_v48  ;;  %v2866_v58 = vmul.f32 1.442695, %v2044_v49 }
 0x533   : > { %v10497_v59 = vpop.eup %10496  ;;  %v6641_v60 = vsub.f32 %v4381_v14, %v5917_v51  ;;  %v5919_v61 = vmul.f32 0.6931472, %v10495_v55  ;;  %10516 = vpow2.f32 %v2864_v53  ;;  %v2868_v56 = vmul.f32 1.442695, %v2045_v54 }
 0x534   : > { %v10499_v63 = vpop.eup %10498  ;;  %v4385_v0 = vmul.f32 0.6931472, %v10497_v59  ;;  %10518 = vpow2.f32 %v2866_v58 }
 0x535   : > { %v10501_v2 = vpop.eup %10500  ;;  %7153 = vst [vmem:[%s12522_s20 + $0x958] sm:$0xff] %v6641_v60  ;;  %v6642_v3 = vsub.f32 %v4383_v57, %v5919_v61  ;;  %v5921_v4 = vmul.f32 0.6931472, %v10499_v63  ;;  %10520 = vpow2.f32 %v2868_v56 }
 0x536   : > { %v10503_v8 = vpop.eup %10502  ;;  %v4387_v9 = vmul.f32 0.6931472, %v10501_v2  ;;  %10522 = vlog2.f32 %v503_v62 }
 0x537   : > { %v10505_v11 = vpop.eup %10504  ;;  %7154 = vst [vmem:[%s12522_s20 + $0x960] sm:$0xff] %v6642_v3  ;;  %v6643_v12 = vsub.f32 %v4385_v0, %v5921_v4  ;;  %v5923_v6 = vmul.f32 0.6931472, %v10503_v8  ;;  %10524 = vlog2.f32 %v504_v1 }
 0x538   : > { %v10507_v13 = vpop.eup %10506  ;;  %v7788_v15 = vadd.f32 -0.99, %v10505_v11  ;;  %v5109_v16 = vsub.f32 1.0, %v10505_v11  ;;  %10526 = vlog2.f32 %v505_v5 }
 0x539   : > { %v10509_v17 = vpop.eup %10508  ;;  %7155 = vst [vmem:[%s12522_s20 + $0x968] sm:$0xff] %v6643_v12  ;;  %v6644_v18 = vsub.f32 %v4387_v9, %v5923_v6  ;;  %v7789_v19 = vadd.f32 -0.99, %v10507_v13  ;;  %v5110_v20 = vsub.f32 1.0, %v10507_v13  ;;  %10528 = vlog2.f32 %v506_v10 }
 0x53a   : > { %v10511_v21 = vpop.eup %10510  ;;  %10530 = vlog2.f32 %v7788_v15  ;;  %v7790_v22 = vadd.f32 -0.99, %v10509_v17  ;;  %v5111_v23 = vsub.f32 1.0, %v10509_v17 }
 0x53b   : > { %v10513_v7 = vpop.eup %10512  ;;  %7156 = vst [vmem:[%s12522_s20 + $0x970] sm:$0xff] %v6644_v18  ;;  %10532 = vlog2.f32 %v5109_v16  ;;  %v7791_v24 = vadd.f32 -0.99, %v10511_v21  ;;  %v5112_v26 = vsub.f32 1.0, %v10511_v21  ;;  %v507_v16 = vld [vmem:[%s12465_s8 + $0x9e0] sm:$0xff] }
 0x53c   : > { %v10515_v52 = vpop.eup %10514  ;;  %10534 = vlog2.f32 %v7789_v19  ;;  %v7792_v28 = vadd.f32 -0.99, %v10513_v7  ;;  %v5113_v30 = vsub.f32 1.0, %v10513_v7  ;;  %v509_v7 = vld [vmem:[%s12465_s8 + $0x9f0] sm:$0xff] }
 0x53d   : > { %v10517_v25 = vpop.eup %10516  ;;  %10536 = vlog2.f32 %v5110_v20  ;;  %v7793_v33 = vadd.f32 -0.99, %v10515_v52  ;;  %v5114_v35 = vsub.f32 1.0, %v10515_v52  ;;  %v508_v20 = vld [vmem:[%s12465_s8 + $0x9e8] sm:$0xff] }
 0x53e   : > { %v10519_v27 = vpop.eup %10518  ;;  %10538 = vlog2.f32 %v7790_v22  ;;  %v7794_v37 = vadd.f32 -0.99, %v10517_v25  ;;  %v5115_v40 = vsub.f32 1.0, %v10517_v25  ;;  %v510_v25 = vld [vmem:[%s12465_s8 + $0x9f8] sm:$0xff] }
 0x53f   : > { %v10521_v29 = vpop.eup %10520  ;;  %10540 = vlog2.f32 %v5111_v23  ;;  %v7795_v44 = vadd.f32 -0.99, %v10519_v27  ;;  %v5116_v48 = vsub.f32 1.0, %v10519_v27 }
 0x540   : > { %v10523_v32 = vpop.eup %10522  ;;  %10542 = vlog2.f32 %v7791_v24  ;;  %v7796_v53 = vadd.f32 -0.99, %v10521_v29  ;;  %v5117_v58 = vsub.f32 1.0, %v10521_v29 }
 0x541   : > { %v10525_v34 = vpop.eup %10524  ;;  %10544 = vlog2.f32 %v5112_v26  ;;  %v1329_v36 = vmul.f32 0.6931472, %v10523_v32 }
 0x542   : > { %v10527_v31 = vpop.eup %10526  ;;  %10546 = vlog2.f32 %v7792_v28  ;;  %v1331_v38 = vmul.f32 0.6931472, %v10525_v34  ;;  %v511_v28 = vld [vmem:[%s12465_s8 + $0xa00] sm:$0xff] }
 0x543   : > { %v10529_v39 = vpop.eup %10528  ;;  %10548 = vlog2.f32 %v5113_v30  ;;  %v1333_v42 = vmul.f32 0.6931472, %v10527_v31  ;;  %v2046_v45 = vmul.f32 %v13390_v41, %v1329_v36  ;;  %v513_v36 = vld [vmem:[%s12465_s8 + $0xa10] sm:$0xff] }
 0x544   : > { %v10531_v43 = vpop.eup %10530  ;;  %10550 = vlog2.f32 %v7793_v33  ;;  %v1335_v46 = vmul.f32 0.6931472, %v10529_v39  ;;  %v2047_v49 = vmul.f32 %v13390_v41, %v1331_v38  ;;  %v512_v33 = vld [vmem:[%s12465_s8 + $0xa08] sm:$0xff]  ;;  %v514_v39 = vld [vmem:[%s12465_s8 + $0xa18] sm:$0xff] }
 0x545   : > { %v10533_v47 = vpop.eup %10532  ;;  %v4389_v14 = vmul.f32 0.6931472, %v10531_v43  ;;  %10552 = vlog2.f32 %v5114_v35  ;;  %v2048_v54 = vmul.f32 %v13390_v41, %v1333_v42  ;;  %v2870_v62 = vmul.f32 1.442695, %v2046_v45  ;;  %v515_v43 = vld [vmem:[%s12465_s8 + $0xa20] sm:$0xff] }
 0x546   : > { %v10535_v50 = vpop.eup %10534  ;;  %v5925_v51 = vmul.f32 0.6931472, %v10533_v47  ;;  %10554 = vlog2.f32 %v7794_v37  ;;  %v2049_v59 = vmul.f32 %v13390_v41, %v1335_v46  ;;  %v2872_v1 = vmul.f32 1.442695, %v2047_v49 }
 0x547   : > { %v10537_v55 = vpop.eup %10536  ;;  %v4391_v57 = vmul.f32 0.6931472, %v10535_v50  ;;  %10556 = vlog2.f32 %v5115_v40  ;;  %v2874_v5 = vmul.f32 1.442695, %v2048_v54 }
 0x548   : > { %v10539_v60 = vpop.eup %10538  ;;  %v6645_v61 = vsub.f32 %v4389_v14, %v5925_v51  ;;  %v5927_v56 = vmul.f32 0.6931472, %v10537_v55  ;;  %10558 = vlog2.f32 %v7795_v44  ;;  %v2876_v10 = vmul.f32 1.442695, %v2049_v59 }
 0x549   : > { %v10541_v63 = vpop.eup %10540  ;;  %v4393_v0 = vmul.f32 0.6931472, %v10539_v60  ;;  %10560 = vlog2.f32 %v5116_v48 }
 0x54a   : > { %v10543_v2 = vpop.eup %10542  ;;  %7157 = vst [vmem:[%s12522_s20 + $0x978] sm:$0xff] %v6645_v61  ;;  %v6646_v3 = vsub.f32 %v4391_v57, %v5927_v56  ;;  %v5929_v4 = vmul.f32 0.6931472, %v10541_v63  ;;  %10562 = vlog2.f32 %v7796_v53 }
 0x54b   : > { %v10545_v8 = vpop.eup %10544  ;;  %v4395_v9 = vmul.f32 0.6931472, %v10543_v2  ;;  %10564 = vlog2.f32 %v5117_v58 }
 0x54c   : > { %v10547_v11 = vpop.eup %10546  ;;  %7158 = vst [vmem:[%s12522_s20 + $0x980] sm:$0xff] %v6646_v3  ;;  %v6647_v12 = vsub.f32 %v4393_v0, %v5929_v4  ;;  %v5931_v6 = vmul.f32 0.6931472, %v10545_v8  ;;  %10566 = vpow2.f32 %v2870_v62 }
 0x54d   : > { %v10549_v13 = vpop.eup %10548  ;;  %v4397_v15 = vmul.f32 0.6931472, %v10547_v11  ;;  %10568 = vpow2.f32 %v2872_v1 }
 0x54e   : > { %v10551_v17 = vpop.eup %10550  ;;  %7159 = vst [vmem:[%s12522_s20 + $0x988] sm:$0xff] %v6647_v12  ;;  %v6648_v18 = vsub.f32 %v4395_v9, %v5931_v6  ;;  %v5933_v19 = vmul.f32 0.6931472, %v10549_v13  ;;  %10570 = vpow2.f32 %v2874_v5 }
 0x54f   : > { %v10553_v21 = vpop.eup %10552  ;;  %v4399_v22 = vmul.f32 0.6931472, %v10551_v17  ;;  %10572 = vpow2.f32 %v2876_v10 }
 0x550   : > { %v10555_v23 = vpop.eup %10554  ;;  %7160 = vst [vmem:[%s12522_s20 + $0x990] sm:$0xff] %v6648_v18  ;;  %v6649_v52 = vsub.f32 %v4397_v15, %v5933_v19  ;;  %v5935_v24 = vmul.f32 0.6931472, %v10553_v21  ;;  %10574 = vlog2.f32 %v507_v16 }
 0x551   : > { %v10557_v26 = vpop.eup %10556  ;;  %v4401_v27 = vmul.f32 0.6931472, %v10555_v23  ;;  %10576 = vlog2.f32 %v508_v20 }
 0x552   : > { %v10559_v29 = vpop.eup %10558  ;;  %7161 = vst [vmem:[%s12522_s20 + $0x998] sm:$0xff] %v6649_v52  ;;  %v6650_v30 = vsub.f32 %v4399_v22, %v5935_v24  ;;  %v5937_v32 = vmul.f32 0.6931472, %v10557_v26  ;;  %10578 = vlog2.f32 %v509_v7 }
 0x553   : > { %v10561_v34 = vpop.eup %10560  ;;  %v4403_v35 = vmul.f32 0.6931472, %v10559_v29  ;;  %10580 = vlog2.f32 %v510_v25 }
 0x554   : > { %v10563_v31 = vpop.eup %10562  ;;  %7162 = vst [vmem:[%s12522_s20 + $0x9a0] sm:$0xff] %v6650_v30  ;;  %v6651_v37 = vsub.f32 %v4401_v27, %v5937_v32  ;;  %v5939_v38 = vmul.f32 0.6931472, %v10561_v34  ;;  %10582 = vlog2.f32 %v511_v28 }
 0x555   : > { %v10565_v40 = vpop.eup %10564  ;;  %v4405_v42 = vmul.f32 0.6931472, %v10563_v31  ;;  %10584 = vlog2.f32 %v512_v33 }
 0x556   : > { %v10567_v44 = vpop.eup %10566  ;;  %7163 = vst [vmem:[%s12522_s20 + $0x9a8] sm:$0xff] %v6651_v37  ;;  %v6652_v45 = vsub.f32 %v4403_v35, %v5939_v38  ;;  %v5941_v46 = vmul.f32 0.6931472, %v10565_v40  ;;  %10586 = vlog2.f32 %v513_v36 }
 0x557   : > { %v10569_v47 = vpop.eup %10568  ;;  %v7797_v14 = vadd.f32 -0.99, %v10567_v44  ;;  %v5118_v48 = vsub.f32 1.0, %v10567_v44  ;;  %10588 = vlog2.f32 %v514_v39 }
 0x558   : > { %v10571_v49 = vpop.eup %10570  ;;  %7164 = vst [vmem:[%s12522_s20 + $0x9b0] sm:$0xff] %v6652_v45  ;;  %v6653_v50 = vsub.f32 %v4405_v42, %v5941_v46  ;;  %v7798_v51 = vadd.f32 -0.99, %v10569_v47  ;;  %v5119_v53 = vsub.f32 1.0, %v10569_v47  ;;  %10590 = vlog2.f32 %v515_v43  ;;  %v516_v42 = vld [vmem:[%s12465_s8 + $0xa28] sm:$0xff]  ;;  %v517_v45 = vld [vmem:[%s12465_s8 + $0xa30] sm:$0xff] }
 0x559   : > { %v10573_v54 = vpop.eup %10572  ;;  %10592 = vlog2.f32 %v7797_v14  ;;  %v7799_v55 = vadd.f32 -0.99, %v10571_v49  ;;  %v5120_v58 = vsub.f32 1.0, %v10571_v49  ;;  %v518_v14 = vld [vmem:[%s12465_s8 + $0xa38] sm:$0xff] }
 0x55a   : > { %v10575_v57 = vpop.eup %10574  ;;  %7165 = vst [vmem:[%s12522_s20 + $0x9b8] sm:$0xff] %v6653_v50  ;;  %10594 = vlog2.f32 %v5118_v48  ;;  %v7800_v60 = vadd.f32 -0.99, %v10573_v54  ;;  %v5121_v62 = vsub.f32 1.0, %v10573_v54  ;;  %v519_v50 = vld [vmem:[%s12465_s8 + $0xa40] sm:$0xff] }
 0x55b   : > { %v10577_v59 = vpop.eup %10576  ;;  %10596 = vlog2.f32 %v7798_v51  ;;  %v1337_v61 = vmul.f32 0.6931472, %v10575_v57 }
 0x55c   : > { %v10579_v56 = vpop.eup %10578  ;;  %10598 = vlog2.f32 %v5119_v53  ;;  %v1339_v63 = vmul.f32 0.6931472, %v10577_v59 }
 0x55d   : > { %v10581_v0 = vpop.eup %10580  ;;  %10600 = vlog2.f32 %v7799_v55  ;;  %v2050_v1 = vmul.f32 %v13390_v41, %v1337_v61  ;;  %v1341_v2 = vmul.f32 0.6931472, %v10579_v56 }
 0x55e   : > { %v10583_v3 = vpop.eup %10582  ;;  %10602 = vlog2.f32 %v5120_v58  ;;  %v2051_v4 = vmul.f32 %v13390_v41, %v1339_v63  ;;  %v1343_v5 = vmul.f32 0.6931472, %v10581_v0 }
 0x55f   : > { %v10585_v8 = vpop.eup %10584  ;;  %10604 = vlog2.f32 %v7800_v60  ;;  %v2878_v9 = vmul.f32 1.442695, %v2050_v1  ;;  %v2052_v10 = vmul.f32 %v13390_v41, %v1341_v2  ;;  %v1345_v11 = vmul.f32 0.6931472, %v10583_v3 }
 0x560   : > { %v10587_v12 = vpop.eup %10586  ;;  %10606 = vlog2.f32 %v5121_v62  ;;  %v2880_v6 = vmul.f32 1.442695, %v2051_v4  ;;  %v2053_v13 = vmul.f32 %v13390_v41, %v1343_v5  ;;  %v1347_v15 = vmul.f32 0.6931472, %v10585_v8 }
 0x561   : > { %v10589_v16 = vpop.eup %10588  ;;  %10608 = vpow2.f32 %v2878_v9  ;;  %v2882_v17 = vmul.f32 1.442695, %v2052_v10  ;;  %v2054_v18 = vmul.f32 %v13390_v41, %v1345_v11  ;;  %v1349_v19 = vmul.f32 0.6931472, %v10587_v12 }
 0x562   : > { %v10591_v20 = vpop.eup %10590  ;;  %10610 = vpow2.f32 %v2880_v6  ;;  %v2884_v21 = vmul.f32 1.442695, %v2053_v13  ;;  %v2055_v22 = vmul.f32 %v13390_v41, %v1347_v15  ;;  %v1351_v7 = vmul.f32 0.6931472, %v10589_v16 }
 0x563   : > { %v10593_v23 = vpop.eup %10592  ;;  %10612 = vpow2.f32 %v2882_v17  ;;  %v2886_v52 = vmul.f32 1.442695, %v2054_v18  ;;  %v2056_v24 = vmul.f32 %v13390_v41, %v1349_v19  ;;  %v1353_v25 = vmul.f32 0.6931472, %v10591_v20 }
 0x564   : > { %v10595_v26 = vpop.eup %10594  ;;  %v4407_v27 = vmul.f32 0.6931472, %v10593_v23  ;;  %10614 = vpow2.f32 %v2884_v21  ;;  %v2888_v28 = vmul.f32 1.442695, %v2055_v22  ;;  %v2057_v29 = vmul.f32 %v13390_v41, %v1351_v7 }
 0x565   : > { %v10597_v30 = vpop.eup %10596  ;;  %v5943_v32 = vmul.f32 0.6931472, %v10595_v26  ;;  %10616 = vpow2.f32 %v2886_v52  ;;  %v2890_v33 = vmul.f32 1.442695, %v2056_v24  ;;  %v2058_v34 = vmul.f32 %v13390_v41, %v1353_v25  ;;  %v13487_v52 = vld [vmem:[#allocation5] ss:$0 sm:$0xff] }
 0x566   : > { %v10599_v35 = vpop.eup %10598  ;;  %v4409_v36 = vmul.f32 0.6931472, %v10597_v30  ;;  %10618 = vpow2.f32 %v2888_v28  ;;  %v2892_v31 = vmul.f32 1.442695, %v2057_v29 }
 0x567   : > { %v10601_v37 = vpop.eup %10600  ;;  %v6654_v38 = vsub.f32 %v4407_v27, %v5943_v32  ;;  %v5945_v39 = vmul.f32 0.6931472, %v10599_v35  ;;  %10620 = vpow2.f32 %v2890_v33  ;;  %v2894_v40 = vmul.f32 1.442695, %v2058_v34 }
 0x568   : > { %v10603_v43 = vpop.eup %10602  ;;  %v4411_v44 = vmul.f32 0.6931472, %v10601_v37  ;;  %10622 = vpow2.f32 %v2892_v31 }
 0x569   : > { %v10605_v46 = vpop.eup %10604  ;;  %7166 = vst [vmem:[%s12522_s20 + $0x9c0] sm:$0xff] %v6654_v38  ;;  %v6655_v41 = vsub.f32 %v4409_v36, %v5945_v39  ;;  %v5947_v47 = vmul.f32 0.6931472, %v10603_v43  ;;  %10624 = vpow2.f32 %v2894_v40 }
 0x56a   : > { %v10607_v48 = vpop.eup %10606  ;;  %v4413_v49 = vmul.f32 0.6931472, %v10605_v46  ;;  %10626 = vlog2.f32 %v516_v42 }
 0x56b   : > { %v10609_v51 = vpop.eup %10608  ;;  %7167 = vst [vmem:[%s12522_s20 + $0x9c8] sm:$0xff] %v6655_v41  ;;  %v6656_v53 = vsub.f32 %v4411_v44, %v5947_v47  ;;  %v5949_v54 = vmul.f32 0.6931472, %v10607_v48  ;;  %10628 = vlog2.f32 %v517_v45 }
 0x56c   : > { %v10611_v55 = vpop.eup %10610  ;;  %v7801_v57 = vadd.f32 -0.99, %v10609_v51  ;;  %v5122_v58 = vsub.f32 1.0, %v10609_v51  ;;  %10630 = vlog2.f32 %v518_v14 }
 0x56d   : > { %v10613_v59 = vpop.eup %10612  ;;  %7168 = vst [vmem:[%s12522_s20 + $0x9d0] sm:$0xff] %v6656_v53  ;;  %v6657_v60 = vsub.f32 %v4413_v49, %v5949_v54  ;;  %v7802_v61 = vadd.f32 -0.99, %v10611_v55  ;;  %v5123_v56 = vsub.f32 1.0, %v10611_v55  ;;  %10632 = vlog2.f32 %v519_v50 }
 0x56e   : > { %v10615_v62 = vpop.eup %10614  ;;  %10634 = vlog2.f32 %v7801_v57  ;;  %v7803_v63 = vadd.f32 -0.99, %v10613_v59  ;;  %v5124_v1 = vsub.f32 1.0, %v10613_v59 }
 0x56f   : > { %v10617_v0 = vpop.eup %10616  ;;  %7169 = vst [vmem:[%s12522_s20 + $0x9d8] sm:$0xff] %v6657_v60  ;;  %10636 = vlog2.f32 %v5122_v58  ;;  %v7804_v3 = vadd.f32 -0.99, %v10615_v62  ;;  %v5125_v5 = vsub.f32 1.0, %v10615_v62  ;;  %v520_v58 = vld [vmem:[%s12465_s8 + $0xa48] sm:$0xff] }
 0x570   : > { %v10619_v2 = vpop.eup %10618  ;;  %10638 = vlog2.f32 %v7802_v61  ;;  %v7805_v9 = vadd.f32 -0.99, %v10617_v0  ;;  %v5126_v11 = vsub.f32 1.0, %v10617_v0  ;;  %v522_v0 = vld [vmem:[%s12465_s8 + $0xa58] sm:$0xff] }
 0x571   : > { %v10621_v4 = vpop.eup %10620  ;;  %10640 = vlog2.f32 %v5123_v56  ;;  %v7806_v6 = vadd.f32 -0.99, %v10619_v2  ;;  %v5127_v15 = vsub.f32 1.0, %v10619_v2  ;;  %v521_v56 = vld [vmem:[%s12465_s8 + $0xa50] sm:$0xff] }
 0x572   : > { %v10623_v8 = vpop.eup %10622  ;;  %10642 = vlog2.f32 %v7803_v63  ;;  %v7807_v18 = vadd.f32 -0.99, %v10621_v4  ;;  %v5128_v21 = vsub.f32 1.0, %v10621_v4  ;;  %v523_v4 = vld [vmem:[%s12465_s8 + $0xa60] sm:$0xff] }
 0x573   : > { %v10625_v10 = vpop.eup %10624  ;;  %10644 = vlog2.f32 %v5124_v1  ;;  %v7808_v23 = vadd.f32 -0.99, %v10623_v8  ;;  %v5129_v28 = vsub.f32 1.0, %v10623_v8 }
 0x574   : > { %v10627_v12 = vpop.eup %10626  ;;  %10646 = vlog2.f32 %v7804_v3  ;;  %v7809_v33 = vadd.f32 -0.99, %v10625_v10  ;;  %v5130_v31 = vsub.f32 1.0, %v10625_v10 }
 0x575   : > { %v10629_v13 = vpop.eup %10628  ;;  %10648 = vlog2.f32 %v5125_v5  ;;  %v1355_v16 = vmul.f32 0.6931472, %v10627_v12 }
 0x576   : > { %v10631_v17 = vpop.eup %10630  ;;  %10650 = vlog2.f32 %v7805_v9  ;;  %v1357_v19 = vmul.f32 0.6931472, %v10629_v13  ;;  %v524_v9 = vld [vmem:[%s12465_s8 + $0xa68] sm:$0xff] }
 0x577   : > { %v10633_v20 = vpop.eup %10632  ;;  %10652 = vlog2.f32 %v5126_v11  ;;  %v1359_v22 = vmul.f32 0.6931472, %v10631_v17  ;;  %v2059_v24 = vmul.f32 %v13487_v52, %v1355_v16  ;;  %v526_v16 = vld [vmem:[%s12465_s8 + $0xa78] sm:$0xff] }
 0x578   : > { %v10635_v7 = vpop.eup %10634  ;;  %10654 = vlog2.f32 %v7806_v6  ;;  %v1361_v25 = vmul.f32 0.6931472, %v10633_v20  ;;  %v2060_v29 = vmul.f32 %v13487_v52, %v1357_v19  ;;  %v525_v6 = vld [vmem:[%s12465_s8 + $0xa70] sm:$0xff]  ;;  %v527_v20 = vld [vmem:[%s12465_s8 + $0xa80] sm:$0xff] }
 0x579   : > { %v10637_v26 = vpop.eup %10636  ;;  %v4415_v27 = vmul.f32 0.6931472, %v10635_v7  ;;  %10656 = vlog2.f32 %v5127_v15  ;;  %v2061_v34 = vmul.f32 %v13487_v52, %v1359_v22  ;;  %v2896_v42 = vmul.f32 1.442695, %v2059_v24  ;;  %v528_v7 = vld [vmem:[%s12465_s8 + $0xa88] sm:$0xff] }
 0x57a   : > { %v10639_v30 = vpop.eup %10638  ;;  %v5951_v32 = vmul.f32 0.6931472, %v10637_v26  ;;  %10658 = vlog2.f32 %v7807_v18  ;;  %v2062_v37 = vmul.f32 %v13487_v52, %v1361_v25  ;;  %v2898_v45 = vmul.f32 1.442695, %v2060_v29 }
 0x57b   : > { %v10641_v35 = vpop.eup %10640  ;;  %v4417_v36 = vmul.f32 0.6931472, %v10639_v30  ;;  %10660 = vlog2.f32 %v5128_v21  ;;  %v2900_v14 = vmul.f32 1.442695, %v2061_v34 }
 0x57c   : > { %v10643_v38 = vpop.eup %10642  ;;  %v6658_v39 = vsub.f32 %v4415_v27, %v5951_v32  ;;  %v5953_v40 = vmul.f32 0.6931472, %v10641_v35  ;;  %10662 = vlog2.f32 %v7808_v23  ;;  %v2902_v50 = vmul.f32 1.442695, %v2062_v37 }
 0x57d   : > { %v10645_v43 = vpop.eup %10644  ;;  %v4419_v44 = vmul.f32 0.6931472, %v10643_v38  ;;  %10664 = vlog2.f32 %v5129_v28 }
 0x57e   : > { %v10647_v46 = vpop.eup %10646  ;;  %7170 = vst [vmem:[%s12522_s20 + $0x9e0] sm:$0xff] %v6658_v39  ;;  %v6659_v41 = vsub.f32 %v4417_v36, %v5953_v40  ;;  %v5955_v47 = vmul.f32 0.6931472, %v10645_v43  ;;  %10666 = vlog2.f32 %v7809_v33 }
 0x57f   : > { %v10649_v48 = vpop.eup %10648  ;;  %v4421_v49 = vmul.f32 0.6931472, %v10647_v46  ;;  %10668 = vlog2.f32 %v5130_v31 }
 0x580   : > { %v10651_v51 = vpop.eup %10650  ;;  %7171 = vst [vmem:[%s12522_s20 + $0x9e8] sm:$0xff] %v6659_v41  ;;  %v6660_v53 = vsub.f32 %v4419_v44, %v5955_v47  ;;  %v5957_v54 = vmul.f32 0.6931472, %v10649_v48  ;;  %10670 = vpow2.f32 %v2896_v42 }
 0x581   : > { %v10653_v55 = vpop.eup %10652  ;;  %v4423_v57 = vmul.f32 0.6931472, %v10651_v51  ;;  %10672 = vpow2.f32 %v2898_v45 }
 0x582   : > { %v10655_v59 = vpop.eup %10654  ;;  %7172 = vst [vmem:[%s12522_s20 + $0x9f0] sm:$0xff] %v6660_v53  ;;  %v6661_v60 = vsub.f32 %v4421_v49, %v5957_v54  ;;  %v5959_v61 = vmul.f32 0.6931472, %v10653_v55  ;;  %10674 = vpow2.f32 %v2900_v14 }
 0x583   : > { %v10657_v62 = vpop.eup %10656  ;;  %v4425_v63 = vmul.f32 0.6931472, %v10655_v59  ;;  %10676 = vpow2.f32 %v2902_v50 }
 0x584   : > { %v10659_v1 = vpop.eup %10658  ;;  %7173 = vst [vmem:[%s12522_s20 + $0x9f8] sm:$0xff] %v6661_v60  ;;  %v6662_v2 = vsub.f32 %v4423_v57, %v5959_v61  ;;  %v5961_v3 = vmul.f32 0.6931472, %v10657_v62  ;;  %10678 = vlog2.f32 %v520_v58 }
 0x585   : > { %v10661_v5 = vpop.eup %10660  ;;  %v4427_v8 = vmul.f32 0.6931472, %v10659_v1  ;;  %10680 = vlog2.f32 %v521_v56 }
 0x586   : > { %v10663_v10 = vpop.eup %10662  ;;  %7174 = vst [vmem:[%s12522_s20 + $0xa00] sm:$0xff] %v6662_v2  ;;  %v6663_v11 = vsub.f32 %v4425_v63, %v5961_v3  ;;  %v5963_v12 = vmul.f32 0.6931472, %v10661_v5  ;;  %10682 = vlog2.f32 %v522_v0 }
 0x587   : > { %v10665_v13 = vpop.eup %10664  ;;  %v4429_v15 = vmul.f32 0.6931472, %v10663_v10  ;;  %10684 = vlog2.f32 %v523_v4 }
 0x588   : > { %v10667_v17 = vpop.eup %10666  ;;  %7175 = vst [vmem:[%s12522_s20 + $0xa08] sm:$0xff] %v6663_v11  ;;  %v6664_v18 = vsub.f32 %v4427_v8, %v5963_v12  ;;  %v5965_v19 = vmul.f32 0.6931472, %v10665_v13  ;;  %10686 = vlog2.f32 %v524_v9 }
 0x589   : > { %v10669_v21 = vpop.eup %10668  ;;  %v4431_v22 = vmul.f32 0.6931472, %v10667_v17  ;;  %10688 = vlog2.f32 %v525_v6 }
 0x58a   : > { %v10671_v23 = vpop.eup %10670  ;;  %7176 = vst [vmem:[%s12522_s20 + $0xa10] sm:$0xff] %v6664_v18  ;;  %v6665_v24 = vsub.f32 %v4429_v15, %v5965_v19  ;;  %v5967_v25 = vmul.f32 0.6931472, %v10669_v21  ;;  %10690 = vlog2.f32 %v526_v16 }
 0x58b   : > { %v10673_v26 = vpop.eup %10672  ;;  %v7810_v27 = vadd.f32 -0.99, %v10671_v23  ;;  %v5131_v28 = vsub.f32 1.0, %v10671_v23  ;;  %10692 = vlog2.f32 %v527_v20 }
 0x58c   : > { %v10675_v29 = vpop.eup %10674  ;;  %7177 = vst [vmem:[%s12522_s20 + $0xa18] sm:$0xff] %v6665_v24  ;;  %v6666_v30 = vsub.f32 %v4431_v22, %v5967_v25  ;;  %v7811_v32 = vadd.f32 -0.99, %v10673_v26  ;;  %v5132_v33 = vsub.f32 1.0, %v10673_v26  ;;  %10694 = vlog2.f32 %v528_v7  ;;  %v529_v22 = vld [vmem:[%s12465_s8 + $0xa90] sm:$0xff]  ;;  %v530_v24 = vld [vmem:[%s12465_s8 + $0xa98] sm:$0xff] }
 0x58d   : > { %v10677_v34 = vpop.eup %10676  ;;  %10696 = vlog2.f32 %v7810_v27  ;;  %v7812_v35 = vadd.f32 -0.99, %v10675_v29  ;;  %v5133_v31 = vsub.f32 1.0, %v10675_v29 }
 0x58e   : > { %v10679_v36 = vpop.eup %10678  ;;  %7178 = vst [vmem:[%s12522_s20 + $0xa20] sm:$0xff] %v6666_v30  ;;  %10698 = vlog2.f32 %v5131_v28  ;;  %v7813_v38 = vadd.f32 -0.99, %v10677_v34  ;;  %v5134_v42 = vsub.f32 1.0, %v10677_v34  ;;  %v531_v28 = vld [vmem:[%s12465_s8 + $0xaa0] sm:$0xff] }
 0x58f   : > { %v10681_v37 = vpop.eup %10680  ;;  %10700 = vlog2.f32 %v7811_v32  ;;  %v1363_v39 = vmul.f32 0.6931472, %v10679_v36  ;;  %v532_v32 = vld [vmem:[%s12465_s8 + $0xaa8] sm:$0xff] }
 0x590   : > { %v10683_v40 = vpop.eup %10682  ;;  %10702 = vlog2.f32 %v5132_v33  ;;  %v1365_v43 = vmul.f32 0.6931472, %v10681_v37 }
 0x591   : > { %v10685_v44 = vpop.eup %10684  ;;  %10704 = vlog2.f32 %v7812_v35  ;;  %v2063_v45 = vmul.f32 %v13487_v52, %v1363_v39  ;;  %v1367_v46 = vmul.f32 0.6931472, %v10683_v40 }
 0x592   : > { %v10687_v41 = vpop.eup %10686  ;;  %10706 = vlog2.f32 %v5133_v31  ;;  %v2064_v47 = vmul.f32 %v13487_v52, %v1365_v43  ;;  %v1369_v14 = vmul.f32 0.6931472, %v10685_v44 }
 0x593   : > { %v10689_v48 = vpop.eup %10688  ;;  %10708 = vlog2.f32 %v7813_v38  ;;  %v2904_v49 = vmul.f32 1.442695, %v2063_v45  ;;  %v2065_v50 = vmul.f32 %v13487_v52, %v1367_v46  ;;  %v1371_v51 = vmul.f32 0.6931472, %v10687_v41 }
 0x594   : > { %v10691_v53 = vpop.eup %10690  ;;  %10710 = vlog2.f32 %v5134_v42  ;;  %v2906_v54 = vmul.f32 1.442695, %v2064_v47  ;;  %v2066_v55 = vmul.f32 %v13487_v52, %v1369_v14  ;;  %v1373_v57 = vmul.f32 0.6931472, %v10689_v48 }
 0x595   : > { %v10693_v58 = vpop.eup %10692  ;;  %10712 = vpow2.f32 %v2904_v49  ;;  %v2908_v59 = vmul.f32 1.442695, %v2065_v50  ;;  %v2067_v60 = vmul.f32 %v13487_v52, %v1371_v51  ;;  %v1375_v61 = vmul.f32 0.6931472, %v10691_v53 }
 0x596   : > { %v10695_v56 = vpop.eup %10694  ;;  %10714 = vpow2.f32 %v2906_v54  ;;  %v2910_v62 = vmul.f32 1.442695, %v2066_v55  ;;  %v2068_v63 = vmul.f32 %v13487_v52, %v1373_v57  ;;  %v1377_v0 = vmul.f32 0.6931472, %v10693_v58 }
 0x597   : > { %v10697_v1 = vpop.eup %10696  ;;  %10716 = vpow2.f32 %v2908_v59  ;;  %v2912_v2 = vmul.f32 1.442695, %v2067_v60  ;;  %v2069_v3 = vmul.f32 %v13487_v52, %v1375_v61  ;;  %v1379_v4 = vmul.f32 0.6931472, %v10695_v56 }
 0x598   : > { %v10699_v5 = vpop.eup %10698  ;;  %v4433_v8 = vmul.f32 0.6931472, %v10697_v1  ;;  %10718 = vpow2.f32 %v2910_v62  ;;  %v2914_v9 = vmul.f32 1.442695, %v2068_v63  ;;  %v2070_v10 = vmul.f32 %v13487_v52, %v1377_v0 }
 0x599   : > { %v10701_v11 = vpop.eup %10700  ;;  %v5969_v12 = vmul.f32 0.6931472, %v10699_v5  ;;  %10720 = vpow2.f32 %v2912_v2  ;;  %v2916_v6 = vmul.f32 1.442695, %v2069_v3  ;;  %v2071_v13 = vmul.f32 %v13487_v52, %v1379_v4 }
 0x59a   : > { %v10703_v15 = vpop.eup %10702  ;;  %v4435_v16 = vmul.f32 0.6931472, %v10701_v11  ;;  %10722 = vpow2.f32 %v2914_v9  ;;  %v2918_v17 = vmul.f32 1.442695, %v2070_v10 }
 0x59b   : > { %v10705_v18 = vpop.eup %10704  ;;  %v6667_v19 = vsub.f32 %v4433_v8, %v5969_v12  ;;  %v5971_v20 = vmul.f32 0.6931472, %v10703_v15  ;;  %10724 = vpow2.f32 %v2916_v6  ;;  %v2920_v21 = vmul.f32 1.442695, %v2071_v13 }
 0x59c   : > { %v10707_v7 = vpop.eup %10706  ;;  %v4437_v23 = vmul.f32 0.6931472, %v10705_v18  ;;  %10726 = vpow2.f32 %v2918_v17 }
 0x59d   : > { %v10709_v25 = vpop.eup %10708  ;;  %7179 = vst [vmem:[%s12522_s20 + $0xa28] sm:$0xff] %v6667_v19  ;;  %v6668_v26 = vsub.f32 %v4435_v16, %v5971_v20  ;;  %v5973_v27 = vmul.f32 0.6931472, %v10707_v7  ;;  %10728 = vpow2.f32 %v2920_v21 }
 0x59e   : > { %v10711_v29 = vpop.eup %10710  ;;  %v4439_v30 = vmul.f32 0.6931472, %v10709_v25  ;;  %10730 = vlog2.f32 %v529_v22 }
 0x59f   : > { %v10713_v33 = vpop.eup %10712  ;;  %7180 = vst [vmem:[%s12522_s20 + $0xa30] sm:$0xff] %v6668_v26  ;;  %v6669_v34 = vsub.f32 %v4437_v23, %v5973_v27  ;;  %v5975_v35 = vmul.f32 0.6931472, %v10711_v29  ;;  %10732 = vlog2.f32 %v530_v24 }
 0x5a0   : > { %v10715_v36 = vpop.eup %10714  ;;  %v7814_v31 = vadd.f32 -0.99, %v10713_v33  ;;  %v5135_v37 = vsub.f32 1.0, %v10713_v33  ;;  %10734 = vlog2.f32 %v531_v28 }
 0x5a1   : > { %v10717_v38 = vpop.eup %10716  ;;  %7181 = vst [vmem:[%s12522_s20 + $0xa38] sm:$0xff] %v6669_v34  ;;  %v6670_v39 = vsub.f32 %v4439_v30, %v5975_v35  ;;  %v7815_v40 = vadd.f32 -0.99, %v10715_v36  ;;  %v5136_v42 = vsub.f32 1.0, %v10715_v36  ;;  %10736 = vlog2.f32 %v532_v32 }
 0x5a2   : > { %v10719_v43 = vpop.eup %10718  ;;  %10738 = vlog2.f32 %v7814_v31  ;;  %v7816_v44 = vadd.f32 -0.99, %v10717_v38  ;;  %v5137_v46 = vsub.f32 1.0, %v10717_v38 }
 0x5a3   : > { %v10721_v45 = vpop.eup %10720  ;;  %7182 = vst [vmem:[%s12522_s20 + $0xa40] sm:$0xff] %v6670_v39  ;;  %10740 = vlog2.f32 %v5135_v37  ;;  %v7817_v47 = vadd.f32 -0.99, %v10719_v43  ;;  %v5138_v48 = vsub.f32 1.0, %v10719_v43  ;;  %v533_v37 = vld [vmem:[%s12465_s8 + $0xab0] sm:$0xff] }
 0x5a4   : > { %v10723_v41 = vpop.eup %10722  ;;  %10742 = vlog2.f32 %v7815_v40  ;;  %v7818_v50 = vadd.f32 -0.99, %v10721_v45  ;;  %v5139_v53 = vsub.f32 1.0, %v10721_v45  ;;  %v535_v45 = vld [vmem:[%s12465_s8 + $0xac0] sm:$0xff] }
 0x5a5   : > { %v10725_v14 = vpop.eup %10724  ;;  %10744 = vlog2.f32 %v5136_v42  ;;  %v7819_v55 = vadd.f32 -0.99, %v10723_v41  ;;  %v5140_v58 = vsub.f32 1.0, %v10723_v41  ;;  %v534_v42 = vld [vmem:[%s12465_s8 + $0xab8] sm:$0xff] }
 0x5a6   : > { %v10727_v49 = vpop.eup %10726  ;;  %10746 = vlog2.f32 %v7816_v44  ;;  %v7820_v61 = vadd.f32 -0.99, %v10725_v14  ;;  %v5141_v63 = vsub.f32 1.0, %v10725_v14  ;;  %v536_v14 = vld [vmem:[%s12465_s8 + $0xac8] sm:$0xff] }
 0x5a7   : > { %v10729_v51 = vpop.eup %10728  ;;  %10748 = vlog2.f32 %v5137_v46  ;;  %v7821_v2 = vadd.f32 -0.99, %v10727_v49  ;;  %v5142_v9 = vsub.f32 1.0, %v10727_v49 }
 0x5a8   : > { %v10731_v54 = vpop.eup %10730  ;;  %10750 = vlog2.f32 %v7817_v47  ;;  %v7822_v6 = vadd.f32 -0.99, %v10729_v51  ;;  %v5143_v17 = vsub.f32 1.0, %v10729_v51 }
 0x5a9   : > { %v10733_v57 = vpop.eup %10732  ;;  %10752 = vlog2.f32 %v5138_v48  ;;  %v1381_v59 = vmul.f32 0.6931472, %v10731_v54 }
 0x5aa   : > { %v10735_v60 = vpop.eup %10734  ;;  %10754 = vlog2.f32 %v7818_v50  ;;  %v1383_v56 = vmul.f32 0.6931472, %v10733_v57  ;;  %v537_v50 = vld [vmem:[%s12465_s8 + $0xad0] sm:$0xff] }
 0x5ab   : > { %v10737_v62 = vpop.eup %10736  ;;  %10756 = vlog2.f32 %v5139_v53  ;;  %v1385_v0 = vmul.f32 0.6931472, %v10735_v60  ;;  %v2072_v3 = vmul.f32 %v13487_v52, %v1381_v59  ;;  %v539_v59 = vld [vmem:[%s12465_s8 + $0xae0] sm:$0xff] }
 0x5ac   : > { %v10739_v1 = vpop.eup %10738  ;;  %10758 = vlog2.f32 %v7819_v55  ;;  %v1387_v4 = vmul.f32 0.6931472, %v10737_v62  ;;  %v2073_v10 = vmul.f32 %v13487_v52, %v1383_v56  ;;  %v538_v55 = vld [vmem:[%s12465_s8 + $0xad8] sm:$0xff]  ;;  %v540_v62 = vld [vmem:[%s12465_s8 + $0xae8] sm:$0xff] }
 0x5ad   : > { %v10741_v5 = vpop.eup %10740  ;;  %v4441_v8 = vmul.f32 0.6931472, %v10739_v1  ;;  %10760 = vlog2.f32 %v5140_v58  ;;  %v2074_v13 = vmul.f32 %v13487_v52, %v1385_v0  ;;  %v2922_v22 = vmul.f32 1.442695, %v2072_v3  ;;  %v541_v1 = vld [vmem:[%s12465_s8 + $0xaf0] sm:$0xff] }
 0x5ae   : > { %v10743_v11 = vpop.eup %10742  ;;  %v5977_v12 = vmul.f32 0.6931472, %v10741_v5  ;;  %10762 = vlog2.f32 %v7820_v61  ;;  %v2075_v18 = vmul.f32 %v13487_v52, %v1387_v4  ;;  %v2924_v24 = vmul.f32 1.442695, %v2073_v10 }
 0x5af   : > { %v10745_v15 = vpop.eup %10744  ;;  %v4443_v16 = vmul.f32 0.6931472, %v10743_v11  ;;  %10764 = vlog2.f32 %v5141_v63  ;;  %v2926_v28 = vmul.f32 1.442695, %v2074_v13 }
 0x5b0   : > { %v10747_v19 = vpop.eup %10746  ;;  %v6671_v20 = vsub.f32 %v4441_v8, %v5977_v12  ;;  %v5979_v21 = vmul.f32 0.6931472, %v10745_v15  ;;  %10766 = vlog2.f32 %v7821_v2  ;;  %v2928_v32 = vmul.f32 1.442695, %v2075_v18 }
 0x5b1   : > { %v10749_v7 = vpop.eup %10748  ;;  %v4445_v23 = vmul.f32 0.6931472, %v10747_v19  ;;  %10768 = vlog2.f32 %v5142_v9 }
 0x5b2   : > { %v10751_v25 = vpop.eup %10750  ;;  %7183 = vst [vmem:[%s12522_s20 + $0xa48] sm:$0xff] %v6671_v20  ;;  %v6672_v26 = vsub.f32 %v4443_v16, %v5979_v21  ;;  %v5981_v27 = vmul.f32 0.6931472, %v10749_v7  ;;  %10770 = vlog2.f32 %v7822_v6 }
 0x5b3   : > { %v10753_v29 = vpop.eup %10752  ;;  %v4447_v30 = vmul.f32 0.6931472, %v10751_v25  ;;  %10772 = vlog2.f32 %v5143_v17 }
 0x5b4   : > { %v10755_v33 = vpop.eup %10754  ;;  %7184 = vst [vmem:[%s12522_s20 + $0xa50] sm:$0xff] %v6672_v26  ;;  %v6673_v34 = vsub.f32 %v4445_v23, %v5981_v27  ;;  %v5983_v35 = vmul.f32 0.6931472, %v10753_v29  ;;  %10774 = vpow2.f32 %v2922_v22 }
 0x5b5   : > { %v10757_v36 = vpop.eup %10756  ;;  %v4449_v31 = vmul.f32 0.6931472, %v10755_v33  ;;  %10776 = vpow2.f32 %v2924_v24 }
 0x5b6   : > { %v10759_v38 = vpop.eup %10758  ;;  %7185 = vst [vmem:[%s12522_s20 + $0xa58] sm:$0xff] %v6673_v34  ;;  %v6674_v39 = vsub.f32 %v4447_v30, %v5983_v35  ;;  %v5985_v40 = vmul.f32 0.6931472, %v10757_v36  ;;  %10778 = vpow2.f32 %v2926_v28 }
 0x5b7   : > { %v10761_v43 = vpop.eup %10760  ;;  %v4451_v44 = vmul.f32 0.6931472, %v10759_v38  ;;  %10780 = vpow2.f32 %v2928_v32 }
 0x5b8   : > { %v10763_v46 = vpop.eup %10762  ;;  %7186 = vst [vmem:[%s12522_s20 + $0xa60] sm:$0xff] %v6674_v39  ;;  %v6675_v41 = vsub.f32 %v4449_v31, %v5985_v40  ;;  %v5987_v47 = vmul.f32 0.6931472, %v10761_v43  ;;  %10782 = vlog2.f32 %v533_v37 }
 0x5b9   : > { %v10765_v48 = vpop.eup %10764  ;;  %v4453_v49 = vmul.f32 0.6931472, %v10763_v46  ;;  %10784 = vlog2.f32 %v534_v42 }
 0x5ba   : > { %v10767_v51 = vpop.eup %10766  ;;  %7187 = vst [vmem:[%s12522_s20 + $0xa68] sm:$0xff] %v6675_v41  ;;  %v6676_v53 = vsub.f32 %v4451_v44, %v5987_v47  ;;  %v5989_v54 = vmul.f32 0.6931472, %v10765_v48  ;;  %10786 = vlog2.f32 %v535_v45 }
 0x5bb   : > { %v10769_v57 = vpop.eup %10768  ;;  %v4455_v58 = vmul.f32 0.6931472, %v10767_v51  ;;  %10788 = vlog2.f32 %v536_v14 }
 0x5bc   : > { %v10771_v60 = vpop.eup %10770  ;;  %7188 = vst [vmem:[%s12522_s20 + $0xa70] sm:$0xff] %v6676_v53  ;;  %v6677_v61 = vsub.f32 %v4453_v49, %v5989_v54  ;;  %v5991_v56 = vmul.f32 0.6931472, %v10769_v57  ;;  %10790 = vlog2.f32 %v537_v50 }
 0x5bd   : > { %v10773_v63 = vpop.eup %10772  ;;  %v4457_v0 = vmul.f32 0.6931472, %v10771_v60  ;;  %10792 = vlog2.f32 %v538_v55 }
 0x5be   : > { %v10775_v2 = vpop.eup %10774  ;;  %7189 = vst [vmem:[%s12522_s20 + $0xa78] sm:$0xff] %v6677_v61  ;;  %v6678_v3 = vsub.f32 %v4455_v58, %v5991_v56  ;;  %v5993_v4 = vmul.f32 0.6931472, %v10773_v63  ;;  %10794 = vlog2.f32 %v539_v59 }
 0x5bf   : > { %v10777_v5 = vpop.eup %10776  ;;  %v7823_v8 = vadd.f32 -0.99, %v10775_v2  ;;  %v5144_v9 = vsub.f32 1.0, %v10775_v2  ;;  %10796 = vlog2.f32 %v540_v62 }
 0x5c0   : > { %v10779_v10 = vpop.eup %10778  ;;  %7190 = vst [vmem:[%s12522_s20 + $0xa80] sm:$0xff] %v6678_v3  ;;  %v6679_v11 = vsub.f32 %v4457_v0, %v5993_v4  ;;  %v7824_v12 = vadd.f32 -0.99, %v10777_v5  ;;  %v5145_v6 = vsub.f32 1.0, %v10777_v5  ;;  %10798 = vlog2.f32 %v541_v1  ;;  %v542_v0 = vld [vmem:[%s12465_s8 + $0xaf8] sm:$0xff]  ;;  %v543_v3 = vld [vmem:[%s12465_s8 + $0xb00] sm:$0xff] }
 0x5c1   : > { %v10781_v13 = vpop.eup %10780  ;;  %10800 = vlog2.f32 %v7823_v8  ;;  %v7825_v15 = vadd.f32 -0.99, %v10779_v10  ;;  %v5146_v17 = vsub.f32 1.0, %v10779_v10 }
 0x5c2   : > { %v10783_v16 = vpop.eup %10782  ;;  %7191 = vst [vmem:[%s12522_s20 + $0xa88] sm:$0xff] %v6679_v11  ;;  %10802 = vlog2.f32 %v5144_v9  ;;  %v7826_v19 = vadd.f32 -0.99, %v10781_v13  ;;  %v5147_v22 = vsub.f32 1.0, %v10781_v13  ;;  %v544_v9 = vld [vmem:[%s12465_s8 + $0xb08] sm:$0xff] }
 0x5c3   : > { %v10785_v18 = vpop.eup %10784  ;;  %10804 = vlog2.f32 %v7824_v12  ;;  %v1389_v20 = vmul.f32 0.6931472, %v10783_v16  ;;  %v545_v12 = vld [vmem:[%s12465_s8 + $0xb10] sm:$0xff] }
 0x5c4   : > { %v10787_v21 = vpop.eup %10786  ;;  %10806 = vlog2.f32 %v5145_v6  ;;  %v1391_v7 = vmul.f32 0.6931472, %v10785_v18 }
 0x5c5   : > { %v10789_v23 = vpop.eup %10788  ;;  %10808 = vlog2.f32 %v7825_v15  ;;  %v2076_v24 = vmul.f32 %v13487_v52, %v1389_v20  ;;  %v1393_v25 = vmul.f32 0.6931472, %v10787_v21 }
 0x5c6   : > { %v10791_v26 = vpop.eup %10790  ;;  %10810 = vlog2.f32 %v5146_v17  ;;  %v2077_v27 = vmul.f32 %v13487_v52, %v1391_v7  ;;  %v1395_v28 = vmul.f32 0.6931472, %v10789_v23 }
 0x5c7   : > { %v10793_v29 = vpop.eup %10792  ;;  %10812 = vlog2.f32 %v7826_v19  ;;  %v2930_v30 = vmul.f32 1.442695, %v2076_v24  ;;  %v2078_v32 = vmul.f32 %v13487_v52, %v1393_v25  ;;  %v1397_v33 = vmul.f32 0.6931472, %v10791_v26 }
 0x5c8   : > { %v10795_v34 = vpop.eup %10794  ;;  %10814 = vlog2.f32 %v5147_v22  ;;  %v2932_v35 = vmul.f32 1.442695, %v2077_v27  ;;  %v2079_v36 = vmul.f32 %v13487_v52, %v1395_v28  ;;  %v1399_v31 = vmul.f32 0.6931472, %v10793_v29 }
 0x5c9   : > { %v10797_v37 = vpop.eup %10796  ;;  %10816 = vpow2.f32 %v2930_v30  ;;  %v2934_v38 = vmul.f32 1.442695, %v2078_v32  ;;  %v2080_v39 = vmul.f32 %v13487_v52, %v1397_v33  ;;  %v1401_v40 = vmul.f32 0.6931472, %v10795_v34 }
 0x5ca   : > { %v10799_v42 = vpop.eup %10798  ;;  %10818 = vpow2.f32 %v2932_v35  ;;  %v2936_v43 = vmul.f32 1.442695, %v2079_v36  ;;  %v2081_v44 = vmul.f32 %v13487_v52, %v1399_v31  ;;  %v1403_v45 = vmul.f32 0.6931472, %v10797_v37 }
 0x5cb   : > { %v10801_v46 = vpop.eup %10800  ;;  %10820 = vpow2.f32 %v2934_v38  ;;  %v2938_v41 = vmul.f32 1.442695, %v2080_v39  ;;  %v2082_v47 = vmul.f32 %v13487_v52, %v1401_v40  ;;  %v1405_v14 = vmul.f32 0.6931472, %v10799_v42 }
 0x5cc   : > { %v10803_v48 = vpop.eup %10802  ;;  %v4459_v49 = vmul.f32 0.6931472, %v10801_v46  ;;  %10822 = vpow2.f32 %v2936_v43  ;;  %v2940_v50 = vmul.f32 1.442695, %v2081_v44  ;;  %v2083_v51 = vmul.f32 %v13487_v52, %v1403_v45 }
 0x5cd   : > { %v10805_v53 = vpop.eup %10804  ;;  %v5995_v54 = vmul.f32 0.6931472, %v10803_v48  ;;  %10824 = vpow2.f32 %v2938_v41  ;;  %v2942_v55 = vmul.f32 1.442695, %v2082_v47  ;;  %v2084_v57 = vmul.f32 %v13487_v52, %v1405_v14 }
 0x5ce   : > { %v10807_v58 = vpop.eup %10806  ;;  %v4461_v59 = vmul.f32 0.6931472, %v10805_v53  ;;  %10826 = vpow2.f32 %v2940_v50  ;;  %v2944_v60 = vmul.f32 1.442695, %v2083_v51 }
 0x5cf   : > { %v10809_v61 = vpop.eup %10808  ;;  %v6680_v56 = vsub.f32 %v4459_v49, %v5995_v54  ;;  %v5997_v62 = vmul.f32 0.6931472, %v10807_v58  ;;  %10828 = vpow2.f32 %v2942_v55  ;;  %v2946_v63 = vmul.f32 1.442695, %v2084_v57 }
 0x5d0   : > { %v10811_v1 = vpop.eup %10810  ;;  %v4463_v2 = vmul.f32 0.6931472, %v10809_v61  ;;  %10830 = vpow2.f32 %v2944_v60 }
 0x5d1   : > { %v10813_v4 = vpop.eup %10812  ;;  %7192 = vst [vmem:[%s12522_s20 + $0xa90] sm:$0xff] %v6680_v56  ;;  %v6681_v5 = vsub.f32 %v4461_v59, %v5997_v62  ;;  %v5999_v8 = vmul.f32 0.6931472, %v10811_v1  ;;  %10832 = vpow2.f32 %v2946_v63 }
 0x5d2   : > { %v10815_v10 = vpop.eup %10814  ;;  %v4465_v11 = vmul.f32 0.6931472, %v10813_v4  ;;  %10834 = vlog2.f32 %v542_v0 }
 0x5d3   : > { %v10817_v6 = vpop.eup %10816  ;;  %7193 = vst [vmem:[%s12522_s20 + $0xa98] sm:$0xff] %v6681_v5  ;;  %v6682_v13 = vsub.f32 %v4463_v2, %v5999_v8  ;;  %v6001_v15 = vmul.f32 0.6931472, %v10815_v10  ;;  %10836 = vlog2.f32 %v543_v3 }
 0x5d4   : > { %v10819_v16 = vpop.eup %10818  ;;  %v7827_v17 = vadd.f32 -0.99, %v10817_v6  ;;  %v5148_v18 = vsub.f32 1.0, %v10817_v6  ;;  %10838 = vlog2.f32 %v544_v9 }
 0x5d5   : > { %v10821_v19 = vpop.eup %10820  ;;  %7194 = vst [vmem:[%s12522_s20 + $0xaa0] sm:$0xff] %v6682_v13  ;;  %v6683_v20 = vsub.f32 %v4465_v11, %v6001_v15  ;;  %v7828_v21 = vadd.f32 -0.99, %v10819_v16  ;;  %v5149_v22 = vsub.f32 1.0, %v10819_v16  ;;  %10840 = vlog2.f32 %v545_v12 }
 0x5d6   : > { %v10823_v7 = vpop.eup %10822  ;;  %10842 = vlog2.f32 %v7827_v17  ;;  %v7829_v23 = vadd.f32 -0.99, %v10821_v19  ;;  %v5150_v25 = vsub.f32 1.0, %v10821_v19  ;;  %v546_v17 = vld [vmem:[%s12465_s8 + $0xb18] sm:$0xff] }
 0x5d7   : > { %v10825_v24 = vpop.eup %10824  ;;  %7195 = vst [vmem:[%s12522_s20 + $0xaa8] sm:$0xff] %v6683_v20  ;;  %10844 = vlog2.f32 %v5148_v18  ;;  %v7830_v27 = vadd.f32 -0.99, %v10823_v7  ;;  %v5151_v29 = vsub.f32 1.0, %v10823_v7 }
 0x5d8   : > { %v10827_v26 = vpop.eup %10826  ;;  %10846 = vlog2.f32 %v7828_v21  ;;  %v7831_v32 = vadd.f32 -0.99, %v10825_v24  ;;  %v5152_v34 = vsub.f32 1.0, %v10825_v24  ;;  %v547_v21 = vld [vmem:[%s12465_s8 + $0xb20] sm:$0xff] }
 0x5d9   : > { %v10829_v28 = vpop.eup %10828  ;;  %10848 = vlog2.f32 %v5149_v22  ;;  %v7832_v36 = vadd.f32 -0.99, %v10827_v26  ;;  %v5153_v37 = vsub.f32 1.0, %v10827_v26 }
 0x5da   : > { %v10831_v30 = vpop.eup %10830  ;;  %10850 = vlog2.f32 %v7829_v23  ;;  %v7833_v40 = vadd.f32 -0.99, %v10829_v28  ;;  %v5154_v44 = vsub.f32 1.0, %v10829_v28  ;;  %v548_v23 = vld [vmem:[%s12465_s8 + $0xb28] sm:$0xff] }
 0x5db   : > { %v10833_v33 = vpop.eup %10832  ;;  %10852 = vlog2.f32 %v5150_v25  ;;  %v7834_v41 = vadd.f32 -0.99, %v10831_v30  ;;  %v5155_v50 = vsub.f32 1.0, %v10831_v30  ;;  %v550_v30 = vld [vmem:[%s12465_s8 + $0xb38] sm:$0xff] }
 0x5dc   : > { %v10835_v35 = vpop.eup %10834  ;;  %10854 = vlog2.f32 %v7830_v27  ;;  %v7835_v55 = vadd.f32 -0.99, %v10833_v33  ;;  %v5156_v60 = vsub.f32 1.0, %v10833_v33  ;;  %v549_v27 = vld [vmem:[%s12465_s8 + $0xb30] sm:$0xff] }
 0x5dd   : > { %v10837_v31 = vpop.eup %10836  ;;  %10856 = vlog2.f32 %v5151_v29  ;;  %v1407_v38 = vmul.f32 0.6931472, %v10835_v35  ;;  %v551_v35 = vld [vmem:[%s12465_s8 + $0xb40] sm:$0xff] }
 0x5de   : > { %v10839_v39 = vpop.eup %10838  ;;  %10858 = vlog2.f32 %v7831_v32  ;;  %v1409_v42 = vmul.f32 0.6931472, %v10837_v31 }
 0x5df   : > { %v10841_v43 = vpop.eup %10840  ;;  %10860 = vlog2.f32 %v5152_v34  ;;  %v1411_v45 = vmul.f32 0.6931472, %v10839_v39  ;;  %v2085_v47 = vmul.f32 %v13487_v52, %v1407_v38 }
 0x5e0   : > { %v10843_v46 = vpop.eup %10842  ;;  %10862 = vlog2.f32 %v7832_v36  ;;  %v1413_v14 = vmul.f32 0.6931472, %v10841_v43  ;;  %v2086_v51 = vmul.f32 %v13487_v52, %v1409_v42  ;;  %v553_v42 = vld [vmem:[%s12465_s8 + $0xb50] sm:$0xff] }
 0x5e1   : > { %v10845_v48 = vpop.eup %10844  ;;  %v4467_v49 = vmul.f32 0.6931472, %v10843_v46  ;;  %10864 = vlog2.f32 %v5153_v37  ;;  %v2087_v57 = vmul.f32 %v13487_v52, %v1411_v45  ;;  %v2948_v0 = vmul.f32 1.442695, %v2085_v47  ;;  %v552_v37 = vld [vmem:[%s12465_s8 + $0xb48] sm:$0xff]  ;;  %v554_v45 = vld [vmem:[%s12465_s8 + $0xb58] sm:$0xff] }
 0x5e2   : > { %v10847_v53 = vpop.eup %10846  ;;  %v6003_v54 = vmul.f32 0.6931472, %v10845_v48  ;;  %10866 = vlog2.f32 %v7833_v40  ;;  %v2088_v61 = vmul.f32 %v13487_v52, %v1413_v14  ;;  %v2950_v3 = vmul.f32 1.442695, %v2086_v51 }
 0x5e3   : > { %v10849_v58 = vpop.eup %10848  ;;  %v4469_v59 = vmul.f32 0.6931472, %v10847_v53  ;;  %10868 = vlog2.f32 %v5154_v44  ;;  %v2952_v9 = vmul.f32 1.442695, %v2087_v57 }
 0x5e4   : > { %v10851_v56 = vpop.eup %10850  ;;  %v6684_v62 = vsub.f32 %v4467_v49, %v6003_v54  ;;  %v6005_v63 = vmul.f32 0.6931472, %v10849_v58  ;;  %10870 = vlog2.f32 %v7834_v41  ;;  %v2954_v11 = vmul.f32 1.442695, %v2088_v61 }
 0x5e5   : > { %v10853_v1 = vpop.eup %10852  ;;  %v4471_v2 = vmul.f32 0.6931472, %v10851_v56  ;;  %10872 = vlog2.f32 %v5155_v50 }
 0x5e6   : > { %v10855_v4 = vpop.eup %10854  ;;  %7196 = vst [vmem:[%s12522_s20 + $0xab0] sm:$0xff] %v6684_v62  ;;  %v6685_v5 = vsub.f32 %v4469_v59, %v6005_v63  ;;  %v6007_v8 = vmul.f32 0.6931472, %v10853_v1  ;;  %10874 = vlog2.f32 %v7835_v55 }
 0x5e7   : > { %v10857_v10 = vpop.eup %10856  ;;  %v4473_v52 = vmul.f32 0.6931472, %v10855_v4  ;;  %10876 = vlog2.f32 %v5156_v60 }
 0x5e8   : > { %v10859_v12 = vpop.eup %10858  ;;  %7197 = vst [vmem:[%s12522_s20 + $0xab8] sm:$0xff] %v6685_v5  ;;  %v6686_v6 = vsub.f32 %v4471_v2, %v6007_v8  ;;  %v6009_v13 = vmul.f32 0.6931472, %v10857_v10  ;;  %10878 = vpow2.f32 %v2948_v0  ;;  %v13589_v2 = vld [vmem:[#allocation5] ss:$0 sm:$0xff] }
 0x5e9   : > { %v10861_v15 = vpop.eup %10860  ;;  %v4475_v16 = vmul.f32 0.6931472, %v10859_v12  ;;  %10880 = vpow2.f32 %v2950_v3 }
 0x5ea   : > { %v10863_v18 = vpop.eup %10862  ;;  %7198 = vst [vmem:[%s12522_s20 + $0xac0] sm:$0xff] %v6686_v6  ;;  %v6687_v19 = vsub.f32 %v4473_v52, %v6009_v13  ;;  %v6011_v20 = vmul.f32 0.6931472, %v10861_v15  ;;  %10882 = vpow2.f32 %v2952_v9 }
 0x5eb   : > { %v10865_v22 = vpop.eup %10864  ;;  %v4477_v7 = vmul.f32 0.6931472, %v10863_v18  ;;  %10884 = vpow2.f32 %v2954_v11 }
 0x5ec   : > { %v10867_v24 = vpop.eup %10866  ;;  %7199 = vst [vmem:[%s12522_s20 + $0xac8] sm:$0xff] %v6687_v19  ;;  %v6688_v25 = vsub.f32 %v4475_v16, %v6011_v20  ;;  %v6013_v26 = vmul.f32 0.6931472, %v10865_v22  ;;  %10886 = vlog2.f32 %v546_v17 }
 0x5ed   : > { %v10869_v28 = vpop.eup %10868  ;;  %v4479_v29 = vmul.f32 0.6931472, %v10867_v24  ;;  %10888 = vlog2.f32 %v547_v21 }
 0x5ee   : > { %v10871_v32 = vpop.eup %10870  ;;  %7200 = vst [vmem:[%s12522_s20 + $0xad0] sm:$0xff] %v6688_v25  ;;  %v6689_v33 = vsub.f32 %v4477_v7, %v6013_v26  ;;  %v6015_v34 = vmul.f32 0.6931472, %v10869_v28  ;;  %10890 = vlog2.f32 %v548_v23 }
 0x5ef   : > { %v10873_v36 = vpop.eup %10872  ;;  %v4481_v31 = vmul.f32 0.6931472, %v10871_v32  ;;  %10892 = vlog2.f32 %v549_v27 }
 0x5f0   : > { %v10875_v38 = vpop.eup %10874  ;;  %7201 = vst [vmem:[%s12522_s20 + $0xad8] sm:$0xff] %v6689_v33  ;;  %v6690_v39 = vsub.f32 %v4479_v29, %v6015_v34  ;;  %v6017_v40 = vmul.f32 0.6931472, %v10873_v36  ;;  %10894 = vlog2.f32 %v550_v30 }
 0x5f1   : > { %v10877_v43 = vpop.eup %10876  ;;  %v4483_v44 = vmul.f32 0.6931472, %v10875_v38  ;;  %10896 = vlog2.f32 %v551_v35 }
 0x5f2   : > { %v10879_v46 = vpop.eup %10878  ;;  %7202 = vst [vmem:[%s12522_s20 + $0xae0] sm:$0xff] %v6690_v39  ;;  %v6691_v41 = vsub.f32 %v4481_v31, %v6017_v40  ;;  %v6019_v47 = vmul.f32 0.6931472, %v10877_v43  ;;  %10898 = vlog2.f32 %v552_v37 }
 0x5f3   : > { %v10881_v14 = vpop.eup %10880  ;;  %v7836_v48 = vadd.f32 -0.99, %v10879_v46  ;;  %v5157_v49 = vsub.f32 1.0, %v10879_v46  ;;  %10900 = vlog2.f32 %v553_v42 }
 0x5f4   : > { %v10883_v50 = vpop.eup %10882  ;;  %7203 = vst [vmem:[%s12522_s20 + $0xae8] sm:$0xff] %v6691_v41  ;;  %v6692_v51 = vsub.f32 %v4483_v44, %v6019_v47  ;;  %v7837_v53 = vadd.f32 -0.99, %v10881_v14  ;;  %v5158_v54 = vsub.f32 1.0, %v10881_v14  ;;  %10902 = vlog2.f32 %v554_v45  ;;  %v555_v44 = vld [vmem:[%s12465_s8 + $0xb60] sm:$0xff]  ;;  %v556_v41 = vld [vmem:[%s12465_s8 + $0xb68] sm:$0xff] }
 0x5f5   : > { %v10885_v55 = vpop.eup %10884  ;;  %10904 = vlog2.f32 %v7836_v48  ;;  %v7838_v57 = vadd.f32 -0.99, %v10883_v50  ;;  %v5159_v59 = vsub.f32 1.0, %v10883_v50 }
 0x5f6   : > { %v10887_v58 = vpop.eup %10886  ;;  %7204 = vst [vmem:[%s12522_s20 + $0xaf0] sm:$0xff] %v6692_v51  ;;  %10906 = vlog2.f32 %v5157_v49  ;;  %v7839_v61 = vadd.f32 -0.99, %v10885_v55  ;;  %v5160_v63 = vsub.f32 1.0, %v10885_v55  ;;  %v557_v49 = vld [vmem:[%s12465_s8 + $0xb70] sm:$0xff] }
 0x5f7   : > { %v10889_v60 = vpop.eup %10888  ;;  %10908 = vlog2.f32 %v7837_v53  ;;  %v1415_v56 = vmul.f32 0.6931472, %v10887_v58  ;;  %v558_v53 = vld [vmem:[%s12465_s8 + $0xb78] sm:$0xff] }
 0x5f8   : > { %v10891_v62 = vpop.eup %10890  ;;  %10910 = vlog2.f32 %v5158_v54  ;;  %v1417_v0 = vmul.f32 0.6931472, %v10889_v60 }
 0x5f9   : > { %v10893_v1 = vpop.eup %10892  ;;  %10912 = vlog2.f32 %v7838_v57  ;;  %v2089_v3 = vmul.f32 %v13589_v2, %v1415_v56  ;;  %v1419_v4 = vmul.f32 0.6931472, %v10891_v62 }
 0x5fa   : > { %v10895_v5 = vpop.eup %10894  ;;  %10914 = vlog2.f32 %v5159_v59  ;;  %v2090_v8 = vmul.f32 %v13589_v2, %v1417_v0  ;;  %v1421_v9 = vmul.f32 0.6931472, %v10893_v1 }
 0x5fb   : > { %v10897_v10 = vpop.eup %10896  ;;  %10916 = vlog2.f32 %v7839_v61  ;;  %v2956_v52 = vmul.f32 1.442695, %v2089_v3  ;;  %v2091_v11 = vmul.f32 %v13589_v2, %v1419_v4  ;;  %v1423_v12 = vmul.f32 0.6931472, %v10895_v5 }
 0x5fc   : > { %v10899_v6 = vpop.eup %10898  ;;  %10918 = vlog2.f32 %v5160_v63  ;;  %v2958_v13 = vmul.f32 1.442695, %v2090_v8  ;;  %v2092_v15 = vmul.f32 %v13589_v2, %v1421_v9  ;;  %v1425_v16 = vmul.f32 0.6931472, %v10897_v10 }
 0x5fd   : > { %v10901_v17 = vpop.eup %10900  ;;  %10920 = vpow2.f32 %v2956_v52  ;;  %v2960_v18 = vmul.f32 1.442695, %v2091_v11  ;;  %v2093_v19 = vmul.f32 %v13589_v2, %v1423_v12  ;;  %v1427_v20 = vmul.f32 0.6931472, %v10899_v6 }
 0x5fe   : > { %v10903_v21 = vpop.eup %10902  ;;  %10922 = vpow2.f32 %v2958_v13  ;;  %v2962_v22 = vmul.f32 1.442695, %v2092_v15  ;;  %v2094_v7 = vmul.f32 %v13589_v2, %v1425_v16  ;;  %v1429_v23 = vmul.f32 0.6931472, %v10901_v17 }
 0x5ff   : > { %v10905_v24 = vpop.eup %10904  ;;  %10924 = vpow2.f32 %v2960_v18  ;;  %v2964_v25 = vmul.f32 1.442695, %v2093_v19  ;;  %v2095_v26 = vmul.f32 %v13589_v2, %v1427_v20  ;;  %v1431_v27 = vmul.f32 0.6931472, %v10903_v21 }
 0x600   : > { %v10907_v28 = vpop.eup %10906  ;;  %v4485_v29 = vmul.f32 0.6931472, %v10905_v24  ;;  %10926 = vpow2.f32 %v2962_v22  ;;  %v2966_v30 = vmul.f32 1.442695, %v2094_v7  ;;  %v2096_v32 = vmul.f32 %v13589_v2, %v1429_v23 }
 0x601   : > { %v10909_v33 = vpop.eup %10908  ;;  %v6021_v34 = vmul.f32 0.6931472, %v10907_v28  ;;  %10928 = vpow2.f32 %v2964_v25  ;;  %v2968_v35 = vmul.f32 1.442695, %v2095_v26  ;;  %v2097_v36 = vmul.f32 %v13589_v2, %v1431_v27 }
 0x602   : > { %v10911_v31 = vpop.eup %10910  ;;  %v4487_v37 = vmul.f32 0.6931472, %v10909_v33  ;;  %10930 = vpow2.f32 %v2966_v30  ;;  %v2970_v38 = vmul.f32 1.442695, %v2096_v32 }
 0x603   : > { %v10913_v39 = vpop.eup %10912  ;;  %v6693_v40 = vsub.f32 %v4485_v29, %v6021_v34  ;;  %v6023_v42 = vmul.f32 0.6931472, %v10911_v31  ;;  %10932 = vpow2.f32 %v2968_v35  ;;  %v2972_v43 = vmul.f32 1.442695, %v2097_v36 }
 0x604   : > { %v10915_v45 = vpop.eup %10914  ;;  %v4489_v46 = vmul.f32 0.6931472, %v10913_v39  ;;  %10934 = vpow2.f32 %v2970_v38 }
 0x605   : > { %v10917_v47 = vpop.eup %10916  ;;  %7205 = vst [vmem:[%s12522_s20 + $0xaf8] sm:$0xff] %v6693_v40  ;;  %v6694_v14 = vsub.f32 %v4487_v37, %v6023_v42  ;;  %v6025_v48 = vmul.f32 0.6931472, %v10915_v45  ;;  %10936 = vpow2.f32 %v2972_v43 }
 0x606   : > { %v10919_v50 = vpop.eup %10918  ;;  %v4491_v51 = vmul.f32 0.6931472, %v10917_v47  ;;  %10938 = vlog2.f32 %v555_v44 }
 0x607   : > { %v10921_v54 = vpop.eup %10920  ;;  %7206 = vst [vmem:[%s12522_s20 + $0xb00] sm:$0xff] %v6694_v14  ;;  %v6695_v55 = vsub.f32 %v4489_v46, %v6025_v48  ;;  %v6027_v57 = vmul.f32 0.6931472, %v10919_v50  ;;  %10940 = vlog2.f32 %v556_v41 }
 0x608   : > { %v10923_v58 = vpop.eup %10922  ;;  %v7840_v59 = vadd.f32 -0.99, %v10921_v54  ;;  %v5161_v60 = vsub.f32 1.0, %v10921_v54  ;;  %10942 = vlog2.f32 %v557_v49 }
 0x609   : > { %v10925_v61 = vpop.eup %10924  ;;  %7207 = vst [vmem:[%s12522_s20 + $0xb08] sm:$0xff] %v6695_v55  ;;  %v6696_v56 = vsub.f32 %v4491_v51, %v6027_v57  ;;  %v7841_v62 = vadd.f32 -0.99, %v10923_v58  ;;  %v5162_v63 = vsub.f32 1.0, %v10923_v58  ;;  %10944 = vlog2.f32 %v558_v53 }
 0x60a   : > { %v10927_v0 = vpop.eup %10926  ;;  %10946 = vlog2.f32 %v7840_v59  ;;  %v7842_v1 = vadd.f32 -0.99, %v10925_v61  ;;  %v5163_v4 = vsub.f32 1.0, %v10925_v61 }
 0x60b   : > { %v10929_v3 = vpop.eup %10928  ;;  %7208 = vst [vmem:[%s12522_s20 + $0xb10] sm:$0xff] %v6696_v56  ;;  %10948 = vlog2.f32 %v5161_v60  ;;  %v7843_v8 = vadd.f32 -0.99, %v10927_v0  ;;  %v5164_v10 = vsub.f32 1.0, %v10927_v0  ;;  %v559_v60 = vld [vmem:[%s12465_s8 + $0xb80] sm:$0xff] }
 0x60c   : > { %v10931_v5 = vpop.eup %10930  ;;  %10950 = vlog2.f32 %v7841_v62  ;;  %v7844_v11 = vadd.f32 -0.99, %v10929_v3  ;;  %v5165_v6 = vsub.f32 1.0, %v10929_v3  ;;  %v561_v3 = vld [vmem:[%s12465_s8 + $0xb90] sm:$0xff] }
 0x60d   : > { %v10933_v9 = vpop.eup %10932  ;;  %10952 = vlog2.f32 %v5162_v63  ;;  %v7845_v15 = vadd.f32 -0.99, %v10931_v5  ;;  %v5166_v17 = vsub.f32 1.0, %v10931_v5  ;;  %v560_v63 = vld [vmem:[%s12465_s8 + $0xb88] sm:$0xff] }
 0x60e   : > { %v10935_v52 = vpop.eup %10934  ;;  %10954 = vlog2.f32 %v7842_v1  ;;  %v7846_v20 = vadd.f32 -0.99, %v10933_v9  ;;  %v5167_v7 = vsub.f32 1.0, %v10933_v9  ;;  %v562_v9 = vld [vmem:[%s12465_s8 + $0xb98] sm:$0xff] }
 0x60f   : > { %v10937_v12 = vpop.eup %10936  ;;  %10956 = vlog2.f32 %v5163_v4  ;;  %v7847_v25 = vadd.f32 -0.99, %v10935_v52  ;;  %v5168_v30 = vsub.f32 1.0, %v10935_v52 }
 0x610   : > { %v10939_v13 = vpop.eup %10938  ;;  %10958 = vlog2.f32 %v7843_v8  ;;  %v7848_v35 = vadd.f32 -0.99, %v10937_v12  ;;  %v5169_v38 = vsub.f32 1.0, %v10937_v12 }
 0x611   : > { %v10941_v16 = vpop.eup %10940  ;;  %10960 = vlog2.f32 %v5164_v10  ;;  %v1433_v18 = vmul.f32 0.6931472, %v10939_v13 }
 0x612   : > { %v10943_v19 = vpop.eup %10942  ;;  %10962 = vlog2.f32 %v7844_v11  ;;  %v1435_v21 = vmul.f32 0.6931472, %v10941_v16  ;;  %v563_v11 = vld [vmem:[%s12465_s8 + $0xba0] sm:$0xff] }
 0x613   : > { %v10945_v22 = vpop.eup %10944  ;;  %10964 = vlog2.f32 %v5165_v6  ;;  %v1437_v23 = vmul.f32 0.6931472, %v10943_v19  ;;  %v2098_v26 = vmul.f32 %v13589_v2, %v1433_v18  ;;  %v565_v18 = vld [vmem:[%s12465_s8 + $0xbb0] sm:$0xff] }
 0x614   : > { %v10947_v24 = vpop.eup %10946  ;;  %10966 = vlog2.f32 %v7845_v15  ;;  %v1439_v27 = vmul.f32 0.6931472, %v10945_v22  ;;  %v2099_v32 = vmul.f32 %v13589_v2, %v1435_v21  ;;  %v564_v15 = vld [vmem:[%s12465_s8 + $0xba8] sm:$0xff]  ;;  %v566_v22 = vld [vmem:[%s12465_s8 + $0xbb8] sm:$0xff] }
 0x615   : > { %v10949_v28 = vpop.eup %10948  ;;  %v4493_v29 = vmul.f32 0.6931472, %v10947_v24  ;;  %10968 = vlog2.f32 %v5166_v17  ;;  %v2100_v36 = vmul.f32 %v13589_v2, %v1437_v23  ;;  %v2974_v44 = vmul.f32 1.442695, %v2098_v26  ;;  %v567_v24 = vld [vmem:[%s12465_s8 + $0xbc0] sm:$0xff] }
 0x616   : > { %v10951_v33 = vpop.eup %10950  ;;  %v6029_v34 = vmul.f32 0.6931472, %v10949_v28  ;;  %10970 = vlog2.f32 %v7846_v20  ;;  %v2101_v39 = vmul.f32 %v13589_v2, %v1439_v27  ;;  %v2976_v41 = vmul.f32 1.442695, %v2099_v32 }
 0x617   : > { %v10953_v31 = vpop.eup %10952  ;;  %v4495_v37 = vmul.f32 0.6931472, %v10951_v33  ;;  %10972 = vlog2.f32 %v5167_v7  ;;  %v2978_v49 = vmul.f32 1.442695, %v2100_v36 }
 0x618   : > { %v10955_v40 = vpop.eup %10954  ;;  %v6697_v42 = vsub.f32 %v4493_v29, %v6029_v34  ;;  %v6031_v43 = vmul.f32 0.6931472, %v10953_v31  ;;  %10974 = vlog2.f32 %v7847_v25  ;;  %v2980_v53 = vmul.f32 1.442695, %v2101_v39 }
 0x619   : > { %v10957_v45 = vpop.eup %10956  ;;  %v4497_v46 = vmul.f32 0.6931472, %v10955_v40  ;;  %10976 = vlog2.f32 %v5168_v30 }
 0x61a   : > { %v10959_v47 = vpop.eup %10958  ;;  %7209 = vst [vmem:[%s12522_s20 + $0xb18] sm:$0xff] %v6697_v42  ;;  %v6698_v14 = vsub.f32 %v4495_v37, %v6031_v43  ;;  %v6033_v48 = vmul.f32 0.6931472, %v10957_v45  ;;  %10978 = vlog2.f32 %v7848_v35 }
 0x61b   : > { %v10961_v50 = vpop.eup %10960  ;;  %v4499_v51 = vmul.f32 0.6931472, %v10959_v47  ;;  %10980 = vlog2.f32 %v5169_v38 }
 0x61c   : > { %v10963_v54 = vpop.eup %10962  ;;  %7210 = vst [vmem:[%s12522_s20 + $0xb20] sm:$0xff] %v6698_v14  ;;  %v6699_v55 = vsub.f32 %v4497_v46, %v6033_v48  ;;  %v6035_v57 = vmul.f32 0.6931472, %v10961_v50  ;;  %10982 = vpow2.f32 %v2974_v44 }
 0x61d   : > { %v10965_v58 = vpop.eup %10964  ;;  %v4501_v59 = vmul.f32 0.6931472, %v10963_v54  ;;  %10984 = vpow2.f32 %v2976_v41 }
 0x61e   : > { %v10967_v61 = vpop.eup %10966  ;;  %7211 = vst [vmem:[%s12522_s20 + $0xb28] sm:$0xff] %v6699_v55  ;;  %v6700_v56 = vsub.f32 %v4499_v51, %v6035_v57  ;;  %v6037_v62 = vmul.f32 0.6931472, %v10965_v58  ;;  %10986 = vpow2.f32 %v2978_v49 }
 0x61f   : > { %v10969_v0 = vpop.eup %10968  ;;  %v4503_v1 = vmul.f32 0.6931472, %v10967_v61  ;;  %10988 = vpow2.f32 %v2980_v53 }
 0x620   : > { %v10971_v4 = vpop.eup %10970  ;;  %7212 = vst [vmem:[%s12522_s20 + $0xb30] sm:$0xff] %v6700_v56  ;;  %v6701_v5 = vsub.f32 %v4501_v59, %v6037_v62  ;;  %v6039_v8 = vmul.f32 0.6931472, %v10969_v0  ;;  %10990 = vlog2.f32 %v559_v60 }
 0x621   : > { %v10973_v10 = vpop.eup %10972  ;;  %v4505_v52 = vmul.f32 0.6931472, %v10971_v4  ;;  %10992 = vlog2.f32 %v560_v63 }
 0x622   : > { %v10975_v12 = vpop.eup %10974  ;;  %7213 = vst [vmem:[%s12522_s20 + $0xb38] sm:$0xff] %v6701_v5  ;;  %v6702_v6 = vsub.f32 %v4503_v1, %v6039_v8  ;;  %v6041_v13 = vmul.f32 0.6931472, %v10973_v10  ;;  %10994 = vlog2.f32 %v561_v3 }
 0x623   : > { %v10977_v16 = vpop.eup %10976  ;;  %v4507_v17 = vmul.f32 0.6931472, %v10975_v12  ;;  %10996 = vlog2.f32 %v562_v9 }
 0x624   : > { %v10979_v19 = vpop.eup %10978  ;;  %7214 = vst [vmem:[%s12522_s20 + $0xb40] sm:$0xff] %v6702_v6  ;;  %v6703_v20 = vsub.f32 %v4505_v52, %v6041_v13  ;;  %v6043_v21 = vmul.f32 0.6931472, %v10977_v16  ;;  %10998 = vlog2.f32 %v563_v11 }
 0x625   : > { %v10981_v7 = vpop.eup %10980  ;;  %v4509_v23 = vmul.f32 0.6931472, %v10979_v19  ;;  %11000 = vlog2.f32 %v564_v15 }
 0x626   : > { %v10983_v25 = vpop.eup %10982  ;;  %7215 = vst [vmem:[%s12522_s20 + $0xb48] sm:$0xff] %v6703_v20  ;;  %v6704_v26 = vsub.f32 %v4507_v17, %v6043_v21  ;;  %v6045_v27 = vmul.f32 0.6931472, %v10981_v7  ;;  %11002 = vlog2.f32 %v565_v18 }
 0x627   : > { %v10985_v28 = vpop.eup %10984  ;;  %v7849_v29 = vadd.f32 -0.99, %v10983_v25  ;;  %v5170_v30 = vsub.f32 1.0, %v10983_v25  ;;  %11004 = vlog2.f32 %v566_v22 }
 0x628   : > { %v10987_v32 = vpop.eup %10986  ;;  %7216 = vst [vmem:[%s12522_s20 + $0xb50] sm:$0xff] %v6704_v26  ;;  %v6705_v33 = vsub.f32 %v4509_v23, %v6045_v27  ;;  %v7850_v34 = vadd.f32 -0.99, %v10985_v28  ;;  %v5171_v35 = vsub.f32 1.0, %v10985_v28  ;;  %11006 = vlog2.f32 %v567_v24  ;;  %v568_v23 = vld [vmem:[%s12465_s8 + $0xbc8] sm:$0xff]  ;;  %v569_v26 = vld [vmem:[%s12465_s8 + $0xbd0] sm:$0xff] }
 0x629   : > { %v10989_v36 = vpop.eup %10988  ;;  %11008 = vlog2.f32 %v7849_v29  ;;  %v7851_v31 = vadd.f32 -0.99, %v10987_v32  ;;  %v5172_v38 = vsub.f32 1.0, %v10987_v32 }
 0x62a   : > { %v10991_v37 = vpop.eup %10990  ;;  %7217 = vst [vmem:[%s12522_s20 + $0xb58] sm:$0xff] %v6705_v33  ;;  %11010 = vlog2.f32 %v5170_v30  ;;  %v7852_v40 = vadd.f32 -0.99, %v10989_v36  ;;  %v5173_v44 = vsub.f32 1.0, %v10989_v36  ;;  %v570_v30 = vld [vmem:[%s12465_s8 + $0xbd8] sm:$0xff] }
 0x62b   : > { %v10993_v39 = vpop.eup %10992  ;;  %11012 = vlog2.f32 %v7850_v34  ;;  %v1441_v42 = vmul.f32 0.6931472, %v10991_v37  ;;  %v571_v34 = vld [vmem:[%s12465_s8 + $0xbe0] sm:$0xff] }
 0x62c   : > { %v10995_v43 = vpop.eup %10994  ;;  %11014 = vlog2.f32 %v5171_v35  ;;  %v1443_v45 = vmul.f32 0.6931472, %v10993_v39 }
 0x62d   : > { %v10997_v46 = vpop.eup %10996  ;;  %11016 = vlog2.f32 %v7851_v31  ;;  %v2102_v41 = vmul.f32 %v13589_v2, %v1441_v42  ;;  %v1445_v47 = vmul.f32 0.6931472, %v10995_v43 }
 0x62e   : > { %v10999_v14 = vpop.eup %10998  ;;  %11018 = vlog2.f32 %v5172_v38  ;;  %v2103_v48 = vmul.f32 %v13589_v2, %v1443_v45  ;;  %v1447_v49 = vmul.f32 0.6931472, %v10997_v46 }
 0x62f   : > { %v11001_v50 = vpop.eup %11000  ;;  %11020 = vlog2.f32 %v7852_v40  ;;  %v2982_v51 = vmul.f32 1.442695, %v2102_v41  ;;  %v2104_v53 = vmul.f32 %v13589_v2, %v1445_v47  ;;  %v1449_v54 = vmul.f32 0.6931472, %v10999_v14 }
 0x630   : > { %v11003_v55 = vpop.eup %11002  ;;  %11022 = vlog2.f32 %v5173_v44  ;;  %v2984_v57 = vmul.f32 1.442695, %v2103_v48  ;;  %v2105_v58 = vmul.f32 %v13589_v2, %v1447_v49  ;;  %v1451_v59 = vmul.f32 0.6931472, %v11001_v50 }
 0x631   : > { %v11005_v60 = vpop.eup %11004  ;;  %11024 = vpow2.f32 %v2982_v51  ;;  %v2986_v61 = vmul.f32 1.442695, %v2104_v53  ;;  %v2106_v56 = vmul.f32 %v13589_v2, %v1449_v54  ;;  %v1453_v62 = vmul.f32 0.6931472, %v11003_v55 }
 0x632   : > { %v11007_v63 = vpop.eup %11006  ;;  %11026 = vpow2.f32 %v2984_v57  ;;  %v2988_v0 = vmul.f32 1.442695, %v2105_v58  ;;  %v2107_v1 = vmul.f32 %v13589_v2, %v1451_v59  ;;  %v1455_v3 = vmul.f32 0.6931472, %v11005_v60 }
 0x633   : > { %v11009_v4 = vpop.eup %11008  ;;  %11028 = vpow2.f32 %v2986_v61  ;;  %v2990_v5 = vmul.f32 1.442695, %v2106_v56  ;;  %v2108_v8 = vmul.f32 %v13589_v2, %v1453_v62  ;;  %v1457_v9 = vmul.f32 0.6931472, %v11007_v63 }
 0x634   : > { %v11011_v10 = vpop.eup %11010  ;;  %v4511_v52 = vmul.f32 0.6931472, %v11009_v4  ;;  %11030 = vpow2.f32 %v2988_v0  ;;  %v2992_v11 = vmul.f32 1.442695, %v2107_v1  ;;  %v2109_v12 = vmul.f32 %v13589_v2, %v1455_v3 }
 0x635   : > { %v11013_v6 = vpop.eup %11012  ;;  %v6047_v13 = vmul.f32 0.6931472, %v11011_v10  ;;  %11032 = vpow2.f32 %v2990_v5  ;;  %v2994_v15 = vmul.f32 1.442695, %v2108_v8  ;;  %v2110_v16 = vmul.f32 %v13589_v2, %v1457_v9 }
 0x636   : > { %v11015_v17 = vpop.eup %11014  ;;  %v4513_v18 = vmul.f32 0.6931472, %v11013_v6  ;;  %11034 = vpow2.f32 %v2992_v11  ;;  %v2996_v19 = vmul.f32 1.442695, %v2109_v12 }
 0x637   : > { %v11017_v20 = vpop.eup %11016  ;;  %v6706_v21 = vsub.f32 %v4511_v52, %v6047_v13  ;;  %v6049_v22 = vmul.f32 0.6931472, %v11015_v17  ;;  %11036 = vpow2.f32 %v2994_v15  ;;  %v2998_v7 = vmul.f32 1.442695, %v2110_v16 }
 0x638   : > { %v11019_v24 = vpop.eup %11018  ;;  %v4515_v25 = vmul.f32 0.6931472, %v11017_v20  ;;  %11038 = vpow2.f32 %v2996_v19 }
 0x639   : > { %v11021_v27 = vpop.eup %11020  ;;  %7218 = vst [vmem:[%s12522_s20 + $0xb60] sm:$0xff] %v6706_v21  ;;  %v6707_v28 = vsub.f32 %v4513_v18, %v6049_v22  ;;  %v6051_v29 = vmul.f32 0.6931472, %v11019_v24  ;;  %11040 = vpow2.f32 %v2998_v7 }
 0x63a   : > { %v11023_v32 = vpop.eup %11022  ;;  %v4517_v33 = vmul.f32 0.6931472, %v11021_v27  ;;  %11042 = vlog2.f32 %v568_v23 }
 0x63b   : > { %v11025_v35 = vpop.eup %11024  ;;  %7219 = vst [vmem:[%s12522_s20 + $0xb68] sm:$0xff] %v6707_v28  ;;  %v6708_v36 = vsub.f32 %v4515_v25, %v6051_v29  ;;  %v6053_v31 = vmul.f32 0.6931472, %v11023_v32  ;;  %11044 = vlog2.f32 %v569_v26 }
 0x63c   : > { %v11027_v37 = vpop.eup %11026  ;;  %v7853_v38 = vadd.f32 -0.99, %v11025_v35  ;;  %v5174_v39 = vsub.f32 1.0, %v11025_v35  ;;  %11046 = vlog2.f32 %v570_v30 }
 0x63d   : > { %v11029_v40 = vpop.eup %11028  ;;  %7220 = vst [vmem:[%s12522_s20 + $0xb70] sm:$0xff] %v6708_v36  ;;  %v6709_v42 = vsub.f32 %v4517_v33, %v6053_v31  ;;  %v7854_v43 = vadd.f32 -0.99, %v11027_v37  ;;  %v5175_v44 = vsub.f32 1.0, %v11027_v37  ;;  %11048 = vlog2.f32 %v571_v34 }
 0x63e   : > { %v11031_v45 = vpop.eup %11030  ;;  %11050 = vlog2.f32 %v7853_v38  ;;  %v7855_v46 = vadd.f32 -0.99, %v11029_v40  ;;  %v5176_v47 = vsub.f32 1.0, %v11029_v40 }
 0x63f   : > { %v11033_v41 = vpop.eup %11032  ;;  %7221 = vst [vmem:[%s12522_s20 + $0xb78] sm:$0xff] %v6709_v42  ;;  %11052 = vlog2.f32 %v5174_v39  ;;  %v7856_v48 = vadd.f32 -0.99, %v11031_v45  ;;  %v5177_v50 = vsub.f32 1.0, %v11031_v45  ;;  %v572_v39 = vld [vmem:[%s12465_s8 + $0xbe8] sm:$0xff] }
 0x640   : > { %v11035_v14 = vpop.eup %11034  ;;  %11054 = vlog2.f32 %v7854_v43  ;;  %v7857_v53 = vadd.f32 -0.99, %v11033_v41  ;;  %v5178_v55 = vsub.f32 1.0, %v11033_v41  ;;  %v574_v41 = vld [vmem:[%s12465_s8 + $0xbf8] sm:$0xff] }
 0x641   : > { %v11037_v49 = vpop.eup %11036  ;;  %11056 = vlog2.f32 %v5175_v44  ;;  %v7858_v58 = vadd.f32 -0.99, %v11035_v14  ;;  %v5179_v60 = vsub.f32 1.0, %v11035_v14  ;;  %v573_v44 = vld [vmem:[%s12465_s8 + $0xbf0] sm:$0xff] }
 0x642   : > { %v11039_v51 = vpop.eup %11038  ;;  %11058 = vlog2.f32 %v7855_v46  ;;  %v7859_v62 = vadd.f32 -0.99, %v11037_v49  ;;  %v5180_v1 = vsub.f32 1.0, %v11037_v49  ;;  %v575_v49 = vld [vmem:[%s12465_s8 + $0xc00] sm:$0xff] }
 0x643   : > { %v11041_v54 = vpop.eup %11040  ;;  %11060 = vlog2.f32 %v5176_v47  ;;  %v7860_v5 = vadd.f32 -0.99, %v11039_v51  ;;  %v5181_v11 = vsub.f32 1.0, %v11039_v51 }
 0x644   : > { %v11043_v57 = vpop.eup %11042  ;;  %11062 = vlog2.f32 %v7856_v48  ;;  %v7861_v15 = vadd.f32 -0.99, %v11041_v54  ;;  %v5182_v19 = vsub.f32 1.0, %v11041_v54 }
 0x645   : > { %v11045_v59 = vpop.eup %11044  ;;  %11064 = vlog2.f32 %v5177_v50  ;;  %v1459_v61 = vmul.f32 0.6931472, %v11043_v57 }
 0x646   : > { %v11047_v56 = vpop.eup %11046  ;;  %11066 = vlog2.f32 %v7857_v53  ;;  %v1461_v63 = vmul.f32 0.6931472, %v11045_v59  ;;  %v576_v53 = vld [vmem:[%s12465_s8 + $0xc08] sm:$0xff] }
 0x647   : > { %v11049_v0 = vpop.eup %11048  ;;  %11068 = vlog2.f32 %v5178_v55  ;;  %v1463_v3 = vmul.f32 0.6931472, %v11047_v56  ;;  %v2111_v8 = vmul.f32 %v13589_v2, %v1459_v61  ;;  %v578_v61 = vld [vmem:[%s12465_s8 + $0xc18] sm:$0xff] }
 0x648   : > { %v11051_v4 = vpop.eup %11050  ;;  %11070 = vlog2.f32 %v7858_v58  ;;  %v1465_v9 = vmul.f32 0.6931472, %v11049_v0  ;;  %v2112_v12 = vmul.f32 %v13589_v2, %v1461_v63  ;;  %v577_v58 = vld [vmem:[%s12465_s8 + $0xc10] sm:$0xff]  ;;  %v579_v0 = vld [vmem:[%s12465_s8 + $0xc20] sm:$0xff] }
 0x649   : > { %v11053_v10 = vpop.eup %11052  ;;  %v4519_v52 = vmul.f32 0.6931472, %v11051_v4  ;;  %11072 = vlog2.f32 %v5179_v60  ;;  %v2113_v16 = vmul.f32 %v13589_v2, %v1463_v3  ;;  %v3000_v23 = vmul.f32 1.442695, %v2111_v8  ;;  %v580_v4 = vld [vmem:[%s12465_s8 + $0xc28] sm:$0xff] }
 0x64a   : > { %v11055_v6 = vpop.eup %11054  ;;  %v6055_v13 = vmul.f32 0.6931472, %v11053_v10  ;;  %11074 = vlog2.f32 %v7859_v62  ;;  %v2114_v20 = vmul.f32 %v13589_v2, %v1465_v9  ;;  %v3002_v26 = vmul.f32 1.442695, %v2112_v12 }
 0x64b   : > { %v11057_v17 = vpop.eup %11056  ;;  %v4521_v18 = vmul.f32 0.6931472, %v11055_v6  ;;  %11076 = vlog2.f32 %v5180_v1  ;;  %v3004_v30 = vmul.f32 1.442695, %v2113_v16 }
 0x64c   : > { %v11059_v21 = vpop.eup %11058  ;;  %v6710_v22 = vsub.f32 %v4519_v52, %v6055_v13  ;;  %v6057_v7 = vmul.f32 0.6931472, %v11057_v17  ;;  %11078 = vlog2.f32 %v7860_v5  ;;  %v3006_v34 = vmul.f32 1.442695, %v2114_v20 }
 0x64d   : > { %v11061_v24 = vpop.eup %11060  ;;  %v4523_v25 = vmul.f32 0.6931472, %v11059_v21  ;;  %11080 = vlog2.f32 %v5181_v11 }
 0x64e   : > { %v11063_v27 = vpop.eup %11062  ;;  %7222 = vst [vmem:[%s12522_s20 + $0xb80] sm:$0xff] %v6710_v22  ;;  %v6711_v28 = vsub.f32 %v4521_v18, %v6057_v7  ;;  %v6059_v29 = vmul.f32 0.6931472, %v11061_v24  ;;  %11082 = vlog2.f32 %v7861_v15 }
 0x64f   : > { %v11065_v32 = vpop.eup %11064  ;;  %v4525_v33 = vmul.f32 0.6931472, %v11063_v27  ;;  %11084 = vlog2.f32 %v5182_v19 }
 0x650   : > { %v11067_v35 = vpop.eup %11066  ;;  %7223 = vst [vmem:[%s12522_s20 + $0xb88] sm:$0xff] %v6711_v28  ;;  %v6712_v36 = vsub.f32 %v4523_v25, %v6059_v29  ;;  %v6061_v31 = vmul.f32 0.6931472, %v11065_v32  ;;  %11086 = vpow2.f32 %v3000_v23 }
 0x651   : > { %v11069_v37 = vpop.eup %11068  ;;  %v4527_v38 = vmul.f32 0.6931472, %v11067_v35  ;;  %11088 = vpow2.f32 %v3002_v26 }
 0x652   : > { %v11071_v40 = vpop.eup %11070  ;;  %7224 = vst [vmem:[%s12522_s20 + $0xb90] sm:$0xff] %v6712_v36  ;;  %v6713_v42 = vsub.f32 %v4525_v33, %v6061_v31  ;;  %v6063_v43 = vmul.f32 0.6931472, %v11069_v37  ;;  %11090 = vpow2.f32 %v3004_v30 }
 0x653   : > { %v11073_v45 = vpop.eup %11072  ;;  %v4529_v46 = vmul.f32 0.6931472, %v11071_v40  ;;  %11092 = vpow2.f32 %v3006_v34 }
 0x654   : > { %v11075_v47 = vpop.eup %11074  ;;  %7225 = vst [vmem:[%s12522_s20 + $0xb98] sm:$0xff] %v6713_v42  ;;  %v6714_v14 = vsub.f32 %v4527_v38, %v6063_v43  ;;  %v6065_v48 = vmul.f32 0.6931472, %v11073_v45  ;;  %11094 = vlog2.f32 %v572_v39 }
 0x655   : > { %v11077_v50 = vpop.eup %11076  ;;  %v4531_v51 = vmul.f32 0.6931472, %v11075_v47  ;;  %11096 = vlog2.f32 %v573_v44 }
 0x656   : > { %v11079_v54 = vpop.eup %11078  ;;  %7226 = vst [vmem:[%s12522_s20 + $0xba0] sm:$0xff] %v6714_v14  ;;  %v6715_v55 = vsub.f32 %v4529_v46, %v6065_v48  ;;  %v6067_v57 = vmul.f32 0.6931472, %v11077_v50  ;;  %11098 = vlog2.f32 %v574_v41 }
 0x657   : > { %v11081_v59 = vpop.eup %11080  ;;  %v4533_v60 = vmul.f32 0.6931472, %v11079_v54  ;;  %11100 = vlog2.f32 %v575_v49 }
 0x658   : > { %v11083_v56 = vpop.eup %11082  ;;  %7227 = vst [vmem:[%s12522_s20 + $0xba8] sm:$0xff] %v6715_v55  ;;  %v6716_v62 = vsub.f32 %v4531_v51, %v6067_v57  ;;  %v6069_v63 = vmul.f32 0.6931472, %v11081_v59  ;;  %11102 = vlog2.f32 %v576_v53 }
 0x659   : > { %v11085_v1 = vpop.eup %11084  ;;  %v4535_v3 = vmul.f32 0.6931472, %v11083_v56  ;;  %11104 = vlog2.f32 %v577_v58 }
 0x65a   : > { %v11087_v5 = vpop.eup %11086  ;;  %7228 = vst [vmem:[%s12522_s20 + $0xbb0] sm:$0xff] %v6716_v62  ;;  %v6717_v8 = vsub.f32 %v4533_v60, %v6069_v63  ;;  %v6071_v9 = vmul.f32 0.6931472, %v11085_v1  ;;  %11106 = vlog2.f32 %v578_v61 }
 0x65b   : > { %v11089_v10 = vpop.eup %11088  ;;  %v7862_v52 = vadd.f32 -0.99, %v11087_v5  ;;  %v5183_v11 = vsub.f32 1.0, %v11087_v5  ;;  %11108 = vlog2.f32 %v579_v0 }
 0x65c   : > { %v11091_v12 = vpop.eup %11090  ;;  %7229 = vst [vmem:[%s12522_s20 + $0xbb8] sm:$0xff] %v6717_v8  ;;  %v6718_v6 = vsub.f32 %v4535_v3, %v6071_v9  ;;  %v7863_v13 = vadd.f32 -0.99, %v11089_v10  ;;  %v5184_v15 = vsub.f32 1.0, %v11089_v10  ;;  %11110 = vlog2.f32 %v580_v4  ;;  %v581_v3 = vld [vmem:[%s12465_s8 + $0xc30] sm:$0xff]  ;;  %v582_v8 = vld [vmem:[%s12465_s8 + $0xc38] sm:$0xff] }
 0x65d   : > { %v11093_v16 = vpop.eup %11092  ;;  %11112 = vlog2.f32 %v7862_v52  ;;  %v7864_v17 = vadd.f32 -0.99, %v11091_v12  ;;  %v5185_v19 = vsub.f32 1.0, %v11091_v12  ;;  %v583_v52 = vld [vmem:[%s12465_s8 + $0xc40] sm:$0xff] }
 0x65e   : > { %v11095_v18 = vpop.eup %11094  ;;  %7230 = vst [vmem:[%s12522_s20 + $0xbc0] sm:$0xff] %v6718_v6  ;;  %11114 = vlog2.f32 %v5183_v11  ;;  %v7865_v21 = vadd.f32 -0.99, %v11093_v16  ;;  %v5186_v23 = vsub.f32 1.0, %v11093_v16  ;;  %v584_v6 = vld [vmem:[%s12465_s8 + $0xc48] sm:$0xff] }
 0x65f   : > { %v11097_v20 = vpop.eup %11096  ;;  %11116 = vlog2.f32 %v7863_v13  ;;  %v1467_v22 = vmul.f32 0.6931472, %v11095_v18 }
 0x660   : > { %v11099_v7 = vpop.eup %11098  ;;  %11118 = vlog2.f32 %v5184_v15  ;;  %v1469_v24 = vmul.f32 0.6931472, %v11097_v20 }
 0x661   : > { %v11101_v25 = vpop.eup %11100  ;;  %11120 = vlog2.f32 %v7864_v17  ;;  %v2115_v26 = vmul.f32 %v13589_v2, %v1467_v22  ;;  %v1471_v27 = vmul.f32 0.6931472, %v11099_v7 }
 0x662   : > { %v11103_v28 = vpop.eup %11102  ;;  %11122 = vlog2.f32 %v5185_v19  ;;  %v2116_v29 = vmul.f32 %v13589_v2, %v1469_v24  ;;  %v1473_v30 = vmul.f32 0.6931472, %v11101_v25 }
 0x663   : > { %v11105_v32 = vpop.eup %11104  ;;  %11124 = vlog2.f32 %v7865_v21  ;;  %v3008_v33 = vmul.f32 1.442695, %v2115_v26  ;;  %v2117_v34 = vmul.f32 %v13589_v2, %v1471_v27  ;;  %v1475_v35 = vmul.f32 0.6931472, %v11103_v28 }
 0x664   : > { %v11107_v36 = vpop.eup %11106  ;;  %11126 = vlog2.f32 %v5186_v23  ;;  %v3010_v31 = vmul.f32 1.442695, %v2116_v29  ;;  %v2118_v37 = vmul.f32 %v13589_v2, %v1473_v30  ;;  %v1477_v38 = vmul.f32 0.6931472, %v11105_v32 }
 0x665   : > { %v11109_v39 = vpop.eup %11108  ;;  %11128 = vpow2.f32 %v3008_v33  ;;  %v3012_v40 = vmul.f32 1.442695, %v2117_v34  ;;  %v2119_v42 = vmul.f32 %v13589_v2, %v1475_v35  ;;  %v1479_v43 = vmul.f32 0.6931472, %v11107_v36 }
 0x666   : > { %v11111_v44 = vpop.eup %11110  ;;  %11130 = vpow2.f32 %v3010_v31  ;;  %v3014_v45 = vmul.f32 1.442695, %v2118_v37  ;;  %v2120_v46 = vmul.f32 %v13589_v2, %v1477_v38  ;;  %v1481_v41 = vmul.f32 0.6931472, %v11109_v39 }
 0x667   : > { %v11113_v47 = vpop.eup %11112  ;;  %11132 = vpow2.f32 %v3012_v40  ;;  %v3016_v14 = vmul.f32 1.442695, %v2119_v42  ;;  %v2121_v48 = vmul.f32 %v13589_v2, %v1479_v43  ;;  %v1483_v49 = vmul.f32 0.6931472, %v11111_v44 }
 0x668   : > { %v11115_v50 = vpop.eup %11114  ;;  %v4537_v51 = vmul.f32 0.6931472, %v11113_v47  ;;  %11134 = vpow2.f32 %v3014_v45  ;;  %v3018_v53 = vmul.f32 1.442695, %v2120_v46  ;;  %v2122_v54 = vmul.f32 %v13589_v2, %v1481_v41 }
 0x669   : > { %v11117_v55 = vpop.eup %11116  ;;  %v6073_v57 = vmul.f32 0.6931472, %v11115_v50  ;;  %11136 = vpow2.f32 %v3016_v14  ;;  %v3020_v58 = vmul.f32 1.442695, %v2121_v48  ;;  %v2123_v59 = vmul.f32 %v13589_v2, %v1483_v49  ;;  %v13686_v14 = vld [vmem:[#allocation5] ss:$0 sm:$0xff] }
 0x66a   : > { %v11119_v60 = vpop.eup %11118  ;;  %v4539_v61 = vmul.f32 0.6931472, %v11117_v55  ;;  %11138 = vpow2.f32 %v3018_v53  ;;  %v3022_v56 = vmul.f32 1.442695, %v2122_v54 }
 0x66b   : > { %v11121_v62 = vpop.eup %11120  ;;  %v6719_v63 = vsub.f32 %v4537_v51, %v6073_v57  ;;  %v6075_v0 = vmul.f32 0.6931472, %v11119_v60  ;;  %11140 = vpow2.f32 %v3020_v58  ;;  %v3024_v1 = vmul.f32 1.442695, %v2123_v59 }
 0x66c   : > { %v11123_v4 = vpop.eup %11122  ;;  %v4541_v5 = vmul.f32 0.6931472, %v11121_v62  ;;  %11142 = vpow2.f32 %v3022_v56 }
 0x66d   : > { %v11125_v9 = vpop.eup %11124  ;;  %7231 = vst [vmem:[%s12522_s20 + $0xbc8] sm:$0xff] %v6719_v63  ;;  %v6720_v2 = vsub.f32 %v4539_v61, %v6075_v0  ;;  %v6077_v10 = vmul.f32 0.6931472, %v11123_v4  ;;  %11144 = vpow2.f32 %v3024_v1 }
 0x66e   : > { %v11127_v11 = vpop.eup %11126  ;;  %v4543_v12 = vmul.f32 0.6931472, %v11125_v9  ;;  %11146 = vlog2.f32 %v581_v3 }
 0x66f   : > { %v11129_v13 = vpop.eup %11128  ;;  %7232 = vst [vmem:[%s12522_s20 + $0xbd0] sm:$0xff] %v6720_v2  ;;  %v6721_v15 = vsub.f32 %v4541_v5, %v6077_v10  ;;  %v6079_v16 = vmul.f32 0.6931472, %v11127_v11  ;;  %11148 = vlog2.f32 %v582_v8 }
 0x670   : > { %v11131_v17 = vpop.eup %11130  ;;  %v7866_v18 = vadd.f32 -0.99, %v11129_v13  ;;  %v5187_v19 = vsub.f32 1.0, %v11129_v13  ;;  %11150 = vlog2.f32 %v583_v52 }
 0x671   : > { %v11133_v20 = vpop.eup %11132  ;;  %7233 = vst [vmem:[%s12522_s20 + $0xbd8] sm:$0xff] %v6721_v15  ;;  %v6722_v21 = vsub.f32 %v4543_v12, %v6079_v16  ;;  %v7867_v22 = vadd.f32 -0.99, %v11131_v17  ;;  %v5188_v7 = vsub.f32 1.0, %v11131_v17  ;;  %11152 = vlog2.f32 %v584_v6 }
 0x672   : > { %v11135_v23 = vpop.eup %11134  ;;  %11154 = vlog2.f32 %v7866_v18  ;;  %v7868_v24 = vadd.f32 -0.99, %v11133_v20  ;;  %v5189_v26 = vsub.f32 1.0, %v11133_v20 }
 0x673   : > { %v11137_v25 = vpop.eup %11136  ;;  %7234 = vst [vmem:[%s12522_s20 + $0xbe0] sm:$0xff] %v6722_v21  ;;  %11156 = vlog2.f32 %v5187_v19  ;;  %v7869_v28 = vadd.f32 -0.99, %v11135_v23  ;;  %v5190_v30 = vsub.f32 1.0, %v11135_v23  ;;  %v585_v19 = vld [vmem:[%s12465_s8 + $0xc50] sm:$0xff] }
 0x674   : > { %v11139_v27 = vpop.eup %11138  ;;  %11158 = vlog2.f32 %v7867_v22  ;;  %v7870_v33 = vadd.f32 -0.99, %v11137_v25  ;;  %v5191_v35 = vsub.f32 1.0, %v11137_v25  ;;  %v587_v25 = vld [vmem:[%s12465_s8 + $0xc60] sm:$0xff] }
 0x675   : > { %v11141_v29 = vpop.eup %11140  ;;  %11160 = vlog2.f32 %v5188_v7  ;;  %v7871_v31 = vadd.f32 -0.99, %v11139_v27  ;;  %v5192_v38 = vsub.f32 1.0, %v11139_v27  ;;  %v586_v7 = vld [vmem:[%s12465_s8 + $0xc58] sm:$0xff] }
 0x676   : > { %v11143_v32 = vpop.eup %11142  ;;  %11162 = vlog2.f32 %v7868_v24  ;;  %v7872_v42 = vadd.f32 -0.99, %v11141_v29  ;;  %v5193_v45 = vsub.f32 1.0, %v11141_v29  ;;  %v588_v29 = vld [vmem:[%s12465_s8 + $0xc68] sm:$0xff] }
 0x677   : > { %v11145_v34 = vpop.eup %11144  ;;  %11164 = vlog2.f32 %v5189_v26  ;;  %v7873_v47 = vadd.f32 -0.99, %v11143_v32  ;;  %v5194_v53 = vsub.f32 1.0, %v11143_v32 }
 0x678   : > { %v11147_v36 = vpop.eup %11146  ;;  %11166 = vlog2.f32 %v7869_v28  ;;  %v7874_v58 = vadd.f32 -0.99, %v11145_v34  ;;  %v5195_v56 = vsub.f32 1.0, %v11145_v34 }
 0x679   : > { %v11149_v37 = vpop.eup %11148  ;;  %11168 = vlog2.f32 %v5190_v30  ;;  %v1485_v39 = vmul.f32 0.6931472, %v11147_v36 }
 0x67a   : > { %v11151_v40 = vpop.eup %11150  ;;  %11170 = vlog2.f32 %v7870_v33  ;;  %v1487_v43 = vmul.f32 0.6931472, %v11149_v37  ;;  %v589_v33 = vld [vmem:[%s12465_s8 + $0xc70] sm:$0xff] }
 0x67b   : > { %v11153_v44 = vpop.eup %11152  ;;  %11172 = vlog2.f32 %v5191_v35  ;;  %v1489_v46 = vmul.f32 0.6931472, %v11151_v40  ;;  %v2124_v48 = vmul.f32 %v13686_v14, %v1485_v39  ;;  %v591_v39 = vld [vmem:[%s12465_s8 + $0xc80] sm:$0xff] }
 0x67c   : > { %v11155_v41 = vpop.eup %11154  ;;  %11174 = vlog2.f32 %v7871_v31  ;;  %v1491_v49 = vmul.f32 0.6931472, %v11153_v44  ;;  %v2125_v54 = vmul.f32 %v13686_v14, %v1487_v43  ;;  %v590_v31 = vld [vmem:[%s12465_s8 + $0xc78] sm:$0xff]  ;;  %v592_v44 = vld [vmem:[%s12465_s8 + $0xc88] sm:$0xff] }
 0x67d   : > { %v11157_v50 = vpop.eup %11156  ;;  %v4545_v51 = vmul.f32 0.6931472, %v11155_v41  ;;  %11176 = vlog2.f32 %v5192_v38  ;;  %v2126_v59 = vmul.f32 %v13686_v14, %v1489_v46  ;;  %v3026_v3 = vmul.f32 1.442695, %v2124_v48  ;;  %v593_v41 = vld [vmem:[%s12465_s8 + $0xc90] sm:$0xff] }
 0x67e   : > { %v11159_v55 = vpop.eup %11158  ;;  %v6081_v57 = vmul.f32 0.6931472, %v11157_v50  ;;  %11178 = vlog2.f32 %v7872_v42  ;;  %v2127_v62 = vmul.f32 %v13686_v14, %v1491_v49  ;;  %v3028_v8 = vmul.f32 1.442695, %v2125_v54 }
 0x67f   : > { %v11161_v60 = vpop.eup %11160  ;;  %v4547_v61 = vmul.f32 0.6931472, %v11159_v55  ;;  %11180 = vlog2.f32 %v5193_v45  ;;  %v3030_v52 = vmul.f32 1.442695, %v2126_v59 }
 0x680   : > { %v11163_v63 = vpop.eup %11162  ;;  %v6723_v0 = vsub.f32 %v4545_v51, %v6081_v57  ;;  %v6083_v1 = vmul.f32 0.6931472, %v11161_v60  ;;  %11182 = vlog2.f32 %v7873_v47  ;;  %v3032_v6 = vmul.f32 1.442695, %v2127_v62 }
 0x681   : > { %v11165_v4 = vpop.eup %11164  ;;  %v4549_v5 = vmul.f32 0.6931472, %v11163_v63  ;;  %11184 = vlog2.f32 %v5194_v53 }
 0x682   : > { %v11167_v9 = vpop.eup %11166  ;;  %7235 = vst [vmem:[%s12522_s20 + $0xbe8] sm:$0xff] %v6723_v0  ;;  %v6724_v2 = vsub.f32 %v4547_v61, %v6083_v1  ;;  %v6085_v10 = vmul.f32 0.6931472, %v11165_v4  ;;  %11186 = vlog2.f32 %v7874_v58 }
 0x683   : > { %v11169_v11 = vpop.eup %11168  ;;  %v4551_v12 = vmul.f32 0.6931472, %v11167_v9  ;;  %11188 = vlog2.f32 %v5195_v56 }
 0x684   : > { %v11171_v13 = vpop.eup %11170  ;;  %7236 = vst [vmem:[%s12522_s20 + $0xbf0] sm:$0xff] %v6724_v2  ;;  %v6725_v15 = vsub.f32 %v4549_v5, %v6085_v10  ;;  %v6087_v16 = vmul.f32 0.6931472, %v11169_v11  ;;  %11190 = vpow2.f32 %v3026_v3 }
 0x685   : > { %v11173_v17 = vpop.eup %11172  ;;  %v4553_v18 = vmul.f32 0.6931472, %v11171_v13  ;;  %11192 = vpow2.f32 %v3028_v8 }
 0x686   : > { %v11175_v20 = vpop.eup %11174  ;;  %7237 = vst [vmem:[%s12522_s20 + $0xbf8] sm:$0xff] %v6725_v15  ;;  %v6726_v21 = vsub.f32 %v4551_v12, %v6087_v16  ;;  %v6089_v22 = vmul.f32 0.6931472, %v11173_v17  ;;  %11194 = vpow2.f32 %v3030_v52 }
 0x687   : > { %v11177_v23 = vpop.eup %11176  ;;  %v4555_v24 = vmul.f32 0.6931472, %v11175_v20  ;;  %11196 = vpow2.f32 %v3032_v6 }
 0x688   : > { %v11179_v26 = vpop.eup %11178  ;;  %7238 = vst [vmem:[%s12522_s20 + $0xc00] sm:$0xff] %v6726_v21  ;;  %v6727_v27 = vsub.f32 %v4553_v18, %v6089_v22  ;;  %v6091_v28 = vmul.f32 0.6931472, %v11177_v23  ;;  %11198 = vlog2.f32 %v585_v19 }
 0x689   : > { %v11181_v30 = vpop.eup %11180  ;;  %v4557_v32 = vmul.f32 0.6931472, %v11179_v26  ;;  %11200 = vlog2.f32 %v586_v7 }
 0x68a   : > { %v11183_v34 = vpop.eup %11182  ;;  %7239 = vst [vmem:[%s12522_s20 + $0xc08] sm:$0xff] %v6727_v27  ;;  %v6728_v35 = vsub.f32 %v4555_v24, %v6091_v28  ;;  %v6093_v36 = vmul.f32 0.6931472, %v11181_v30  ;;  %11202 = vlog2.f32 %v587_v25 }
 0x68b   : > { %v11185_v37 = vpop.eup %11184  ;;  %v4559_v38 = vmul.f32 0.6931472, %v11183_v34  ;;  %11204 = vlog2.f32 %v588_v29 }
 0x68c   : > { %v11187_v40 = vpop.eup %11186  ;;  %7240 = vst [vmem:[%s12522_s20 + $0xc10] sm:$0xff] %v6728_v35  ;;  %v6729_v42 = vsub.f32 %v4557_v32, %v6093_v36  ;;  %v6095_v43 = vmul.f32 0.6931472, %v11185_v37  ;;  %11206 = vlog2.f32 %v589_v33 }
 0x68d   : > { %v11189_v45 = vpop.eup %11188  ;;  %v4561_v46 = vmul.f32 0.6931472, %v11187_v40  ;;  %11208 = vlog2.f32 %v590_v31 }
 0x68e   : > { %v11191_v47 = vpop.eup %11190  ;;  %7241 = vst [vmem:[%s12522_s20 + $0xc18] sm:$0xff] %v6729_v42  ;;  %v6730_v48 = vsub.f32 %v4559_v38, %v6095_v43  ;;  %v6097_v49 = vmul.f32 0.6931472, %v11189_v45  ;;  %11210 = vlog2.f32 %v591_v39 }
 0x68f   : > { %v11193_v50 = vpop.eup %11192  ;;  %v7875_v51 = vadd.f32 -0.99, %v11191_v47  ;;  %v5196_v53 = vsub.f32 1.0, %v11191_v47  ;;  %11212 = vlog2.f32 %v592_v44 }
 0x690   : > { %v11195_v54 = vpop.eup %11194  ;;  %7242 = vst [vmem:[%s12522_s20 + $0xc20] sm:$0xff] %v6730_v48  ;;  %v6731_v55 = vsub.f32 %v4561_v46, %v6097_v49  ;;  %v7876_v57 = vadd.f32 -0.99, %v11193_v50  ;;  %v5197_v58 = vsub.f32 1.0, %v11193_v50  ;;  %11214 = vlog2.f32 %v593_v41  ;;  %v594_v46 = vld [vmem:[%s12465_s8 + $0xc98] sm:$0xff]  ;;  %v595_v48 = vld [vmem:[%s12465_s8 + $0xca0] sm:$0xff] }
 0x691   : > { %v11197_v59 = vpop.eup %11196  ;;  %11216 = vlog2.f32 %v7875_v51  ;;  %v7877_v60 = vadd.f32 -0.99, %v11195_v54  ;;  %v5198_v56 = vsub.f32 1.0, %v11195_v54 }
 0x692   : > { %v11199_v61 = vpop.eup %11198  ;;  %7243 = vst [vmem:[%s12522_s20 + $0xc28] sm:$0xff] %v6731_v55  ;;  %11218 = vlog2.f32 %v5196_v53  ;;  %v7878_v63 = vadd.f32 -0.99, %v11197_v59  ;;  %v5199_v3 = vsub.f32 1.0, %v11197_v59  ;;  %v596_v53 = vld [vmem:[%s12465_s8 + $0xca8] sm:$0xff] }
 0x693   : > { %v11201_v62 = vpop.eup %11200  ;;  %11220 = vlog2.f32 %v7876_v57  ;;  %v1493_v0 = vmul.f32 0.6931472, %v11199_v61  ;;  %v597_v57 = vld [vmem:[%s12465_s8 + $0xcb0] sm:$0xff] }
 0x694   : > { %v11203_v1 = vpop.eup %11202  ;;  %11222 = vlog2.f32 %v5197_v58  ;;  %v1495_v4 = vmul.f32 0.6931472, %v11201_v62 }
 0x695   : > { %v11205_v5 = vpop.eup %11204  ;;  %11224 = vlog2.f32 %v7877_v60  ;;  %v2128_v8 = vmul.f32 %v13686_v14, %v1493_v0  ;;  %v1497_v9 = vmul.f32 0.6931472, %v11203_v1 }
 0x696   : > { %v11207_v2 = vpop.eup %11206  ;;  %11226 = vlog2.f32 %v5198_v56  ;;  %v2129_v10 = vmul.f32 %v13686_v14, %v1495_v4  ;;  %v1499_v52 = vmul.f32 0.6931472, %v11205_v5 }
 0x697   : > { %v11209_v11 = vpop.eup %11208  ;;  %11228 = vlog2.f32 %v7878_v63  ;;  %v3034_v12 = vmul.f32 1.442695, %v2128_v8  ;;  %v2130_v6 = vmul.f32 %v13686_v14, %v1497_v9  ;;  %v1501_v13 = vmul.f32 0.6931472, %v11207_v2 }
 0x698   : > { %v11211_v15 = vpop.eup %11210  ;;  %11230 = vlog2.f32 %v5199_v3  ;;  %v3036_v16 = vmul.f32 1.442695, %v2129_v10  ;;  %v2131_v17 = vmul.f32 %v13686_v14, %v1499_v52  ;;  %v1503_v18 = vmul.f32 0.6931472, %v11209_v11 }
 0x699   : > { %v11213_v19 = vpop.eup %11212  ;;  %11232 = vpow2.f32 %v3034_v12  ;;  %v3038_v20 = vmul.f32 1.442695, %v2130_v6  ;;  %v2132_v21 = vmul.f32 %v13686_v14, %v1501_v13  ;;  %v1505_v22 = vmul.f32 0.6931472, %v11211_v15 }
 0x69a   : > { %v11215_v7 = vpop.eup %11214  ;;  %11234 = vpow2.f32 %v3036_v16  ;;  %v3040_v23 = vmul.f32 1.442695, %v2131_v17  ;;  %v2133_v24 = vmul.f32 %v13686_v14, %v1503_v18  ;;  %v1507_v25 = vmul.f32 0.6931472, %v11213_v19 }
 0x69b   : > { %v11217_v26 = vpop.eup %11216  ;;  %11236 = vpow2.f32 %v3038_v20  ;;  %v3042_v27 = vmul.f32 1.442695, %v2132_v21  ;;  %v2134_v28 = vmul.f32 %v13686_v14, %v1505_v22  ;;  %v1509_v29 = vmul.f32 0.6931472, %v11215_v7 }
 0x69c   : > { %v11219_v30 = vpop.eup %11218  ;;  %v4563_v32 = vmul.f32 0.6931472, %v11217_v26  ;;  %11238 = vpow2.f32 %v3040_v23  ;;  %v3044_v33 = vmul.f32 1.442695, %v2133_v24  ;;  %v2135_v34 = vmul.f32 %v13686_v14, %v1507_v25 }
 0x69d   : > { %v11221_v35 = vpop.eup %11220  ;;  %v6099_v36 = vmul.f32 0.6931472, %v11219_v30  ;;  %11240 = vpow2.f32 %v3042_v27  ;;  %v3046_v31 = vmul.f32 1.442695, %v2134_v28  ;;  %v2136_v37 = vmul.f32 %v13686_v14, %v1509_v29 }
 0x69e   : > { %v11223_v38 = vpop.eup %11222  ;;  %v4565_v39 = vmul.f32 0.6931472, %v11221_v35  ;;  %11242 = vpow2.f32 %v3044_v33  ;;  %v3048_v40 = vmul.f32 1.442695, %v2135_v34 }
 0x69f   : > { %v11225_v42 = vpop.eup %11224  ;;  %v6732_v43 = vsub.f32 %v4563_v32, %v6099_v36  ;;  %v6101_v44 = vmul.f32 0.6931472, %v11223_v38  ;;  %11244 = vpow2.f32 %v3046_v31  ;;  %v3050_v45 = vmul.f32 1.442695, %v2136_v37 }
 0x6a0   : > { %v11227_v41 = vpop.eup %11226  ;;  %v4567_v47 = vmul.f32 0.6931472, %v11225_v42  ;;  %11246 = vpow2.f32 %v3048_v40 }
 0x6a1   : > { %v11229_v49 = vpop.eup %11228  ;;  %7244 = vst [vmem:[%s12522_s20 + $0xc30] sm:$0xff] %v6732_v43  ;;  %v6733_v50 = vsub.f32 %v4565_v39, %v6101_v44  ;;  %v6103_v51 = vmul.f32 0.6931472, %v11227_v41  ;;  %11248 = vpow2.f32 %v3050_v45 }
 0x6a2   : > { %v11231_v54 = vpop.eup %11230  ;;  %v4569_v55 = vmul.f32 0.6931472, %v11229_v49  ;;  %11250 = vlog2.f32 %v594_v46 }
 0x6a3   : > { %v11233_v58 = vpop.eup %11232  ;;  %7245 = vst [vmem:[%s12522_s20 + $0xc38] sm:$0xff] %v6733_v50  ;;  %v6734_v59 = vsub.f32 %v4567_v47, %v6103_v51  ;;  %v6105_v60 = vmul.f32 0.6931472, %v11231_v54  ;;  %11252 = vlog2.f32 %v595_v48 }
 0x6a4   : > { %v11235_v61 = vpop.eup %11234  ;;  %v7879_v56 = vadd.f32 -0.99, %v11233_v58  ;;  %v5200_v62 = vsub.f32 1.0, %v11233_v58  ;;  %11254 = vlog2.f32 %v596_v53 }
 0x6a5   : > { %v11237_v63 = vpop.eup %11236  ;;  %7246 = vst [vmem:[%s12522_s20 + $0xc40] sm:$0xff] %v6734_v59  ;;  %v6735_v0 = vsub.f32 %v4569_v55, %v6105_v60  ;;  %v7880_v1 = vadd.f32 -0.99, %v11235_v61  ;;  %v5201_v3 = vsub.f32 1.0, %v11235_v61  ;;  %11256 = vlog2.f32 %v597_v57 }
 0x6a6   : > { %v11239_v4 = vpop.eup %11238  ;;  %11258 = vlog2.f32 %v7879_v56  ;;  %v7881_v5 = vadd.f32 -0.99, %v11237_v63  ;;  %v5202_v9 = vsub.f32 1.0, %v11237_v63 }
 0x6a7   : > { %v11241_v8 = vpop.eup %11240  ;;  %7247 = vst [vmem:[%s12522_s20 + $0xc48] sm:$0xff] %v6735_v0  ;;  %11260 = vlog2.f32 %v5200_v62  ;;  %v7882_v10 = vadd.f32 -0.99, %v11239_v4  ;;  %v5203_v11 = vsub.f32 1.0, %v11239_v4  ;;  %v598_v62 = vld [vmem:[%s12465_s8 + $0xcb8] sm:$0xff] }
 0x6a8   : > { %v11243_v2 = vpop.eup %11242  ;;  %11262 = vlog2.f32 %v7880_v1  ;;  %v7883_v6 = vadd.f32 -0.99, %v11241_v8  ;;  %v5204_v15 = vsub.f32 1.0, %v11241_v8  ;;  %v600_v8 = vld [vmem:[%s12465_s8 + $0xcc8] sm:$0xff] }
 0x6a9   : > { %v11245_v52 = vpop.eup %11244  ;;  %11264 = vlog2.f32 %v5201_v3  ;;  %v7884_v17 = vadd.f32 -0.99, %v11243_v2  ;;  %v5205_v19 = vsub.f32 1.0, %v11243_v2  ;;  %v599_v3 = vld [vmem:[%s12465_s8 + $0xcc0] sm:$0xff] }
 0x6aa   : > { %v11247_v12 = vpop.eup %11246  ;;  %11266 = vlog2.f32 %v7881_v5  ;;  %v7885_v22 = vadd.f32 -0.99, %v11245_v52  ;;  %v5206_v24 = vsub.f32 1.0, %v11245_v52  ;;  %v601_v52 = vld [vmem:[%s12465_s8 + $0xcd0] sm:$0xff] }
 0x6ab   : > { %v11249_v13 = vpop.eup %11248  ;;  %11268 = vlog2.f32 %v5202_v9  ;;  %v7886_v27 = vadd.f32 -0.99, %v11247_v12  ;;  %v5207_v33 = vsub.f32 1.0, %v11247_v12 }
 0x6ac   : > { %v11251_v16 = vpop.eup %11250  ;;  %11270 = vlog2.f32 %v7882_v10  ;;  %v7887_v31 = vadd.f32 -0.99, %v11249_v13  ;;  %v5208_v40 = vsub.f32 1.0, %v11249_v13 }
 0x6ad   : > { %v11253_v18 = vpop.eup %11252  ;;  %11272 = vlog2.f32 %v5203_v11  ;;  %v1511_v20 = vmul.f32 0.6931472, %v11251_v16 }
 0x6ae   : > { %v11255_v21 = vpop.eup %11254  ;;  %11274 = vlog2.f32 %v7883_v6  ;;  %v1513_v7 = vmul.f32 0.6931472, %v11253_v18  ;;  %v602_v6 = vld [vmem:[%s12465_s8 + $0xcd8] sm:$0xff] }
 0x6af   : > { %v11257_v23 = vpop.eup %11256  ;;  %11276 = vlog2.f32 %v5204_v15  ;;  %v1515_v25 = vmul.f32 0.6931472, %v11255_v21  ;;  %v2137_v28 = vmul.f32 %v13686_v14, %v1511_v20  ;;  %v604_v20 = vld [vmem:[%s12465_s8 + $0xce8] sm:$0xff] }
 0x6b0   : > { %v11259_v26 = vpop.eup %11258  ;;  %11278 = vlog2.f32 %v7884_v17  ;;  %v1517_v29 = vmul.f32 0.6931472, %v11257_v23  ;;  %v2138_v34 = vmul.f32 %v13686_v14, %v1513_v7  ;;  %v603_v17 = vld [vmem:[%s12465_s8 + $0xce0] sm:$0xff]  ;;  %v605_v23 = vld [vmem:[%s12465_s8 + $0xcf0] sm:$0xff] }
 0x6b1   : > { %v11261_v30 = vpop.eup %11260  ;;  %v4571_v32 = vmul.f32 0.6931472, %v11259_v26  ;;  %11280 = vlog2.f32 %v5205_v19  ;;  %v2139_v37 = vmul.f32 %v13686_v14, %v1515_v25  ;;  %v3052_v46 = vmul.f32 1.442695, %v2137_v28  ;;  %v606_v26 = vld [vmem:[%s12465_s8 + $0xcf8] sm:$0xff] }
 0x6b2   : > { %v11263_v35 = vpop.eup %11262  ;;  %v6107_v36 = vmul.f32 0.6931472, %v11261_v30  ;;  %11282 = vlog2.f32 %v7885_v22  ;;  %v2140_v42 = vmul.f32 %v13686_v14, %v1517_v29  ;;  %v3054_v48 = vmul.f32 1.442695, %v2138_v34 }
 0x6b3   : > { %v11265_v38 = vpop.eup %11264  ;;  %v4573_v39 = vmul.f32 0.6931472, %v11263_v35  ;;  %11284 = vlog2.f32 %v5206_v24  ;;  %v3056_v53 = vmul.f32 1.442695, %v2139_v37 }
 0x6b4   : > { %v11267_v43 = vpop.eup %11266  ;;  %v6736_v44 = vsub.f32 %v4571_v32, %v6107_v36  ;;  %v6109_v45 = vmul.f32 0.6931472, %v11265_v38  ;;  %11286 = vlog2.f32 %v7886_v27  ;;  %v3058_v57 = vmul.f32 1.442695, %v2140_v42 }
 0x6b5   : > { %v11269_v41 = vpop.eup %11268  ;;  %v4575_v47 = vmul.f32 0.6931472, %v11267_v43  ;;  %11288 = vlog2.f32 %v5207_v33 }
 0x6b6   : > { %v11271_v49 = vpop.eup %11270  ;;  %7248 = vst [vmem:[%s12522_s20 + $0xc50] sm:$0xff] %v6736_v44  ;;  %v6737_v50 = vsub.f32 %v4573_v39, %v6109_v45  ;;  %v6111_v51 = vmul.f32 0.6931472, %v11269_v41  ;;  %11290 = vlog2.f32 %v7887_v31 }
 0x6b7   : > { %v11273_v54 = vpop.eup %11272  ;;  %v4577_v55 = vmul.f32 0.6931472, %v11271_v49  ;;  %11292 = vlog2.f32 %v5208_v40 }
 0x6b8   : > { %v11275_v58 = vpop.eup %11274  ;;  %7249 = vst [vmem:[%s12522_s20 + $0xc58] sm:$0xff] %v6737_v50  ;;  %v6738_v59 = vsub.f32 %v4575_v47, %v6111_v51  ;;  %v6113_v60 = vmul.f32 0.6931472, %v11273_v54  ;;  %11294 = vpow2.f32 %v3052_v46 }
 0x6b9   : > { %v11277_v61 = vpop.eup %11276  ;;  %v4579_v56 = vmul.f32 0.6931472, %v11275_v58  ;;  %11296 = vpow2.f32 %v3054_v48 }
 0x6ba   : > { %v11279_v63 = vpop.eup %11278  ;;  %7250 = vst [vmem:[%s12522_s20 + $0xc60] sm:$0xff] %v6738_v59  ;;  %v6739_v0 = vsub.f32 %v4577_v55, %v6113_v60  ;;  %v6115_v1 = vmul.f32 0.6931472, %v11277_v61  ;;  %11298 = vpow2.f32 %v3056_v53 }
 0x6bb   : > { %v11281_v4 = vpop.eup %11280  ;;  %v4581_v5 = vmul.f32 0.6931472, %v11279_v63  ;;  %11300 = vpow2.f32 %v3058_v57 }
 0x6bc   : > { %v11283_v9 = vpop.eup %11282  ;;  %7251 = vst [vmem:[%s12522_s20 + $0xc68] sm:$0xff] %v6739_v0  ;;  %v6740_v2 = vsub.f32 %v4579_v56, %v6115_v1  ;;  %v6117_v10 = vmul.f32 0.6931472, %v11281_v4  ;;  %11302 = vlog2.f32 %v598_v62 }
 0x6bd   : > { %v11285_v11 = vpop.eup %11284  ;;  %v4583_v12 = vmul.f32 0.6931472, %v11283_v9  ;;  %11304 = vlog2.f32 %v599_v3 }
 0x6be   : > { %v11287_v13 = vpop.eup %11286  ;;  %7252 = vst [vmem:[%s12522_s20 + $0xc70] sm:$0xff] %v6740_v2  ;;  %v6741_v15 = vsub.f32 %v4581_v5, %v6117_v10  ;;  %v6119_v16 = vmul.f32 0.6931472, %v11285_v11  ;;  %11306 = vlog2.f32 %v600_v8 }
 0x6bf   : > { %v11289_v18 = vpop.eup %11288  ;;  %v4585_v19 = vmul.f32 0.6931472, %v11287_v13  ;;  %11308 = vlog2.f32 %v601_v52 }
 0x6c0   : > { %v11291_v21 = vpop.eup %11290  ;;  %7253 = vst [vmem:[%s12522_s20 + $0xc78] sm:$0xff] %v6741_v15  ;;  %v6742_v22 = vsub.f32 %v4583_v12, %v6119_v16  ;;  %v6121_v7 = vmul.f32 0.6931472, %v11289_v18  ;;  %11310 = vlog2.f32 %v602_v6 }
 0x6c1   : > { %v11293_v24 = vpop.eup %11292  ;;  %v4587_v25 = vmul.f32 0.6931472, %v11291_v21  ;;  %11312 = vlog2.f32 %v603_v17 }
 0x6c2   : > { %v11295_v27 = vpop.eup %11294  ;;  %7254 = vst [vmem:[%s12522_s20 + $0xc80] sm:$0xff] %v6742_v22  ;;  %v6743_v28 = vsub.f32 %v4585_v19, %v6121_v7  ;;  %v6123_v29 = vmul.f32 0.6931472, %v11293_v24  ;;  %11314 = vlog2.f32 %v604_v20 }
 0x6c3   : > { %v11297_v30 = vpop.eup %11296  ;;  %v7888_v32 = vadd.f32 -0.99, %v11295_v27  ;;  %v5209_v33 = vsub.f32 1.0, %v11295_v27  ;;  %11316 = vlog2.f32 %v605_v23 }
 0x6c4   : > { %v11299_v34 = vpop.eup %11298  ;;  %7255 = vst [vmem:[%s12522_s20 + $0xc88] sm:$0xff] %v6743_v28  ;;  %v6744_v35 = vsub.f32 %v4587_v25, %v6123_v29  ;;  %v7889_v36 = vadd.f32 -0.99, %v11297_v30  ;;  %v5210_v31 = vsub.f32 1.0, %v11297_v30  ;;  %11318 = vlog2.f32 %v606_v26  ;;  %v607_v25 = vld [vmem:[%s12465_s8 + $0xd00] sm:$0xff]  ;;  %v608_v28 = vld [vmem:[%s12465_s8 + $0xd08] sm:$0xff] }
 0x6c5   : > { %v11301_v37 = vpop.eup %11300  ;;  %11320 = vlog2.f32 %v7888_v32  ;;  %v7890_v38 = vadd.f32 -0.99, %v11299_v34  ;;  %v5211_v40 = vsub.f32 1.0, %v11299_v34 }
 0x6c6   : > { %v11303_v39 = vpop.eup %11302  ;;  %7256 = vst [vmem:[%s12522_s20 + $0xc90] sm:$0xff] %v6744_v35  ;;  %11322 = vlog2.f32 %v5209_v33  ;;  %v7891_v43 = vadd.f32 -0.99, %v11301_v37  ;;  %v5212_v46 = vsub.f32 1.0, %v11301_v37  ;;  %v609_v33 = vld [vmem:[%s12465_s8 + $0xd10] sm:$0xff] }
 0x6c7   : > { %v11305_v42 = vpop.eup %11304  ;;  %11324 = vlog2.f32 %v7889_v36  ;;  %v1519_v44 = vmul.f32 0.6931472, %v11303_v39  ;;  %v610_v36 = vld [vmem:[%s12465_s8 + $0xd18] sm:$0xff] }
 0x6c8   : > { %v11307_v45 = vpop.eup %11306  ;;  %11326 = vlog2.f32 %v5210_v31  ;;  %v1521_v41 = vmul.f32 0.6931472, %v11305_v42 }
 0x6c9   : > { %v11309_v47 = vpop.eup %11308  ;;  %11328 = vlog2.f32 %v7890_v38  ;;  %v2141_v48 = vmul.f32 %v13686_v14, %v1519_v44  ;;  %v1523_v49 = vmul.f32 0.6931472, %v11307_v45 }
 0x6ca   : > { %v11311_v50 = vpop.eup %11310  ;;  %11330 = vlog2.f32 %v5211_v40  ;;  %v2142_v51 = vmul.f32 %v13686_v14, %v1521_v41  ;;  %v1525_v53 = vmul.f32 0.6931472, %v11309_v47 }
 0x6cb   : > { %v11313_v54 = vpop.eup %11312  ;;  %11332 = vlog2.f32 %v7891_v43  ;;  %v3060_v55 = vmul.f32 1.442695, %v2141_v48  ;;  %v2143_v57 = vmul.f32 %v13686_v14, %v1523_v49  ;;  %v1527_v58 = vmul.f32 0.6931472, %v11311_v50 }
 0x6cc   : > { %v11315_v59 = vpop.eup %11314  ;;  %11334 = vlog2.f32 %v5212_v46  ;;  %v3062_v60 = vmul.f32 1.442695, %v2142_v51  ;;  %v2144_v61 = vmul.f32 %v13686_v14, %v1525_v53  ;;  %v1529_v56 = vmul.f32 0.6931472, %v11313_v54 }
 0x6cd   : > { %v11317_v62 = vpop.eup %11316  ;;  %11336 = vpow2.f32 %v3060_v55  ;;  %v3064_v63 = vmul.f32 1.442695, %v2143_v57  ;;  %v2145_v0 = vmul.f32 %v13686_v14, %v1527_v58  ;;  %v1531_v1 = vmul.f32 0.6931472, %v11315_v59 }
 0x6ce   : > { %v11319_v3 = vpop.eup %11318  ;;  %11338 = vpow2.f32 %v3062_v60  ;;  %v3066_v4 = vmul.f32 1.442695, %v2144_v61  ;;  %v2146_v5 = vmul.f32 %v13686_v14, %v1529_v56  ;;  %v1533_v8 = vmul.f32 0.6931472, %v11317_v62 }
 0x6cf   : > { %v11321_v9 = vpop.eup %11320  ;;  %11340 = vpow2.f32 %v3064_v63  ;;  %v3068_v2 = vmul.f32 1.442695, %v2145_v0  ;;  %v2147_v10 = vmul.f32 %v13686_v14, %v1531_v1  ;;  %v1535_v52 = vmul.f32 0.6931472, %v11319_v3 }
 0x6d0   : > { %v11323_v11 = vpop.eup %11322  ;;  %v4589_v12 = vmul.f32 0.6931472, %v11321_v9  ;;  %11342 = vpow2.f32 %v3066_v4  ;;  %v3070_v6 = vmul.f32 1.442695, %v2146_v5  ;;  %v2148_v13 = vmul.f32 %v13686_v14, %v1533_v8 }
 0x6d1   : > { %v11325_v15 = vpop.eup %11324  ;;  %v6125_v16 = vmul.f32 0.6931472, %v11323_v11  ;;  %11344 = vpow2.f32 %v3068_v2  ;;  %v3072_v17 = vmul.f32 1.442695, %v2147_v10  ;;  %v2149_v18 = vmul.f32 %v13686_v14, %v1535_v52 }
 0x6d2   : > { %v11327_v19 = vpop.eup %11326  ;;  %v4591_v20 = vmul.f32 0.6931472, %v11325_v15  ;;  %11346 = vpow2.f32 %v3070_v6  ;;  %v3074_v21 = vmul.f32 1.442695, %v2148_v13 }
 0x6d3   : > { %v11329_v22 = vpop.eup %11328  ;;  %v6745_v7 = vsub.f32 %v4589_v12, %v6125_v16  ;;  %v6127_v23 = vmul.f32 0.6931472, %v11327_v19  ;;  %11348 = vpow2.f32 %v3072_v17  ;;  %v3076_v24 = vmul.f32 1.442695, %v2149_v18 }
 0x6d4   : > { %v11331_v26 = vpop.eup %11330  ;;  %v4593_v27 = vmul.f32 0.6931472, %v11329_v22  ;;  %11350 = vpow2.f32 %v3074_v21 }
 0x6d5   : > { %v11333_v29 = vpop.eup %11332  ;;  %7257 = vst [vmem:[%s12522_s20 + $0xc98] sm:$0xff] %v6745_v7  ;;  %v6746_v30 = vsub.f32 %v4591_v20, %v6127_v23  ;;  %v6129_v32 = vmul.f32 0.6931472, %v11331_v26  ;;  %11352 = vpow2.f32 %v3076_v24 }
 0x6d6   : > { %v11335_v34 = vpop.eup %11334  ;;  %v4595_v35 = vmul.f32 0.6931472, %v11333_v29  ;;  %11354 = vlog2.f32 %v607_v25 }
 0x6d7   : > { %v11337_v31 = vpop.eup %11336  ;;  %7258 = vst [vmem:[%s12522_s20 + $0xca0] sm:$0xff] %v6746_v30  ;;  %v6747_v37 = vsub.f32 %v4593_v27, %v6129_v32  ;;  %v6131_v38 = vmul.f32 0.6931472, %v11335_v34  ;;  %11356 = vlog2.f32 %v608_v28 }
 0x6d8   : > { %v11339_v39 = vpop.eup %11338  ;;  %v7892_v40 = vadd.f32 -0.99, %v11337_v31  ;;  %v5213_v42 = vsub.f32 1.0, %v11337_v31  ;;  %11358 = vlog2.f32 %v609_v33 }
 0x6d9   : > { %v11341_v43 = vpop.eup %11340  ;;  %7259 = vst [vmem:[%s12522_s20 + $0xca8] sm:$0xff] %v6747_v37  ;;  %v6748_v44 = vsub.f32 %v4595_v35, %v6131_v38  ;;  %v7893_v45 = vadd.f32 -0.99, %v11339_v39  ;;  %v5214_v46 = vsub.f32 1.0, %v11339_v39  ;;  %11360 = vlog2.f32 %v610_v36 }
 0x6da   : > { %v11343_v41 = vpop.eup %11342  ;;  %11362 = vlog2.f32 %v7892_v40  ;;  %v7894_v47 = vadd.f32 -0.99, %v11341_v43  ;;  %v5215_v49 = vsub.f32 1.0, %v11341_v43  ;;  %v611_v40 = vld [vmem:[%s12465_s8 + $0xd20] sm:$0xff] }
 0x6db   : > { %v11345_v48 = vpop.eup %11344  ;;  %7260 = vst [vmem:[%s12522_s20 + $0xcb0] sm:$0xff] %v6748_v44  ;;  %11364 = vlog2.f32 %v5213_v42  ;;  %v7895_v51 = vadd.f32 -0.99, %v11343_v41  ;;  %v5216_v54 = vsub.f32 1.0, %v11343_v41 }
 0x6dc   : > { %v11347_v50 = vpop.eup %11346  ;;  %11366 = vlog2.f32 %v7893_v45  ;;  %v7896_v57 = vadd.f32 -0.99, %v11345_v48  ;;  %v5217_v59 = vsub.f32 1.0, %v11345_v48  ;;  %v612_v45 = vld [vmem:[%s12465_s8 + $0xd28] sm:$0xff] }
 0x6dd   : > { %v11349_v53 = vpop.eup %11348  ;;  %11368 = vlog2.f32 %v5214_v46  ;;  %v7897_v61 = vadd.f32 -0.99, %v11347_v50  ;;  %v5218_v62 = vsub.f32 1.0, %v11347_v50 }
 0x6de   : > { %v11351_v55 = vpop.eup %11350  ;;  %11370 = vlog2.f32 %v7894_v47  ;;  %v7898_v1 = vadd.f32 -0.99, %v11349_v53  ;;  %v5219_v5 = vsub.f32 1.0, %v11349_v53  ;;  %v613_v47 = vld [vmem:[%s12465_s8 + $0xd30] sm:$0xff] }
 0x6df   : > { %v11353_v58 = vpop.eup %11352  ;;  %11372 = vlog2.f32 %v5215_v49  ;;  %v7899_v2 = vadd.f32 -0.99, %v11351_v55  ;;  %v5220_v6 = vsub.f32 1.0, %v11351_v55  ;;  %v615_v55 = vld [vmem:[%s12465_s8 + $0xd40] sm:$0xff] }
 0x6e0   : > { %v11355_v60 = vpop.eup %11354  ;;  %11374 = vlog2.f32 %v7895_v51  ;;  %v7900_v17 = vadd.f32 -0.99, %v11353_v58  ;;  %v5221_v21 = vsub.f32 1.0, %v11353_v58  ;;  %v614_v51 = vld [vmem:[%s12465_s8 + $0xd38] sm:$0xff] }
 0x6e1   : > { %v11357_v56 = vpop.eup %11356  ;;  %11376 = vlog2.f32 %v5216_v54  ;;  %v1537_v63 = vmul.f32 0.6931472, %v11355_v60  ;;  %v616_v60 = vld [vmem:[%s12465_s8 + $0xd48] sm:$0xff] }
 0x6e2   : > { %v11359_v0 = vpop.eup %11358  ;;  %11378 = vlog2.f32 %v7896_v57  ;;  %v1539_v3 = vmul.f32 0.6931472, %v11357_v56 }
 0x6e3   : > { %v11361_v4 = vpop.eup %11360  ;;  %11380 = vlog2.f32 %v5217_v59  ;;  %v1541_v8 = vmul.f32 0.6931472, %v11359_v0  ;;  %v2150_v10 = vmul.f32 %v13686_v14, %v1537_v63 }
 0x6e4   : > { %v11363_v9 = vpop.eup %11362  ;;  %11382 = vlog2.f32 %v7897_v61  ;;  %v1543_v52 = vmul.f32 0.6931472, %v11361_v4  ;;  %v2151_v13 = vmul.f32 %v13686_v14, %v1539_v3  ;;  %v618_v3 = vld [vmem:[%s12465_s8 + $0xd58] sm:$0xff] }
 0x6e5   : > { %v11365_v11 = vpop.eup %11364  ;;  %v4597_v12 = vmul.f32 0.6931472, %v11363_v9  ;;  %11384 = vlog2.f32 %v5218_v62  ;;  %v2152_v18 = vmul.f32 %v13686_v14, %v1541_v8  ;;  %v3078_v25 = vmul.f32 1.442695, %v2150_v10  ;;  %v617_v62 = vld [vmem:[%s12465_s8 + $0xd50] sm:$0xff]  ;;  %v619_v8 = vld [vmem:[%s12465_s8 + $0xd60] sm:$0xff] }
 0x6e6   : > { %v11367_v15 = vpop.eup %11366  ;;  %v6133_v16 = vmul.f32 0.6931472, %v11365_v11  ;;  %11386 = vlog2.f32 %v7898_v1  ;;  %v2153_v22 = vmul.f32 %v13686_v14, %v1543_v52  ;;  %v3080_v28 = vmul.f32 1.442695, %v2151_v13 }
 0x6e7   : > { %v11369_v19 = vpop.eup %11368  ;;  %v4599_v20 = vmul.f32 0.6931472, %v11367_v15  ;;  %11388 = vlog2.f32 %v5219_v5  ;;  %v3082_v33 = vmul.f32 1.442695, %v2152_v18 }
 0x6e8   : > { %v11371_v7 = vpop.eup %11370  ;;  %v6749_v23 = vsub.f32 %v4597_v12, %v6133_v16  ;;  %v6135_v24 = vmul.f32 0.6931472, %v11369_v19  ;;  %11390 = vlog2.f32 %v7899_v2  ;;  %v3084_v35 = vmul.f32 1.442695, %v2153_v22 }
 0x6e9   : > { %v11373_v26 = vpop.eup %11372  ;;  %v4601_v27 = vmul.f32 0.6931472, %v11371_v7  ;;  %11392 = vlog2.f32 %v5220_v6 }
 0x6ea   : > { %v11375_v29 = vpop.eup %11374  ;;  %7261 = vst [vmem:[%s12522_s20 + $0xcb8] sm:$0xff] %v6749_v23  ;;  %v6750_v30 = vsub.f32 %v4599_v20, %v6135_v24  ;;  %v6137_v32 = vmul.f32 0.6931472, %v11373_v26  ;;  %11394 = vlog2.f32 %v7900_v17 }
 0x6eb   : > { %v11377_v34 = vpop.eup %11376  ;;  %v4603_v14 = vmul.f32 0.6931472, %v11375_v29  ;;  %11396 = vlog2.f32 %v5221_v21 }
 0x6ec   : > { %v11379_v36 = vpop.eup %11378  ;;  %7262 = vst [vmem:[%s12522_s20 + $0xcc0] sm:$0xff] %v6750_v30  ;;  %v6751_v31 = vsub.f32 %v4601_v27, %v6137_v32  ;;  %v6139_v37 = vmul.f32 0.6931472, %v11377_v34  ;;  %11398 = vpow2.f32 %v3078_v25  ;;  %v13788_v27 = vld [vmem:[#allocation5] ss:$0 sm:$0xff] }
 0x6ed   : > { %v11381_v38 = vpop.eup %11380  ;;  %v4605_v39 = vmul.f32 0.6931472, %v11379_v36  ;;  %11400 = vpow2.f32 %v3080_v28 }
 0x6ee   : > { %v11383_v42 = vpop.eup %11382  ;;  %7263 = vst [vmem:[%s12522_s20 + $0xcc8] sm:$0xff] %v6751_v31  ;;  %v6752_v43 = vsub.f32 %v4603_v14, %v6139_v37  ;;  %v6141_v44 = vmul.f32 0.6931472, %v11381_v38  ;;  %11402 = vpow2.f32 %v3082_v33 }
 0x6ef   : > { %v11385_v46 = vpop.eup %11384  ;;  %v4607_v41 = vmul.f32 0.6931472, %v11383_v42  ;;  %11404 = vpow2.f32 %v3084_v35 }
 0x6f0   : > { %v11387_v48 = vpop.eup %11386  ;;  %7264 = vst [vmem:[%s12522_s20 + $0xcd0] sm:$0xff] %v6752_v43  ;;  %v6753_v49 = vsub.f32 %v4605_v39, %v6141_v44  ;;  %v6143_v50 = vmul.f32 0.6931472, %v11385_v46  ;;  %11406 = vlog2.f32 %v611_v40 }
 0x6f1   : > { %v11389_v53 = vpop.eup %11388  ;;  %v4609_v54 = vmul.f32 0.6931472, %v11387_v48  ;;  %11408 = vlog2.f32 %v612_v45 }
 0x6f2   : > { %v11391_v57 = vpop.eup %11390  ;;  %7265 = vst [vmem:[%s12522_s20 + $0xcd8] sm:$0xff] %v6753_v49  ;;  %v6754_v58 = vsub.f32 %v4607_v41, %v6143_v50  ;;  %v6145_v59 = vmul.f32 0.6931472, %v11389_v53  ;;  %11410 = vlog2.f32 %v613_v47 }
 0x6f3   : > { %v11393_v61 = vpop.eup %11392  ;;  %v4611_v56 = vmul.f32 0.6931472, %v11391_v57  ;;  %11412 = vlog2.f32 %v614_v51 }
 0x6f4   : > { %v11395_v63 = vpop.eup %11394  ;;  %7266 = vst [vmem:[%s12522_s20 + $0xce0] sm:$0xff] %v6754_v58  ;;  %v6755_v0 = vsub.f32 %v4609_v54, %v6145_v59  ;;  %v6147_v1 = vmul.f32 0.6931472, %v11393_v61  ;;  %11414 = vlog2.f32 %v615_v55 }
 0x6f5   : > { %v11397_v4 = vpop.eup %11396  ;;  %v4613_v5 = vmul.f32 0.6931472, %v11395_v63  ;;  %11416 = vlog2.f32 %v616_v60 }
 0x6f6   : > { %v11399_v9 = vpop.eup %11398  ;;  %7267 = vst [vmem:[%s12522_s20 + $0xce8] sm:$0xff] %v6755_v0  ;;  %v6756_v2 = vsub.f32 %v4611_v56, %v6147_v1  ;;  %v6149_v10 = vmul.f32 0.6931472, %v11397_v4  ;;  %11418 = vlog2.f32 %v617_v62 }
 0x6f7   : > { %v11401_v52 = vpop.eup %11400  ;;  %v7901_v11 = vadd.f32 -0.99, %v11399_v9  ;;  %v5222_v12 = vsub.f32 1.0, %v11399_v9  ;;  %11420 = vlog2.f32 %v618_v3 }
 0x6f8   : > { %v11403_v6 = vpop.eup %11402  ;;  %7268 = vst [vmem:[%s12522_s20 + $0xcf0] sm:$0xff] %v6756_v2  ;;  %v6757_v13 = vsub.f32 %v4613_v5, %v6149_v10  ;;  %v7902_v15 = vadd.f32 -0.99, %v11401_v52  ;;  %v5223_v16 = vsub.f32 1.0, %v11401_v52  ;;  %11422 = vlog2.f32 %v619_v8  ;;  %v620_v5 = vld [vmem:[%s12465_s8 + $0xd68] sm:$0xff]  ;;  %v621_v2 = vld [vmem:[%s12465_s8 + $0xd70] sm:$0xff] }
 0x6f9   : > { %v11405_v17 = vpop.eup %11404  ;;  %11424 = vlog2.f32 %v7901_v11  ;;  %v7903_v18 = vadd.f32 -0.99, %v11403_v6  ;;  %v5224_v20 = vsub.f32 1.0, %v11403_v6 }
 0x6fa   : > { %v11407_v19 = vpop.eup %11406  ;;  %7269 = vst [vmem:[%s12522_s20 + $0xcf8] sm:$0xff] %v6757_v13  ;;  %11426 = vlog2.f32 %v5222_v12  ;;  %v7904_v22 = vadd.f32 -0.99, %v11405_v17  ;;  %v5225_v24 = vsub.f32 1.0, %v11405_v17  ;;  %v622_v12 = vld [vmem:[%s12465_s8 + $0xd78] sm:$0xff] }
 0x6fb   : > { %v11409_v21 = vpop.eup %11408  ;;  %11428 = vlog2.f32 %v7902_v15  ;;  %v1545_v7 = vmul.f32 0.6931472, %v11407_v19  ;;  %v623_v15 = vld [vmem:[%s12465_s8 + $0xd80] sm:$0xff] }
 0x6fc   : > { %v11411_v23 = vpop.eup %11410  ;;  %11430 = vlog2.f32 %v5223_v16  ;;  %v1547_v25 = vmul.f32 0.6931472, %v11409_v21 }
 0x6fd   : > { %v11413_v26 = vpop.eup %11412  ;;  %11432 = vlog2.f32 %v7903_v18  ;;  %v2154_v28 = vmul.f32 %v13788_v27, %v1545_v7  ;;  %v1549_v29 = vmul.f32 0.6931472, %v11411_v23 }
 0x6fe   : > { %v11415_v30 = vpop.eup %11414  ;;  %11434 = vlog2.f32 %v5224_v20  ;;  %v2155_v32 = vmul.f32 %v13788_v27, %v1547_v25  ;;  %v1551_v33 = vmul.f32 0.6931472, %v11413_v26 }
 0x6ff   : > { %v11417_v34 = vpop.eup %11416  ;;  %11436 = vlog2.f32 %v7904_v22  ;;  %v3086_v14 = vmul.f32 1.442695, %v2154_v28  ;;  %v2156_v35 = vmul.f32 %v13788_v27, %v1549_v29  ;;  %v1553_v36 = vmul.f32 0.6931472, %v11415_v30 }
 0x700   : > { %v11419_v31 = vpop.eup %11418  ;;  %11438 = vlog2.f32 %v5225_v24  ;;  %v3088_v37 = vmul.f32 1.442695, %v2155_v32  ;;  %v2157_v38 = vmul.f32 %v13788_v27, %v1551_v33  ;;  %v1555_v39 = vmul.f32 0.6931472, %v11417_v34 }
 0x701   : > { %v11421_v40 = vpop.eup %11420  ;;  %11440 = vpow2.f32 %v3086_v14  ;;  %v3090_v42 = vmul.f32 1.442695, %v2156_v35  ;;  %v2158_v43 = vmul.f32 %v13788_v27, %v1553_v36  ;;  %v1557_v44 = vmul.f32 0.6931472, %v11419_v31 }
 0x702   : > { %v11423_v45 = vpop.eup %11422  ;;  %11442 = vpow2.f32 %v3088_v37  ;;  %v3092_v46 = vmul.f32 1.442695, %v2157_v38  ;;  %v2159_v41 = vmul.f32 %v13788_v27, %v1555_v39  ;;  %v1559_v47 = vmul.f32 0.6931472, %v11421_v40 }
 0x703   : > { %v11425_v48 = vpop.eup %11424  ;;  %11444 = vpow2.f32 %v3090_v42  ;;  %v3094_v49 = vmul.f32 1.442695, %v2158_v43  ;;  %v2160_v50 = vmul.f32 %v13788_v27, %v1557_v44  ;;  %v1561_v51 = vmul.f32 0.6931472, %v11423_v45 }
 0x704   : > { %v11427_v53 = vpop.eup %11426  ;;  %v4615_v54 = vmul.f32 0.6931472, %v11425_v48  ;;  %11446 = vpow2.f32 %v3092_v46  ;;  %v3096_v55 = vmul.f32 1.442695, %v2159_v41  ;;  %v2161_v57 = vmul.f32 %v13788_v27, %v1559_v47 }
 0x705   : > { %v11429_v58 = vpop.eup %11428  ;;  %v6151_v59 = vmul.f32 0.6931472, %v11427_v53  ;;  %11448 = vpow2.f32 %v3094_v49  ;;  %v3098_v60 = vmul.f32 1.442695, %v2160_v50  ;;  %v2162_v61 = vmul.f32 %v13788_v27, %v1561_v51 }
 0x706   : > { %v11431_v56 = vpop.eup %11430  ;;  %v4617_v62 = vmul.f32 0.6931472, %v11429_v58  ;;  %11450 = vpow2.f32 %v3096_v55  ;;  %v3100_v63 = vmul.f32 1.442695, %v2161_v57 }
 0x707   : > { %v11433_v0 = vpop.eup %11432  ;;  %v6758_v1 = vsub.f32 %v4615_v54, %v6151_v59  ;;  %v6153_v3 = vmul.f32 0.6931472, %v11431_v56  ;;  %11452 = vpow2.f32 %v3098_v60  ;;  %v3102_v4 = vmul.f32 1.442695, %v2162_v61 }
 0x708   : > { %v11435_v8 = vpop.eup %11434  ;;  %v4619_v9 = vmul.f32 0.6931472, %v11433_v0  ;;  %11454 = vpow2.f32 %v3100_v63 }
 0x709   : > { %v11437_v10 = vpop.eup %11436  ;;  %7270 = vst [vmem:[%s12522_s20 + $0xd00] sm:$0xff] %v6758_v1  ;;  %v6759_v52 = vsub.f32 %v4617_v62, %v6153_v3  ;;  %v6155_v11 = vmul.f32 0.6931472, %v11435_v8  ;;  %11456 = vpow2.f32 %v3102_v4 }
 0x70a   : > { %v11439_v6 = vpop.eup %11438  ;;  %v4621_v13 = vmul.f32 0.6931472, %v11437_v10  ;;  %11458 = vlog2.f32 %v620_v5 }
 0x70b   : > { %v11441_v16 = vpop.eup %11440  ;;  %7271 = vst [vmem:[%s12522_s20 + $0xd08] sm:$0xff] %v6759_v52  ;;  %v6760_v17 = vsub.f32 %v4619_v9, %v6155_v11  ;;  %v6157_v18 = vmul.f32 0.6931472, %v11439_v6  ;;  %11460 = vlog2.f32 %v621_v2 }
 0x70c   : > { %v11443_v19 = vpop.eup %11442  ;;  %v7905_v20 = vadd.f32 -0.99, %v11441_v16  ;;  %v5226_v21 = vsub.f32 1.0, %v11441_v16  ;;  %11462 = vlog2.f32 %v622_v12 }
 0x70d   : > { %v11445_v22 = vpop.eup %11444  ;;  %7272 = vst [vmem:[%s12522_s20 + $0xd10] sm:$0xff] %v6760_v17  ;;  %v6761_v7 = vsub.f32 %v4621_v13, %v6157_v18  ;;  %v7906_v23 = vadd.f32 -0.99, %v11443_v19  ;;  %v5227_v24 = vsub.f32 1.0, %v11443_v19  ;;  %11464 = vlog2.f32 %v623_v15 }
 0x70e   : > { %v11447_v25 = vpop.eup %11446  ;;  %11466 = vlog2.f32 %v7905_v20  ;;  %v7907_v26 = vadd.f32 -0.99, %v11445_v22  ;;  %v5228_v29 = vsub.f32 1.0, %v11445_v22 }
 0x70f   : > { %v11449_v28 = vpop.eup %11448  ;;  %7273 = vst [vmem:[%s12522_s20 + $0xd18] sm:$0xff] %v6761_v7  ;;  %11468 = vlog2.f32 %v5226_v21  ;;  %v7908_v32 = vadd.f32 -0.99, %v11447_v25  ;;  %v5229_v34 = vsub.f32 1.0, %v11447_v25  ;;  %v624_v21 = vld [vmem:[%s12465_s8 + $0xd88] sm:$0xff] }
 0x710   : > { %v11451_v30 = vpop.eup %11450  ;;  %11470 = vlog2.f32 %v7906_v23  ;;  %v7909_v35 = vadd.f32 -0.99, %v11449_v28  ;;  %v5230_v31 = vsub.f32 1.0, %v11449_v28  ;;  %v626_v28 = vld [vmem:[%s12465_s8 + $0xd98] sm:$0xff] }
 0x711   : > { %v11453_v33 = vpop.eup %11452  ;;  %11472 = vlog2.f32 %v5227_v24  ;;  %v7910_v38 = vadd.f32 -0.99, %v11451_v30  ;;  %v5231_v40 = vsub.f32 1.0, %v11451_v30  ;;  %v625_v24 = vld [vmem:[%s12465_s8 + $0xd90] sm:$0xff] }
 0x712   : > { %v11455_v14 = vpop.eup %11454  ;;  %11474 = vlog2.f32 %v7907_v26  ;;  %v7911_v44 = vadd.f32 -0.99, %v11453_v33  ;;  %v5232_v41 = vsub.f32 1.0, %v11453_v33  ;;  %v627_v33 = vld [vmem:[%s12465_s8 + $0xda0] sm:$0xff] }
 0x713   : > { %v11457_v36 = vpop.eup %11456  ;;  %11476 = vlog2.f32 %v5228_v29  ;;  %v7912_v49 = vadd.f32 -0.99, %v11455_v14  ;;  %v5233_v55 = vsub.f32 1.0, %v11455_v14 }
 0x714   : > { %v11459_v37 = vpop.eup %11458  ;;  %11478 = vlog2.f32 %v7908_v32  ;;  %v7913_v60 = vadd.f32 -0.99, %v11457_v36  ;;  %v5234_v63 = vsub.f32 1.0, %v11457_v36 }
 0x715   : > { %v11461_v39 = vpop.eup %11460  ;;  %11480 = vlog2.f32 %v5229_v34  ;;  %v1563_v42 = vmul.f32 0.6931472, %v11459_v37 }
 0x716   : > { %v11463_v43 = vpop.eup %11462  ;;  %11482 = vlog2.f32 %v7909_v35  ;;  %v1565_v45 = vmul.f32 0.6931472, %v11461_v39  ;;  %v628_v35 = vld [vmem:[%s12465_s8 + $0xda8] sm:$0xff] }
 0x717   : > { %v11465_v46 = vpop.eup %11464  ;;  %11484 = vlog2.f32 %v5230_v31  ;;  %v1567_v47 = vmul.f32 0.6931472, %v11463_v43  ;;  %v2163_v50 = vmul.f32 %v13788_v27, %v1563_v42  ;;  %v630_v42 = vld [vmem:[%s12465_s8 + $0xdb8] sm:$0xff] }
 0x718   : > { %v11467_v48 = vpop.eup %11466  ;;  %11486 = vlog2.f32 %v7910_v38  ;;  %v1569_v51 = vmul.f32 0.6931472, %v11465_v46  ;;  %v2164_v57 = vmul.f32 %v13788_v27, %v1565_v45  ;;  %v629_v38 = vld [vmem:[%s12465_s8 + $0xdb0] sm:$0xff]  ;;  %v631_v46 = vld [vmem:[%s12465_s8 + $0xdc0] sm:$0xff] }
 0x719   : > { %v11469_v53 = vpop.eup %11468  ;;  %v4623_v54 = vmul.f32 0.6931472, %v11467_v48  ;;  %11488 = vlog2.f32 %v5231_v40  ;;  %v2165_v61 = vmul.f32 %v13788_v27, %v1567_v47  ;;  %v3104_v5 = vmul.f32 1.442695, %v2163_v50  ;;  %v632_v48 = vld [vmem:[%s12465_s8 + $0xdc8] sm:$0xff] }
 0x71a   : > { %v11471_v58 = vpop.eup %11470  ;;  %v6159_v59 = vmul.f32 0.6931472, %v11469_v53  ;;  %11490 = vlog2.f32 %v7911_v44  ;;  %v2166_v0 = vmul.f32 %v13788_v27, %v1569_v51  ;;  %v3106_v2 = vmul.f32 1.442695, %v2164_v57 }
 0x71b   : > { %v11473_v56 = vpop.eup %11472  ;;  %v4625_v62 = vmul.f32 0.6931472, %v11471_v58  ;;  %11492 = vlog2.f32 %v5232_v41  ;;  %v3108_v12 = vmul.f32 1.442695, %v2165_v61 }
 0x71c   : > { %v11475_v1 = vpop.eup %11474  ;;  %v6762_v3 = vsub.f32 %v4623_v54, %v6159_v59  ;;  %v6161_v4 = vmul.f32 0.6931472, %v11473_v56  ;;  %11494 = vlog2.f32 %v7912_v49  ;;  %v3110_v15 = vmul.f32 1.442695, %v2166_v0 }
 0x71d   : > { %v11477_v8 = vpop.eup %11476  ;;  %v4627_v9 = vmul.f32 0.6931472, %v11475_v1  ;;  %11496 = vlog2.f32 %v5233_v55 }
 0x71e   : > { %v11479_v10 = vpop.eup %11478  ;;  %7274 = vst [vmem:[%s12522_s20 + $0xd20] sm:$0xff] %v6762_v3  ;;  %v6763_v52 = vsub.f32 %v4625_v62, %v6161_v4  ;;  %v6163_v11 = vmul.f32 0.6931472, %v11477_v8  ;;  %11498 = vlog2.f32 %v7913_v60 }
 0x71f   : > { %v11481_v6 = vpop.eup %11480  ;;  %v4629_v13 = vmul.f32 0.6931472, %v11479_v10  ;;  %11500 = vlog2.f32 %v5234_v63 }
 0x720   : > { %v11483_v16 = vpop.eup %11482  ;;  %7275 = vst [vmem:[%s12522_s20 + $0xd28] sm:$0xff] %v6763_v52  ;;  %v6764_v17 = vsub.f32 %v4627_v9, %v6163_v11  ;;  %v6165_v18 = vmul.f32 0.6931472, %v11481_v6  ;;  %11502 = vpow2.f32 %v3104_v5 }
 0x721   : > { %v11485_v19 = vpop.eup %11484  ;;  %v4631_v20 = vmul.f32 0.6931472, %v11483_v16  ;;  %11504 = vpow2.f32 %v3106_v2 }
 0x722   : > { %v11487_v22 = vpop.eup %11486  ;;  %7276 = vst [vmem:[%s12522_s20 + $0xd30] sm:$0xff] %v6764_v17  ;;  %v6765_v7 = vsub.f32 %v4629_v13, %v6165_v18  ;;  %v6167_v23 = vmul.f32 0.6931472, %v11485_v19  ;;  %11506 = vpow2.f32 %v3108_v12 }
 0x723   : > { %v11489_v25 = vpop.eup %11488  ;;  %v4633_v26 = vmul.f32 0.6931472, %v11487_v22  ;;  %11508 = vpow2.f32 %v3110_v15 }
 0x724   : > { %v11491_v29 = vpop.eup %11490  ;;  %7277 = vst [vmem:[%s12522_s20 + $0xd38] sm:$0xff] %v6765_v7  ;;  %v6766_v30 = vsub.f32 %v4631_v20, %v6167_v23  ;;  %v6169_v32 = vmul.f32 0.6931472, %v11489_v25  ;;  %11510 = vlog2.f32 %v624_v21 }
 0x725   : > { %v11493_v34 = vpop.eup %11492  ;;  %v4635_v14 = vmul.f32 0.6931472, %v11491_v29  ;;  %11512 = vlog2.f32 %v625_v24 }
 0x726   : > { %v11495_v36 = vpop.eup %11494  ;;  %7278 = vst [vmem:[%s12522_s20 + $0xd40] sm:$0xff] %v6766_v30  ;;  %v6767_v31 = vsub.f32 %v4633_v26, %v6169_v32  ;;  %v6171_v37 = vmul.f32 0.6931472, %v11493_v34  ;;  %11514 = vlog2.f32 %v626_v28 }
 0x727   : > { %v11497_v39 = vpop.eup %11496  ;;  %v4637_v40 = vmul.f32 0.6931472, %v11495_v36  ;;  %11516 = vlog2.f32 %v627_v33 }
 0x728   : > { %v11499_v43 = vpop.eup %11498  ;;  %7279 = vst [vmem:[%s12522_s20 + $0xd48] sm:$0xff] %v6767_v31  ;;  %v6768_v44 = vsub.f32 %v4635_v14, %v6171_v37  ;;  %v6173_v45 = vmul.f32 0.6931472, %v11497_v39  ;;  %11518 = vlog2.f32 %v628_v35 }
 0x729   : > { %v11501_v41 = vpop.eup %11500  ;;  %v4639_v47 = vmul.f32 0.6931472, %v11499_v43  ;;  %11520 = vlog2.f32 %v629_v38 }
 0x72a   : > { %v11503_v49 = vpop.eup %11502  ;;  %7280 = vst [vmem:[%s12522_s20 + $0xd50] sm:$0xff] %v6768_v44  ;;  %v6769_v50 = vsub.f32 %v4637_v40, %v6173_v45  ;;  %v6175_v51 = vmul.f32 0.6931472, %v11501_v41  ;;  %11522 = vlog2.f32 %v630_v42 }
 0x72b   : > { %v11505_v53 = vpop.eup %11504  ;;  %v7914_v54 = vadd.f32 -0.99, %v11503_v49  ;;  %v5235_v55 = vsub.f32 1.0, %v11503_v49  ;;  %11524 = vlog2.f32 %v631_v46 }
 0x72c   : > { %v11507_v57 = vpop.eup %11506  ;;  %7281 = vst [vmem:[%s12522_s20 + $0xd58] sm:$0xff] %v6769_v50  ;;  %v6770_v58 = vsub.f32 %v4639_v47, %v6175_v51  ;;  %v7915_v59 = vadd.f32 -0.99, %v11505_v53  ;;  %v5236_v60 = vsub.f32 1.0, %v11505_v53  ;;  %11526 = vlog2.f32 %v632_v48  ;;  %v633_v47 = vld [vmem:[%s12465_s8 + $0xdd0] sm:$0xff]  ;;  %v634_v50 = vld [vmem:[%s12465_s8 + $0xdd8] sm:$0xff] }
 0x72d   : > { %v11509_v61 = vpop.eup %11508  ;;  %11528 = vlog2.f32 %v7914_v54  ;;  %v7916_v56 = vadd.f32 -0.99, %v11507_v57  ;;  %v5237_v63 = vsub.f32 1.0, %v11507_v57 }
 0x72e   : > { %v11511_v62 = vpop.eup %11510  ;;  %7282 = vst [vmem:[%s12522_s20 + $0xd60] sm:$0xff] %v6770_v58  ;;  %11530 = vlog2.f32 %v5235_v55  ;;  %v7917_v1 = vadd.f32 -0.99, %v11509_v61  ;;  %v5238_v5 = vsub.f32 1.0, %v11509_v61  ;;  %v635_v55 = vld [vmem:[%s12465_s8 + $0xde0] sm:$0xff] }
 0x72f   : > { %v11513_v0 = vpop.eup %11512  ;;  %11532 = vlog2.f32 %v7915_v59  ;;  %v1571_v3 = vmul.f32 0.6931472, %v11511_v62  ;;  %v636_v59 = vld [vmem:[%s12465_s8 + $0xde8] sm:$0xff] }
 0x730   : > { %v11515_v4 = vpop.eup %11514  ;;  %11534 = vlog2.f32 %v5236_v60  ;;  %v1573_v8 = vmul.f32 0.6931472, %v11513_v0 }
 0x731   : > { %v11517_v9 = vpop.eup %11516  ;;  %11536 = vlog2.f32 %v7916_v56  ;;  %v2167_v2 = vmul.f32 %v13788_v27, %v1571_v3  ;;  %v1575_v10 = vmul.f32 0.6931472, %v11515_v4 }
 0x732   : > { %v11519_v52 = vpop.eup %11518  ;;  %11538 = vlog2.f32 %v5237_v63  ;;  %v2168_v11 = vmul.f32 %v13788_v27, %v1573_v8  ;;  %v1577_v12 = vmul.f32 0.6931472, %v11517_v9 }
 0x733   : > { %v11521_v6 = vpop.eup %11520  ;;  %11540 = vlog2.f32 %v7917_v1  ;;  %v3112_v13 = vmul.f32 1.442695, %v2167_v2  ;;  %v2169_v15 = vmul.f32 %v13788_v27, %v1575_v10  ;;  %v1579_v16 = vmul.f32 0.6931472, %v11519_v52 }
 0x734   : > { %v11523_v17 = vpop.eup %11522  ;;  %11542 = vlog2.f32 %v5238_v5  ;;  %v3114_v18 = vmul.f32 1.442695, %v2168_v11  ;;  %v2170_v19 = vmul.f32 %v13788_v27, %v1577_v12  ;;  %v1581_v20 = vmul.f32 0.6931472, %v11521_v6 }
 0x735   : > { %v11525_v21 = vpop.eup %11524  ;;  %11544 = vpow2.f32 %v3112_v13  ;;  %v3116_v22 = vmul.f32 1.442695, %v2169_v15  ;;  %v2171_v7 = vmul.f32 %v13788_v27, %v1579_v16  ;;  %v1583_v23 = vmul.f32 0.6931472, %v11523_v17 }
 0x736   : > { %v11527_v24 = vpop.eup %11526  ;;  %11546 = vpow2.f32 %v3114_v18  ;;  %v3118_v25 = vmul.f32 1.442695, %v2170_v19  ;;  %v2172_v26 = vmul.f32 %v13788_v27, %v1581_v20  ;;  %v1585_v28 = vmul.f32 0.6931472, %v11525_v21 }
 0x737   : > { %v11529_v29 = vpop.eup %11528  ;;  %11548 = vpow2.f32 %v3116_v22  ;;  %v3120_v30 = vmul.f32 1.442695, %v2171_v7  ;;  %v2173_v32 = vmul.f32 %v13788_v27, %v1583_v23  ;;  %v1587_v33 = vmul.f32 0.6931472, %v11527_v24 }
 0x738   : > { %v11531_v34 = vpop.eup %11530  ;;  %v4641_v14 = vmul.f32 0.6931472, %v11529_v29  ;;  %11550 = vpow2.f32 %v3118_v25  ;;  %v3122_v35 = vmul.f32 1.442695, %v2172_v26  ;;  %v2174_v36 = vmul.f32 %v13788_v27, %v1585_v28 }
 0x739   : > { %v11533_v31 = vpop.eup %11532  ;;  %v6177_v37 = vmul.f32 0.6931472, %v11531_v34  ;;  %11552 = vpow2.f32 %v3120_v30  ;;  %v3124_v38 = vmul.f32 1.442695, %v2173_v32  ;;  %v2175_v39 = vmul.f32 %v13788_v27, %v1587_v33 }
 0x73a   : > { %v11535_v40 = vpop.eup %11534  ;;  %v4643_v42 = vmul.f32 0.6931472, %v11533_v31  ;;  %11554 = vpow2.f32 %v3122_v35  ;;  %v3126_v43 = vmul.f32 1.442695, %v2174_v36 }
 0x73b   : > { %v11537_v44 = vpop.eup %11536  ;;  %v6771_v45 = vsub.f32 %v4641_v14, %v6177_v37  ;;  %v6179_v46 = vmul.f32 0.6931472, %v11535_v40  ;;  %11556 = vpow2.f32 %v3124_v38  ;;  %v3128_v41 = vmul.f32 1.442695, %v2175_v39 }
 0x73c   : > { %v11539_v48 = vpop.eup %11538  ;;  %v4645_v49 = vmul.f32 0.6931472, %v11537_v44  ;;  %11558 = vpow2.f32 %v3126_v43 }
 0x73d   : > { %v11541_v51 = vpop.eup %11540  ;;  %7283 = vst [vmem:[%s12522_s20 + $0xd68] sm:$0xff] %v6771_v45  ;;  %v6772_v53 = vsub.f32 %v4643_v42, %v6179_v46  ;;  %v6181_v54 = vmul.f32 0.6931472, %v11539_v48  ;;  %11560 = vpow2.f32 %v3128_v41 }
 0x73e   : > { %v11543_v57 = vpop.eup %11542  ;;  %v4647_v58 = vmul.f32 0.6931472, %v11541_v51  ;;  %11562 = vlog2.f32 %v633_v47 }
 0x73f   : > { %v11545_v60 = vpop.eup %11544  ;;  %7284 = vst [vmem:[%s12522_s20 + $0xd70] sm:$0xff] %v6772_v53  ;;  %v6773_v61 = vsub.f32 %v4645_v49, %v6181_v54  ;;  %v6183_v56 = vmul.f32 0.6931472, %v11543_v57  ;;  %11564 = vlog2.f32 %v634_v50 }
 0x740   : > { %v11547_v62 = vpop.eup %11546  ;;  %v7918_v63 = vadd.f32 -0.99, %v11545_v60  ;;  %v5239_v0 = vsub.f32 1.0, %v11545_v60  ;;  %11566 = vlog2.f32 %v635_v55 }
 0x741   : > { %v11549_v1 = vpop.eup %11548  ;;  %7285 = vst [vmem:[%s12522_s20 + $0xd78] sm:$0xff] %v6773_v61  ;;  %v6774_v3 = vsub.f32 %v4647_v58, %v6183_v56  ;;  %v7919_v4 = vadd.f32 -0.99, %v11547_v62  ;;  %v5240_v5 = vsub.f32 1.0, %v11547_v62  ;;  %11568 = vlog2.f32 %v636_v59 }
 0x742   : > { %v11551_v8 = vpop.eup %11550  ;;  %11570 = vlog2.f32 %v7918_v63  ;;  %v7920_v9 = vadd.f32 -0.99, %v11549_v1  ;;  %v5241_v10 = vsub.f32 1.0, %v11549_v1 }
 0x743   : > { %v11553_v2 = vpop.eup %11552  ;;  %7286 = vst [vmem:[%s12522_s20 + $0xd80] sm:$0xff] %v6774_v3  ;;  %11572 = vlog2.f32 %v5239_v0  ;;  %v7921_v11 = vadd.f32 -0.99, %v11551_v8  ;;  %v5242_v6 = vsub.f32 1.0, %v11551_v8  ;;  %v637_v0 = vld [vmem:[%s12465_s8 + $0xdf0] sm:$0xff] }
 0x744   : > { %v11555_v52 = vpop.eup %11554  ;;  %11574 = vlog2.f32 %v7919_v4  ;;  %v7922_v15 = vadd.f32 -0.99, %v11553_v2  ;;  %v5243_v17 = vsub.f32 1.0, %v11553_v2  ;;  %v639_v2 = vld [vmem:[%s12465_s8 + $0xe00] sm:$0xff] }
 0x745   : > { %v11557_v12 = vpop.eup %11556  ;;  %11576 = vlog2.f32 %v5240_v5  ;;  %v7923_v19 = vadd.f32 -0.99, %v11555_v52  ;;  %v5244_v21 = vsub.f32 1.0, %v11555_v52  ;;  %v638_v5 = vld [vmem:[%s12465_s8 + $0xdf8] sm:$0xff] }
 0x746   : > { %v11559_v13 = vpop.eup %11558  ;;  %11578 = vlog2.f32 %v7920_v9  ;;  %v7924_v23 = vadd.f32 -0.99, %v11557_v12  ;;  %v5245_v26 = vsub.f32 1.0, %v11557_v12  ;;  %v640_v12 = vld [vmem:[%s12465_s8 + $0xe08] sm:$0xff] }
 0x747   : > { %v11561_v16 = vpop.eup %11560  ;;  %11580 = vlog2.f32 %v5241_v10  ;;  %v7925_v30 = vadd.f32 -0.99, %v11559_v13  ;;  %v5246_v35 = vsub.f32 1.0, %v11559_v13 }
 0x748   : > { %v11563_v18 = vpop.eup %11562  ;;  %11582 = vlog2.f32 %v7921_v11  ;;  %v7926_v38 = vadd.f32 -0.99, %v11561_v16  ;;  %v5247_v43 = vsub.f32 1.0, %v11561_v16 }
 0x749   : > { %v11565_v20 = vpop.eup %11564  ;;  %11584 = vlog2.f32 %v5242_v6  ;;  %v1589_v22 = vmul.f32 0.6931472, %v11563_v18 }
 0x74a   : > { %v11567_v7 = vpop.eup %11566  ;;  %11586 = vlog2.f32 %v7922_v15  ;;  %v1591_v24 = vmul.f32 0.6931472, %v11565_v20  ;;  %v641_v15 = vld [vmem:[%s12465_s8 + $0xe10] sm:$0xff] }
 0x74b   : > { %v11569_v25 = vpop.eup %11568  ;;  %11588 = vlog2.f32 %v5243_v17  ;;  %v1593_v28 = vmul.f32 0.6931472, %v11567_v7  ;;  %v2176_v32 = vmul.f32 %v13788_v27, %v1589_v22  ;;  %v643_v22 = vld [vmem:[%s12465_s8 + $0xe20] sm:$0xff] }
 0x74c   : > { %v11571_v29 = vpop.eup %11570  ;;  %11590 = vlog2.f32 %v7923_v19  ;;  %v1595_v33 = vmul.f32 0.6931472, %v11569_v25  ;;  %v2177_v36 = vmul.f32 %v13788_v27, %v1591_v24  ;;  %v642_v19 = vld [vmem:[%s12465_s8 + $0xe18] sm:$0xff]  ;;  %v644_v25 = vld [vmem:[%s12465_s8 + $0xe28] sm:$0xff] }
 0x74d   : > { %v11573_v34 = vpop.eup %11572  ;;  %v4649_v14 = vmul.f32 0.6931472, %v11571_v29  ;;  %11592 = vlog2.f32 %v5244_v21  ;;  %v2178_v39 = vmul.f32 %v13788_v27, %v1593_v28  ;;  %v3130_v47 = vmul.f32 1.442695, %v2176_v32  ;;  %v645_v29 = vld [vmem:[%s12465_s8 + $0xe30] sm:$0xff] }
 0x74e   : > { %v11575_v31 = vpop.eup %11574  ;;  %v6185_v37 = vmul.f32 0.6931472, %v11573_v34  ;;  %11594 = vlog2.f32 %v7924_v23  ;;  %v2179_v44 = vmul.f32 %v13788_v27, %v1595_v33  ;;  %v3132_v50 = vmul.f32 1.442695, %v2177_v36 }
 0x74f   : > { %v11577_v40 = vpop.eup %11576  ;;  %v4651_v42 = vmul.f32 0.6931472, %v11575_v31  ;;  %11596 = vlog2.f32 %v5245_v26  ;;  %v3134_v55 = vmul.f32 1.442695, %v2178_v39 }
 0x750   : > { %v11579_v45 = vpop.eup %11578  ;;  %v6775_v46 = vsub.f32 %v4649_v14, %v6185_v37  ;;  %v6187_v41 = vmul.f32 0.6931472, %v11577_v40  ;;  %11598 = vlog2.f32 %v7925_v30  ;;  %v3136_v59 = vmul.f32 1.442695, %v2179_v44 }
 0x751   : > { %v11581_v48 = vpop.eup %11580  ;;  %v4653_v49 = vmul.f32 0.6931472, %v11579_v45  ;;  %11600 = vlog2.f32 %v5246_v35 }
 0x752   : > { %v11583_v51 = vpop.eup %11582  ;;  %7287 = vst [vmem:[%s12522_s20 + $0xd88] sm:$0xff] %v6775_v46  ;;  %v6776_v53 = vsub.f32 %v4651_v42, %v6187_v41  ;;  %v6189_v54 = vmul.f32 0.6931472, %v11581_v48  ;;  %11602 = vlog2.f32 %v7926_v38 }
 0x753   : > { %v11585_v57 = vpop.eup %11584  ;;  %v4655_v58 = vmul.f32 0.6931472, %v11583_v51  ;;  %11604 = vlog2.f32 %v5247_v43 }
 0x754   : > { %v11587_v60 = vpop.eup %11586  ;;  %7288 = vst [vmem:[%s12522_s20 + $0xd90] sm:$0xff] %v6776_v53  ;;  %v6777_v61 = vsub.f32 %v4653_v49, %v6189_v54  ;;  %v6191_v56 = vmul.f32 0.6931472, %v11585_v57  ;;  %11606 = vpow2.f32 %v3130_v47 }
 0x755   : > { %v11589_v62 = vpop.eup %11588  ;;  %v4657_v63 = vmul.f32 0.6931472, %v11587_v60  ;;  %11608 = vpow2.f32 %v3132_v50 }
 0x756   : > { %v11591_v1 = vpop.eup %11590  ;;  %7289 = vst [vmem:[%s12522_s20 + $0xd98] sm:$0xff] %v6777_v61  ;;  %v6778_v3 = vsub.f32 %v4655_v58, %v6191_v56  ;;  %v6193_v4 = vmul.f32 0.6931472, %v11589_v62  ;;  %11610 = vpow2.f32 %v3134_v55 }
 0x757   : > { %v11593_v8 = vpop.eup %11592  ;;  %v4659_v9 = vmul.f32 0.6931472, %v11591_v1  ;;  %11612 = vpow2.f32 %v3136_v59 }
 0x758   : > { %v11595_v10 = vpop.eup %11594  ;;  %7290 = vst [vmem:[%s12522_s20 + $0xda0] sm:$0xff] %v6778_v3  ;;  %v6779_v52 = vsub.f32 %v4657_v63, %v6193_v4  ;;  %v6195_v11 = vmul.f32 0.6931472, %v11593_v8  ;;  %11614 = vlog2.f32 %v637_v0 }
 0x759   : > { %v11597_v6 = vpop.eup %11596  ;;  %v4661_v13 = vmul.f32 0.6931472, %v11595_v10  ;;  %11616 = vlog2.f32 %v638_v5 }
 0x75a   : > { %v11599_v16 = vpop.eup %11598  ;;  %7291 = vst [vmem:[%s12522_s20 + $0xda8] sm:$0xff] %v6779_v52  ;;  %v6780_v17 = vsub.f32 %v4659_v9, %v6195_v11  ;;  %v6197_v18 = vmul.f32 0.6931472, %v11597_v6  ;;  %11618 = vlog2.f32 %v639_v2 }
 0x75b   : > { %v11601_v20 = vpop.eup %11600  ;;  %v4663_v21 = vmul.f32 0.6931472, %v11599_v16  ;;  %11620 = vlog2.f32 %v640_v12 }
 0x75c   : > { %v11603_v7 = vpop.eup %11602  ;;  %7292 = vst [vmem:[%s12522_s20 + $0xdb0] sm:$0xff] %v6780_v17  ;;  %v6781_v23 = vsub.f32 %v4661_v13, %v6197_v18  ;;  %v6199_v24 = vmul.f32 0.6931472, %v11601_v20  ;;  %11622 = vlog2.f32 %v641_v15 }
 0x75d   : > { %v11605_v26 = vpop.eup %11604  ;;  %v4665_v28 = vmul.f32 0.6931472, %v11603_v7  ;;  %11624 = vlog2.f32 %v642_v19 }
 0x75e   : > { %v11607_v30 = vpop.eup %11606  ;;  %7293 = vst [vmem:[%s12522_s20 + $0xdb8] sm:$0xff] %v6781_v23  ;;  %v6782_v32 = vsub.f32 %v4663_v21, %v6199_v24  ;;  %v6201_v33 = vmul.f32 0.6931472, %v11605_v26  ;;  %11626 = vlog2.f32 %v643_v22 }
 0x75f   : > { %v11609_v34 = vpop.eup %11608  ;;  %v7927_v14 = vadd.f32 -0.99, %v11607_v30  ;;  %v5248_v35 = vsub.f32 1.0, %v11607_v30  ;;  %11628 = vlog2.f32 %v644_v25 }
 0x760   : > { %v11611_v36 = vpop.eup %11610  ;;  %7294 = vst [vmem:[%s12522_s20 + $0xdc0] sm:$0xff] %v6782_v32  ;;  %v6783_v31 = vsub.f32 %v4665_v28, %v6201_v33  ;;  %v7928_v37 = vadd.f32 -0.99, %v11609_v34  ;;  %v5249_v38 = vsub.f32 1.0, %v11609_v34  ;;  %11630 = vlog2.f32 %v645_v29  ;;  %v646_v28 = vld [vmem:[%s12465_s8 + $0xe38] sm:$0xff]  ;;  %v647_v32 = vld [vmem:[%s12465_s8 + $0xe40] sm:$0xff] }
 0x761   : > { %v11613_v39 = vpop.eup %11612  ;;  %11632 = vlog2.f32 %v7927_v14  ;;  %v7929_v40 = vadd.f32 -0.99, %v11611_v36  ;;  %v5250_v43 = vsub.f32 1.0, %v11611_v36  ;;  %v648_v14 = vld [vmem:[%s12465_s8 + $0xe48] sm:$0xff] }
 0x762   : > { %v11615_v42 = vpop.eup %11614  ;;  %7295 = vst [vmem:[%s12522_s20 + $0xdc8] sm:$0xff] %v6783_v31  ;;  %11634 = vlog2.f32 %v5248_v35  ;;  %v7930_v45 = vadd.f32 -0.99, %v11613_v39  ;;  %v5251_v47 = vsub.f32 1.0, %v11613_v39  ;;  %v649_v31 = vld [vmem:[%s12465_s8 + $0xe50] sm:$0xff] }
 0x763   : > { %v11617_v44 = vpop.eup %11616  ;;  %11636 = vlog2.f32 %v7928_v37  ;;  %v1597_v46 = vmul.f32 0.6931472, %v11615_v42 }
 0x764   : > { %v11619_v41 = vpop.eup %11618  ;;  %11638 = vlog2.f32 %v5249_v38  ;;  %v1599_v48 = vmul.f32 0.6931472, %v11617_v44 }
 0x765   : > { %v11621_v49 = vpop.eup %11620  ;;  %11640 = vlog2.f32 %v7929_v40  ;;  %v2180_v50 = vmul.f32 %v13788_v27, %v1597_v46  ;;  %v1601_v51 = vmul.f32 0.6931472, %v11619_v41 }
 0x766   : > { %v11623_v53 = vpop.eup %11622  ;;  %11642 = vlog2.f32 %v5250_v43  ;;  %v2181_v54 = vmul.f32 %v13788_v27, %v1599_v48  ;;  %v1603_v55 = vmul.f32 0.6931472, %v11621_v49 }
 0x767   : > { %v11625_v57 = vpop.eup %11624  ;;  %11644 = vlog2.f32 %v7930_v45  ;;  %v3138_v58 = vmul.f32 1.442695, %v2180_v50  ;;  %v2182_v59 = vmul.f32 %v13788_v27, %v1601_v51  ;;  %v1605_v60 = vmul.f32 0.6931472, %v11623_v53 }
 0x768   : > { %v11627_v61 = vpop.eup %11626  ;;  %11646 = vlog2.f32 %v5251_v47  ;;  %v3140_v56 = vmul.f32 1.442695, %v2181_v54  ;;  %v2183_v62 = vmul.f32 %v13788_v27, %v1603_v55  ;;  %v1607_v63 = vmul.f32 0.6931472, %v11625_v57 }
 0x769   : > { %v11629_v0 = vpop.eup %11628  ;;  %11648 = vpow2.f32 %v3138_v58  ;;  %v3142_v1 = vmul.f32 1.442695, %v2182_v59  ;;  %v2184_v3 = vmul.f32 %v13788_v27, %v1605_v60  ;;  %v1609_v4 = vmul.f32 0.6931472, %v11627_v61 }
 0x76a   : > { %v11631_v5 = vpop.eup %11630  ;;  %11650 = vpow2.f32 %v3140_v56  ;;  %v3144_v8 = vmul.f32 1.442695, %v2183_v62  ;;  %v2185_v9 = vmul.f32 %v13788_v27, %v1607_v63  ;;  %v1611_v2 = vmul.f32 0.6931472, %v11629_v0 }
 0x76b   : > { %v11633_v10 = vpop.eup %11632  ;;  %11652 = vpow2.f32 %v3142_v1  ;;  %v3146_v52 = vmul.f32 1.442695, %v2184_v3  ;;  %v2186_v11 = vmul.f32 %v13788_v27, %v1609_v4  ;;  %v1613_v12 = vmul.f32 0.6931472, %v11631_v5 }
 0x76c   : > { %v11635_v6 = vpop.eup %11634  ;;  %v4667_v13 = vmul.f32 0.6931472, %v11633_v10  ;;  %11654 = vpow2.f32 %v3144_v8  ;;  %v3148_v15 = vmul.f32 1.442695, %v2185_v9  ;;  %v2187_v16 = vmul.f32 %v13788_v27, %v1611_v2 }
 0x76d   : > { %v11637_v17 = vpop.eup %11636  ;;  %v6203_v18 = vmul.f32 0.6931472, %v11635_v6  ;;  %11656 = vpow2.f32 %v3146_v52  ;;  %v3150_v19 = vmul.f32 1.442695, %v2186_v11  ;;  %v2188_v20 = vmul.f32 %v13788_v27, %v1613_v12  ;;  %v13885_v52 = vld [vmem:[#allocation5] ss:$0 sm:$0xff] }
 0x76e   : > { %v11639_v21 = vpop.eup %11638  ;;  %v4669_v22 = vmul.f32 0.6931472, %v11637_v17  ;;  %11658 = vpow2.f32 %v3148_v15  ;;  %v3152_v7 = vmul.f32 1.442695, %v2187_v16 }
 0x76f   : > { %v11641_v23 = vpop.eup %11640  ;;  %v6784_v24 = vsub.f32 %v4667_v13, %v6203_v18  ;;  %v6205_v25 = vmul.f32 0.6931472, %v11639_v21  ;;  %11660 = vpow2.f32 %v3150_v19  ;;  %v3154_v26 = vmul.f32 1.442695, %v2188_v20 }
 0x770   : > { %v11643_v29 = vpop.eup %11642  ;;  %v4671_v30 = vmul.f32 0.6931472, %v11641_v23  ;;  %11662 = vpow2.f32 %v3152_v7 }
 0x771   : > { %v11645_v33 = vpop.eup %11644  ;;  %7296 = vst [vmem:[%s12522_s20 + $0xdd0] sm:$0xff] %v6784_v24  ;;  %v6785_v27 = vsub.f32 %v4669_v22, %v6205_v25  ;;  %v6207_v34 = vmul.f32 0.6931472, %v11643_v29  ;;  %11664 = vpow2.f32 %v3154_v26 }
 0x772   : > { %v11647_v35 = vpop.eup %11646  ;;  %v4673_v36 = vmul.f32 0.6931472, %v11645_v33  ;;  %11666 = vlog2.f32 %v646_v28 }
 0x773   : > { %v11649_v37 = vpop.eup %11648  ;;  %7297 = vst [vmem:[%s12522_s20 + $0xdd8] sm:$0xff] %v6785_v27  ;;  %v6786_v38 = vsub.f32 %v4671_v30, %v6207_v34  ;;  %v6209_v39 = vmul.f32 0.6931472, %v11647_v35  ;;  %11668 = vlog2.f32 %v647_v32 }
 0x774   : > { %v11651_v40 = vpop.eup %11650  ;;  %v7931_v42 = vadd.f32 -0.99, %v11649_v37  ;;  %v5252_v43 = vsub.f32 1.0, %v11649_v37  ;;  %11670 = vlog2.f32 %v648_v14 }
 0x775   : > { %v11653_v44 = vpop.eup %11652  ;;  %7298 = vst [vmem:[%s12522_s20 + $0xde0] sm:$0xff] %v6786_v38  ;;  %v6787_v45 = vsub.f32 %v4673_v36, %v6209_v39  ;;  %v7932_v46 = vadd.f32 -0.99, %v11651_v40  ;;  %v5253_v41 = vsub.f32 1.0, %v11651_v40  ;;  %11672 = vlog2.f32 %v649_v31 }
 0x776   : > { %v11655_v47 = vpop.eup %11654  ;;  %11674 = vlog2.f32 %v7931_v42  ;;  %v7933_v48 = vadd.f32 -0.99, %v11653_v44  ;;  %v5254_v50 = vsub.f32 1.0, %v11653_v44 }
 0x777   : > { %v11657_v49 = vpop.eup %11656  ;;  %7299 = vst [vmem:[%s12522_s20 + $0xde8] sm:$0xff] %v6787_v45  ;;  %11676 = vlog2.f32 %v5252_v43  ;;  %v7934_v53 = vadd.f32 -0.99, %v11655_v47  ;;  %v5255_v55 = vsub.f32 1.0, %v11655_v47  ;;  %v650_v43 = vld [vmem:[%s12465_s8 + $0xe58] sm:$0xff] }
 0x778   : > { %v11659_v51 = vpop.eup %11658  ;;  %11678 = vlog2.f32 %v7932_v46  ;;  %v7935_v58 = vadd.f32 -0.99, %v11657_v49  ;;  %v5256_v60 = vsub.f32 1.0, %v11657_v49  ;;  %v652_v49 = vld [vmem:[%s12465_s8 + $0xe68] sm:$0xff] }
 0x779   : > { %v11661_v54 = vpop.eup %11660  ;;  %11680 = vlog2.f32 %v5253_v41  ;;  %v7936_v56 = vadd.f32 -0.99, %v11659_v51  ;;  %v5257_v63 = vsub.f32 1.0, %v11659_v51  ;;  %v651_v41 = vld [vmem:[%s12465_s8 + $0xe60] sm:$0xff] }
 0x77a   : > { %v11663_v57 = vpop.eup %11662  ;;  %11682 = vlog2.f32 %v7933_v48  ;;  %v7937_v3 = vadd.f32 -0.99, %v11661_v54  ;;  %v5258_v8 = vsub.f32 1.0, %v11661_v54  ;;  %v653_v54 = vld [vmem:[%s12465_s8 + $0xe70] sm:$0xff] }
 0x77b   : > { %v11665_v59 = vpop.eup %11664  ;;  %11684 = vlog2.f32 %v5254_v50  ;;  %v7938_v10 = vadd.f32 -0.99, %v11663_v57  ;;  %v5259_v15 = vsub.f32 1.0, %v11663_v57 }
 0x77c   : > { %v11667_v61 = vpop.eup %11666  ;;  %11686 = vlog2.f32 %v7934_v53  ;;  %v7939_v19 = vadd.f32 -0.99, %v11665_v59  ;;  %v5260_v7 = vsub.f32 1.0, %v11665_v59 }
 0x77d   : > { %v11669_v62 = vpop.eup %11668  ;;  %11688 = vlog2.f32 %v5255_v55  ;;  %v1615_v0 = vmul.f32 0.6931472, %v11667_v61 }
 0x77e   : > { %v11671_v1 = vpop.eup %11670  ;;  %11690 = vlog2.f32 %v7935_v58  ;;  %v1617_v4 = vmul.f32 0.6931472, %v11669_v62  ;;  %v654_v58 = vld [vmem:[%s12465_s8 + $0xe78] sm:$0xff] }
 0x77f   : > { %v11673_v5 = vpop.eup %11672  ;;  %11692 = vlog2.f32 %v5256_v60  ;;  %v1619_v9 = vmul.f32 0.6931472, %v11671_v1  ;;  %v2189_v11 = vmul.f32 %v13885_v52, %v1615_v0  ;;  %v656_v0 = vld [vmem:[%s12465_s8 + $0xe88] sm:$0xff] }
 0x780   : > { %v11675_v2 = vpop.eup %11674  ;;  %11694 = vlog2.f32 %v7936_v56  ;;  %v1621_v12 = vmul.f32 0.6931472, %v11673_v5  ;;  %v2190_v16 = vmul.f32 %v13885_v52, %v1617_v4  ;;  %v655_v56 = vld [vmem:[%s12465_s8 + $0xe80] sm:$0xff]  ;;  %v657_v5 = vld [vmem:[%s12465_s8 + $0xe90] sm:$0xff] }
 0x781   : > { %v11677_v6 = vpop.eup %11676  ;;  %v4675_v13 = vmul.f32 0.6931472, %v11675_v2  ;;  %11696 = vlog2.f32 %v5257_v63  ;;  %v2191_v20 = vmul.f32 %v13885_v52, %v1619_v9  ;;  %v3156_v28 = vmul.f32 1.442695, %v2189_v11  ;;  %v658_v2 = vld [vmem:[%s12465_s8 + $0xe98] sm:$0xff] }
 0x782   : > { %v11679_v17 = vpop.eup %11678  ;;  %v6211_v18 = vmul.f32 0.6931472, %v11677_v6  ;;  %11698 = vlog2.f32 %v7937_v3  ;;  %v2192_v23 = vmul.f32 %v13885_v52, %v1621_v12  ;;  %v3158_v32 = vmul.f32 1.442695, %v2190_v16 }
 0x783   : > { %v11681_v21 = vpop.eup %11680  ;;  %v4677_v22 = vmul.f32 0.6931472, %v11679_v17  ;;  %11700 = vlog2.f32 %v5258_v8  ;;  %v3160_v14 = vmul.f32 1.442695, %v2191_v20 }
 0x784   : > { %v11683_v24 = vpop.eup %11682  ;;  %v6788_v25 = vsub.f32 %v4675_v13, %v6211_v18  ;;  %v6213_v26 = vmul.f32 0.6931472, %v11681_v21  ;;  %11702 = vlog2.f32 %v7938_v10  ;;  %v3162_v31 = vmul.f32 1.442695, %v2192_v23 }
 0x785   : > { %v11685_v29 = vpop.eup %11684  ;;  %v4679_v30 = vmul.f32 0.6931472, %v11683_v24  ;;  %11704 = vlog2.f32 %v5259_v15 }
 0x786   : > { %v11687_v33 = vpop.eup %11686  ;;  %7300 = vst [vmem:[%s12522_s20 + $0xdf0] sm:$0xff] %v6788_v25  ;;  %v6789_v27 = vsub.f32 %v4677_v22, %v6213_v26  ;;  %v6215_v34 = vmul.f32 0.6931472, %v11685_v29  ;;  %11706 = vlog2.f32 %v7939_v19 }
 0x787   : > { %v11689_v35 = vpop.eup %11688  ;;  %v4681_v36 = vmul.f32 0.6931472, %v11687_v33  ;;  %11708 = vlog2.f32 %v5260_v7 }
 0x788   : > { %v11691_v37 = vpop.eup %11690  ;;  %7301 = vst [vmem:[%s12522_s20 + $0xdf8] sm:$0xff] %v6789_v27  ;;  %v6790_v38 = vsub.f32 %v4679_v30, %v6215_v34  ;;  %v6217_v39 = vmul.f32 0.6931472, %v11689_v35  ;;  %11710 = vpow2.f32 %v3156_v28 }
 0x789   : > { %v11693_v40 = vpop.eup %11692  ;;  %v4683_v42 = vmul.f32 0.6931472, %v11691_v37  ;;  %11712 = vpow2.f32 %v3158_v32 }
 0x78a   : > { %v11695_v44 = vpop.eup %11694  ;;  %7302 = vst [vmem:[%s12522_s20 + $0xe00] sm:$0xff] %v6790_v38  ;;  %v6791_v45 = vsub.f32 %v4681_v36, %v6217_v39  ;;  %v6219_v46 = vmul.f32 0.6931472, %v11693_v40  ;;  %11714 = vpow2.f32 %v3160_v14 }
 0x78b   : > { %v11697_v47 = vpop.eup %11696  ;;  %v4685_v48 = vmul.f32 0.6931472, %v11695_v44  ;;  %11716 = vpow2.f32 %v3162_v31 }
 0x78c   : > { %v11699_v50 = vpop.eup %11698  ;;  %7303 = vst [vmem:[%s12522_s20 + $0xe08] sm:$0xff] %v6791_v45  ;;  %v6792_v51 = vsub.f32 %v4683_v42, %v6219_v46  ;;  %v6221_v53 = vmul.f32 0.6931472, %v11697_v47  ;;  %11718 = vlog2.f32 %v650_v43 }
 0x78d   : > { %v11701_v55 = vpop.eup %11700  ;;  %v4687_v57 = vmul.f32 0.6931472, %v11699_v50  ;;  %11720 = vlog2.f32 %v651_v41 }
 0x78e   : > { %v11703_v59 = vpop.eup %11702  ;;  %7304 = vst [vmem:[%s12522_s20 + $0xe10] sm:$0xff] %v6792_v51  ;;  %v6793_v60 = vsub.f32 %v4685_v48, %v6221_v53  ;;  %v6223_v61 = vmul.f32 0.6931472, %v11701_v55  ;;  %11722 = vlog2.f32 %v652_v49 }
 0x78f   : > { %v11705_v62 = vpop.eup %11704  ;;  %v4689_v63 = vmul.f32 0.6931472, %v11703_v59  ;;  %11724 = vlog2.f32 %v653_v54 }
 0x790   : > { %v11707_v1 = vpop.eup %11706  ;;  %7305 = vst [vmem:[%s12522_s20 + $0xe18] sm:$0xff] %v6793_v60  ;;  %v6794_v3 = vsub.f32 %v4687_v57, %v6223_v61  ;;  %v6225_v4 = vmul.f32 0.6931472, %v11705_v62  ;;  %11726 = vlog2.f32 %v654_v58 }
 0x791   : > { %v11709_v8 = vpop.eup %11708  ;;  %v4691_v9 = vmul.f32 0.6931472, %v11707_v1  ;;  %11728 = vlog2.f32 %v655_v56 }
 0x792   : > { %v11711_v10 = vpop.eup %11710  ;;  %7306 = vst [vmem:[%s12522_s20 + $0xe20] sm:$0xff] %v6794_v3  ;;  %v6795_v11 = vsub.f32 %v4689_v63, %v6225_v4  ;;  %v6227_v12 = vmul.f32 0.6931472, %v11709_v8  ;;  %11730 = vlog2.f32 %v656_v0 }
 0x793   : > { %v11713_v6 = vpop.eup %11712  ;;  %v7940_v13 = vadd.f32 -0.99, %v11711_v10  ;;  %v5261_v15 = vsub.f32 1.0, %v11711_v10  ;;  %11732 = vlog2.f32 %v657_v5 }
 0x794   : > { %v11715_v16 = vpop.eup %11714  ;;  %7307 = vst [vmem:[%s12522_s20 + $0xe28] sm:$0xff] %v6795_v11  ;;  %v6796_v17 = vsub.f32 %v4691_v9, %v6227_v12  ;;  %v7941_v18 = vadd.f32 -0.99, %v11713_v6  ;;  %v5262_v19 = vsub.f32 1.0, %v11713_v6  ;;  %11734 = vlog2.f32 %v658_v2  ;;  %v659_v9 = vld [vmem:[%s12465_s8 + $0xea0] sm:$0xff]  ;;  %v660_v11 = vld [vmem:[%s12465_s8 + $0xea8] sm:$0xff] }
 0x795   : > { %v11717_v20 = vpop.eup %11716  ;;  %11736 = vlog2.f32 %v7940_v13  ;;  %v7942_v21 = vadd.f32 -0.99, %v11715_v16  ;;  %v5263_v7 = vsub.f32 1.0, %v11715_v16 }
 0x796   : > { %v11719_v22 = vpop.eup %11718  ;;  %7308 = vst [vmem:[%s12522_s20 + $0xe30] sm:$0xff] %v6796_v17  ;;  %11738 = vlog2.f32 %v5261_v15  ;;  %v7943_v24 = vadd.f32 -0.99, %v11717_v20  ;;  %v5264_v28 = vsub.f32 1.0, %v11717_v20  ;;  %v661_v15 = vld [vmem:[%s12465_s8 + $0xeb0] sm:$0xff] }
 0x797   : > { %v11721_v23 = vpop.eup %11720  ;;  %11740 = vlog2.f32 %v7941_v18  ;;  %v1623_v25 = vmul.f32 0.6931472, %v11719_v22  ;;  %v662_v18 = vld [vmem:[%s12465_s8 + $0xeb8] sm:$0xff] }
 0x798   : > { %v11723_v26 = vpop.eup %11722  ;;  %11742 = vlog2.f32 %v5262_v19  ;;  %v1625_v29 = vmul.f32 0.6931472, %v11721_v23 }
 0x799   : > { %v11725_v30 = vpop.eup %11724  ;;  %11744 = vlog2.f32 %v7942_v21  ;;  %v2193_v32 = vmul.f32 %v13885_v52, %v1623_v25  ;;  %v1627_v33 = vmul.f32 0.6931472, %v11723_v26 }
 0x79a   : > { %v11727_v27 = vpop.eup %11726  ;;  %11746 = vlog2.f32 %v5263_v7  ;;  %v2194_v34 = vmul.f32 %v13885_v52, %v1625_v29  ;;  %v1629_v14 = vmul.f32 0.6931472, %v11725_v30 }
 0x79b   : > { %v11729_v35 = vpop.eup %11728  ;;  %11748 = vlog2.f32 %v7943_v24  ;;  %v3164_v36 = vmul.f32 1.442695, %v2193_v32  ;;  %v2195_v31 = vmul.f32 %v13885_v52, %v1627_v33  ;;  %v1631_v37 = vmul.f32 0.6931472, %v11727_v27 }
 0x79c   : > { %v11731_v38 = vpop.eup %11730  ;;  %11750 = vlog2.f32 %v5264_v28  ;;  %v3166_v39 = vmul.f32 1.442695, %v2194_v34  ;;  %v2196_v40 = vmul.f32 %v13885_v52, %v1629_v14  ;;  %v1633_v42 = vmul.f32 0.6931472, %v11729_v35 }
 0x79d   : > { %v11733_v43 = vpop.eup %11732  ;;  %11752 = vpow2.f32 %v3164_v36  ;;  %v3168_v44 = vmul.f32 1.442695, %v2195_v31  ;;  %v2197_v45 = vmul.f32 %v13885_v52, %v1631_v37  ;;  %v1635_v46 = vmul.f32 0.6931472, %v11731_v38 }
 0x79e   : > { %v11735_v41 = vpop.eup %11734  ;;  %11754 = vpow2.f32 %v3166_v39  ;;  %v3170_v47 = vmul.f32 1.442695, %v2196_v40  ;;  %v2198_v48 = vmul.f32 %v13885_v52, %v1633_v42  ;;  %v1637_v49 = vmul.f32 0.6931472, %v11733_v43 }
 0x79f   : > { %v11737_v50 = vpop.eup %11736  ;;  %11756 = vpow2.f32 %v3168_v44  ;;  %v3172_v51 = vmul.f32 1.442695, %v2197_v45  ;;  %v2199_v53 = vmul.f32 %v13885_v52, %v1635_v46  ;;  %v1639_v54 = vmul.f32 0.6931472, %v11735_v41 }
 0x7a0   : > { %v11739_v55 = vpop.eup %11738  ;;  %v4693_v57 = vmul.f32 0.6931472, %v11737_v50  ;;  %11758 = vpow2.f32 %v3170_v47  ;;  %v3174_v58 = vmul.f32 1.442695, %v2198_v48  ;;  %v2200_v59 = vmul.f32 %v13885_v52, %v1637_v49 }
 0x7a1   : > { %v11741_v60 = vpop.eup %11740  ;;  %v6229_v61 = vmul.f32 0.6931472, %v11739_v55  ;;  %11760 = vpow2.f32 %v3172_v51  ;;  %v3176_v56 = vmul.f32 1.442695, %v2199_v53  ;;  %v2201_v62 = vmul.f32 %v13885_v52, %v1639_v54 }
 0x7a2   : > { %v11743_v63 = vpop.eup %11742  ;;  %v4695_v0 = vmul.f32 0.6931472, %v11741_v60  ;;  %11762 = vpow2.f32 %v3174_v58  ;;  %v3178_v1 = vmul.f32 1.442695, %v2200_v59 }
 0x7a3   : > { %v11745_v3 = vpop.eup %11744  ;;  %v6797_v4 = vsub.f32 %v4693_v57, %v6229_v61  ;;  %v6231_v5 = vmul.f32 0.6931472, %v11743_v63  ;;  %11764 = vpow2.f32 %v3176_v56  ;;  %v3180_v8 = vmul.f32 1.442695, %v2201_v62 }
 0x7a4   : > { %v11747_v2 = vpop.eup %11746  ;;  %v4697_v10 = vmul.f32 0.6931472, %v11745_v3  ;;  %11766 = vpow2.f32 %v3178_v1 }
 0x7a5   : > { %v11749_v12 = vpop.eup %11748  ;;  %7309 = vst [vmem:[%s12522_s20 + $0xe38] sm:$0xff] %v6797_v4  ;;  %v6798_v6 = vsub.f32 %v4695_v0, %v6231_v5  ;;  %v6233_v13 = vmul.f32 0.6931472, %v11747_v2  ;;  %11768 = vpow2.f32 %v3180_v8 }
 0x7a6   : > { %v11751_v16 = vpop.eup %11750  ;;  %v4699_v17 = vmul.f32 0.6931472, %v11749_v12  ;;  %11770 = vlog2.f32 %v659_v9 }
 0x7a7   : > { %v11753_v19 = vpop.eup %11752  ;;  %7310 = vst [vmem:[%s12522_s20 + $0xe40] sm:$0xff] %v6798_v6  ;;  %v6799_v20 = vsub.f32 %v4697_v10, %v6233_v13  ;;  %v6235_v21 = vmul.f32 0.6931472, %v11751_v16  ;;  %11772 = vlog2.f32 %v660_v11 }
 0x7a8   : > { %v11755_v22 = vpop.eup %11754  ;;  %v7944_v7 = vadd.f32 -0.99, %v11753_v19  ;;  %v5265_v23 = vsub.f32 1.0, %v11753_v19  ;;  %11774 = vlog2.f32 %v661_v15 }
 0x7a9   : > { %v11757_v24 = vpop.eup %11756  ;;  %7311 = vst [vmem:[%s12522_s20 + $0xe48] sm:$0xff] %v6799_v20  ;;  %v6800_v25 = vsub.f32 %v4699_v17, %v6235_v21  ;;  %v7945_v26 = vadd.f32 -0.99, %v11755_v22  ;;  %v5266_v28 = vsub.f32 1.0, %v11755_v22  ;;  %11776 = vlog2.f32 %v662_v18 }
 0x7aa   : > { %v11759_v29 = vpop.eup %11758  ;;  %11778 = vlog2.f32 %v7944_v7  ;;  %v7946_v30 = vadd.f32 -0.99, %v11757_v24  ;;  %v5267_v33 = vsub.f32 1.0, %v11757_v24 }
 0x7ab   : > { %v11761_v32 = vpop.eup %11760  ;;  %7312 = vst [vmem:[%s12522_s20 + $0xe50] sm:$0xff] %v6800_v25  ;;  %11780 = vlog2.f32 %v5265_v23  ;;  %v7947_v34 = vadd.f32 -0.99, %v11759_v29  ;;  %v5268_v35 = vsub.f32 1.0, %v11759_v29  ;;  %v663_v23 = vld [vmem:[%s12465_s8 + $0xec0] sm:$0xff] }
 0x7ac   : > { %v11763_v27 = vpop.eup %11762  ;;  %11782 = vlog2.f32 %v7945_v26  ;;  %v7948_v31 = vadd.f32 -0.99, %v11761_v32  ;;  %v5269_v38 = vsub.f32 1.0, %v11761_v32  ;;  %v665_v32 = vld [vmem:[%s12465_s8 + $0xed0] sm:$0xff] }
 0x7ad   : > { %v11765_v14 = vpop.eup %11764  ;;  %11784 = vlog2.f32 %v5266_v28  ;;  %v7949_v40 = vadd.f32 -0.99, %v11763_v27  ;;  %v5270_v43 = vsub.f32 1.0, %v11763_v27  ;;  %v664_v28 = vld [vmem:[%s12465_s8 + $0xec8] sm:$0xff] }
 0x7ae   : > { %v11767_v36 = vpop.eup %11766  ;;  %11786 = vlog2.f32 %v7946_v30  ;;  %v7950_v46 = vadd.f32 -0.99, %v11765_v14  ;;  %v5271_v48 = vsub.f32 1.0, %v11765_v14  ;;  %v666_v14 = vld [vmem:[%s12465_s8 + $0xed8] sm:$0xff] }
 0x7af   : > { %v11769_v37 = vpop.eup %11768  ;;  %11788 = vlog2.f32 %v5267_v33  ;;  %v7951_v51 = vadd.f32 -0.99, %v11767_v36  ;;  %v5272_v58 = vsub.f32 1.0, %v11767_v36 }
 0x7b0   : > { %v11771_v39 = vpop.eup %11770  ;;  %11790 = vlog2.f32 %v7947_v34  ;;  %v7952_v56 = vadd.f32 -0.99, %v11769_v37  ;;  %v5273_v1 = vsub.f32 1.0, %v11769_v37 }
 0x7b1   : > { %v11773_v42 = vpop.eup %11772  ;;  %11792 = vlog2.f32 %v5268_v35  ;;  %v1641_v44 = vmul.f32 0.6931472, %v11771_v39 }
 0x7b2   : > { %v11775_v45 = vpop.eup %11774  ;;  %11794 = vlog2.f32 %v7948_v31  ;;  %v1643_v41 = vmul.f32 0.6931472, %v11773_v42  ;;  %v667_v31 = vld [vmem:[%s12465_s8 + $0xee0] sm:$0xff] }
 0x7b3   : > { %v11777_v47 = vpop.eup %11776  ;;  %11796 = vlog2.f32 %v5269_v38  ;;  %v1645_v49 = vmul.f32 0.6931472, %v11775_v45  ;;  %v2202_v53 = vmul.f32 %v13885_v52, %v1641_v44  ;;  %v669_v44 = vld [vmem:[%s12465_s8 + $0xef0] sm:$0xff] }
 0x7b4   : > { %v11779_v50 = vpop.eup %11778  ;;  %11798 = vlog2.f32 %v7949_v40  ;;  %v1647_v54 = vmul.f32 0.6931472, %v11777_v47  ;;  %v2203_v59 = vmul.f32 %v13885_v52, %v1643_v41  ;;  %v668_v40 = vld [vmem:[%s12465_s8 + $0xee8] sm:$0xff]  ;;  %v670_v47 = vld [vmem:[%s12465_s8 + $0xef8] sm:$0xff] }
 0x7b5   : > { %v11781_v55 = vpop.eup %11780  ;;  %v4701_v57 = vmul.f32 0.6931472, %v11779_v50  ;;  %11800 = vlog2.f32 %v5270_v43  ;;  %v2204_v62 = vmul.f32 %v13885_v52, %v1645_v49  ;;  %v3182_v9 = vmul.f32 1.442695, %v2202_v53  ;;  %v671_v50 = vld [vmem:[%s12465_s8 + $0xf00] sm:$0xff] }
 0x7b6   : > { %v11783_v60 = vpop.eup %11782  ;;  %v6237_v61 = vmul.f32 0.6931472, %v11781_v55  ;;  %11802 = vlog2.f32 %v7950_v46  ;;  %v2205_v3 = vmul.f32 %v13885_v52, %v1647_v54  ;;  %v3184_v11 = vmul.f32 1.442695, %v2203_v59 }
 0x7b7   : > { %v11785_v63 = vpop.eup %11784  ;;  %v4703_v0 = vmul.f32 0.6931472, %v11783_v60  ;;  %11804 = vlog2.f32 %v5271_v48  ;;  %v3186_v15 = vmul.f32 1.442695, %v2204_v62 }
 0x7b8   : > { %v11787_v4 = vpop.eup %11786  ;;  %v6801_v5 = vsub.f32 %v4701_v57, %v6237_v61  ;;  %v6239_v8 = vmul.f32 0.6931472, %v11785_v63  ;;  %11806 = vlog2.f32 %v7951_v51  ;;  %v3188_v18 = vmul.f32 1.442695, %v2205_v3 }
 0x7b9   : > { %v11789_v2 = vpop.eup %11788  ;;  %v4705_v10 = vmul.f32 0.6931472, %v11787_v4  ;;  %11808 = vlog2.f32 %v5272_v58 }
 0x7ba   : > { %v11791_v12 = vpop.eup %11790  ;;  %7313 = vst [vmem:[%s12522_s20 + $0xe58] sm:$0xff] %v6801_v5  ;;  %v6802_v6 = vsub.f32 %v4703_v0, %v6239_v8  ;;  %v6241_v13 = vmul.f32 0.6931472, %v11789_v2  ;;  %11810 = vlog2.f32 %v7952_v56 }
 0x7bb   : > { %v11793_v16 = vpop.eup %11792  ;;  %v4707_v17 = vmul.f32 0.6931472, %v11791_v12  ;;  %11812 = vlog2.f32 %v5273_v1 }
 0x7bc   : > { %v11795_v19 = vpop.eup %11794  ;;  %7314 = vst [vmem:[%s12522_s20 + $0xe60] sm:$0xff] %v6802_v6  ;;  %v6803_v20 = vsub.f32 %v4705_v10, %v6241_v13  ;;  %v6243_v21 = vmul.f32 0.6931472, %v11793_v16  ;;  %11814 = vpow2.f32 %v3182_v9 }
 0x7bd   : > { %v11797_v22 = vpop.eup %11796  ;;  %v4709_v7 = vmul.f32 0.6931472, %v11795_v19  ;;  %11816 = vpow2.f32 %v3184_v11 }
 0x7be   : > { %v11799_v24 = vpop.eup %11798  ;;  %7315 = vst [vmem:[%s12522_s20 + $0xe68] sm:$0xff] %v6803_v20  ;;  %v6804_v25 = vsub.f32 %v4707_v17, %v6243_v21  ;;  %v6245_v26 = vmul.f32 0.6931472, %v11797_v22  ;;  %11818 = vpow2.f32 %v3186_v15 }
 0x7bf   : > { %v11801_v29 = vpop.eup %11800  ;;  %v4711_v30 = vmul.f32 0.6931472, %v11799_v24  ;;  %11820 = vpow2.f32 %v3188_v18 }
 0x7c0   : > { %v11803_v33 = vpop.eup %11802  ;;  %7316 = vst [vmem:[%s12522_s20 + $0xe70] sm:$0xff] %v6804_v25  ;;  %v6805_v27 = vsub.f32 %v4709_v7, %v6245_v26  ;;  %v6247_v34 = vmul.f32 0.6931472, %v11801_v29  ;;  %11822 = vlog2.f32 %v663_v23 }
 0x7c1   : > { %v11805_v35 = vpop.eup %11804  ;;  %v4713_v36 = vmul.f32 0.6931472, %v11803_v33  ;;  %11824 = vlog2.f32 %v664_v28 }
 0x7c2   : > { %v11807_v37 = vpop.eup %11806  ;;  %7317 = vst [vmem:[%s12522_s20 + $0xe78] sm:$0xff] %v6805_v27  ;;  %v6806_v38 = vsub.f32 %v4711_v30, %v6247_v34  ;;  %v6249_v39 = vmul.f32 0.6931472, %v11805_v35  ;;  %11826 = vlog2.f32 %v665_v32 }
 0x7c3   : > { %v11809_v42 = vpop.eup %11808  ;;  %v4715_v43 = vmul.f32 0.6931472, %v11807_v37  ;;  %11828 = vlog2.f32 %v666_v14 }
 0x7c4   : > { %v11811_v45 = vpop.eup %11810  ;;  %7318 = vst [vmem:[%s12522_s20 + $0xe80] sm:$0xff] %v6806_v38  ;;  %v6807_v46 = vsub.f32 %v4713_v36, %v6249_v39  ;;  %v6251_v41 = vmul.f32 0.6931472, %v11809_v42  ;;  %11830 = vlog2.f32 %v667_v31 }
 0x7c5   : > { %v11813_v48 = vpop.eup %11812  ;;  %v4717_v49 = vmul.f32 0.6931472, %v11811_v45  ;;  %11832 = vlog2.f32 %v668_v40 }
 0x7c6   : > { %v11815_v51 = vpop.eup %11814  ;;  %7319 = vst [vmem:[%s12522_s20 + $0xe88] sm:$0xff] %v6807_v46  ;;  %v6808_v53 = vsub.f32 %v4715_v43, %v6251_v41  ;;  %v6253_v54 = vmul.f32 0.6931472, %v11813_v48  ;;  %11834 = vlog2.f32 %v669_v44 }
 0x7c7   : > { %v11817_v55 = vpop.eup %11816  ;;  %v7953_v57 = vadd.f32 -0.99, %v11815_v51  ;;  %v5274_v58 = vsub.f32 1.0, %v11815_v51  ;;  %11836 = vlog2.f32 %v670_v47 }
 0x7c8   : > { %v11819_v59 = vpop.eup %11818  ;;  %7320 = vst [vmem:[%s12522_s20 + $0xe90] sm:$0xff] %v6808_v53  ;;  %v6809_v60 = vsub.f32 %v4717_v49, %v6253_v54  ;;  %v7954_v61 = vadd.f32 -0.99, %v11817_v55  ;;  %v5275_v56 = vsub.f32 1.0, %v11817_v55  ;;  %11838 = vlog2.f32 %v671_v50  ;;  %v672_v49 = vld [vmem:[%s12465_s8 + $0xf08] sm:$0xff]  ;;  %v673_v53 = vld [vmem:[%s12465_s8 + $0xf10] sm:$0xff] }
 0x7c9   : > { %v11821_v62 = vpop.eup %11820  ;;  %11840 = vlog2.f32 %v7953_v57  ;;  %v7955_v63 = vadd.f32 -0.99, %v11819_v59  ;;  %v5276_v1 = vsub.f32 1.0, %v11819_v59 }
 0x7ca   : > { %v11823_v0 = vpop.eup %11822  ;;  %7321 = vst [vmem:[%s12522_s20 + $0xe98] sm:$0xff] %v6809_v60  ;;  %11842 = vlog2.f32 %v5274_v58  ;;  %v7956_v4 = vadd.f32 -0.99, %v11821_v62  ;;  %v5277_v9 = vsub.f32 1.0, %v11821_v62  ;;  %v674_v58 = vld [vmem:[%s12465_s8 + $0xf18] sm:$0xff] }
 0x7cb   : > { %v11825_v3 = vpop.eup %11824  ;;  %11844 = vlog2.f32 %v7954_v61  ;;  %v1649_v5 = vmul.f32 0.6931472, %v11823_v0  ;;  %v675_v61 = vld [vmem:[%s12465_s8 + $0xf20] sm:$0xff] }
 0x7cc   : > { %v11827_v8 = vpop.eup %11826  ;;  %11846 = vlog2.f32 %v5275_v56  ;;  %v1651_v2 = vmul.f32 0.6931472, %v11825_v3 }
 0x7cd   : > { %v11829_v10 = vpop.eup %11828  ;;  %11848 = vlog2.f32 %v7955_v63  ;;  %v2206_v11 = vmul.f32 %v13885_v52, %v1649_v5  ;;  %v1653_v12 = vmul.f32 0.6931472, %v11827_v8 }
 0x7ce   : > { %v11831_v6 = vpop.eup %11830  ;;  %11850 = vlog2.f32 %v5276_v1  ;;  %v2207_v13 = vmul.f32 %v13885_v52, %v1651_v2  ;;  %v1655_v15 = vmul.f32 0.6931472, %v11829_v10 }
 0x7cf   : > { %v11833_v16 = vpop.eup %11832  ;;  %11852 = vlog2.f32 %v7956_v4  ;;  %v3190_v17 = vmul.f32 1.442695, %v2206_v11  ;;  %v2208_v18 = vmul.f32 %v13885_v52, %v1653_v12  ;;  %v1657_v19 = vmul.f32 0.6931472, %v11831_v6 }
 0x7d0   : > { %v11835_v20 = vpop.eup %11834  ;;  %11854 = vlog2.f32 %v5277_v9  ;;  %v3192_v21 = vmul.f32 1.442695, %v2207_v13  ;;  %v2209_v22 = vmul.f32 %v13885_v52, %v1655_v15  ;;  %v1659_v7 = vmul.f32 0.6931472, %v11833_v16 }
 0x7d1   : > { %v11837_v23 = vpop.eup %11836  ;;  %11856 = vpow2.f32 %v3190_v17  ;;  %v3194_v24 = vmul.f32 1.442695, %v2208_v18  ;;  %v2210_v25 = vmul.f32 %v13885_v52, %v1657_v19  ;;  %v1661_v26 = vmul.f32 0.6931472, %v11835_v20 }
 0x7d2   : > { %v11839_v28 = vpop.eup %11838  ;;  %11858 = vpow2.f32 %v3192_v21  ;;  %v3196_v29 = vmul.f32 1.442695, %v2209_v22  ;;  %v2211_v30 = vmul.f32 %v13885_v52, %v1659_v7  ;;  %v1663_v32 = vmul.f32 0.6931472, %v11837_v23 }
 0x7d3   : > { %v11841_v33 = vpop.eup %11840  ;;  %11860 = vpow2.f32 %v3194_v24  ;;  %v3198_v27 = vmul.f32 1.442695, %v2210_v25  ;;  %v2212_v34 = vmul.f32 %v13885_v52, %v1661_v26  ;;  %v1665_v14 = vmul.f32 0.6931472, %v11839_v28 }
 0x7d4   : > { %v11843_v35 = vpop.eup %11842  ;;  %v4719_v36 = vmul.f32 0.6931472, %v11841_v33  ;;  %11862 = vpow2.f32 %v3196_v29  ;;  %v3200_v31 = vmul.f32 1.442695, %v2211_v30  ;;  %v2213_v37 = vmul.f32 %v13885_v52, %v1663_v32 }
 0x7d5   : > { %v11845_v38 = vpop.eup %11844  ;;  %v6255_v39 = vmul.f32 0.6931472, %v11843_v35  ;;  %11864 = vpow2.f32 %v3198_v27  ;;  %v3202_v40 = vmul.f32 1.442695, %v2212_v34  ;;  %v2214_v42 = vmul.f32 %v13885_v52, %v1665_v14 }
 0x7d6   : > { %v11847_v43 = vpop.eup %11846  ;;  %v4721_v44 = vmul.f32 0.6931472, %v11845_v38  ;;  %11866 = vpow2.f32 %v3200_v31  ;;  %v3204_v45 = vmul.f32 1.442695, %v2213_v37 }
 0x7d7   : > { %v11849_v46 = vpop.eup %11848  ;;  %v6810_v41 = vsub.f32 %v4719_v36, %v6255_v39  ;;  %v6257_v47 = vmul.f32 0.6931472, %v11847_v43  ;;  %11868 = vpow2.f32 %v3202_v40  ;;  %v3206_v48 = vmul.f32 1.442695, %v2214_v42 }
 0x7d8   : > { %v11851_v50 = vpop.eup %11850  ;;  %v4723_v51 = vmul.f32 0.6931472, %v11849_v46  ;;  %11870 = vpow2.f32 %v3204_v45 }
 0x7d9   : > { %v11853_v54 = vpop.eup %11852  ;;  %7322 = vst [vmem:[%s12522_s20 + $0xea0] sm:$0xff] %v6810_v41  ;;  %v6811_v55 = vsub.f32 %v4721_v44, %v6257_v47  ;;  %v6259_v57 = vmul.f32 0.6931472, %v11851_v50  ;;  %11872 = vpow2.f32 %v3206_v48 }
 0x7da   : > { %v11855_v59 = vpop.eup %11854  ;;  %v4725_v60 = vmul.f32 0.6931472, %v11853_v54  ;;  %11874 = vlog2.f32 %v672_v49 }
 0x7db   : > { %v11857_v56 = vpop.eup %11856  ;;  %7323 = vst [vmem:[%s12522_s20 + $0xea8] sm:$0xff] %v6811_v55  ;;  %v6812_v62 = vsub.f32 %v4723_v51, %v6259_v57  ;;  %v6261_v63 = vmul.f32 0.6931472, %v11855_v59  ;;  %11876 = vlog2.f32 %v673_v53 }
 0x7dc   : > { %v11859_v0 = vpop.eup %11858  ;;  %v7957_v1 = vadd.f32 -0.99, %v11857_v56  ;;  %v5278_v3 = vsub.f32 1.0, %v11857_v56  ;;  %11878 = vlog2.f32 %v674_v58 }
 0x7dd   : > { %v11861_v4 = vpop.eup %11860  ;;  %7324 = vst [vmem:[%s12522_s20 + $0xeb0] sm:$0xff] %v6812_v62  ;;  %v6813_v5 = vsub.f32 %v4725_v60, %v6261_v63  ;;  %v7958_v8 = vadd.f32 -0.99, %v11859_v0  ;;  %v5279_v9 = vsub.f32 1.0, %v11859_v0  ;;  %11880 = vlog2.f32 %v675_v61 }
 0x7de   : > { %v11863_v2 = vpop.eup %11862  ;;  %11882 = vlog2.f32 %v7957_v1  ;;  %v7959_v10 = vadd.f32 -0.99, %v11861_v4  ;;  %v5280_v12 = vsub.f32 1.0, %v11861_v4  ;;  %v676_v1 = vld [vmem:[%s12465_s8 + $0xf28] sm:$0xff] }
 0x7df   : > { %v11865_v11 = vpop.eup %11864  ;;  %7325 = vst [vmem:[%s12522_s20 + $0xeb8] sm:$0xff] %v6813_v5  ;;  %11884 = vlog2.f32 %v5278_v3  ;;  %v7960_v13 = vadd.f32 -0.99, %v11863_v2  ;;  %v5281_v16 = vsub.f32 1.0, %v11863_v2 }
 0x7e0   : > { %v11867_v6 = vpop.eup %11866  ;;  %11886 = vlog2.f32 %v7958_v8  ;;  %v7961_v18 = vadd.f32 -0.99, %v11865_v11  ;;  %v5282_v20 = vsub.f32 1.0, %v11865_v11  ;;  %v677_v8 = vld [vmem:[%s12465_s8 + $0xf30] sm:$0xff] }
 0x7e1   : > { %v11869_v15 = vpop.eup %11868  ;;  %11888 = vlog2.f32 %v5279_v9  ;;  %v7962_v22 = vadd.f32 -0.99, %v11867_v6  ;;  %v5283_v23 = vsub.f32 1.0, %v11867_v6 }
 0x7e2   : > { %v11871_v17 = vpop.eup %11870  ;;  %11890 = vlog2.f32 %v7959_v10  ;;  %v7963_v26 = vadd.f32 -0.99, %v11869_v15  ;;  %v5284_v30 = vsub.f32 1.0, %v11869_v15  ;;  %v678_v10 = vld [vmem:[%s12465_s8 + $0xf38] sm:$0xff] }
 0x7e3   : > { %v11873_v19 = vpop.eup %11872  ;;  %11892 = vlog2.f32 %v5280_v12  ;;  %v7964_v27 = vadd.f32 -0.99, %v11871_v17  ;;  %v5285_v31 = vsub.f32 1.0, %v11871_v17  ;;  %v680_v17 = vld [vmem:[%s12465_s8 + $0xf48] sm:$0xff] }
 0x7e4   : > { %v11875_v21 = vpop.eup %11874  ;;  %11894 = vlog2.f32 %v7960_v13  ;;  %v7965_v40 = vadd.f32 -0.99, %v11873_v19  ;;  %v5286_v45 = vsub.f32 1.0, %v11873_v19  ;;  %v679_v13 = vld [vmem:[%s12465_s8 + $0xf40] sm:$0xff] }
 0x7e5   : > { %v11877_v7 = vpop.eup %11876  ;;  %11896 = vlog2.f32 %v5281_v16  ;;  %v1667_v24 = vmul.f32 0.6931472, %v11875_v21  ;;  %v681_v21 = vld [vmem:[%s12465_s8 + $0xf50] sm:$0xff] }
 0x7e6   : > { %v11879_v25 = vpop.eup %11878  ;;  %11898 = vlog2.f32 %v7961_v18  ;;  %v1669_v28 = vmul.f32 0.6931472, %v11877_v7 }
 0x7e7   : > { %v11881_v29 = vpop.eup %11880  ;;  %11900 = vlog2.f32 %v5282_v20  ;;  %v1671_v32 = vmul.f32 0.6931472, %v11879_v25  ;;  %v2215_v34 = vmul.f32 %v13885_v52, %v1667_v24 }
 0x7e8   : > { %v11883_v33 = vpop.eup %11882  ;;  %11902 = vlog2.f32 %v7962_v22  ;;  %v1673_v14 = vmul.f32 0.6931472, %v11881_v29  ;;  %v2216_v37 = vmul.f32 %v13885_v52, %v1669_v28  ;;  %v683_v28 = vld [vmem:[%s12465_s8 + $0xf60] sm:$0xff] }
 0x7e9   : > { %v11885_v35 = vpop.eup %11884  ;;  %v4727_v36 = vmul.f32 0.6931472, %v11883_v33  ;;  %11904 = vlog2.f32 %v5283_v23  ;;  %v2217_v42 = vmul.f32 %v13885_v52, %v1671_v32  ;;  %v3208_v49 = vmul.f32 1.442695, %v2215_v34  ;;  %v682_v23 = vld [vmem:[%s12465_s8 + $0xf58] sm:$0xff]  ;;  %v684_v32 = vld [vmem:[%s12465_s8 + $0xf68] sm:$0xff] }
 0x7ea   : > { %v11887_v38 = vpop.eup %11886  ;;  %v6263_v39 = vmul.f32 0.6931472, %v11885_v35  ;;  %11906 = vlog2.f32 %v7963_v26  ;;  %v2218_v46 = vmul.f32 %v13885_v52, %v1673_v14  ;;  %v3210_v53 = vmul.f32 1.442695, %v2216_v37 }
 0x7eb   : > { %v11889_v43 = vpop.eup %11888  ;;  %v4729_v44 = vmul.f32 0.6931472, %v11887_v38  ;;  %11908 = vlog2.f32 %v5284_v30  ;;  %v3212_v58 = vmul.f32 1.442695, %v2217_v42 }
 0x7ec   : > { %v11891_v41 = vpop.eup %11890  ;;  %v6814_v47 = vsub.f32 %v4727_v36, %v6263_v39  ;;  %v6265_v48 = vmul.f32 0.6931472, %v11889_v43  ;;  %11910 = vlog2.f32 %v7964_v27  ;;  %v3214_v60 = vmul.f32 1.442695, %v2218_v46 }
 0x7ed   : > { %v11893_v50 = vpop.eup %11892  ;;  %v4731_v51 = vmul.f32 0.6931472, %v11891_v41  ;;  %11912 = vlog2.f32 %v5285_v31 }
 0x7ee   : > { %v11895_v54 = vpop.eup %11894  ;;  %7326 = vst [vmem:[%s12522_s20 + $0xec0] sm:$0xff] %v6814_v47  ;;  %v6815_v55 = vsub.f32 %v4729_v44, %v6265_v48  ;;  %v6267_v57 = vmul.f32 0.6931472, %v11893_v50  ;;  %11914 = vlog2.f32 %v7965_v40 }
 0x7ef   : > { %v11897_v59 = vpop.eup %11896  ;;  %v4733_v52 = vmul.f32 0.6931472, %v11895_v54  ;;  %11916 = vlog2.f32 %v5286_v45 }
 0x7f0   : > { %v11899_v61 = vpop.eup %11898  ;;  %7327 = vst [vmem:[%s12522_s20 + $0xec8] sm:$0xff] %v6815_v55  ;;  %v6816_v56 = vsub.f32 %v4731_v51, %v6267_v57  ;;  %v6269_v62 = vmul.f32 0.6931472, %v11897_v59  ;;  %11918 = vpow2.f32 %v3208_v49  ;;  %v13987_v51 = vld [vmem:[#allocation5] ss:$0 sm:$0xff] }
 0x7f1   : > { %v11901_v63 = vpop.eup %11900  ;;  %v4735_v0 = vmul.f32 0.6931472, %v11899_v61  ;;  %11920 = vpow2.f32 %v3210_v53 }
 0x7f2   : > { %v11903_v3 = vpop.eup %11902  ;;  %7328 = vst [vmem:[%s12522_s20 + $0xed0] sm:$0xff] %v6816_v56  ;;  %v6817_v4 = vsub.f32 %v4733_v52, %v6269_v62  ;;  %v6271_v5 = vmul.f32 0.6931472, %v11901_v63  ;;  %11922 = vpow2.f32 %v3212_v58 }
 0x7f3   : > { %v11905_v9 = vpop.eup %11904  ;;  %v4737_v2 = vmul.f32 0.6931472, %v11903_v3  ;;  %11924 = vpow2.f32 %v3214_v60 }
 0x7f4   : > { %v11907_v11 = vpop.eup %11906  ;;  %7329 = vst [vmem:[%s12522_s20 + $0xed8] sm:$0xff] %v6817_v4  ;;  %v6818_v12 = vsub.f32 %v4735_v0, %v6271_v5  ;;  %v6273_v6 = vmul.f32 0.6931472, %v11905_v9  ;;  %11926 = vlog2.f32 %v676_v1 }
 0x7f5   : > { %v11909_v15 = vpop.eup %11908  ;;  %v4739_v16 = vmul.f32 0.6931472, %v11907_v11  ;;  %11928 = vlog2.f32 %v677_v8 }
 0x7f6   : > { %v11911_v18 = vpop.eup %11910  ;;  %7330 = vst [vmem:[%s12522_s20 + $0xee0] sm:$0xff] %v6818_v12  ;;  %v6819_v19 = vsub.f32 %v4737_v2, %v6273_v6  ;;  %v6275_v20 = vmul.f32 0.6931472, %v11909_v15  ;;  %11930 = vlog2.f32 %v678_v10 }
 0x7f7   : > { %v11913_v22 = vpop.eup %11912  ;;  %v4741_v7 = vmul.f32 0.6931472, %v11911_v18  ;;  %11932 = vlog2.f32 %v679_v13 }
 0x7f8   : > { %v11915_v24 = vpop.eup %11914  ;;  %7331 = vst [vmem:[%s12522_s20 + $0xee8] sm:$0xff] %v6819_v19  ;;  %v6820_v25 = vsub.f32 %v4739_v16, %v6275_v20  ;;  %v6277_v26 = vmul.f32 0.6931472, %v11913_v22  ;;  %11934 = vlog2.f32 %v680_v17 }
 0x7f9   : > { %v11917_v29 = vpop.eup %11916  ;;  %v4743_v30 = vmul.f32 0.6931472, %v11915_v24  ;;  %11936 = vlog2.f32 %v681_v21 }
 0x7fa   : > { %v11919_v33 = vpop.eup %11918  ;;  %7332 = vst [vmem:[%s12522_s20 + $0xef0] sm:$0xff] %v6820_v25  ;;  %v6821_v27 = vsub.f32 %v4741_v7, %v6277_v26  ;;  %v6279_v34 = vmul.f32 0.6931472, %v11917_v29  ;;  %11938 = vlog2.f32 %v682_v23 }
 0x7fb   : > { %v11921_v14 = vpop.eup %11920  ;;  %v7966_v35 = vadd.f32 -0.99, %v11919_v33  ;;  %v5287_v36 = vsub.f32 1.0, %v11919_v33  ;;  %11940 = vlog2.f32 %v683_v28 }
 0x7fc   : > { %v11923_v31 = vpop.eup %11922  ;;  %7333 = vst [vmem:[%s12522_s20 + $0xef8] sm:$0xff] %v6821_v27  ;;  %v6822_v37 = vsub.f32 %v4743_v30, %v6279_v34  ;;  %v7967_v38 = vadd.f32 -0.99, %v11921_v14  ;;  %v5288_v39 = vsub.f32 1.0, %v11921_v14  ;;  %11942 = vlog2.f32 %v684_v32  ;;  %v685_v30 = vld [vmem:[%s12465_s8 + $0xf70] sm:$0xff]  ;;  %v686_v27 = vld [vmem:[%s12465_s8 + $0xf78] sm:$0xff] }
 0x7fd   : > { %v11925_v40 = vpop.eup %11924  ;;  %11944 = vlog2.f32 %v7966_v35  ;;  %v7968_v42 = vadd.f32 -0.99, %v11923_v31  ;;  %v5289_v44 = vsub.f32 1.0, %v11923_v31 }
 0x7fe   : > { %v11927_v43 = vpop.eup %11926  ;;  %7334 = vst [vmem:[%s12522_s20 + $0xf00] sm:$0xff] %v6822_v37  ;;  %11946 = vlog2.f32 %v5287_v36  ;;  %v7969_v46 = vadd.f32 -0.99, %v11925_v40  ;;  %v5290_v48 = vsub.f32 1.0, %v11925_v40  ;;  %v687_v36 = vld [vmem:[%s12465_s8 + $0xf80] sm:$0xff] }
 0x7ff   : > { %v11929_v45 = vpop.eup %11928  ;;  %11948 = vlog2.f32 %v7967_v38  ;;  %v1675_v41 = vmul.f32 0.6931472, %v11927_v43  ;;  %v688_v38 = vld [vmem:[%s12465_s8 + $0xf88] sm:$0xff] }
 0x800   : > { %v11931_v47 = vpop.eup %11930  ;;  %11950 = vlog2.f32 %v5288_v39  ;;  %v1677_v49 = vmul.f32 0.6931472, %v11929_v45 }
 0x801   : > { %v11933_v50 = vpop.eup %11932  ;;  %11952 = vlog2.f32 %v7968_v42  ;;  %v2219_v53 = vmul.f32 %v13987_v51, %v1675_v41  ;;  %v1679_v54 = vmul.f32 0.6931472, %v11931_v47 }
 0x802   : > { %v11935_v55 = vpop.eup %11934  ;;  %11954 = vlog2.f32 %v5289_v44  ;;  %v2220_v57 = vmul.f32 %v13987_v51, %v1677_v49  ;;  %v1681_v58 = vmul.f32 0.6931472, %v11933_v50 }
 0x803   : > { %v11937_v59 = vpop.eup %11936  ;;  %11956 = vlog2.f32 %v7969_v46  ;;  %v3216_v52 = vmul.f32 1.442695, %v2219_v53  ;;  %v2221_v60 = vmul.f32 %v13987_v51, %v1679_v54  ;;  %v1683_v61 = vmul.f32 0.6931472, %v11935_v55 }
 0x804   : > { %v11939_v56 = vpop.eup %11938  ;;  %11958 = vlog2.f32 %v5290_v48  ;;  %v3218_v62 = vmul.f32 1.442695, %v2220_v57  ;;  %v2222_v63 = vmul.f32 %v13987_v51, %v1681_v58  ;;  %v1685_v0 = vmul.f32 0.6931472, %v11937_v59 }
 0x805   : > { %v11941_v1 = vpop.eup %11940  ;;  %11960 = vpow2.f32 %v3216_v52  ;;  %v3220_v3 = vmul.f32 1.442695, %v2221_v60  ;;  %v2223_v4 = vmul.f32 %v13987_v51, %v1683_v61  ;;  %v1687_v5 = vmul.f32 0.6931472, %v11939_v56 }
 0x806   : > { %v11943_v8 = vpop.eup %11942  ;;  %11962 = vpow2.f32 %v3218_v62  ;;  %v3222_v9 = vmul.f32 1.442695, %v2222_v63  ;;  %v2224_v2 = vmul.f32 %v13987_v51, %v1685_v0  ;;  %v1689_v10 = vmul.f32 0.6931472, %v11941_v1 }
 0x807   : > { %v11945_v11 = vpop.eup %11944  ;;  %11964 = vpow2.f32 %v3220_v3  ;;  %v3224_v12 = vmul.f32 1.442695, %v2223_v4  ;;  %v2225_v6 = vmul.f32 %v13987_v51, %v1687_v5  ;;  %v1691_v13 = vmul.f32 0.6931472, %v11943_v8 }
 0x808   : > { %v11947_v15 = vpop.eup %11946  ;;  %v4745_v16 = vmul.f32 0.6931472, %v11945_v11  ;;  %11966 = vpow2.f32 %v3222_v9  ;;  %v3226_v17 = vmul.f32 1.442695, %v2224_v2  ;;  %v2226_v18 = vmul.f32 %v13987_v51, %v1689_v10 }
 0x809   : > { %v11949_v19 = vpop.eup %11948  ;;  %v6281_v20 = vmul.f32 0.6931472, %v11947_v15  ;;  %11968 = vpow2.f32 %v3224_v12  ;;  %v3228_v21 = vmul.f32 1.442695, %v2225_v6  ;;  %v2227_v22 = vmul.f32 %v13987_v51, %v1691_v13 }
 0x80a   : > { %v11951_v7 = vpop.eup %11950  ;;  %v4747_v23 = vmul.f32 0.6931472, %v11949_v19  ;;  %11970 = vpow2.f32 %v3226_v17  ;;  %v3230_v24 = vmul.f32 1.442695, %v2226_v18 }
 0x80b   : > { %v11953_v25 = vpop.eup %11952  ;;  %v6823_v26 = vsub.f32 %v4745_v16, %v6281_v20  ;;  %v6283_v28 = vmul.f32 0.6931472, %v11951_v7  ;;  %11972 = vpow2.f32 %v3228_v21  ;;  %v3232_v29 = vmul.f32 1.442695, %v2227_v22 }
 0x80c   : > { %v11955_v32 = vpop.eup %11954  ;;  %v4749_v33 = vmul.f32 0.6931472, %v11953_v25  ;;  %11974 = vpow2.f32 %v3230_v24 }
 0x80d   : > { %v11957_v34 = vpop.eup %11956  ;;  %7335 = vst [vmem:[%s12522_s20 + $0xf08] sm:$0xff] %v6823_v26  ;;  %v6824_v14 = vsub.f32 %v4747_v23, %v6283_v28  ;;  %v6285_v35 = vmul.f32 0.6931472, %v11955_v32  ;;  %11976 = vpow2.f32 %v3232_v29 }
 0x80e   : > { %v11959_v31 = vpop.eup %11958  ;;  %v4751_v37 = vmul.f32 0.6931472, %v11957_v34  ;;  %11978 = vlog2.f32 %v685_v30 }
 0x80f   : > { %v11961_v39 = vpop.eup %11960  ;;  %7336 = vst [vmem:[%s12522_s20 + $0xf10] sm:$0xff] %v6824_v14  ;;  %v6825_v40 = vsub.f32 %v4749_v33, %v6285_v35  ;;  %v6287_v42 = vmul.f32 0.6931472, %v11959_v31  ;;  %11980 = vlog2.f32 %v686_v27 }
 0x810   : > { %v11963_v43 = vpop.eup %11962  ;;  %v7970_v44 = vadd.f32 -0.99, %v11961_v39  ;;  %v5291_v45 = vsub.f32 1.0, %v11961_v39  ;;  %11982 = vlog2.f32 %v687_v36 }
 0x811   : > { %v11965_v46 = vpop.eup %11964  ;;  %7337 = vst [vmem:[%s12522_s20 + $0xf18] sm:$0xff] %v6825_v40  ;;  %v6826_v41 = vsub.f32 %v4751_v37, %v6287_v42  ;;  %v7971_v47 = vadd.f32 -0.99, %v11963_v43  ;;  %v5292_v48 = vsub.f32 1.0, %v11963_v43  ;;  %11984 = vlog2.f32 %v688_v38 }
 0x812   : > { %v11967_v49 = vpop.eup %11966  ;;  %11986 = vlog2.f32 %v7970_v44  ;;  %v7972_v50 = vadd.f32 -0.99, %v11965_v46  ;;  %v5293_v54 = vsub.f32 1.0, %v11965_v46 }
 0x813   : > { %v11969_v53 = vpop.eup %11968  ;;  %7338 = vst [vmem:[%s12522_s20 + $0xf20] sm:$0xff] %v6826_v41  ;;  %11988 = vlog2.f32 %v5291_v45  ;;  %v7973_v57 = vadd.f32 -0.99, %v11967_v49  ;;  %v5294_v59 = vsub.f32 1.0, %v11967_v49  ;;  %v689_v45 = vld [vmem:[%s12465_s8 + $0xf90] sm:$0xff] }
 0x814   : > { %v11971_v55 = vpop.eup %11970  ;;  %11990 = vlog2.f32 %v7971_v47  ;;  %v7974_v60 = vadd.f32 -0.99, %v11969_v53  ;;  %v5295_v56 = vsub.f32 1.0, %v11969_v53  ;;  %v691_v53 = vld [vmem:[%s12465_s8 + $0xfa0] sm:$0xff] }
 0x815   : > { %v11973_v58 = vpop.eup %11972  ;;  %11992 = vlog2.f32 %v5292_v48  ;;  %v7975_v63 = vadd.f32 -0.99, %v11971_v55  ;;  %v5296_v1 = vsub.f32 1.0, %v11971_v55  ;;  %v690_v48 = vld [vmem:[%s12465_s8 + $0xf98] sm:$0xff] }
 0x816   : > { %v11975_v52 = vpop.eup %11974  ;;  %11994 = vlog2.f32 %v7972_v50  ;;  %v7976_v5 = vadd.f32 -0.99, %v11973_v58  ;;  %v5297_v2 = vsub.f32 1.0, %v11973_v58  ;;  %v692_v58 = vld [vmem:[%s12465_s8 + $0xfa8] sm:$0xff] }
 0x817   : > { %v11977_v61 = vpop.eup %11976  ;;  %11996 = vlog2.f32 %v5293_v54  ;;  %v7977_v12 = vadd.f32 -0.99, %v11975_v52  ;;  %v5298_v17 = vsub.f32 1.0, %v11975_v52 }
 0x818   : > { %v11979_v62 = vpop.eup %11978  ;;  %11998 = vlog2.f32 %v7973_v57  ;;  %v7978_v21 = vadd.f32 -0.99, %v11977_v61  ;;  %v5299_v24 = vsub.f32 1.0, %v11977_v61 }
 0x819   : > { %v11981_v0 = vpop.eup %11980  ;;  %12000 = vlog2.f32 %v5294_v59  ;;  %v1693_v3 = vmul.f32 0.6931472, %v11979_v62 }
 0x81a   : > { %v11983_v4 = vpop.eup %11982  ;;  %12002 = vlog2.f32 %v7974_v60  ;;  %v1695_v8 = vmul.f32 0.6931472, %v11981_v0  ;;  %v693_v60 = vld [vmem:[%s12465_s8 + $0xfb0] sm:$0xff] }
 0x81b   : > { %v11985_v9 = vpop.eup %11984  ;;  %12004 = vlog2.f32 %v5295_v56  ;;  %v1697_v10 = vmul.f32 0.6931472, %v11983_v4  ;;  %v2228_v6 = vmul.f32 %v13987_v51, %v1693_v3  ;;  %v695_v3 = vld [vmem:[%s12465_s8 + $0xfc0] sm:$0xff] }
 0x81c   : > { %v11987_v11 = vpop.eup %11986  ;;  %12006 = vlog2.f32 %v7975_v63  ;;  %v1699_v13 = vmul.f32 0.6931472, %v11985_v9  ;;  %v2229_v18 = vmul.f32 %v13987_v51, %v1695_v8  ;;  %v694_v63 = vld [vmem:[%s12465_s8 + $0xfb8] sm:$0xff]  ;;  %v696_v9 = vld [vmem:[%s12465_s8 + $0xfc8] sm:$0xff] }
 0x81d   : > { %v11989_v15 = vpop.eup %11988  ;;  %v4753_v16 = vmul.f32 0.6931472, %v11987_v11  ;;  %12008 = vlog2.f32 %v5296_v1  ;;  %v2230_v22 = vmul.f32 %v13987_v51, %v1697_v10  ;;  %v3234_v30 = vmul.f32 1.442695, %v2228_v6  ;;  %v697_v11 = vld [vmem:[%s12465_s8 + $0xfd0] sm:$0xff] }
 0x81e   : > { %v11991_v19 = vpop.eup %11990  ;;  %v6289_v20 = vmul.f32 0.6931472, %v11989_v15  ;;  %12010 = vlog2.f32 %v7976_v5  ;;  %v2231_v25 = vmul.f32 %v13987_v51, %v1699_v13  ;;  %v3236_v27 = vmul.f32 1.442695, %v2229_v18 }
 0x81f   : > { %v11993_v7 = vpop.eup %11992  ;;  %v4755_v23 = vmul.f32 0.6931472, %v11991_v19  ;;  %12012 = vlog2.f32 %v5297_v2  ;;  %v3238_v36 = vmul.f32 1.442695, %v2230_v22 }
 0x820   : > { %v11995_v26 = vpop.eup %11994  ;;  %v6827_v28 = vsub.f32 %v4753_v16, %v6289_v20  ;;  %v6291_v29 = vmul.f32 0.6931472, %v11993_v7  ;;  %12014 = vlog2.f32 %v7977_v12  ;;  %v3240_v38 = vmul.f32 1.442695, %v2231_v25 }
 0x821   : > { %v11997_v32 = vpop.eup %11996  ;;  %v4757_v33 = vmul.f32 0.6931472, %v11995_v26  ;;  %12016 = vlog2.f32 %v5298_v17 }
 0x822   : > { %v11999_v34 = vpop.eup %11998  ;;  %7339 = vst [vmem:[%s12522_s20 + $0xf28] sm:$0xff] %v6827_v28  ;;  %v6828_v14 = vsub.f32 %v4755_v23, %v6291_v29  ;;  %v6293_v35 = vmul.f32 0.6931472, %v11997_v32  ;;  %12018 = vlog2.f32 %v7978_v21 }
 0x823   : > { %v12001_v31 = vpop.eup %12000  ;;  %v4759_v37 = vmul.f32 0.6931472, %v11999_v34  ;;  %12020 = vlog2.f32 %v5299_v24 }
 0x824   : > { %v12003_v39 = vpop.eup %12002  ;;  %7340 = vst [vmem:[%s12522_s20 + $0xf30] sm:$0xff] %v6828_v14  ;;  %v6829_v40 = vsub.f32 %v4757_v33, %v6293_v35  ;;  %v6295_v42 = vmul.f32 0.6931472, %v12001_v31  ;;  %12022 = vpow2.f32 %v3234_v30 }
 0x825   : > { %v12005_v43 = vpop.eup %12004  ;;  %v4761_v44 = vmul.f32 0.6931472, %v12003_v39  ;;  %12024 = vpow2.f32 %v3236_v27 }
 0x826   : > { %v12007_v46 = vpop.eup %12006  ;;  %7341 = vst [vmem:[%s12522_s20 + $0xf38] sm:$0xff] %v6829_v40  ;;  %v6830_v41 = vsub.f32 %v4759_v37, %v6295_v42  ;;  %v6297_v47 = vmul.f32 0.6931472, %v12005_v43  ;;  %12026 = vpow2.f32 %v3238_v36 }
 0x827   : > { %v12009_v49 = vpop.eup %12008  ;;  %v4763_v50 = vmul.f32 0.6931472, %v12007_v46  ;;  %12028 = vpow2.f32 %v3240_v38 }
 0x828   : > { %v12011_v54 = vpop.eup %12010  ;;  %7342 = vst [vmem:[%s12522_s20 + $0xf40] sm:$0xff] %v6830_v41  ;;  %v6831_v55 = vsub.f32 %v4761_v44, %v6297_v47  ;;  %v6299_v57 = vmul.f32 0.6931472, %v12009_v49  ;;  %12030 = vlog2.f32 %v689_v45 }
 0x829   : > { %v12013_v59 = vpop.eup %12012  ;;  %v4765_v52 = vmul.f32 0.6931472, %v12011_v54  ;;  %12032 = vlog2.f32 %v690_v48 }
 0x82a   : > { %v12015_v61 = vpop.eup %12014  ;;  %7343 = vst [vmem:[%s12522_s20 + $0xf48] sm:$0xff] %v6831_v55  ;;  %v6832_v56 = vsub.f32 %v4763_v50, %v6299_v57  ;;  %v6301_v62 = vmul.f32 0.6931472, %v12013_v59  ;;  %12034 = vlog2.f32 %v691_v53 }
 0x82b   : > { %v12017_v0 = vpop.eup %12016  ;;  %v4767_v1 = vmul.f32 0.6931472, %v12015_v61  ;;  %12036 = vlog2.f32 %v692_v58 }
 0x82c   : > { %v12019_v4 = vpop.eup %12018  ;;  %7344 = vst [vmem:[%s12522_s20 + $0xf50] sm:$0xff] %v6832_v56  ;;  %v6833_v5 = vsub.f32 %v4765_v52, %v6301_v62  ;;  %v6303_v8 = vmul.f32 0.6931472, %v12017_v0  ;;  %12038 = vlog2.f32 %v693_v60 }
 0x82d   : > { %v12021_v2 = vpop.eup %12020  ;;  %v4769_v10 = vmul.f32 0.6931472, %v12019_v4  ;;  %12040 = vlog2.f32 %v694_v63 }
 0x82e   : > { %v12023_v12 = vpop.eup %12022  ;;  %7345 = vst [vmem:[%s12522_s20 + $0xf58] sm:$0xff] %v6833_v5  ;;  %v6834_v6 = vsub.f32 %v4767_v1, %v6303_v8  ;;  %v6305_v13 = vmul.f32 0.6931472, %v12021_v2  ;;  %12042 = vlog2.f32 %v695_v3 }
 0x82f   : > { %v12025_v15 = vpop.eup %12024  ;;  %v7979_v16 = vadd.f32 -0.99, %v12023_v12  ;;  %v5300_v17 = vsub.f32 1.0, %v12023_v12  ;;  %12044 = vlog2.f32 %v696_v9 }
 0x830   : > { %v12027_v18 = vpop.eup %12026  ;;  %7346 = vst [vmem:[%s12522_s20 + $0xf60] sm:$0xff] %v6834_v6  ;;  %v6835_v19 = vsub.f32 %v4769_v10, %v6305_v13  ;;  %v7980_v20 = vadd.f32 -0.99, %v12025_v15  ;;  %v5301_v21 = vsub.f32 1.0, %v12025_v15  ;;  %12046 = vlog2.f32 %v697_v11  ;;  %v698_v10 = vld [vmem:[%s12465_s8 + $0xfd8] sm:$0xff]  ;;  %v699_v6 = vld [vmem:[%s12465_s8 + $0xfe0] sm:$0xff] }
 0x831   : > { %v12029_v22 = vpop.eup %12028  ;;  %12048 = vlog2.f32 %v7979_v16  ;;  %v7981_v7 = vadd.f32 -0.99, %v12027_v18  ;;  %v5302_v24 = vsub.f32 1.0, %v12027_v18 }
 0x832   : > { %v12031_v23 = vpop.eup %12030  ;;  %7347 = vst [vmem:[%s12522_s20 + $0xf68] sm:$0xff] %v6835_v19  ;;  %12050 = vlog2.f32 %v5300_v17  ;;  %v7982_v26 = vadd.f32 -0.99, %v12029_v22  ;;  %v5303_v30 = vsub.f32 1.0, %v12029_v22  ;;  %v700_v17 = vld [vmem:[%s12465_s8 + $0xfe8] sm:$0xff] }
 0x833   : > { %v12033_v25 = vpop.eup %12032  ;;  %12052 = vlog2.f32 %v7980_v20  ;;  %v1701_v28 = vmul.f32 0.6931472, %v12031_v23  ;;  %v701_v20 = vld [vmem:[%s12465_s8 + $0xff0] sm:$0xff] }
 0x834   : > { %v12035_v29 = vpop.eup %12034  ;;  %12054 = vlog2.f32 %v5301_v21  ;;  %v1703_v32 = vmul.f32 0.6931472, %v12033_v25 }
 0x835   : > { %v12037_v33 = vpop.eup %12036  ;;  %12056 = vlog2.f32 %v7981_v7  ;;  %v2232_v27 = vmul.f32 %v13987_v51, %v1701_v28  ;;  %v1705_v34 = vmul.f32 0.6931472, %v12035_v29 }
 0x836   : > { %v12039_v14 = vpop.eup %12038  ;;  %12058 = vlog2.f32 %v5302_v24  ;;  %v2233_v35 = vmul.f32 %v13987_v51, %v1703_v32  ;;  %v1707_v36 = vmul.f32 0.6931472, %v12037_v33 }
 0x837   : > { %v12041_v31 = vpop.eup %12040  ;;  %12060 = vlog2.f32 %v7982_v26  ;;  %v3242_v37 = vmul.f32 1.442695, %v2232_v27  ;;  %v2234_v38 = vmul.f32 %v13987_v51, %v1705_v34  ;;  %v1709_v39 = vmul.f32 0.6931472, %v12039_v14 }
 0x838   : > { %v12043_v40 = vpop.eup %12042  ;;  %12062 = vlog2.f32 %v5303_v30  ;;  %v3244_v42 = vmul.f32 1.442695, %v2233_v35  ;;  %v2235_v43 = vmul.f32 %v13987_v51, %v1707_v36  ;;  %v1711_v44 = vmul.f32 0.6931472, %v12041_v31 }
 0x839   : > { %v12045_v45 = vpop.eup %12044  ;;  %12064 = vpow2.f32 %v3242_v37  ;;  %v3246_v46 = vmul.f32 1.442695, %v2234_v38  ;;  %v2236_v41 = vmul.f32 %v13987_v51, %v1709_v39  ;;  %v1713_v47 = vmul.f32 0.6931472, %v12043_v40 }
 0x83a   : > { %v12047_v48 = vpop.eup %12046  ;;  %12066 = vpow2.f32 %v3244_v42  ;;  %v3248_v49 = vmul.f32 1.442695, %v2235_v43  ;;  %v2237_v50 = vmul.f32 %v13987_v51, %v1711_v44  ;;  %v1715_v53 = vmul.f32 0.6931472, %v12045_v45 }
 0x83b   : > { %v12049_v54 = vpop.eup %12048  ;;  %12068 = vpow2.f32 %v3246_v46  ;;  %v3250_v55 = vmul.f32 1.442695, %v2236_v41  ;;  %v2238_v57 = vmul.f32 %v13987_v51, %v1713_v47  ;;  %v1717_v58 = vmul.f32 0.6931472, %v12047_v48 }
 0x83c   : > { %v12051_v59 = vpop.eup %12050  ;;  %v4771_v52 = vmul.f32 0.6931472, %v12049_v54  ;;  %12070 = vpow2.f32 %v3248_v49  ;;  %v3252_v60 = vmul.f32 1.442695, %v2237_v50  ;;  %v2239_v61 = vmul.f32 %v13987_v51, %v1715_v53 }
 0x83d   : > { %v12053_v56 = vpop.eup %12052  ;;  %v6307_v62 = vmul.f32 0.6931472, %v12051_v59  ;;  %12072 = vpow2.f32 %v3250_v55  ;;  %v3254_v63 = vmul.f32 1.442695, %v2238_v57  ;;  %v2240_v0 = vmul.f32 %v13987_v51, %v1717_v58 }
 0x83e   : > { %v12055_v1 = vpop.eup %12054  ;;  %v4773_v3 = vmul.f32 0.6931472, %v12053_v56  ;;  %12074 = vpow2.f32 %v3252_v60  ;;  %v3256_v4 = vmul.f32 1.442695, %v2239_v61 }
 0x83f   : > { %v12057_v5 = vpop.eup %12056  ;;  %v6836_v8 = vsub.f32 %v4771_v52, %v6307_v62  ;;  %v6309_v9 = vmul.f32 0.6931472, %v12055_v1  ;;  %12076 = vpow2.f32 %v3254_v63  ;;  %v3258_v2 = vmul.f32 1.442695, %v2240_v0 }
 0x840   : > { %v12059_v11 = vpop.eup %12058  ;;  %v4775_v12 = vmul.f32 0.6931472, %v12057_v5  ;;  %12078 = vpow2.f32 %v3256_v4 }
 0x841   : > { %v12061_v13 = vpop.eup %12060  ;;  %7348 = vst [vmem:[%s12522_s20 + $0xf70] sm:$0xff] %v6836_v8  ;;  %v6837_v15 = vsub.f32 %v4773_v3, %v6309_v9  ;;  %v6311_v16 = vmul.f32 0.6931472, %v12059_v11  ;;  %12080 = vpow2.f32 %v3258_v2 }
 0x842   : > { %v12063_v18 = vpop.eup %12062  ;;  %v4777_v19 = vmul.f32 0.6931472, %v12061_v13  ;;  %12082 = vlog2.f32 %v698_v10 }
 0x843   : > { %v12065_v21 = vpop.eup %12064  ;;  %7349 = vst [vmem:[%s12522_s20 + $0xf78] sm:$0xff] %v6837_v15  ;;  %v6838_v22 = vsub.f32 %v4775_v12, %v6311_v16  ;;  %v6313_v7 = vmul.f32 0.6931472, %v12063_v18  ;;  %12084 = vlog2.f32 %v699_v6 }
 0x844   : > { %v12067_v23 = vpop.eup %12066  ;;  %v7983_v24 = vadd.f32 -0.99, %v12065_v21  ;;  %v5304_v25 = vsub.f32 1.0, %v12065_v21  ;;  %12086 = vlog2.f32 %v700_v17 }
 0x845   : > { %v12069_v26 = vpop.eup %12068  ;;  %7350 = vst [vmem:[%s12522_s20 + $0xf80] sm:$0xff] %v6838_v22  ;;  %v6839_v28 = vsub.f32 %v4777_v19, %v6313_v7  ;;  %v7984_v29 = vadd.f32 -0.99, %v12067_v23  ;;  %v5305_v30 = vsub.f32 1.0, %v12067_v23  ;;  %12088 = vlog2.f32 %v701_v20 }
 0x846   : > { %v12071_v32 = vpop.eup %12070  ;;  %12090 = vlog2.f32 %v7983_v24  ;;  %v7985_v33 = vadd.f32 -0.99, %v12069_v26  ;;  %v5306_v34 = vsub.f32 1.0, %v12069_v26 }
 0x847   : > { %v12073_v27 = vpop.eup %12072  ;;  %7351 = vst [vmem:[%s12522_s20 + $0xf88] sm:$0xff] %v6839_v28  ;;  %12092 = vlog2.f32 %v5304_v25  ;;  %v7986_v35 = vadd.f32 -0.99, %v12071_v32  ;;  %v5307_v31 = vsub.f32 1.0, %v12071_v32  ;;  %v702_v25 = vld [vmem:[%s12465_s8 + $0xff8] sm:$0xff] }
 0x848   : > { %v12075_v14 = vpop.eup %12074  ;;  %12094 = vlog2.f32 %v7984_v29  ;;  %v7987_v38 = vadd.f32 -0.99, %v12073_v27  ;;  %v5308_v40 = vsub.f32 1.0, %v12073_v27 }
 0x849   : > { %v12077_v36 = vpop.eup %12076  ;;  %12096 = vlog2.f32 %v5305_v30  ;;  %v7988_v43 = vadd.f32 -0.99, %v12075_v14  ;;  %v5309_v45 = vsub.f32 1.0, %v12075_v14 }
 0x84a   : > { %v12079_v37 = vpop.eup %12078  ;;  %12098 = vlog2.f32 %v7985_v33  ;;  %v7989_v47 = vadd.f32 -0.99, %v12077_v36  ;;  %v5310_v50 = vsub.f32 1.0, %v12077_v36 }
 0x84b   : > { %v12081_v39 = vpop.eup %12080  ;;  %12100 = vlog2.f32 %v5306_v34  ;;  %v7990_v55 = vadd.f32 -0.99, %v12079_v37  ;;  %v5311_v60 = vsub.f32 1.0, %v12079_v37 }
 0x84c   : > { %v12083_v42 = vpop.eup %12082  ;;  %12102 = vlog2.f32 %v7986_v35  ;;  %v7991_v63 = vadd.f32 -0.99, %v12081_v39  ;;  %v5312_v4 = vsub.f32 1.0, %v12081_v39 }
 0x84d   : > { %v12085_v44 = vpop.eup %12084  ;;  %12104 = vlog2.f32 %v5307_v31  ;;  %v1719_v46 = vmul.f32 0.6931472, %v12083_v42 }
 0x84e   : > { %v12087_v41 = vpop.eup %12086  ;;  %12106 = vlog2.f32 %v7987_v38  ;;  %v1721_v48 = vmul.f32 0.6931472, %v12085_v44 }
 0x84f   : > { %v12089_v49 = vpop.eup %12088  ;;  %12108 = vlog2.f32 %v5308_v40  ;;  %v1723_v53 = vmul.f32 0.6931472, %v12087_v41  ;;  %v2241_v57 = vmul.f32 %v13987_v51, %v1719_v46 }
 0x850   : > { %v12091_v54 = vpop.eup %12090  ;;  %12110 = vlog2.f32 %v7988_v43  ;;  %v1725_v58 = vmul.f32 0.6931472, %v12089_v49  ;;  %v2242_v61 = vmul.f32 %v13987_v51, %v1721_v48 }
 0x851   : > { %v12093_v59 = vpop.eup %12092  ;;  %v4779_v52 = vmul.f32 0.6931472, %v12091_v54  ;;  %12112 = vlog2.f32 %v5309_v45  ;;  %v2243_v0 = vmul.f32 %v13987_v51, %v1723_v53  ;;  %v3260_v10 = vmul.f32 1.442695, %v2241_v57 }
 0x852   : > { %v12095_v56 = vpop.eup %12094  ;;  %v6315_v62 = vmul.f32 0.6931472, %v12093_v59  ;;  %12114 = vlog2.f32 %v7989_v47  ;;  %v2244_v5 = vmul.f32 %v13987_v51, %v1725_v58  ;;  %v3262_v6 = vmul.f32 1.442695, %v2242_v61 }
 0x853   : > { %v12097_v1 = vpop.eup %12096  ;;  %v4781_v3 = vmul.f32 0.6931472, %v12095_v56  ;;  %12116 = vlog2.f32 %v5310_v50  ;;  %v3264_v17 = vmul.f32 1.442695, %v2243_v0 }
 0x854   : > { %v12099_v8 = vpop.eup %12098  ;;  %v6840_v9 = vsub.f32 %v4779_v52, %v6315_v62  ;;  %v6317_v2 = vmul.f32 0.6931472, %v12097_v1  ;;  %12118 = vlog2.f32 %v7990_v55  ;;  %v3266_v20 = vmul.f32 1.442695, %v2244_v5 }
 0x855   : > { %v12101_v11 = vpop.eup %12100  ;;  %v4783_v12 = vmul.f32 0.6931472, %v12099_v8  ;;  %12120 = vlog2.f32 %v5311_v60 }
 0x856   : > { %v12103_v13 = vpop.eup %12102  ;;  %7352 = vst [vmem:[%s12522_s20 + $0xf90] sm:$0xff] %v6840_v9  ;;  %v6841_v15 = vsub.f32 %v4781_v3, %v6317_v2  ;;  %v6319_v16 = vmul.f32 0.6931472, %v12101_v11  ;;  %12122 = vlog2.f32 %v7991_v63 }
 0x857   : > { %v12105_v18 = vpop.eup %12104  ;;  %v4785_v19 = vmul.f32 0.6931472, %v12103_v13  ;;  %12124 = vlog2.f32 %v5312_v4 }
 0x858   : > { %v12107_v21 = vpop.eup %12106  ;;  %7353 = vst [vmem:[%s12522_s20 + $0xf98] sm:$0xff] %v6841_v15  ;;  %v6842_v22 = vsub.f32 %v4783_v12, %v6319_v16  ;;  %v6321_v7 = vmul.f32 0.6931472, %v12105_v18  ;;  %12126 = vpow2.f32 %v3260_v10 }
 0x859   : > { %v12109_v23 = vpop.eup %12108  ;;  %v4787_v24 = vmul.f32 0.6931472, %v12107_v21  ;;  %12128 = vpow2.f32 %v3262_v6 }
 0x85a   : > { %v12111_v26 = vpop.eup %12110  ;;  %7354 = vst [vmem:[%s12522_s20 + $0xfa0] sm:$0xff] %v6842_v22  ;;  %v6843_v28 = vsub.f32 %v4785_v19, %v6321_v7  ;;  %v6323_v29 = vmul.f32 0.6931472, %v12109_v23  ;;  %12130 = vpow2.f32 %v3264_v17 }
 0x85b   : > { %v12113_v30 = vpop.eup %12112  ;;  %v4789_v32 = vmul.f32 0.6931472, %v12111_v26  ;;  %12132 = vpow2.f32 %v3266_v20 }
 0x85c   : > { %v12115_v33 = vpop.eup %12114  ;;  %7355 = vst [vmem:[%s12522_s20 + $0xfa8] sm:$0xff] %v6843_v28  ;;  %v6844_v27 = vsub.f32 %v4787_v24, %v6323_v29  ;;  %v6325_v34 = vmul.f32 0.6931472, %v12113_v30  ;;  %12134 = vlog2.f32 %v702_v25 }
 0x85d   : > { %v12117_v14 = vpop.eup %12116  ;;  %v4791_v35 = vmul.f32 0.6931472, %v12115_v33 }
 0x85e   : > { %v12119_v36 = vpop.eup %12118  ;;  %7356 = vst [vmem:[%s12522_s20 + $0xfb0] sm:$0xff] %v6844_v27  ;;  %v6845_v31 = vsub.f32 %v4789_v32, %v6325_v34  ;;  %v6327_v37 = vmul.f32 0.6931472, %v12117_v14 }
 0x85f   : > { %v12121_v38 = vpop.eup %12120  ;;  %v4793_v39 = vmul.f32 0.6931472, %v12119_v36 }
 0x860   : > { %v12123_v40 = vpop.eup %12122  ;;  %7357 = vst [vmem:[%s12522_s20 + $0xfb8] sm:$0xff] %v6845_v31  ;;  %v6846_v42 = vsub.f32 %v4791_v35, %v6327_v37  ;;  %v6329_v43 = vmul.f32 0.6931472, %v12121_v38 }
 0x861   : > { %v12125_v44 = vpop.eup %12124  ;;  %v4795_v45 = vmul.f32 0.6931472, %v12123_v40 }
 0x862   : > { %v12127_v46 = vpop.eup %12126  ;;  %7358 = vst [vmem:[%s12522_s20 + $0xfc0] sm:$0xff] %v6846_v42  ;;  %v6847_v41 = vsub.f32 %v4793_v39, %v6329_v43  ;;  %v6331_v47 = vmul.f32 0.6931472, %v12125_v44 }
 0x863   : > { %v12129_v48 = vpop.eup %12128  ;;  %v7992_v49 = vadd.f32 -0.99, %v12127_v46  ;;  %v5313_v50 = vsub.f32 1.0, %v12127_v46 }
 0x864   : > { %v12131_v53 = vpop.eup %12130  ;;  %7359 = vst [vmem:[%s12522_s20 + $0xfc8] sm:$0xff] %v6847_v41  ;;  %v6848_v54 = vsub.f32 %v4795_v45, %v6331_v47  ;;  %v7993_v55 = vadd.f32 -0.99, %v12129_v48  ;;  %v5314_v57 = vsub.f32 1.0, %v12129_v48 }
 0x865   : > { %v12133_v58 = vpop.eup %12132  ;;  %12136 = vlog2.f32 %v7992_v49  ;;  %v7994_v59 = vadd.f32 -0.99, %v12131_v53  ;;  %v5315_v60 = vsub.f32 1.0, %v12131_v53 }
 0x866   : > { %v12135_v52 = vpop.eup %12134  ;;  %7360 = vst [vmem:[%s12522_s20 + $0xfd0] sm:$0xff] %v6848_v54  ;;  %12138 = vlog2.f32 %v5313_v50  ;;  %v7995_v61 = vadd.f32 -0.99, %v12133_v58  ;;  %v5316_v62 = vsub.f32 1.0, %v12133_v58 }
 0x867   : > { %12140 = vlog2.f32 %v7993_v55  ;;  %v1727_v56 = vmul.f32 0.6931472, %v12135_v52 }
 0x868   : > { %12142 = vlog2.f32 %v5314_v57 }
 0x869   : > { %12144 = vlog2.f32 %v7994_v59  ;;  %v2245_v63 = vmul.f32 %v13987_v51, %v1727_v56 }
 0x86a   : > { %12146 = vlog2.f32 %v5315_v60 }
 0x86b   : > { %12148 = vlog2.f32 %v7995_v61  ;;  %v3268_v0 = vmul.f32 1.442695, %v2245_v63 }
 0x86c   : > { %12150 = vlog2.f32 %v5316_v62 }
 0x86d   : > { %12152 = vpow2.f32 %v3268_v0 }
 0x86f   : > { %v12137_v1 = vpop.eup %12136 }
 0x870   : > { %v12139_v3 = vpop.eup %12138  ;;  %v4797_v4 = vmul.f32 0.6931472, %v12137_v1 }
 0x871   : > { %v12141_v5 = vpop.eup %12140  ;;  %v6333_v8 = vmul.f32 0.6931472, %v12139_v3 }
 0x872   : > { %v12143_v9 = vpop.eup %12142  ;;  %v4799_v2 = vmul.f32 0.6931472, %v12141_v5 }
 0x873   : > { %v12145_v10 = vpop.eup %12144  ;;  %v6849_v11 = vsub.f32 %v4797_v4, %v6333_v8  ;;  %v6335_v12 = vmul.f32 0.6931472, %v12143_v9 }
 0x874   : > { %v12147_v6 = vpop.eup %12146  ;;  %v4801_v51 = vmul.f32 0.6931472, %v12145_v10 }
 0x875   : > { %v12149_v13 = vpop.eup %12148  ;;  %7361 = vst [vmem:[%s12522_s20 + $0xfd8] sm:$0xff] %v6849_v11  ;;  %v6850_v15 = vsub.f32 %v4799_v2, %v6335_v12  ;;  %v6337_v16 = vmul.f32 0.6931472, %v12147_v6 }
 0x876   : > { %v12151_v17 = vpop.eup %12150  ;;  %v4803_v18 = vmul.f32 0.6931472, %v12149_v13 }
 0x877   : > { %v12153_v19 = vpop.eup %12152  ;;  %7362 = vst [vmem:[%s12522_s20 + $0xfe0] sm:$0xff] %v6850_v15  ;;  %v6851_v20 = vsub.f32 %v4801_v51, %v6337_v16  ;;  %v6339_v21 = vmul.f32 0.6931472, %v12151_v17 }
 0x878   : > { %v7996_v22 = vadd.f32 -0.99, %v12153_v19  ;;  %v5317_v7 = vsub.f32 1.0, %v12153_v19 }
 0x879   : > { %7363 = vst [vmem:[%s12522_s20 + $0xfe8] sm:$0xff] %v6851_v20  ;;  %v6852_v23 = vsub.f32 %v4803_v18, %v6339_v21 }
 0x87a   : > { %12154 = vlog2.f32 %v7996_v22 }
 0x87b   : > { %7364 = vst [vmem:[%s12522_s20 + $0xff0] sm:$0xff] %v6852_v23  ;;  %12156 = vlog2.f32 %v5317_v7 }
 0x884   : > { %v12155_v24 = vpop.eup %12154  ;;  %7373 = sbr.rel (!%p14144_p8) target bundleno = 2215 (0x8a7), region = 40 }
 0x885   : > { %v12157_v25 = vpop.eup %12156  ;;  %v4805_v26 = vmul.f32 0.6931472, %v12155_v24 }
 0x886   : > { %v6341_v28 = vmul.f32 0.6931472, %v12157_v25 }
 0x888   : > { %v6853_v29 = vsub.f32 %v4805_v26, %v6341_v28 }
 0x88a   : > { %7365 = vst [vmem:[%s12522_s20 + $0xff8] sm:$0xff] %v6853_v29 }
 0x88b   : > { %s14153_s29 = smov (!%p7376_p9, %s7375_s29), 512 }
 0x88c   : > { %s14069_s4 = sshll.u32 %s14153_s29, 7 }
 0x88d   : > { %s7380_s5 = ssub.s32 65536, %s14069_s4 }
 0x88e   : > { %7381 = vsyncadd %s7367_s23, %s7380_s5  ;;  %p8000_p10 = scmp.ne.s32.totalorder %s14069_s4, 0  ;;  %s8007_s21 = sshll.u32 %s12344_s13, 16 }
 0x88f   : > { %s14079_s17 = scalar_lea.hbm %s14129_s2, %s8007_s21  ;;  %s7386_s24 = sshll.u32 %s12522_s20, 4  ;;  %s14082_s24 = int_to_ptr.vmem [resolvable:$true] %s7386_s24 }
 0x890   : > { %s12229_s27 = scalar_lea.vmem %s14082_s24, %s14069_s4  ;;  %s12305_s26 = smov [#allocation7]  }
 0x891   : > { %p12230_p1 = scmp.ne.s32.totalorder %s14082_s24, %s12229_s27  ;;  %s12233_s25 = sshll.u32 %s12305_s26, 4  ;;  %s12234_s25 = int_to_ptr.vmem [resolvable:$false] %s12233_s25 }
 0x892   : > { %s12235_s13 = scalar_lea.vmem %s12234_s25, 131072  ;;  %p12236_p4 = scmp.lt.s32.totalorder %s14082_s24, %s12234_s25 }
 0x893   : > { %p12231_p0 = pnand %p12230_p1, %p8000_p10  ;;  %p12237_p6 = scmp.lt.s32.totalorder %s12235_s13, %s12229_s27 }
 0x895   : > { %p12232_p7 = pneg %p12231_p0  ;;  %p12238_p11 = por %p12237_p6, %p12236_p4 }
 0x897   : > { %p12239_p13 = pnand %p12238_p11, %p12232_p7 }
 0x899   : > { %12242 = shalt.err (!%p12239_p13)
}
 0x89a   : > { %s12243_s19 = scalar_lea.hbm %s14079_s17, %s14069_s4  ;;  %s12247_s7 = scalar_lea.hbm %s14129_s2, 140032 }
 0x89b   : > { %p12244_p12 = scmp.ne.s32.totalorder %s14079_s17, %s12243_s19  ;;  %p12248_p3 = scmp.lt.u32.totalorder %s14079_s17, %s14129_s2 }
 0x89c   : > { %p12249_p8 = scmp.lt.u32.totalorder %s12247_s7, %s12243_s19  ;;  %p12251_p1 = scmp.lt.u32.totalorder %s12243_s19, %s14079_s17 }
 0x89d   : > { %p12245_p2 = pnand %p12244_p12, %p8000_p10 }
 0x89e   : > { %p12250_p9 = por %p12249_p8, %p12248_p3 }
 0x89f   : > { %p12246_p5 = pneg %p12245_p2 }
 0x8a0   : > { %p12252_p0 = por %p12251_p1, %p12250_p9 }
 0x8a2   : > { %p12253_p7 = pnand %p12252_p0, %p12246_p5 }
 0x8a4   : > { %12256 = shalt.err (!%p12253_p7)
}
 0x8a5   : > { %s12306_s28 = smov 128   ;;  %s12307_s29 = smov 8  }
 0x8a6   : > { %7392 = dma.vmem_to_hbm [thread:$0]  (%p8000_p10), %s14082_s24, %s14069_s4, %s14079_s17, %s7367_s23, %s12306_s28, %s12306_s28, %s12307_s29  }
 0x8a7 PF: > { %p8024_p4 = scmp.ge.s32.totalorder %s12299_s12, 2  ;;  %s7401_s5 = sand.u32 1, %s12287_s9  }
 0x8a8   : > { %p14145_p6 = scmp.ne.s32.totalorder %s14136_s22, 0  ;;  %s7402_s21 = scalar_lea.sflag [#allocation4], %s7401_s5 }
 0x8aa   : > { %p8019_p11 = pnand %p8024_p4, %p14145_p6 }
 0x8ac   : > { %12282 = dma.done.wait (!%p8019_p11), %s7402_s21, 65536  }
 0x8ad   : > { %12284 = vsyncadd (!%p8019_p11), %s7402_s21, 4294901760  ;;  %p16_p13 = scmp.ge.s32.totalorder %s12348_s15, 5   ;;  %s14146_s9 = smov %s12291_s10 }
 0x8ae   : > { %s14147_s10 = smov %s12295_s11  ;;  %s14148_s11 = smov %s12360_s18 }
 0x8af   : > { %s14149_s12 = smov %s12348_s15  ;;  %18 = sbr.rel (!%p16_p13) target bundleno = 6 (0x6), region = 77 }
 0x8b6   :  { %7407 = vsyncpa [#allocation3], 1 }
 0x8b7   :  { %7409 = vsyncpa [#allocation3 + $0x1], 1 }
 0x8b8   :  { %7410 = vsyncpa [#allocation6], 1 }
 0x8b9   :  { %7411 = vsyncpa [#allocation4], 1 }
 0x8ba   :  { %7413 = vsyncpa [#allocation4 + $0x1], 1 }

</bundles_post_ra>
